<compile_context>
chip_gen: v7x
topology: tpu7x:2x2x1
jax: 0.10.0
libtpu: 0.0.40
codegen_flags: <defaults>
</compile_context>

<pallas_src>
import functools

import jax
import jax.numpy as jnp
from jax.experimental import pallas as pl
from jax.experimental.pallas import tpu as pltpu

EPS = 1e-6


def _layernorm(x, g, b):
    mu = jnp.mean(x, axis=-1, keepdims=True)
    var = jnp.mean((x - mu) ** 2, axis=-1, keepdims=True)
    return (x - mu) * jax.lax.rsqrt(var + EPS) * g + b


# ------------------------------------------------------------ fused kernel --

def fused_backbone_kernel(
        patches_ref, stem_w_ref, stem_b_ref, stem_g_ref, stem_beta_ref,
        dww_ref, dwb_ref, lng_ref, lnb_ref,
        w1_ref, b1_ref, grng_ref, grnb_ref, w2_ref, b2_ref,
        head_g_ref, head_b_ref,
        o_ref,
        halo_ref,
        *, B, H, W, C, HID, K, DEPTH, PADL):
    pad = K // 2
    N = B * H * W

    # ---- stem: patchify conv as one batched matmul + LayerNorm -------------
    tok = jnp.dot(patches_ref[...], stem_w_ref[...],
                  preferred_element_type=jnp.float32) + stem_b_ref[...]
    tok = _layernorm(tok, stem_g_ref[...], stem_beta_ref[...])

    # Zero the halo scratch ONCE (the border stays zero for every block), then
    # write the interior.  The interior starts at sublane-aligned column PADL,
    # so this and every per-block write-back is an aligned masked store.
    halo_ref[...] = jnp.zeros_like(halo_ref)
    halo_ref[:, pad:pad + H, PADL:PADL + W, :] = tok.reshape(B, H, W, C)

    col0 = PADL - pad            # physical column of conceptual padded col 0

    # ---- DEPTH ConvNeXtV2 blocks, feature map resident in VMEM -------------
    for d in range(DEPTH):                       # static unroll (DEPTH small)
        xp = halo_ref[...]                       # (B, H+2p, PADL+W+p, C)
        resid = xp[:, pad:pad + H, PADL:PADL + W, :]

        # Depthwise 7x7 conv: weights loaded once per block, 49 statically
        # unrolled shifted reads of the zero-padded halo (each weight
        # broadcast appears exactly once in the trace).
        dww = dww_ref[d]                         # (K*K, C)
        acc = jnp.zeros((B, H, W, C), jnp.float32)
        for dy in range(K):
            for dx in range(K):
                t = dy * K + dx
                wk = dww[t:t + 1, :]             # (1, C)
                acc = acc + xp[:, dy:dy + H, col0 + dx:col0 + dx + W, :] * wk
        x = acc + dwb_ref[d]                     # (1, C) broadcast

        # Channel LayerNorm + pointwise expand over ALL tokens at once.
        t2 = _layernorm(x.reshape(N, C), lng_ref[d], lnb_ref[d])
        h = jnp.dot(t2, w1_ref[d], preferred_element_type=jnp.float32) + b1_ref[d]
        # TODO(synk): timm ConvNeXtV2 uses exact (erf) GELU; tanh approx kept
        # to match the synthetic reference.
        h = jax.nn.gelu(h, approximate=True)

        # GRN: L2 over the spatial axis per image, normalized by channel mean.
        h3 = h.reshape(B, H * W, HID)
        gx = jnp.sqrt(jnp.sum(h3 * h3, axis=1, keepdims=True))       # (B,1,HID)
        nx = gx / (jnp.mean(gx, axis=-1, keepdims=True) + EPS)
        h3 = grng_ref[d] * (h3 * nx) + grnb_ref[d] + h3

        # Pointwise project + residual; write the interior back into the halo.
        y = jnp.dot(h3.reshape(N, HID), w2_ref[d],
                    preferred_element_type=jnp.float32) + b2_ref[d]
        halo_ref[:, pad:pad + H, PADL:PADL + W, :] = resid + y.reshape(B, H, W, C)

    # ---- head: global average pool over tokens + final LayerNorm -----------
    feat = halo_ref[:, pad:pad + H, PADL:PADL + W, :]
    pooled = jnp.mean(feat.reshape(B, H * W, C), axis=1)              # (B, C)
    o_ref[...] = _layernorm(pooled, head_g_ref[...], head_b_ref[...])


# ------------------------------------------------------------ params / glue --

def init_params(key, cin=3, patch=4, dim=32, hidden=128, depth=2, K=7):
    keys = jax.random.split(key, 8)
    s = 0.05
    return {
        "stem_w": s * jax.random.normal(keys[0], (patch * patch * cin, dim), jnp.float32),
        "stem_b": jnp.zeros((1, dim), jnp.float32),
        "stem_ln_g": jnp.ones((1, dim), jnp.float32),
        "stem_ln_b": jnp.zeros((1, dim), jnp.float32),
        "head_ln_g": jnp.ones((1, dim), jnp.float32),
        "head_ln_b": jnp.zeros((1, dim), jnp.float32),
        # per-block params, stacked on a leading depth axis
        "dw_w": s * jax.random.normal(keys[1], (depth, K * K, dim), jnp.float32),
        "dw_b": jnp.zeros((depth, 1, dim), jnp.float32),
        "ln_g": jnp.ones((depth, 1, dim), jnp.float32),
        "ln_b": jnp.zeros((depth, 1, dim), jnp.float32),
        "w1": s * jax.random.normal(keys[2], (depth, dim, hidden), jnp.float32),
        "b1": s * jax.random.normal(keys[3], (depth, 1, hidden), jnp.float32),
        "grn_g": 0.1 * jnp.ones((depth, 1, hidden), jnp.float32),
        "grn_b": jnp.zeros((depth, 1, hidden), jnp.float32),
        "w2": s * jax.random.normal(keys[4], (depth, hidden, dim), jnp.float32),
        "b2": s * jax.random.normal(keys[5], (depth, 1, dim), jnp.float32),
    }


def backbone_forward(x_nchw, params, *, patch=4, dim=32, hidden=128, K=7):
    B, Cin, Himg, Wimg = x_nchw.shape
    Hp, Wp = Himg // patch, Wimg // patch
    depth = params["dw_w"].shape[0]
    pad = K // 2
    PADL = 8   # sublane-aligned start column of the halo interior

    # NCHW -> NHWC, then non-overlapping 4x4 patches -> token matrix.
    x = jnp.transpose(x_nchw, (0, 2, 3, 1)).astype(jnp.float32)
    patches = x.reshape(B, Hp, patch, Wp, patch, Cin)
    patches = patches.transpose(0, 1, 3, 2, 4, 5).reshape(
        B * Hp * Wp, patch * patch * Cin)

    vmem = pl.BlockSpec(memory_space=pltpu.MemorySpace.VMEM)
    kern = functools.partial(fused_backbone_kernel, B=B, H=Hp, W=Wp, C=dim,
                             HID=hidden, K=K, DEPTH=depth, PADL=PADL)

    return pl.pallas_call(
        kern,
        out_shape=jax.ShapeDtypeStruct((B, dim), jnp.float32),
        in_specs=[vmem] * 17,
        out_specs=vmem,
        scratch_shapes=[
            pltpu.VMEM((B, Hp + 2 * pad, PADL + Wp + pad, dim), jnp.float32),
        ],
    )(patches,
      params["stem_w"], params["stem_b"], params["stem_ln_g"], params["stem_ln_b"],
      params["dw_w"], params["dw_b"], params["ln_g"], params["ln_b"],
      params["w1"], params["b1"], params["grn_g"], params["grn_b"],
      params["w2"], params["b2"],
      params["head_ln_g"], params["head_ln_b"])


# ------------------------------------------------------- pure-JAX reference --

def reference_forward(x_nchw, params, patch=4, dim=32, hidden=128, K=7):
    B, Cin, Himg, Wimg = x_nchw.shape
    Hp, Wp = Himg // patch, Wimg // patch
    pad = K // 2
    x = jnp.transpose(x_nchw, (0, 2, 3, 1)).astype(jnp.float32)
    patches = x.reshape(B, Hp, patch, Wp, patch, Cin).transpose(0, 1, 3, 2, 4, 5)
    patches = patches.reshape(B * Hp * Wp, patch * patch * Cin)
    tok = _layernorm(patches @ params["stem_w"] + params["stem_b"],
                     params["stem_ln_g"], params["stem_ln_b"])
    feat = tok.reshape(B, Hp, Wp, dim)
    depth = params["dw_w"].shape[0]
    for d in range(depth):
        xpad = jnp.pad(feat, ((0, 0), (pad, pad), (pad, pad), (0, 0)))
        acc = jnp.zeros_like(feat)
        for dy in range(K):
            for dx in range(K):
                acc = acc + xpad[:, dy:dy + Hp, dx:dx + Wp, :] * params["dw_w"][d, dy * K + dx]
        y = acc + params["dw_b"][d].reshape(1, 1, 1, dim)
        t = _layernorm(y, params["ln_g"][d, 0], params["ln_b"][d, 0])
        h = t.reshape(B, Hp * Wp, dim) @ params["w1"][d] + params["b1"][d]
        h = jax.nn.gelu(h, approximate=True)
        gx = jnp.sqrt(jnp.sum(h * h, axis=1, keepdims=True))
        nx = gx / (jnp.mean(gx, axis=-1, keepdims=True) + EPS)
        h = params["grn_g"][d] * (h * nx) + params["grn_b"][d] + h
        y2 = h @ params["w2"][d] + params["b2"][d]
        feat = feat + y2.reshape(B, Hp, Wp, dim)
    pooled = feat.reshape(B, Hp * Wp, dim).mean(axis=1)
    return _layernorm(pooled, params["head_ln_g"], params["head_ln_b"])


if __name__ == "__main__":
    key = jax.random.PRNGKey(0)
    kx, kp = jax.random.split(key)
    # PyTorch-style NCHW image batch (small synthetic size).
    x = jax.random.normal(kx, (2, 3, 16, 16), jnp.float32)
    params = init_params(kp)

    feats = jax.jit(backbone_forward)(x, params)
    feats = jax.block_until_ready(feats)

    ref = reference_forward(x, params)
    assert feats.shape == (2, 32), feats.shape
    assert jnp.allclose(feats, ref, rtol=1e-3, atol=1e-3), \
        float(jnp.max(jnp.abs(feats - ref)))
    print("KERNEL_OK")
</pallas_src>

<mosaic_0001>
module attributes {stable_mosaic.version = 11 : i64} {
  func.func @fused_backbone_kernel(%arg0: memref<32x48xf32, #tpu.memory_space<vmem>>, %arg1: memref<48x32xf32, #tpu.memory_space<vmem>>, %arg2: memref<1x32xf32, #tpu.memory_space<vmem>>, %arg3: memref<1x32xf32, #tpu.memory_space<vmem>>, %arg4: memref<1x32xf32, #tpu.memory_space<vmem>>, %arg5: memref<2x49x32xf32, #tpu.memory_space<vmem>>, %arg6: memref<2x1x32xf32, #tpu.memory_space<vmem>>, %arg7: memref<2x1x32xf32, #tpu.memory_space<vmem>>, %arg8: memref<2x1x32xf32, #tpu.memory_space<vmem>>, %arg9: memref<2x32x128xf32, #tpu.memory_space<vmem>>, %arg10: memref<2x1x128xf32, #tpu.memory_space<vmem>>, %arg11: memref<2x1x128xf32, #tpu.memory_space<vmem>>, %arg12: memref<2x1x128xf32, #tpu.memory_space<vmem>>, %arg13: memref<2x128x32xf32, #tpu.memory_space<vmem>>, %arg14: memref<2x1x32xf32, #tpu.memory_space<vmem>>, %arg15: memref<1x32xf32, #tpu.memory_space<vmem>>, %arg16: memref<1x32xf32, #tpu.memory_space<vmem>>, %arg17: memref<2x32xf32, #tpu.memory_space<vmem>>, %arg18: memref<2x10x15x32xf32, #tpu.memory_space<vmem>>) attributes {dimension_semantics = [], scalar_prefetch = 0 : i64, scratch_operands = 1 : i64, tpu.core_type = #tpu.core_type<tc>} {
    %c0 = arith.constant 0 : index
    %c0_0 = arith.constant 0 : index
    %0 = vector.load %arg0[%c0, %c0_0] : memref<32x48xf32, #tpu.memory_space<vmem>>, vector<32x48xf32>
    %c0_1 = arith.constant 0 : index
    %c0_2 = arith.constant 0 : index
    %1 = vector.load %arg1[%c0_1, %c0_2] : memref<48x32xf32, #tpu.memory_space<vmem>>, vector<48x32xf32>
    %cst = arith.constant dense<0.000000e+00> : vector<32x32xf32>
    %2 = tpu.matmul %0, %1, %cst {dimension_numbers = #tpu.dot_dimension_numbers<[1], [0], [0], [1], [0, 0, 1, 1], [], []>} : vector<32x48xf32>, vector<48x32xf32>, vector<32x32xf32> -> vector<32x32xf32>
    %c0_3 = arith.constant 0 : index
    %c0_4 = arith.constant 0 : index
    %3 = vector.load %arg2[%c0_3, %c0_4] : memref<1x32xf32, #tpu.memory_space<vmem>>, vector<1x32xf32>
    %4 = vector.broadcast %3 : vector<1x32xf32> to vector<32x32xf32>
    %5 = arith.addf %2, %4 : vector<32x32xf32>
    %c0_5 = arith.constant 0 : index
    %c0_6 = arith.constant 0 : index
    %6 = vector.load %arg3[%c0_5, %c0_6] : memref<1x32xf32, #tpu.memory_space<vmem>>, vector<1x32xf32>
    %c0_7 = arith.constant 0 : index
    %c0_8 = arith.constant 0 : index
    %7 = vector.load %arg4[%c0_7, %c0_8] : memref<1x32xf32, #tpu.memory_space<vmem>>, vector<1x32xf32>
    %cst_9 = arith.constant dense<0.000000e+00> : vector<32xf32>
    %8 = vector.multi_reduction <add>, %5, %cst_9 [1] : vector<32x32xf32> to vector<32xf32>
    %9 = vector.shape_cast %8 : vector<32xf32> to vector<32x1xf32>
    %cst_10 = arith.constant 3.200000e+01 : f32
    %10 = vector.broadcast %cst_10 : f32 to vector<32x1xf32>
    %11 = arith.divf %9, %10 : vector<32x1xf32>
    %12 = vector.broadcast %11 : vector<32x1xf32> to vector<32x32xf32>
    %13 = arith.subf %5, %12 : vector<32x32xf32>
    %14 = arith.mulf %13, %13 : vector<32x32xf32>
    %cst_11 = arith.constant dense<0.000000e+00> : vector<32xf32>
    %15 = vector.multi_reduction <add>, %14, %cst_11 [1] : vector<32x32xf32> to vector<32xf32>
    %16 = vector.shape_cast %15 : vector<32xf32> to vector<32x1xf32>
    %cst_12 = arith.constant 3.200000e+01 : f32
    %17 = vector.broadcast %cst_12 : f32 to vector<32x1xf32>
    %18 = arith.divf %16, %17 : vector<32x1xf32>
    %19 = vector.broadcast %11 : vector<32x1xf32> to vector<32x32xf32>
    %20 = arith.subf %5, %19 : vector<32x32xf32>
    %cst_13 = arith.constant 9.99999997E-7 : f32
    %21 = vector.broadcast %cst_13 : f32 to vector<32x1xf32>
    %22 = arith.addf %18, %21 : vector<32x1xf32>
    %23 = math.rsqrt %22 : vector<32x1xf32>
    %24 = vector.broadcast %23 : vector<32x1xf32> to vector<32x32xf32>
    %25 = arith.mulf %20, %24 : vector<32x32xf32>
    %26 = vector.broadcast %6 : vector<1x32xf32> to vector<32x32xf32>
    %27 = arith.mulf %25, %26 : vector<32x32xf32>
    %28 = vector.broadcast %7 : vector<1x32xf32> to vector<32x32xf32>
    %29 = arith.addf %27, %28 : vector<32x32xf32>
    %cst_14 = arith.constant 0.000000e+00 : f32
    %30 = vector.broadcast %cst_14 : f32 to vector<2x10x15x32xf32>
    %c0_15 = arith.constant 0 : index
    %c0_16 = arith.constant 0 : index
    %c0_17 = arith.constant 0 : index
    %c0_18 = arith.constant 0 : index
    %31 = vector.load %arg18[%c0_15, %c0_16, %c0_17, %c0_18] : memref<2x10x15x32xf32, #tpu.memory_space<vmem>>, vector<2x10x15x32xf32>
    tpu.vector_store %arg18[%c0_15, %c0_16, %c0_17, %c0_18], %30 {strides = array<i32>} : memref<2x10x15x32xf32, #tpu.memory_space<vmem>>, vector<2x10x15x32xf32>,
    %32 = vector.shape_cast %29 : vector<32x32xf32> to vector<2x4x4x32xf32>
    %c0_19 = arith.constant 0 : index
    %c3 = arith.constant 3 : index
    %c8 = arith.constant 8 : index
    %c0_20 = arith.constant 0 : index
    %33 = vector.load %arg18[%c0_19, %c3, %c8, %c0_20] : memref<2x10x15x32xf32, #tpu.memory_space<vmem>>, vector<2x4x4x32xf32>
    tpu.vector_store %arg18[%c0_19, %c3, %c8, %c0_20], %32 {strides = array<i32>} : memref<2x10x15x32xf32, #tpu.memory_space<vmem>>, vector<2x4x4x32xf32>,
    %c0_21 = arith.constant 0 : index
    %c0_22 = arith.constant 0 : index
    %c0_23 = arith.constant 0 : index
    %c0_24 = arith.constant 0 : index
    %34 = vector.load %arg18[%c0_21, %c0_22, %c0_23, %c0_24] : memref<2x10x15x32xf32, #tpu.memory_space<vmem>>, vector<2x10x15x32xf32>
    %35 = vector.extract_strided_slice %34 {offsets = [0, 3, 8, 0], sizes = [2, 4, 4, 32], strides = [1, 1, 1, 1]} : vector<2x10x15x32xf32> to vector<2x4x4x32xf32>
    %c0_25 = arith.constant 0 : index
    %c0_26 = arith.constant 0 : index
    %c0_27 = arith.constant 0 : index
    %36 = vector.load %arg5[%c0_25, %c0_26, %c0_27] : memref<2x49x32xf32, #tpu.memory_space<vmem>>, vector<1x49x32xf32>
    %37 = vector.shape_cast %36 : vector<1x49x32xf32> to vector<49x32xf32>
    %cst_28 = arith.constant 0.000000e+00 : f32
    %38 = vector.broadcast %cst_28 : f32 to vector<2x4x4x32xf32>
    %39 = vector.extract_strided_slice %37 {offsets = [0, 0], sizes = [1, 32], strides = [1, 1]} : vector<49x32xf32> to vector<1x32xf32>
    %40 = vector.extract_strided_slice %34 {offsets = [0, 0, 5, 0], sizes = [2, 4, 4, 32], strides = [1, 1, 1, 1]} : vector<2x10x15x32xf32> to vector<2x4x4x32xf32>
    %41 = vector.shape_cast %39 : vector<1x32xf32> to vector<1x1x1x32xf32>
    %42 = vector.broadcast %41 : vector<1x1x1x32xf32> to vector<2x4x4x32xf32>
    %43 = arith.mulf %40, %42 : vector<2x4x4x32xf32>
    %44 = arith.addf %38, %43 : vector<2x4x4x32xf32>
    %45 = vector.extract_strided_slice %37 {offsets = [1, 0], sizes = [1, 32], strides = [1, 1]} : vector<49x32xf32> to vector<1x32xf32>
    %46 = vector.extract_strided_slice %34 {offsets = [0, 0, 6, 0], sizes = [2, 4, 4, 32], strides = [1, 1, 1, 1]} : vector<2x10x15x32xf32> to vector<2x4x4x32xf32>
    %47 = vector.shape_cast %45 : vector<1x32xf32> to vector<1x1x1x32xf32>
    %48 = vector.broadcast %47 : vector<1x1x1x32xf32> to vector<2x4x4x32xf32>
    %49 = arith.mulf %46, %48 : vector<2x4x4x32xf32>
    %50 = arith.addf %44, %49 : vector<2x4x4x32xf32>
    %51 = vector.extract_strided_slice %37 {offsets = [2, 0], sizes = [1, 32], strides = [1, 1]} : vector<49x32xf32> to vector<1x32xf32>
    %52 = vector.extract_strided_slice %34 {offsets = [0, 0, 7, 0], sizes = [2, 4, 4, 32], strides = [1, 1, 1, 1]} : vector<2x10x15x32xf32> to vector<2x4x4x32xf32>
    %53 = vector.shape_cast %51 : vector<1x32xf32> to vector<1x1x1x32xf32>
    %54 = vector.broadcast %53 : vector<1x1x1x32xf32> to vector<2x4x4x32xf32>
    %55 = arith.mulf %52, %54 : vector<2x4x4x32xf32>
    %56 = arith.addf %50, %55 : vector<2x4x4x32xf32>
    %57 = vector.extract_strided_slice %37 {offsets = [3, 0], sizes = [1, 32], strides = [1, 1]} : vector<49x32xf32> to vector<1x32xf32>
    %58 = vector.extract_strided_slice %34 {offsets = [0, 0, 8, 0], sizes = [2, 4, 4, 32], strides = [1, 1, 1, 1]} : vector<2x10x15x32xf32> to vector<2x4x4x32xf32>
    %59 = vector.shape_cast %57 : vector<1x32xf32> to vector<1x1x1x32xf32>
    %60 = vector.broadcast %59 : vector<1x1x1x32xf32> to vector<2x4x4x32xf32>
    %61 = arith.mulf %58, %60 : vector<2x4x4x32xf32>
    %62 = arith.addf %56, %61 : vector<2x4x4x32xf32>
    %63 = vector.extract_strided_slice %37 {offsets = [4, 0], sizes = [1, 32], strides = [1, 1]} : vector<49x32xf32> to vector<1x32xf32>
    %64 = vector.extract_strided_slice %34 {offsets = [0, 0, 9, 0], sizes = [2, 4, 4, 32], strides = [1, 1, 1, 1]} : vector<2x10x15x32xf32> to vector<2x4x4x32xf32>
    %65 = vector.shape_cast %63 : vector<1x32xf32> to vector<1x1x1x32xf32>
    %66 = vector.broadcast %65 : vector<1x1x1x32xf32> to vector<2x4x4x32xf32>
    %67 = arith.mulf %64, %66 : vector<2x4x4x32xf32>
    %68 = arith.addf %62, %67 : vector<2x4x4x32xf32>
    %69 = vector.extract_strided_slice %37 {offsets = [5, 0], sizes = [1, 32], strides = [1, 1]} : vector<49x32xf32> to vector<1x32xf32>
    %70 = vector.extract_strided_slice %34 {offsets = [0, 0, 10, 0], sizes = [2, 4, 4, 32], strides = [1, 1, 1, 1]} : vector<2x10x15x32xf32> to vector<2x4x4x32xf32>
    %71 = vector.shape_cast %69 : vector<1x32xf32> to vector<1x1x1x32xf32>
    %72 = vector.broadcast %71 : vector<1x1x1x32xf32> to vector<2x4x4x32xf32>
    %73 = arith.mulf %70, %72 : vector<2x4x4x32xf32>
    %74 = arith.addf %68, %73 : vector<2x4x4x32xf32>
    %75 = vector.extract_strided_slice %37 {offsets = [6, 0], sizes = [1, 32], strides = [1, 1]} : vector<49x32xf32> to vector<1x32xf32>
    %76 = vector.extract_strided_slice %34 {offsets = [0, 0, 11, 0], sizes = [2, 4, 4, 32], strides = [1, 1, 1, 1]} : vector<2x10x15x32xf32> to vector<2x4x4x32xf32>
    %77 = vector.shape_cast %75 : vector<1x32xf32> to vector<1x1x1x32xf32>
    %78 = vector.broadcast %77 : vector<1x1x1x32xf32> to vector<2x4x4x32xf32>
    %79 = arith.mulf %76, %78 : vector<2x4x4x32xf32>
    %80 = arith.addf %74, %79 : vector<2x4x4x32xf32>
    %81 = vector.extract_strided_slice %37 {offsets = [7, 0], sizes = [1, 32], strides = [1, 1]} : vector<49x32xf32> to vector<1x32xf32>
    %82 = vector.extract_strided_slice %34 {offsets = [0, 1, 5, 0], sizes = [2, 4, 4, 32], strides = [1, 1, 1, 1]} : vector<2x10x15x32xf32> to vector<2x4x4x32xf32>
    %83 = vector.shape_cast %81 : vector<1x32xf32> to vector<1x1x1x32xf32>
    %84 = vector.broadcast %83 : vector<1x1x1x32xf32> to vector<2x4x4x32xf32>
    %85 = arith.mulf %82, %84 : vector<2x4x4x32xf32>
    %86 = arith.addf %80, %85 : vector<2x4x4x32xf32>
    %87 = vector.extract_strided_slice %37 {offsets = [8, 0], sizes = [1, 32], strides = [1, 1]} : vector<49x32xf32> to vector<1x32xf32>
    %88 = vector.extract_strided_slice %34 {offsets = [0, 1, 6, 0], sizes = [2, 4, 4, 32], strides = [1, 1, 1, 1]} : vector<2x10x15x32xf32> to vector<2x4x4x32xf32>
    %89 = vector.shape_cast %87 : vector<1x32xf32> to vector<1x1x1x32xf32>
    %90 = vector.broadcast %89 : vector<1x1x1x32xf32> to vector<2x4x4x32xf32>
    %91 = arith.mulf %88, %90 : vector<2x4x4x32xf32>
    %92 = arith.addf %86, %91 : vector<2x4x4x32xf32>
    %93 = vector.extract_strided_slice %37 {offsets = [9, 0], sizes = [1, 32], strides = [1, 1]} : vector<49x32xf32> to vector<1x32xf32>
    %94 = vector.extract_strided_slice %34 {offsets = [0, 1, 7, 0], sizes = [2, 4, 4, 32], strides = [1, 1, 1, 1]} : vector<2x10x15x32xf32> to vector<2x4x4x32xf32>
    %95 = vector.shape_cast %93 : vector<1x32xf32> to vector<1x1x1x32xf32>
    %96 = vector.broadcast %95 : vector<1x1x1x32xf32> to vector<2x4x4x32xf32>
    %97 = arith.mulf %94, %96 : vector<2x4x4x32xf32>
    %98 = arith.addf %92, %97 : vector<2x4x4x32xf32>
    %99 = vector.extract_strided_slice %37 {offsets = [10, 0], sizes = [1, 32], strides = [1, 1]} : vector<49x32xf32> to vector<1x32xf32>
    %100 = vector.extract_strided_slice %34 {offsets = [0, 1, 8, 0], sizes = [2, 4, 4, 32], strides = [1, 1, 1, 1]} : vector<2x10x15x32xf32> to vector<2x4x4x32xf32>
    %101 = vector.shape_cast %99 : vector<1x32xf32> to vector<1x1x1x32xf32>
    %102 = vector.broadcast %101 : vector<1x1x1x32xf32> to vector<2x4x4x32xf32>
    %103 = arith.mulf %100, %102 : vector<2x4x4x32xf32>
    %104 = arith.addf %98, %103 : vector<2x4x4x32xf32>
    %105 = vector.extract_strided_slice %37 {offsets = [11, 0], sizes = [1, 32], strides = [1, 1]} : vector<49x32xf32> to vector<1x32xf32>
    %106 = vector.extract_strided_slice %34 {offsets = [0, 1, 9, 0], sizes = [2, 4, 4, 32], strides = [1, 1, 1, 1]} : vector<2x10x15x32xf32> to vector<2x4x4x32xf32>
    %107 = vector.shape_cast %105 : vector<1x32xf32> to vector<1x1x1x32xf32>
    %108 = vector.broadcast %107 : vector<1x1x1x32xf32> to vector<2x4x4x32xf32>
    %109 = arith.mulf %106, %108 : vector<2x4x4x32xf32>
    %110 = arith.addf %104, %109 : vector<2x4x4x32xf32>
    %111 = vector.extract_strided_slice %37 {offsets = [12, 0], sizes = [1, 32], strides = [1, 1]} : vector<49x32xf32> to vector<1x32xf32>
    %112 = vector.extract_strided_slice %34 {offsets = [0, 1, 10, 0], sizes = [2, 4, 4, 32], strides = [1, 1, 1, 1]} : vector<2x10x15x32xf32> to vector<2x4x4x32xf32>
    %113 = vector.shape_cast %111 : vector<1x32xf32> to vector<1x1x1x32xf32>
    %114 = vector.broadcast %113 : vector<1x1x1x32xf32> to vector<2x4x4x32xf32>
    %115 = arith.mulf %112, %114 : vector<2x4x4x32xf32>
    %116 = arith.addf %110, %115 : vector<2x4x4x32xf32>
    %117 = vector.extract_strided_slice %37 {offsets = [13, 0], sizes = [1, 32], strides = [1, 1]} : vector<49x32xf32> to vector<1x32xf32>
    %118 = vector.extract_strided_slice %34 {offsets = [0, 1, 11, 0], sizes = [2, 4, 4, 32], strides = [1, 1, 1, 1]} : vector<2x10x15x32xf32> to vector<2x4x4x32xf32>
    %119 = vector.shape_cast %117 : vector<1x32xf32> to vector<1x1x1x32xf32>
    %120 = vector.broadcast %119 : vector<1x1x1x32xf32> to vector<2x4x4x32xf32>
    %121 = arith.mulf %118, %120 : vector<2x4x4x32xf32>
    %122 = arith.addf %116, %121 : vector<2x4x4x32xf32>
    %123 = vector.extract_strided_slice %37 {offsets = [14, 0], sizes = [1, 32], strides = [1, 1]} : vector<49x32xf32> to vector<1x32xf32>
    %124 = vector.extract_strided_slice %34 {offsets = [0, 2, 5, 0], sizes = [2, 4, 4, 32], strides = [1, 1, 1, 1]} : vector<2x10x15x32xf32> to vector<2x4x4x32xf32>
    %125 = vector.shape_cast %123 : vector<1x32xf32> to vector<1x1x1x32xf32>
    %126 = vector.broadcast %125 : vector<1x1x1x32xf32> to vector<2x4x4x32xf32>
    %127 = arith.mulf %124, %126 : vector<2x4x4x32xf32>
    %128 = arith.addf %122, %127 : vector<2x4x4x32xf32>
    %129 = vector.extract_strided_slice %37 {offsets = [15, 0], sizes = [1, 32], strides = [1, 1]} : vector<49x32xf32> to vector<1x32xf32>
    %130 = vector.extract_strided_slice %34 {offsets = [0, 2, 6, 0], sizes = [2, 4, 4, 32], strides = [1, 1, 1, 1]} : vector<2x10x15x32xf32> to vector<2x4x4x32xf32>
    %131 = vector.shape_cast %129 : vector<1x32xf32> to vector<1x1x1x32xf32>
    %132 = vector.broadcast %131 : vector<1x1x1x32xf32> to vector<2x4x4x32xf32>
    %133 = arith.mulf %130, %132 : vector<2x4x4x32xf32>
    %134 = arith.addf %128, %133 : vector<2x4x4x32xf32>
    %135 = vector.extract_strided_slice %37 {offsets = [16, 0], sizes = [1, 32], strides = [1, 1]} : vector<49x32xf32> to vector<1x32xf32>
    %136 = vector.extract_strided_slice %34 {offsets = [0, 2, 7, 0], sizes = [2, 4, 4, 32], strides = [1, 1, 1, 1]} : vector<2x10x15x32xf32> to vector<2x4x4x32xf32>
    %137 = vector.shape_cast %135 : vector<1x32xf32> to vector<1x1x1x32xf32>
    %138 = vector.broadcast %137 : vector<1x1x1x32xf32> to vector<2x4x4x32xf32>
    %139 = arith.mulf %136, %138 : vector<2x4x4x32xf32>
    %140 = arith.addf %134, %139 : vector<2x4x4x32xf32>
    %141 = vector.extract_strided_slice %37 {offsets = [17, 0], sizes = [1, 32], strides = [1, 1]} : vector<49x32xf32> to vector<1x32xf32>
    %142 = vector.extract_strided_slice %34 {offsets = [0, 2, 8, 0], sizes = [2, 4, 4, 32], strides = [1, 1, 1, 1]} : vector<2x10x15x32xf32> to vector<2x4x4x32xf32>
    %143 = vector.shape_cast %141 : vector<1x32xf32> to vector<1x1x1x32xf32>
    %144 = vector.broadcast %143 : vector<1x1x1x32xf32> to vector<2x4x4x32xf32>
    %145 = arith.mulf %142, %144 : vector<2x4x4x32xf32>
    %146 = arith.addf %140, %145 : vector<2x4x4x32xf32>
    %147 = vector.extract_strided_slice %37 {offsets = [18, 0], sizes = [1, 32], strides = [1, 1]} : vector<49x32xf32> to vector<1x32xf32>
    %148 = vector.extract_strided_slice %34 {offsets = [0, 2, 9, 0], sizes = [2, 4, 4, 32], strides = [1, 1, 1, 1]} : vector<2x10x15x32xf32> to vector<2x4x4x32xf32>
    %149 = vector.shape_cast %147 : vector<1x32xf32> to vector<1x1x1x32xf32>
    %150 = vector.broadcast %149 : vector<1x1x1x32xf32> to vector<2x4x4x32xf32>
    %151 = arith.mulf %148, %150 : vector<2x4x4x32xf32>
    %152 = arith.addf %146, %151 : vector<2x4x4x32xf32>
    %153 = vector.extract_strided_slice %37 {offsets = [19, 0], sizes = [1, 32], strides = [1, 1]} : vector<49x32xf32> to vector<1x32xf32>
    %154 = vector.extract_strided_slice %34 {offsets = [0, 2, 10, 0], sizes = [2, 4, 4, 32], strides = [1, 1, 1, 1]} : vector<2x10x15x32xf32> to vector<2x4x4x32xf32>
    %155 = vector.shape_cast %153 : vector<1x32xf32> to vector<1x1x1x32xf32>
    %156 = vector.broadcast %155 : vector<1x1x1x32xf32> to vector<2x4x4x32xf32>
    %157 = arith.mulf %154, %156 : vector<2x4x4x32xf32>
    %158 = arith.addf %152, %157 : vector<2x4x4x32xf32>
    %159 = vector.extract_strided_slice %37 {offsets = [20, 0], sizes = [1, 32], strides = [1, 1]} : vector<49x32xf32> to vector<1x32xf32>
    %160 = vector.extract_strided_slice %34 {offsets = [0, 2, 11, 0], sizes = [2, 4, 4, 32], strides = [1, 1, 1, 1]} : vector<2x10x15x32xf32> to vector<2x4x4x32xf32>
    %161 = vector.shape_cast %159 : vector<1x32xf32> to vector<1x1x1x32xf32>
    %162 = vector.broadcast %161 : vector<1x1x1x32xf32> to vector<2x4x4x32xf32>
    %163 = arith.mulf %160, %162 : vector<2x4x4x32xf32>
    %164 = arith.addf %158, %163 : vector<2x4x4x32xf32>
    %165 = vector.extract_strided_slice %37 {offsets = [21, 0], sizes = [1, 32], strides = [1, 1]} : vector<49x32xf32> to vector<1x32xf32>
    %166 = vector.extract_strided_slice %34 {offsets = [0, 3, 5, 0], sizes = [2, 4, 4, 32], strides = [1, 1, 1, 1]} : vector<2x10x15x32xf32> to vector<2x4x4x32xf32>
    %167 = vector.shape_cast %165 : vector<1x32xf32> to vector<1x1x1x32xf32>
    %168 = vector.broadcast %167 : vector<1x1x1x32xf32> to vector<2x4x4x32xf32>
    %169 = arith.mulf %166, %168 : vector<2x4x4x32xf32>
    %170 = arith.addf %164, %169 : vector<2x4x4x32xf32>
    %171 = vector.extract_strided_slice %37 {offsets = [22, 0], sizes = [1, 32], strides = [1, 1]} : vector<49x32xf32> to vector<1x32xf32>
    %172 = vector.extract_strided_slice %34 {offsets = [0, 3, 6, 0], sizes = [2, 4, 4, 32], strides = [1, 1, 1, 1]} : vector<2x10x15x32xf32> to vector<2x4x4x32xf32>
    %173 = vector.shape_cast %171 : vector<1x32xf32> to vector<1x1x1x32xf32>
    %174 = vector.broadcast %173 : vector<1x1x1x32xf32> to vector<2x4x4x32xf32>
    %175 = arith.mulf %172, %174 : vector<2x4x4x32xf32>
    %176 = arith.addf %170, %175 : vector<2x4x4x32xf32>
    %177 = vector.extract_strided_slice %37 {offsets = [23, 0], sizes = [1, 32], strides = [1, 1]} : vector<49x32xf32> to vector<1x32xf32>
    %178 = vector.extract_strided_slice %34 {offsets = [0, 3, 7, 0], sizes = [2, 4, 4, 32], strides = [1, 1, 1, 1]} : vector<2x10x15x32xf32> to vector<2x4x4x32xf32>
    %179 = vector.shape_cast %177 : vector<1x32xf32> to vector<1x1x1x32xf32>
    %180 = vector.broadcast %179 : vector<1x1x1x32xf32> to vector<2x4x4x32xf32>
    %181 = arith.mulf %178, %180 : vector<2x4x4x32xf32>
    %182 = arith.addf %176, %181 : vector<2x4x4x32xf32>
    %183 = vector.extract_strided_slice %37 {offsets = [24, 0], sizes = [1, 32], strides = [1, 1]} : vector<49x32xf32> to vector<1x32xf32>
    %184 = vector.extract_strided_slice %34 {offsets = [0, 3, 8, 0], sizes = [2, 4, 4, 32], strides = [1, 1, 1, 1]} : vector<2x10x15x32xf32> to vector<2x4x4x32xf32>
    %185 = vector.shape_cast %183 : vector<1x32xf32> to vector<1x1x1x32xf32>
    %186 = vector.broadcast %185 : vector<1x1x1x32xf32> to vector<2x4x4x32xf32>
    %187 = arith.mulf %184, %186 : vector<2x4x4x32xf32>
    %188 = arith.addf %182, %187 : vector<2x4x4x32xf32>
    %189 = vector.extract_strided_slice %37 {offsets = [25, 0], sizes = [1, 32], strides = [1, 1]} : vector<49x32xf32> to vector<1x32xf32>
    %190 = vector.extract_strided_slice %34 {offsets = [0, 3, 9, 0], sizes = [2, 4, 4, 32], strides = [1, 1, 1, 1]} : vector<2x10x15x32xf32> to vector<2x4x4x32xf32>
    %191 = vector.shape_cast %189 : vector<1x32xf32> to vector<1x1x1x32xf32>
    %192 = vector.broadcast %191 : vector<1x1x1x32xf32> to vector<2x4x4x32xf32>
    %193 = arith.mulf %190, %192 : vector<2x4x4x32xf32>
    %194 = arith.addf %188, %193 : vector<2x4x4x32xf32>
    %195 = vector.extract_strided_slice %37 {offsets = [26, 0], sizes = [1, 32], strides = [1, 1]} : vector<49x32xf32> to vector<1x32xf32>
    %196 = vector.extract_strided_slice %34 {offsets = [0, 3, 10, 0], sizes = [2, 4, 4, 32], strides = [1, 1, 1, 1]} : vector<2x10x15x32xf32> to vector<2x4x4x32xf32>
    %197 = vector.shape_cast %195 : vector<1x32xf32> to vector<1x1x1x32xf32>
    %198 = vector.broadcast %197 : vector<1x1x1x32xf32> to vector<2x4x4x32xf32>
    %199 = arith.mulf %196, %198 : vector<2x4x4x32xf32>
    %200 = arith.addf %194, %199 : vector<2x4x4x32xf32>
    %201 = vector.extract_strided_slice %37 {offsets = [27, 0], sizes = [1, 32], strides = [1, 1]} : vector<49x32xf32> to vector<1x32xf32>
    %202 = vector.extract_strided_slice %34 {offsets = [0, 3, 11, 0], sizes = [2, 4, 4, 32], strides = [1, 1, 1, 1]} : vector<2x10x15x32xf32> to vector<2x4x4x32xf32>
    %203 = vector.shape_cast %201 : vector<1x32xf32> to vector<1x1x1x32xf32>
    %204 = vector.broadcast %203 : vector<1x1x1x32xf32> to vector<2x4x4x32xf32>
    %205 = arith.mulf %202, %204 : vector<2x4x4x32xf32>
    %206 = arith.addf %200, %205 : vector<2x4x4x32xf32>
    %207 = vector.extract_strided_slice %37 {offsets = [28, 0], sizes = [1, 32], strides = [1, 1]} : vector<49x32xf32> to vector<1x32xf32>
    %208 = vector.extract_strided_slice %34 {offsets = [0, 4, 5, 0], sizes = [2, 4, 4, 32], strides = [1, 1, 1, 1]} : vector<2x10x15x32xf32> to vector<2x4x4x32xf32>
    %209 = vector.shape_cast %207 : vector<1x32xf32> to vector<1x1x1x32xf32>
    %210 = vector.broadcast %209 : vector<1x1x1x32xf32> to vector<2x4x4x32xf32>
    %211 = arith.mulf %208, %210 : vector<2x4x4x32xf32>
    %212 = arith.addf %206, %211 : vector<2x4x4x32xf32>
    %213 = vector.extract_strided_slice %37 {offsets = [29, 0], sizes = [1, 32], strides = [1, 1]} : vector<49x32xf32> to vector<1x32xf32>
    %214 = vector.extract_strided_slice %34 {offsets = [0, 4, 6, 0], sizes = [2, 4, 4, 32], strides = [1, 1, 1, 1]} : vector<2x10x15x32xf32> to vector<2x4x4x32xf32>
    %215 = vector.shape_cast %213 : vector<1x32xf32> to vector<1x1x1x32xf32>
    %216 = vector.broadcast %215 : vector<1x1x1x32xf32> to vector<2x4x4x32xf32>
    %217 = arith.mulf %214, %216 : vector<2x4x4x32xf32>
    %218 = arith.addf %212, %217 : vector<2x4x4x32xf32>
    %219 = vector.extract_strided_slice %37 {offsets = [30, 0], sizes = [1, 32], strides = [1, 1]} : vector<49x32xf32> to vector<1x32xf32>
    %220 = vector.extract_strided_slice %34 {offsets = [0, 4, 7, 0], sizes = [2, 4, 4, 32], strides = [1, 1, 1, 1]} : vector<2x10x15x32xf32> to vector<2x4x4x32xf32>
    %221 = vector.shape_cast %219 : vector<1x32xf32> to vector<1x1x1x32xf32>
    %222 = vector.broadcast %221 : vector<1x1x1x32xf32> to vector<2x4x4x32xf32>
    %223 = arith.mulf %220, %222 : vector<2x4x4x32xf32>
    %224 = arith.addf %218, %223 : vector<2x4x4x32xf32>
    %225 = vector.extract_strided_slice %37 {offsets = [31, 0], sizes = [1, 32], strides = [1, 1]} : vector<49x32xf32> to vector<1x32xf32>
    %226 = vector.extract_strided_slice %34 {offsets = [0, 4, 8, 0], sizes = [2, 4, 4, 32], strides = [1, 1, 1, 1]} : vector<2x10x15x32xf32> to vector<2x4x4x32xf32>
    %227 = vector.shape_cast %225 : vector<1x32xf32> to vector<1x1x1x32xf32>
    %228 = vector.broadcast %227 : vector<1x1x1x32xf32> to vector<2x4x4x32xf32>
    %229 = arith.mulf %226, %228 : vector<2x4x4x32xf32>
    %230 = arith.addf %224, %229 : vector<2x4x4x32xf32>
    %231 = vector.extract_strided_slice %37 {offsets = [32, 0], sizes = [1, 32], strides = [1, 1]} : vector<49x32xf32> to vector<1x32xf32>
    %232 = vector.extract_strided_slice %34 {offsets = [0, 4, 9, 0], sizes = [2, 4, 4, 32], strides = [1, 1, 1, 1]} : vector<2x10x15x32xf32> to vector<2x4x4x32xf32>
    %233 = vector.shape_cast %231 : vector<1x32xf32> to vector<1x1x1x32xf32>
    %234 = vector.broadcast %233 : vector<1x1x1x32xf32> to vector<2x4x4x32xf32>
    %235 = arith.mulf %232, %234 : vector<2x4x4x32xf32>
    %236 = arith.addf %230, %235 : vector<2x4x4x32xf32>
    %237 = vector.extract_strided_slice %37 {offsets = [33, 0], sizes = [1, 32], strides = [1, 1]} : vector<49x32xf32> to vector<1x32xf32>
    %238 = vector.extract_strided_slice %34 {offsets = [0, 4, 10, 0], sizes = [2, 4, 4, 32], strides = [1, 1, 1, 1]} : vector<2x10x15x32xf32> to vector<2x4x4x32xf32>
    %239 = vector.shape_cast %237 : vector<1x32xf32> to vector<1x1x1x32xf32>
    %240 = vector.broadcast %239 : vector<1x1x1x32xf32> to vector<2x4x4x32xf32>
    %241 = arith.mulf %238, %240 : vector<2x4x4x32xf32>
    %242 = arith.addf %236, %241 : vector<2x4x4x32xf32>
    %243 = vector.extract_strided_slice %37 {offsets = [34, 0], sizes = [1, 32], strides = [1, 1]} : vector<49x32xf32> to vector<1x32xf32>
    %244 = vector.extract_strided_slice %34 {offsets = [0, 4, 11, 0], sizes = [2, 4, 4, 32], strides = [1, 1, 1, 1]} : vector<2x10x15x32xf32> to vector<2x4x4x32xf32>
    %245 = vector.shape_cast %243 : vector<1x32xf32> to vector<1x1x1x32xf32>
    %246 = vector.broadcast %245 : vector<1x1x1x32xf32> to vector<2x4x4x32xf32>
    %247 = arith.mulf %244, %246 : vector<2x4x4x32xf32>
    %248 = arith.addf %242, %247 : vector<2x4x4x32xf32>
    %249 = vector.extract_strided_slice %37 {offsets = [35, 0], sizes = [1, 32], strides = [1, 1]} : vector<49x32xf32> to vector<1x32xf32>
    %250 = vector.extract_strided_slice %34 {offsets = [0, 5, 5, 0], sizes = [2, 4, 4, 32], strides = [1, 1, 1, 1]} : vector<2x10x15x32xf32> to vector<2x4x4x32xf32>
    %251 = vector.shape_cast %249 : vector<1x32xf32> to vector<1x1x1x32xf32>
    %252 = vector.broadcast %251 : vector<1x1x1x32xf32> to vector<2x4x4x32xf32>
    %253 = arith.mulf %250, %252 : vector<2x4x4x32xf32>
    %254 = arith.addf %248, %253 : vector<2x4x4x32xf32>
    %255 = vector.extract_strided_slice %37 {offsets = [36, 0], sizes = [1, 32], strides = [1, 1]} : vector<49x32xf32> to vector<1x32xf32>
    %256 = vector.extract_strided_slice %34 {offsets = [0, 5, 6, 0], sizes = [2, 4, 4, 32], strides = [1, 1, 1, 1]} : vector<2x10x15x32xf32> to vector<2x4x4x32xf32>
    %257 = vector.shape_cast %255 : vector<1x32xf32> to vector<1x1x1x32xf32>
    %258 = vector.broadcast %257 : vector<1x1x1x32xf32> to vector<2x4x4x32xf32>
    %259 = arith.mulf %256, %258 : vector<2x4x4x32xf32>
    %260 = arith.addf %254, %259 : vector<2x4x4x32xf32>
    %261 = vector.extract_strided_slice %37 {offsets = [37, 0], sizes = [1, 32], strides = [1, 1]} : vector<49x32xf32> to vector<1x32xf32>
    %262 = vector.extract_strided_slice %34 {offsets = [0, 5, 7, 0], sizes = [2, 4, 4, 32], strides = [1, 1, 1, 1]} : vector<2x10x15x32xf32> to vector<2x4x4x32xf32>
    %263 = vector.shape_cast %261 : vector<1x32xf32> to vector<1x1x1x32xf32>
    %264 = vector.broadcast %263 : vector<1x1x1x32xf32> to vector<2x4x4x32xf32>
    %265 = arith.mulf %262, %264 : vector<2x4x4x32xf32>
    %266 = arith.addf %260, %265 : vector<2x4x4x32xf32>
    %267 = vector.extract_strided_slice %37 {offsets = [38, 0], sizes = [1, 32], strides = [1, 1]} : vector<49x32xf32> to vector<1x32xf32>
    %268 = vector.extract_strided_slice %34 {offsets = [0, 5, 8, 0], sizes = [2, 4, 4, 32], strides = [1, 1, 1, 1]} : vector<2x10x15x32xf32> to vector<2x4x4x32xf32>
    %269 = vector.shape_cast %267 : vector<1x32xf32> to vector<1x1x1x32xf32>
    %270 = vector.broadcast %269 : vector<1x1x1x32xf32> to vector<2x4x4x32xf32>
    %271 = arith.mulf %268, %270 : vector<2x4x4x32xf32>
    %272 = arith.addf %266, %271 : vector<2x4x4x32xf32>
    %273 = vector.extract_strided_slice %37 {offsets = [39, 0], sizes = [1, 32], strides = [1, 1]} : vector<49x32xf32> to vector<1x32xf32>
    %274 = vector.extract_strided_slice %34 {offsets = [0, 5, 9, 0], sizes = [2, 4, 4, 32], strides = [1, 1, 1, 1]} : vector<2x10x15x32xf32> to vector<2x4x4x32xf32>
    %275 = vector.shape_cast %273 : vector<1x32xf32> to vector<1x1x1x32xf32>
    %276 = vector.broadcast %275 : vector<1x1x1x32xf32> to vector<2x4x4x32xf32>
    %277 = arith.mulf %274, %276 : vector<2x4x4x32xf32>
    %278 = arith.addf %272, %277 : vector<2x4x4x32xf32>
    %279 = vector.extract_strided_slice %37 {offsets = [40, 0], sizes = [1, 32], strides = [1, 1]} : vector<49x32xf32> to vector<1x32xf32>
    %280 = vector.extract_strided_slice %34 {offsets = [0, 5, 10, 0], sizes = [2, 4, 4, 32], strides = [1, 1, 1, 1]} : vector<2x10x15x32xf32> to vector<2x4x4x32xf32>
    %281 = vector.shape_cast %279 : vector<1x32xf32> to vector<1x1x1x32xf32>
    %282 = vector.broadcast %281 : vector<1x1x1x32xf32> to vector<2x4x4x32xf32>
    %283 = arith.mulf %280, %282 : vector<2x4x4x32xf32>
    %284 = arith.addf %278, %283 : vector<2x4x4x32xf32>
    %285 = vector.extract_strided_slice %37 {offsets = [41, 0], sizes = [1, 32], strides = [1, 1]} : vector<49x32xf32> to vector<1x32xf32>
    %286 = vector.extract_strided_slice %34 {offsets = [0, 5, 11, 0], sizes = [2, 4, 4, 32], strides = [1, 1, 1, 1]} : vector<2x10x15x32xf32> to vector<2x4x4x32xf32>
    %287 = vector.shape_cast %285 : vector<1x32xf32> to vector<1x1x1x32xf32>
    %288 = vector.broadcast %287 : vector<1x1x1x32xf32> to vector<2x4x4x32xf32>
    %289 = arith.mulf %286, %288 : vector<2x4x4x32xf32>
    %290 = arith.addf %284, %289 : vector<2x4x4x32xf32>
    %291 = vector.extract_strided_slice %37 {offsets = [42, 0], sizes = [1, 32], strides = [1, 1]} : vector<49x32xf32> to vector<1x32xf32>
    %292 = vector.extract_strided_slice %34 {offsets = [0, 6, 5, 0], sizes = [2, 4, 4, 32], strides = [1, 1, 1, 1]} : vector<2x10x15x32xf32> to vector<2x4x4x32xf32>
    %293 = vector.shape_cast %291 : vector<1x32xf32> to vector<1x1x1x32xf32>
    %294 = vector.broadcast %293 : vector<1x1x1x32xf32> to vector<2x4x4x32xf32>
    %295 = arith.mulf %292, %294 : vector<2x4x4x32xf32>
    %296 = arith.addf %290, %295 : vector<2x4x4x32xf32>
    %297 = vector.extract_strided_slice %37 {offsets = [43, 0], sizes = [1, 32], strides = [1, 1]} : vector<49x32xf32> to vector<1x32xf32>
    %298 = vector.extract_strided_slice %34 {offsets = [0, 6, 6, 0], sizes = [2, 4, 4, 32], strides = [1, 1, 1, 1]} : vector<2x10x15x32xf32> to vector<2x4x4x32xf32>
    %299 = vector.shape_cast %297 : vector<1x32xf32> to vector<1x1x1x32xf32>
    %300 = vector.broadcast %299 : vector<1x1x1x32xf32> to vector<2x4x4x32xf32>
    %301 = arith.mulf %298, %300 : vector<2x4x4x32xf32>
    %302 = arith.addf %296, %301 : vector<2x4x4x32xf32>
    %303 = vector.extract_strided_slice %37 {offsets = [44, 0], sizes = [1, 32], strides = [1, 1]} : vector<49x32xf32> to vector<1x32xf32>
    %304 = vector.extract_strided_slice %34 {offsets = [0, 6, 7, 0], sizes = [2, 4, 4, 32], strides = [1, 1, 1, 1]} : vector<2x10x15x32xf32> to vector<2x4x4x32xf32>
    %305 = vector.shape_cast %303 : vector<1x32xf32> to vector<1x1x1x32xf32>
    %306 = vector.broadcast %305 : vector<1x1x1x32xf32> to vector<2x4x4x32xf32>
    %307 = arith.mulf %304, %306 : vector<2x4x4x32xf32>
    %308 = arith.addf %302, %307 : vector<2x4x4x32xf32>
    %309 = vector.extract_strided_slice %37 {offsets = [45, 0], sizes = [1, 32], strides = [1, 1]} : vector<49x32xf32> to vector<1x32xf32>
    %310 = vector.extract_strided_slice %34 {offsets = [0, 6, 8, 0], sizes = [2, 4, 4, 32], strides = [1, 1, 1, 1]} : vector<2x10x15x32xf32> to vector<2x4x4x32xf32>
    %311 = vector.shape_cast %309 : vector<1x32xf32> to vector<1x1x1x32xf32>
    %312 = vector.broadcast %311 : vector<1x1x1x32xf32> to vector<2x4x4x32xf32>
    %313 = arith.mulf %310, %312 : vector<2x4x4x32xf32>
    %314 = arith.addf %308, %313 : vector<2x4x4x32xf32>
    %315 = vector.extract_strided_slice %37 {offsets = [46, 0], sizes = [1, 32], strides = [1, 1]} : vector<49x32xf32> to vector<1x32xf32>
    %316 = vector.extract_strided_slice %34 {offsets = [0, 6, 9, 0], sizes = [2, 4, 4, 32], strides = [1, 1, 1, 1]} : vector<2x10x15x32xf32> to vector<2x4x4x32xf32>
    %317 = vector.shape_cast %315 : vector<1x32xf32> to vector<1x1x1x32xf32>
    %318 = vector.broadcast %317 : vector<1x1x1x32xf32> to vector<2x4x4x32xf32>
    %319 = arith.mulf %316, %318 : vector<2x4x4x32xf32>
    %320 = arith.addf %314, %319 : vector<2x4x4x32xf32>
    %321 = vector.extract_strided_slice %37 {offsets = [47, 0], sizes = [1, 32], strides = [1, 1]} : vector<49x32xf32> to vector<1x32xf32>
    %322 = vector.extract_strided_slice %34 {offsets = [0, 6, 10, 0], sizes = [2, 4, 4, 32], strides = [1, 1, 1, 1]} : vector<2x10x15x32xf32> to vector<2x4x4x32xf32>
    %323 = vector.shape_cast %321 : vector<1x32xf32> to vector<1x1x1x32xf32>
    %324 = vector.broadcast %323 : vector<1x1x1x32xf32> to vector<2x4x4x32xf32>
    %325 = arith.mulf %322, %324 : vector<2x4x4x32xf32>
    %326 = arith.addf %320, %325 : vector<2x4x4x32xf32>
    %327 = vector.extract_strided_slice %37 {offsets = [48, 0], sizes = [1, 32], strides = [1, 1]} : vector<49x32xf32> to vector<1x32xf32>
    %328 = vector.extract_strided_slice %34 {offsets = [0, 6, 11, 0], sizes = [2, 4, 4, 32], strides = [1, 1, 1, 1]} : vector<2x10x15x32xf32> to vector<2x4x4x32xf32>
    %329 = vector.shape_cast %327 : vector<1x32xf32> to vector<1x1x1x32xf32>
    %330 = vector.broadcast %329 : vector<1x1x1x32xf32> to vector<2x4x4x32xf32>
    %331 = arith.mulf %328, %330 : vector<2x4x4x32xf32>
    %332 = arith.addf %326, %331 : vector<2x4x4x32xf32>
    %c0_29 = arith.constant 0 : index
    %c0_30 = arith.constant 0 : index
    %c0_31 = arith.constant 0 : index
    %333 = vector.load %arg6[%c0_29, %c0_30, %c0_31] : memref<2x1x32xf32, #tpu.memory_space<vmem>>, vector<1x1x32xf32>
    %334 = vector.shape_cast %333 : vector<1x1x32xf32> to vector<1x32xf32>
    %335 = vector.shape_cast %334 : vector<1x32xf32> to vector<1x1x1x32xf32>
    %336 = vector.broadcast %335 : vector<1x1x1x32xf32> to vector<2x4x4x32xf32>
    %337 = arith.addf %332, %336 : vector<2x4x4x32xf32>
    %338 = vector.shape_cast %337 : vector<2x4x4x32xf32> to vector<32x32xf32>
    %c0_32 = arith.constant 0 : index
    %c0_33 = arith.constant 0 : index
    %c0_34 = arith.constant 0 : index
    %339 = vector.load %arg7[%c0_32, %c0_33, %c0_34] : memref<2x1x32xf32, #tpu.memory_space<vmem>>, vector<1x1x32xf32>
    %340 = vector.shape_cast %339 : vector<1x1x32xf32> to vector<1x32xf32>
    %c0_35 = arith.constant 0 : index
    %c0_36 = arith.constant 0 : index
    %c0_37 = arith.constant 0 : index
    %341 = vector.load %arg8[%c0_35, %c0_36, %c0_37] : memref<2x1x32xf32, #tpu.memory_space<vmem>>, vector<1x1x32xf32>
    %342 = vector.shape_cast %341 : vector<1x1x32xf32> to vector<1x32xf32>
    %cst_38 = arith.constant dense<0.000000e+00> : vector<32xf32>
    %343 = vector.multi_reduction <add>, %338, %cst_38 [1] : vector<32x32xf32> to vector<32xf32>
    %344 = vector.shape_cast %343 : vector<32xf32> to vector<32x1xf32>
    %cst_39 = arith.constant 3.200000e+01 : f32
    %345 = vector.broadcast %cst_39 : f32 to vector<32x1xf32>
    %346 = arith.divf %344, %345 : vector<32x1xf32>
    %347 = vector.broadcast %346 : vector<32x1xf32> to vector<32x32xf32>
    %348 = arith.subf %338, %347 : vector<32x32xf32>
    %349 = arith.mulf %348, %348 : vector<32x32xf32>
    %cst_40 = arith.constant dense<0.000000e+00> : vector<32xf32>
    %350 = vector.multi_reduction <add>, %349, %cst_40 [1] : vector<32x32xf32> to vector<32xf32>
    %351 = vector.shape_cast %350 : vector<32xf32> to vector<32x1xf32>
    %cst_41 = arith.constant 3.200000e+01 : f32
    %352 = vector.broadcast %cst_41 : f32 to vector<32x1xf32>
    %353 = arith.divf %351, %352 : vector<32x1xf32>
    %354 = vector.broadcast %346 : vector<32x1xf32> to vector<32x32xf32>
    %355 = arith.subf %338, %354 : vector<32x32xf32>
    %cst_42 = arith.constant 9.99999997E-7 : f32
    %356 = vector.broadcast %cst_42 : f32 to vector<32x1xf32>
    %357 = arith.addf %353, %356 : vector<32x1xf32>
    %358 = math.rsqrt %357 : vector<32x1xf32>
    %359 = vector.broadcast %358 : vector<32x1xf32> to vector<32x32xf32>
    %360 = arith.mulf %355, %359 : vector<32x32xf32>
    %361 = vector.broadcast %340 : vector<1x32xf32> to vector<32x32xf32>
    %362 = arith.mulf %360, %361 : vector<32x32xf32>
    %363 = vector.broadcast %342 : vector<1x32xf32> to vector<32x32xf32>
    %364 = arith.addf %362, %363 : vector<32x32xf32>
    %c0_43 = arith.constant 0 : index
    %c0_44 = arith.constant 0 : index
    %c0_45 = arith.constant 0 : index
    %365 = vector.load %arg9[%c0_43, %c0_44, %c0_45] : memref<2x32x128xf32, #tpu.memory_space<vmem>>, vector<1x32x128xf32>
    %366 = vector.shape_cast %365 : vector<1x32x128xf32> to vector<32x128xf32>
    %cst_46 = arith.constant dense<0.000000e+00> : vector<32x128xf32>
    %367 = tpu.matmul %364, %366, %cst_46 {dimension_numbers = #tpu.dot_dimension_numbers<[1], [0], [0], [1], [0, 0, 1, 1], [], []>} : vector<32x32xf32>, vector<32x128xf32>, vector<32x128xf32> -> vector<32x128xf32>
    %c0_47 = arith.constant 0 : index
    %c0_48 = arith.constant 0 : index
    %c0_49 = arith.constant 0 : index
    %368 = vector.load %arg10[%c0_47, %c0_48, %c0_49] : memref<2x1x128xf32, #tpu.memory_space<vmem>>, vector<1x1x128xf32>
    %369 = vector.shape_cast %368 : vector<1x1x128xf32> to vector<1x128xf32>
    %370 = vector.broadcast %369 : vector<1x128xf32> to vector<32x128xf32>
    %371 = arith.addf %367, %370 : vector<32x128xf32>
    %372 = arith.mulf %371, %371 : vector<32x128xf32>
    %373 = arith.mulf %371, %372 : vector<32x128xf32>
    %cst_50 = arith.constant 4.471500e-02 : f32
    %374 = vector.broadcast %cst_50 : f32 to vector<32x128xf32>
    %375 = arith.mulf %374, %373 : vector<32x128xf32>
    %376 = arith.addf %371, %375 : vector<32x128xf32>
    %cst_51 = arith.constant 0.797884583 : f32
    %377 = vector.broadcast %cst_51 : f32 to vector<32x128xf32>
    %378 = arith.mulf %377, %376 : vector<32x128xf32>
    %379 = math.tanh %378 : vector<32x128xf32>
    %cst_52 = arith.constant 1.000000e+00 : f32
    %380 = vector.broadcast %cst_52 : f32 to vector<32x128xf32>
    %381 = arith.addf %380, %379 : vector<32x128xf32>
    %cst_53 = arith.constant 5.000000e-01 : f32
    %382 = vector.broadcast %cst_53 : f32 to vector<32x128xf32>
    %383 = arith.mulf %382, %381 : vector<32x128xf32>
    %384 = arith.mulf %371, %383 : vector<32x128xf32>
    %385 = vector.shape_cast %384 : vector<32x128xf32> to vector<2x16x128xf32>
    %386 = arith.mulf %385, %385 : vector<2x16x128xf32>
    %cst_54 = arith.constant dense<0.000000e+00> : vector<2x128xf32>
    %387 = vector.multi_reduction <add>, %386, %cst_54 [1] : vector<2x16x128xf32> to vector<2x128xf32>
    %388 = vector.shape_cast %387 : vector<2x128xf32> to vector<2x1x128xf32>
    %389 = math.sqrt %388 : vector<2x1x128xf32>
    %cst_55 = arith.constant dense<0.000000e+00> : vector<2x1xf32>
    %390 = vector.multi_reduction <add>, %389, %cst_55 [2] : vector<2x1x128xf32> to vector<2x1xf32>
    %391 = vector.shape_cast %390 : vector<2x1xf32> to vector<2x1x1xf32>
    %cst_56 = arith.constant 1.280000e+02 : f32
    %392 = vector.broadcast %cst_56 : f32 to vector<2x1x1xf32>
    %393 = arith.divf %391, %392 : vector<2x1x1xf32>
    %cst_57 = arith.constant 9.99999997E-7 : f32
    %394 = vector.broadcast %cst_57 : f32 to vector<2x1x1xf32>
    %395 = arith.addf %393, %394 : vector<2x1x1xf32>
    %396 = vector.broadcast %395 : vector<2x1x1xf32> to vector<2x1x128xf32>
    %397 = arith.divf %389, %396 : vector<2x1x128xf32>
    %c0_58 = arith.constant 0 : index
    %c0_59 = arith.constant 0 : index
    %c0_60 = arith.constant 0 : index
    %398 = vector.load %arg11[%c0_58, %c0_59, %c0_60] : memref<2x1x128xf32, #tpu.memory_space<vmem>>, vector<1x1x128xf32>
    %399 = vector.shape_cast %398 : vector<1x1x128xf32> to vector<1x128xf32>
    %400 = vector.broadcast %397 : vector<2x1x128xf32> to vector<2x16x128xf32>
    %401 = arith.mulf %385, %400 : vector<2x16x128xf32>
    %402 = vector.shape_cast %399 : vector<1x128xf32> to vector<1x1x128xf32>
    %403 = vector.broadcast %402 : vector<1x1x128xf32> to vector<2x16x128xf32>
    %404 = arith.mulf %403, %401 : vector<2x16x128xf32>
    %c0_61 = arith.constant 0 : index
    %c0_62 = arith.constant 0 : index
    %c0_63 = arith.constant 0 : index
    %405 = vector.load %arg12[%c0_61, %c0_62, %c0_63] : memref<2x1x128xf32, #tpu.memory_space<vmem>>, vector<1x1x128xf32>
    %406 = vector.shape_cast %405 : vector<1x1x128xf32> to vector<1x128xf32>
    %407 = vector.shape_cast %406 : vector<1x128xf32> to vector<1x1x128xf32>
    %408 = vector.broadcast %407 : vector<1x1x128xf32> to vector<2x16x128xf32>
    %409 = arith.addf %404, %408 : vector<2x16x128xf32>
    %410 = arith.addf %409, %385 : vector<2x16x128xf32>
    %411 = vector.shape_cast %410 : vector<2x16x128xf32> to vector<32x128xf32>
    %c0_64 = arith.constant 0 : index
    %c0_65 = arith.constant 0 : index
    %c0_66 = arith.constant 0 : index
    %412 = vector.load %arg13[%c0_64, %c0_65, %c0_66] : memref<2x128x32xf32, #tpu.memory_space<vmem>>, vector<1x128x32xf32>
    %413 = vector.shape_cast %412 : vector<1x128x32xf32> to vector<128x32xf32>
    %cst_67 = arith.constant dense<0.000000e+00> : vector<32x32xf32>
    %414 = tpu.matmul %411, %413, %cst_67 {dimension_numbers = #tpu.dot_dimension_numbers<[1], [0], [0], [1], [0, 0, 1, 1], [], []>} : vector<32x128xf32>, vector<128x32xf32>, vector<32x32xf32> -> vector<32x32xf32>
    %c0_68 = arith.constant 0 : index
    %c0_69 = arith.constant 0 : index
    %c0_70 = arith.constant 0 : index
    %415 = vector.load %arg14[%c0_68, %c0_69, %c0_70] : memref<2x1x32xf32, #tpu.memory_space<vmem>>, vector<1x1x32xf32>
    %416 = vector.shape_cast %415 : vector<1x1x32xf32> to vector<1x32xf32>
    %417 = vector.broadcast %416 : vector<1x32xf32> to vector<32x32xf32>
    %418 = arith.addf %414, %417 : vector<32x32xf32>
    %419 = vector.shape_cast %418 : vector<32x32xf32> to vector<2x4x4x32xf32>
    %420 = arith.addf %35, %419 : vector<2x4x4x32xf32>
    %c0_71 = arith.constant 0 : index
    %c3_72 = arith.constant 3 : index
    %c8_73 = arith.constant 8 : index
    %c0_74 = arith.constant 0 : index
    %421 = vector.load %arg18[%c0_71, %c3_72, %c8_73, %c0_74] : memref<2x10x15x32xf32, #tpu.memory_space<vmem>>, vector<2x4x4x32xf32>
    tpu.vector_store %arg18[%c0_71, %c3_72, %c8_73, %c0_74], %420 {strides = array<i32>} : memref<2x10x15x32xf32, #tpu.memory_space<vmem>>, vector<2x4x4x32xf32>,
    %c0_75 = arith.constant 0 : index
    %c0_76 = arith.constant 0 : index
    %c0_77 = arith.constant 0 : index
    %c0_78 = arith.constant 0 : index
    %422 = vector.load %arg18[%c0_75, %c0_76, %c0_77, %c0_78] : memref<2x10x15x32xf32, #tpu.memory_space<vmem>>, vector<2x10x15x32xf32>
    %423 = vector.extract_strided_slice %422 {offsets = [0, 3, 8, 0], sizes = [2, 4, 4, 32], strides = [1, 1, 1, 1]} : vector<2x10x15x32xf32> to vector<2x4x4x32xf32>
    %c1 = arith.constant 1 : index
    %c0_79 = arith.constant 0 : index
    %c0_80 = arith.constant 0 : index
    %424 = vector.load %arg5[%c1, %c0_79, %c0_80] : memref<2x49x32xf32, #tpu.memory_space<vmem>>, vector<1x49x32xf32>
    %425 = vector.shape_cast %424 : vector<1x49x32xf32> to vector<49x32xf32>
    %cst_81 = arith.constant 0.000000e+00 : f32
    %426 = vector.broadcast %cst_81 : f32 to vector<2x4x4x32xf32>
    %427 = vector.extract_strided_slice %425 {offsets = [0, 0], sizes = [1, 32], strides = [1, 1]} : vector<49x32xf32> to vector<1x32xf32>
    %428 = vector.extract_strided_slice %422 {offsets = [0, 0, 5, 0], sizes = [2, 4, 4, 32], strides = [1, 1, 1, 1]} : vector<2x10x15x32xf32> to vector<2x4x4x32xf32>
    %429 = vector.shape_cast %427 : vector<1x32xf32> to vector<1x1x1x32xf32>
    %430 = vector.broadcast %429 : vector<1x1x1x32xf32> to vector<2x4x4x32xf32>
    %431 = arith.mulf %428, %430 : vector<2x4x4x32xf32>
    %432 = arith.addf %426, %431 : vector<2x4x4x32xf32>
    %433 = vector.extract_strided_slice %425 {offsets = [1, 0], sizes = [1, 32], strides = [1, 1]} : vector<49x32xf32> to vector<1x32xf32>
    %434 = vector.extract_strided_slice %422 {offsets = [0, 0, 6, 0], sizes = [2, 4, 4, 32], strides = [1, 1, 1, 1]} : vector<2x10x15x32xf32> to vector<2x4x4x32xf32>
    %435 = vector.shape_cast %433 : vector<1x32xf32> to vector<1x1x1x32xf32>
    %436 = vector.broadcast %435 : vector<1x1x1x32xf32> to vector<2x4x4x32xf32>
    %437 = arith.mulf %434, %436 : vector<2x4x4x32xf32>
    %438 = arith.addf %432, %437 : vector<2x4x4x32xf32>
    %439 = vector.extract_strided_slice %425 {offsets = [2, 0], sizes = [1, 32], strides = [1, 1]} : vector<49x32xf32> to vector<1x32xf32>
    %440 = vector.extract_strided_slice %422 {offsets = [0, 0, 7, 0], sizes = [2, 4, 4, 32], strides = [1, 1, 1, 1]} : vector<2x10x15x32xf32> to vector<2x4x4x32xf32>
    %441 = vector.shape_cast %439 : vector<1x32xf32> to vector<1x1x1x32xf32>
    %442 = vector.broadcast %441 : vector<1x1x1x32xf32> to vector<2x4x4x32xf32>
    %443 = arith.mulf %440, %442 : vector<2x4x4x32xf32>
    %444 = arith.addf %438, %443 : vector<2x4x4x32xf32>
    %445 = vector.extract_strided_slice %425 {offsets = [3, 0], sizes = [1, 32], strides = [1, 1]} : vector<49x32xf32> to vector<1x32xf32>
    %446 = vector.extract_strided_slice %422 {offsets = [0, 0, 8, 0], sizes = [2, 4, 4, 32], strides = [1, 1, 1, 1]} : vector<2x10x15x32xf32> to vector<2x4x4x32xf32>
    %447 = vector.shape_cast %445 : vector<1x32xf32> to vector<1x1x1x32xf32>
    %448 = vector.broadcast %447 : vector<1x1x1x32xf32> to vector<2x4x4x32xf32>
    %449 = arith.mulf %446, %448 : vector<2x4x4x32xf32>
    %450 = arith.addf %444, %449 : vector<2x4x4x32xf32>
    %451 = vector.extract_strided_slice %425 {offsets = [4, 0], sizes = [1, 32], strides = [1, 1]} : vector<49x32xf32> to vector<1x32xf32>
    %452 = vector.extract_strided_slice %422 {offsets = [0, 0, 9, 0], sizes = [2, 4, 4, 32], strides = [1, 1, 1, 1]} : vector<2x10x15x32xf32> to vector<2x4x4x32xf32>
    %453 = vector.shape_cast %451 : vector<1x32xf32> to vector<1x1x1x32xf32>
    %454 = vector.broadcast %453 : vector<1x1x1x32xf32> to vector<2x4x4x32xf32>
    %455 = arith.mulf %452, %454 : vector<2x4x4x32xf32>
    %456 = arith.addf %450, %455 : vector<2x4x4x32xf32>
    %457 = vector.extract_strided_slice %425 {offsets = [5, 0], sizes = [1, 32], strides = [1, 1]} : vector<49x32xf32> to vector<1x32xf32>
    %458 = vector.extract_strided_slice %422 {offsets = [0, 0, 10, 0], sizes = [2, 4, 4, 32], strides = [1, 1, 1, 1]} : vector<2x10x15x32xf32> to vector<2x4x4x32xf32>
    %459 = vector.shape_cast %457 : vector<1x32xf32> to vector<1x1x1x32xf32>
    %460 = vector.broadcast %459 : vector<1x1x1x32xf32> to vector<2x4x4x32xf32>
    %461 = arith.mulf %458, %460 : vector<2x4x4x32xf32>
    %462 = arith.addf %456, %461 : vector<2x4x4x32xf32>
    %463 = vector.extract_strided_slice %425 {offsets = [6, 0], sizes = [1, 32], strides = [1, 1]} : vector<49x32xf32> to vector<1x32xf32>
    %464 = vector.extract_strided_slice %422 {offsets = [0, 0, 11, 0], sizes = [2, 4, 4, 32], strides = [1, 1, 1, 1]} : vector<2x10x15x32xf32> to vector<2x4x4x32xf32>
    %465 = vector.shape_cast %463 : vector<1x32xf32> to vector<1x1x1x32xf32>
    %466 = vector.broadcast %465 : vector<1x1x1x32xf32> to vector<2x4x4x32xf32>
    %467 = arith.mulf %464, %466 : vector<2x4x4x32xf32>
    %468 = arith.addf %462, %467 : vector<2x4x4x32xf32>
    %469 = vector.extract_strided_slice %425 {offsets = [7, 0], sizes = [1, 32], strides = [1, 1]} : vector<49x32xf32> to vector<1x32xf32>
    %470 = vector.extract_strided_slice %422 {offsets = [0, 1, 5, 0], sizes = [2, 4, 4, 32], strides = [1, 1, 1, 1]} : vector<2x10x15x32xf32> to vector<2x4x4x32xf32>
    %471 = vector.shape_cast %469 : vector<1x32xf32> to vector<1x1x1x32xf32>
    %472 = vector.broadcast %471 : vector<1x1x1x32xf32> to vector<2x4x4x32xf32>
    %473 = arith.mulf %470, %472 : vector<2x4x4x32xf32>
    %474 = arith.addf %468, %473 : vector<2x4x4x32xf32>
    %475 = vector.extract_strided_slice %425 {offsets = [8, 0], sizes = [1, 32], strides = [1, 1]} : vector<49x32xf32> to vector<1x32xf32>
    %476 = vector.extract_strided_slice %422 {offsets = [0, 1, 6, 0], sizes = [2, 4, 4, 32], strides = [1, 1, 1, 1]} : vector<2x10x15x32xf32> to vector<2x4x4x32xf32>
    %477 = vector.shape_cast %475 : vector<1x32xf32> to vector<1x1x1x32xf32>
    %478 = vector.broadcast %477 : vector<1x1x1x32xf32> to vector<2x4x4x32xf32>
    %479 = arith.mulf %476, %478 : vector<2x4x4x32xf32>
    %480 = arith.addf %474, %479 : vector<2x4x4x32xf32>
    %481 = vector.extract_strided_slice %425 {offsets = [9, 0], sizes = [1, 32], strides = [1, 1]} : vector<49x32xf32> to vector<1x32xf32>
    %482 = vector.extract_strided_slice %422 {offsets = [0, 1, 7, 0], sizes = [2, 4, 4, 32], strides = [1, 1, 1, 1]} : vector<2x10x15x32xf32> to vector<2x4x4x32xf32>
    %483 = vector.shape_cast %481 : vector<1x32xf32> to vector<1x1x1x32xf32>
    %484 = vector.broadcast %483 : vector<1x1x1x32xf32> to vector<2x4x4x32xf32>
    %485 = arith.mulf %482, %484 : vector<2x4x4x32xf32>
    %486 = arith.addf %480, %485 : vector<2x4x4x32xf32>
    %487 = vector.extract_strided_slice %425 {offsets = [10, 0], sizes = [1, 32], strides = [1, 1]} : vector<49x32xf32> to vector<1x32xf32>
    %488 = vector.extract_strided_slice %422 {offsets = [0, 1, 8, 0], sizes = [2, 4, 4, 32], strides = [1, 1, 1, 1]} : vector<2x10x15x32xf32> to vector<2x4x4x32xf32>
    %489 = vector.shape_cast %487 : vector<1x32xf32> to vector<1x1x1x32xf32>
    %490 = vector.broadcast %489 : vector<1x1x1x32xf32> to vector<2x4x4x32xf32>
    %491 = arith.mulf %488, %490 : vector<2x4x4x32xf32>
    %492 = arith.addf %486, %491 : vector<2x4x4x32xf32>
    %493 = vector.extract_strided_slice %425 {offsets = [11, 0], sizes = [1, 32], strides = [1, 1]} : vector<49x32xf32> to vector<1x32xf32>
    %494 = vector.extract_strided_slice %422 {offsets = [0, 1, 9, 0], sizes = [2, 4, 4, 32], strides = [1, 1, 1, 1]} : vector<2x10x15x32xf32> to vector<2x4x4x32xf32>
    %495 = vector.shape_cast %493 : vector<1x32xf32> to vector<1x1x1x32xf32>
    %496 = vector.broadcast %495 : vector<1x1x1x32xf32> to vector<2x4x4x32xf32>
    %497 = arith.mulf %494, %496 : vector<2x4x4x32xf32>
    %498 = arith.addf %492, %497 : vector<2x4x4x32xf32>
    %499 = vector.extract_strided_slice %425 {offsets = [12, 0], sizes = [1, 32], strides = [1, 1]} : vector<49x32xf32> to vector<1x32xf32>
    %500 = vector.extract_strided_slice %422 {offsets = [0, 1, 10, 0], sizes = [2, 4, 4, 32], strides = [1, 1, 1, 1]} : vector<2x10x15x32xf32> to vector<2x4x4x32xf32>
    %501 = vector.shape_cast %499 : vector<1x32xf32> to vector<1x1x1x32xf32>
    %502 = vector.broadcast %501 : vector<1x1x1x32xf32> to vector<2x4x4x32xf32>
    %503 = arith.mulf %500, %502 : vector<2x4x4x32xf32>
    %504 = arith.addf %498, %503 : vector<2x4x4x32xf32>
    %505 = vector.extract_strided_slice %425 {offsets = [13, 0], sizes = [1, 32], strides = [1, 1]} : vector<49x32xf32> to vector<1x32xf32>
    %506 = vector.extract_strided_slice %422 {offsets = [0, 1, 11, 0], sizes = [2, 4, 4, 32], strides = [1, 1, 1, 1]} : vector<2x10x15x32xf32> to vector<2x4x4x32xf32>
    %507 = vector.shape_cast %505 : vector<1x32xf32> to vector<1x1x1x32xf32>
    %508 = vector.broadcast %507 : vector<1x1x1x32xf32> to vector<2x4x4x32xf32>
    %509 = arith.mulf %506, %508 : vector<2x4x4x32xf32>
    %510 = arith.addf %504, %509 : vector<2x4x4x32xf32>
    %511 = vector.extract_strided_slice %425 {offsets = [14, 0], sizes = [1, 32], strides = [1, 1]} : vector<49x32xf32> to vector<1x32xf32>
    %512 = vector.extract_strided_slice %422 {offsets = [0, 2, 5, 0], sizes = [2, 4, 4, 32], strides = [1, 1, 1, 1]} : vector<2x10x15x32xf32> to vector<2x4x4x32xf32>
    %513 = vector.shape_cast %511 : vector<1x32xf32> to vector<1x1x1x32xf32>
    %514 = vector.broadcast %513 : vector<1x1x1x32xf32> to vector<2x4x4x32xf32>
    %515 = arith.mulf %512, %514 : vector<2x4x4x32xf32>
    %516 = arith.addf %510, %515 : vector<2x4x4x32xf32>
    %517 = vector.extract_strided_slice %425 {offsets = [15, 0], sizes = [1, 32], strides = [1, 1]} : vector<49x32xf32> to vector<1x32xf32>
    %518 = vector.extract_strided_slice %422 {offsets = [0, 2, 6, 0], sizes = [2, 4, 4, 32], strides = [1, 1, 1, 1]} : vector<2x10x15x32xf32> to vector<2x4x4x32xf32>
    %519 = vector.shape_cast %517 : vector<1x32xf32> to vector<1x1x1x32xf32>
    %520 = vector.broadcast %519 : vector<1x1x1x32xf32> to vector<2x4x4x32xf32>
    %521 = arith.mulf %518, %520 : vector<2x4x4x32xf32>
    %522 = arith.addf %516, %521 : vector<2x4x4x32xf32>
    %523 = vector.extract_strided_slice %425 {offsets = [16, 0], sizes = [1, 32], strides = [1, 1]} : vector<49x32xf32> to vector<1x32xf32>
    %524 = vector.extract_strided_slice %422 {offsets = [0, 2, 7, 0], sizes = [2, 4, 4, 32], strides = [1, 1, 1, 1]} : vector<2x10x15x32xf32> to vector<2x4x4x32xf32>
    %525 = vector.shape_cast %523 : vector<1x32xf32> to vector<1x1x1x32xf32>
    %526 = vector.broadcast %525 : vector<1x1x1x32xf32> to vector<2x4x4x32xf32>
    %527 = arith.mulf %524, %526 : vector<2x4x4x32xf32>
    %528 = arith.addf %522, %527 : vector<2x4x4x32xf32>
    %529 = vector.extract_strided_slice %425 {offsets = [17, 0], sizes = [1, 32], strides = [1, 1]} : vector<49x32xf32> to vector<1x32xf32>
    %530 = vector.extract_strided_slice %422 {offsets = [0, 2, 8, 0], sizes = [2, 4, 4, 32], strides = [1, 1, 1, 1]} : vector<2x10x15x32xf32> to vector<2x4x4x32xf32>
    %531 = vector.shape_cast %529 : vector<1x32xf32> to vector<1x1x1x32xf32>
    %532 = vector.broadcast %531 : vector<1x1x1x32xf32> to vector<2x4x4x32xf32>
    %533 = arith.mulf %530, %532 : vector<2x4x4x32xf32>
    %534 = arith.addf %528, %533 : vector<2x4x4x32xf32>
    %535 = vector.extract_strided_slice %425 {offsets = [18, 0], sizes = [1, 32], strides = [1, 1]} : vector<49x32xf32> to vector<1x32xf32>
    %536 = vector.extract_strided_slice %422 {offsets = [0, 2, 9, 0], sizes = [2, 4, 4, 32], strides = [1, 1, 1, 1]} : vector<2x10x15x32xf32> to vector<2x4x4x32xf32>
    %537 = vector.shape_cast %535 : vector<1x32xf32> to vector<1x1x1x32xf32>
    %538 = vector.broadcast %537 : vector<1x1x1x32xf32> to vector<2x4x4x32xf32>
    %539 = arith.mulf %536, %538 : vector<2x4x4x32xf32>
    %540 = arith.addf %534, %539 : vector<2x4x4x32xf32>
    %541 = vector.extract_strided_slice %425 {offsets = [19, 0], sizes = [1, 32], strides = [1, 1]} : vector<49x32xf32> to vector<1x32xf32>
    %542 = vector.extract_strided_slice %422 {offsets = [0, 2, 10, 0], sizes = [2, 4, 4, 32], strides = [1, 1, 1, 1]} : vector<2x10x15x32xf32> to vector<2x4x4x32xf32>
    %543 = vector.shape_cast %541 : vector<1x32xf32> to vector<1x1x1x32xf32>
    %544 = vector.broadcast %543 : vector<1x1x1x32xf32> to vector<2x4x4x32xf32>
    %545 = arith.mulf %542, %544 : vector<2x4x4x32xf32>
    %546 = arith.addf %540, %545 : vector<2x4x4x32xf32>
    %547 = vector.extract_strided_slice %425 {offsets = [20, 0], sizes = [1, 32], strides = [1, 1]} : vector<49x32xf32> to vector<1x32xf32>
    %548 = vector.extract_strided_slice %422 {offsets = [0, 2, 11, 0], sizes = [2, 4, 4, 32], strides = [1, 1, 1, 1]} : vector<2x10x15x32xf32> to vector<2x4x4x32xf32>
    %549 = vector.shape_cast %547 : vector<1x32xf32> to vector<1x1x1x32xf32>
    %550 = vector.broadcast %549 : vector<1x1x1x32xf32> to vector<2x4x4x32xf32>
    %551 = arith.mulf %548, %550 : vector<2x4x4x32xf32>
    %552 = arith.addf %546, %551 : vector<2x4x4x32xf32>
    %553 = vector.extract_strided_slice %425 {offsets = [21, 0], sizes = [1, 32], strides = [1, 1]} : vector<49x32xf32> to vector<1x32xf32>
    %554 = vector.extract_strided_slice %422 {offsets = [0, 3, 5, 0], sizes = [2, 4, 4, 32], strides = [1, 1, 1, 1]} : vector<2x10x15x32xf32> to vector<2x4x4x32xf32>
    %555 = vector.shape_cast %553 : vector<1x32xf32> to vector<1x1x1x32xf32>
    %556 = vector.broadcast %555 : vector<1x1x1x32xf32> to vector<2x4x4x32xf32>
    %557 = arith.mulf %554, %556 : vector<2x4x4x32xf32>
    %558 = arith.addf %552, %557 : vector<2x4x4x32xf32>
    %559 = vector.extract_strided_slice %425 {offsets = [22, 0], sizes = [1, 32], strides = [1, 1]} : vector<49x32xf32> to vector<1x32xf32>
    %560 = vector.extract_strided_slice %422 {offsets = [0, 3, 6, 0], sizes = [2, 4, 4, 32], strides = [1, 1, 1, 1]} : vector<2x10x15x32xf32> to vector<2x4x4x32xf32>
    %561 = vector.shape_cast %559 : vector<1x32xf32> to vector<1x1x1x32xf32>
    %562 = vector.broadcast %561 : vector<1x1x1x32xf32> to vector<2x4x4x32xf32>
    %563 = arith.mulf %560, %562 : vector<2x4x4x32xf32>
    %564 = arith.addf %558, %563 : vector<2x4x4x32xf32>
    %565 = vector.extract_strided_slice %425 {offsets = [23, 0], sizes = [1, 32], strides = [1, 1]} : vector<49x32xf32> to vector<1x32xf32>
    %566 = vector.extract_strided_slice %422 {offsets = [0, 3, 7, 0], sizes = [2, 4, 4, 32], strides = [1, 1, 1, 1]} : vector<2x10x15x32xf32> to vector<2x4x4x32xf32>
    %567 = vector.shape_cast %565 : vector<1x32xf32> to vector<1x1x1x32xf32>
    %568 = vector.broadcast %567 : vector<1x1x1x32xf32> to vector<2x4x4x32xf32>
    %569 = arith.mulf %566, %568 : vector<2x4x4x32xf32>
    %570 = arith.addf %564, %569 : vector<2x4x4x32xf32>
    %571 = vector.extract_strided_slice %425 {offsets = [24, 0], sizes = [1, 32], strides = [1, 1]} : vector<49x32xf32> to vector<1x32xf32>
    %572 = vector.extract_strided_slice %422 {offsets = [0, 3, 8, 0], sizes = [2, 4, 4, 32], strides = [1, 1, 1, 1]} : vector<2x10x15x32xf32> to vector<2x4x4x32xf32>
    %573 = vector.shape_cast %571 : vector<1x32xf32> to vector<1x1x1x32xf32>
    %574 = vector.broadcast %573 : vector<1x1x1x32xf32> to vector<2x4x4x32xf32>
    %575 = arith.mulf %572, %574 : vector<2x4x4x32xf32>
    %576 = arith.addf %570, %575 : vector<2x4x4x32xf32>
    %577 = vector.extract_strided_slice %425 {offsets = [25, 0], sizes = [1, 32], strides = [1, 1]} : vector<49x32xf32> to vector<1x32xf32>
    %578 = vector.extract_strided_slice %422 {offsets = [0, 3, 9, 0], sizes = [2, 4, 4, 32], strides = [1, 1, 1, 1]} : vector<2x10x15x32xf32> to vector<2x4x4x32xf32>
    %579 = vector.shape_cast %577 : vector<1x32xf32> to vector<1x1x1x32xf32>
    %580 = vector.broadcast %579 : vector<1x1x1x32xf32> to vector<2x4x4x32xf32>
    %581 = arith.mulf %578, %580 : vector<2x4x4x32xf32>
    %582 = arith.addf %576, %581 : vector<2x4x4x32xf32>
    %583 = vector.extract_strided_slice %425 {offsets = [26, 0], sizes = [1, 32], strides = [1, 1]} : vector<49x32xf32> to vector<1x32xf32>
    %584 = vector.extract_strided_slice %422 {offsets = [0, 3, 10, 0], sizes = [2, 4, 4, 32], strides = [1, 1, 1, 1]} : vector<2x10x15x32xf32> to vector<2x4x4x32xf32>
    %585 = vector.shape_cast %583 : vector<1x32xf32> to vector<1x1x1x32xf32>
    %586 = vector.broadcast %585 : vector<1x1x1x32xf32> to vector<2x4x4x32xf32>
    %587 = arith.mulf %584, %586 : vector<2x4x4x32xf32>
    %588 = arith.addf %582, %587 : vector<2x4x4x32xf32>
    %589 = vector.extract_strided_slice %425 {offsets = [27, 0], sizes = [1, 32], strides = [1, 1]} : vector<49x32xf32> to vector<1x32xf32>
    %590 = vector.extract_strided_slice %422 {offsets = [0, 3, 11, 0], sizes = [2, 4, 4, 32], strides = [1, 1, 1, 1]} : vector<2x10x15x32xf32> to vector<2x4x4x32xf32>
    %591 = vector.shape_cast %589 : vector<1x32xf32> to vector<1x1x1x32xf32>
    %592 = vector.broadcast %591 : vector<1x1x1x32xf32> to vector<2x4x4x32xf32>
    %593 = arith.mulf %590, %592 : vector<2x4x4x32xf32>
    %594 = arith.addf %588, %593 : vector<2x4x4x32xf32>
    %595 = vector.extract_strided_slice %425 {offsets = [28, 0], sizes = [1, 32], strides = [1, 1]} : vector<49x32xf32> to vector<1x32xf32>
    %596 = vector.extract_strided_slice %422 {offsets = [0, 4, 5, 0], sizes = [2, 4, 4, 32], strides = [1, 1, 1, 1]} : vector<2x10x15x32xf32> to vector<2x4x4x32xf32>
    %597 = vector.shape_cast %595 : vector<1x32xf32> to vector<1x1x1x32xf32>
    %598 = vector.broadcast %597 : vector<1x1x1x32xf32> to vector<2x4x4x32xf32>
    %599 = arith.mulf %596, %598 : vector<2x4x4x32xf32>
    %600 = arith.addf %594, %599 : vector<2x4x4x32xf32>
    %601 = vector.extract_strided_slice %425 {offsets = [29, 0], sizes = [1, 32], strides = [1, 1]} : vector<49x32xf32> to vector<1x32xf32>
    %602 = vector.extract_strided_slice %422 {offsets = [0, 4, 6, 0], sizes = [2, 4, 4, 32], strides = [1, 1, 1, 1]} : vector<2x10x15x32xf32> to vector<2x4x4x32xf32>
    %603 = vector.shape_cast %601 : vector<1x32xf32> to vector<1x1x1x32xf32>
    %604 = vector.broadcast %603 : vector<1x1x1x32xf32> to vector<2x4x4x32xf32>
    %605 = arith.mulf %602, %604 : vector<2x4x4x32xf32>
    %606 = arith.addf %600, %605 : vector<2x4x4x32xf32>
    %607 = vector.extract_strided_slice %425 {offsets = [30, 0], sizes = [1, 32], strides = [1, 1]} : vector<49x32xf32> to vector<1x32xf32>
    %608 = vector.extract_strided_slice %422 {offsets = [0, 4, 7, 0], sizes = [2, 4, 4, 32], strides = [1, 1, 1, 1]} : vector<2x10x15x32xf32> to vector<2x4x4x32xf32>
    %609 = vector.shape_cast %607 : vector<1x32xf32> to vector<1x1x1x32xf32>
    %610 = vector.broadcast %609 : vector<1x1x1x32xf32> to vector<2x4x4x32xf32>
    %611 = arith.mulf %608, %610 : vector<2x4x4x32xf32>
    %612 = arith.addf %606, %611 : vector<2x4x4x32xf32>
    %613 = vector.extract_strided_slice %425 {offsets = [31, 0], sizes = [1, 32], strides = [1, 1]} : vector<49x32xf32> to vector<1x32xf32>
    %614 = vector.extract_strided_slice %422 {offsets = [0, 4, 8, 0], sizes = [2, 4, 4, 32], strides = [1, 1, 1, 1]} : vector<2x10x15x32xf32> to vector<2x4x4x32xf32>
    %615 = vector.shape_cast %613 : vector<1x32xf32> to vector<1x1x1x32xf32>
    %616 = vector.broadcast %615 : vector<1x1x1x32xf32> to vector<2x4x4x32xf32>
    %617 = arith.mulf %614, %616 : vector<2x4x4x32xf32>
    %618 = arith.addf %612, %617 : vector<2x4x4x32xf32>
    %619 = vector.extract_strided_slice %425 {offsets = [32, 0], sizes = [1, 32], strides = [1, 1]} : vector<49x32xf32> to vector<1x32xf32>
    %620 = vector.extract_strided_slice %422 {offsets = [0, 4, 9, 0], sizes = [2, 4, 4, 32], strides = [1, 1, 1, 1]} : vector<2x10x15x32xf32> to vector<2x4x4x32xf32>
    %621 = vector.shape_cast %619 : vector<1x32xf32> to vector<1x1x1x32xf32>
    %622 = vector.broadcast %621 : vector<1x1x1x32xf32> to vector<2x4x4x32xf32>
    %623 = arith.mulf %620, %622 : vector<2x4x4x32xf32>
    %624 = arith.addf %618, %623 : vector<2x4x4x32xf32>
    %625 = vector.extract_strided_slice %425 {offsets = [33, 0], sizes = [1, 32], strides = [1, 1]} : vector<49x32xf32> to vector<1x32xf32>
    %626 = vector.extract_strided_slice %422 {offsets = [0, 4, 10, 0], sizes = [2, 4, 4, 32], strides = [1, 1, 1, 1]} : vector<2x10x15x32xf32> to vector<2x4x4x32xf32>
    %627 = vector.shape_cast %625 : vector<1x32xf32> to vector<1x1x1x32xf32>
    %628 = vector.broadcast %627 : vector<1x1x1x32xf32> to vector<2x4x4x32xf32>
    %629 = arith.mulf %626, %628 : vector<2x4x4x32xf32>
    %630 = arith.addf %624, %629 : vector<2x4x4x32xf32>
    %631 = vector.extract_strided_slice %425 {offsets = [34, 0], sizes = [1, 32], strides = [1, 1]} : vector<49x32xf32> to vector<1x32xf32>
    %632 = vector.extract_strided_slice %422 {offsets = [0, 4, 11, 0], sizes = [2, 4, 4, 32], strides = [1, 1, 1, 1]} : vector<2x10x15x32xf32> to vector<2x4x4x32xf32>
    %633 = vector.shape_cast %631 : vector<1x32xf32> to vector<1x1x1x32xf32>
    %634 = vector.broadcast %633 : vector<1x1x1x32xf32> to vector<2x4x4x32xf32>
    %635 = arith.mulf %632, %634 : vector<2x4x4x32xf32>
    %636 = arith.addf %630, %635 : vector<2x4x4x32xf32>
    %637 = vector.extract_strided_slice %425 {offsets = [35, 0], sizes = [1, 32], strides = [1, 1]} : vector<49x32xf32> to vector<1x32xf32>
    %638 = vector.extract_strided_slice %422 {offsets = [0, 5, 5, 0], sizes = [2, 4, 4, 32], strides = [1, 1, 1, 1]} : vector<2x10x15x32xf32> to vector<2x4x4x32xf32>
    %639 = vector.shape_cast %637 : vector<1x32xf32> to vector<1x1x1x32xf32>
    %640 = vector.broadcast %639 : vector<1x1x1x32xf32> to vector<2x4x4x32xf32>
    %641 = arith.mulf %638, %640 : vector<2x4x4x32xf32>
    %642 = arith.addf %636, %641 : vector<2x4x4x32xf32>
    %643 = vector.extract_strided_slice %425 {offsets = [36, 0], sizes = [1, 32], strides = [1, 1]} : vector<49x32xf32> to vector<1x32xf32>
    %644 = vector.extract_strided_slice %422 {offsets = [0, 5, 6, 0], sizes = [2, 4, 4, 32], strides = [1, 1, 1, 1]} : vector<2x10x15x32xf32> to vector<2x4x4x32xf32>
    %645 = vector.shape_cast %643 : vector<1x32xf32> to vector<1x1x1x32xf32>
    %646 = vector.broadcast %645 : vector<1x1x1x32xf32> to vector<2x4x4x32xf32>
    %647 = arith.mulf %644, %646 : vector<2x4x4x32xf32>
    %648 = arith.addf %642, %647 : vector<2x4x4x32xf32>
    %649 = vector.extract_strided_slice %425 {offsets = [37, 0], sizes = [1, 32], strides = [1, 1]} : vector<49x32xf32> to vector<1x32xf32>
    %650 = vector.extract_strided_slice %422 {offsets = [0, 5, 7, 0], sizes = [2, 4, 4, 32], strides = [1, 1, 1, 1]} : vector<2x10x15x32xf32> to vector<2x4x4x32xf32>
    %651 = vector.shape_cast %649 : vector<1x32xf32> to vector<1x1x1x32xf32>
    %652 = vector.broadcast %651 : vector<1x1x1x32xf32> to vector<2x4x4x32xf32>
    %653 = arith.mulf %650, %652 : vector<2x4x4x32xf32>
    %654 = arith.addf %648, %653 : vector<2x4x4x32xf32>
    %655 = vector.extract_strided_slice %425 {offsets = [38, 0], sizes = [1, 32], strides = [1, 1]} : vector<49x32xf32> to vector<1x32xf32>
    %656 = vector.extract_strided_slice %422 {offsets = [0, 5, 8, 0], sizes = [2, 4, 4, 32], strides = [1, 1, 1, 1]} : vector<2x10x15x32xf32> to vector<2x4x4x32xf32>
    %657 = vector.shape_cast %655 : vector<1x32xf32> to vector<1x1x1x32xf32>
    %658 = vector.broadcast %657 : vector<1x1x1x32xf32> to vector<2x4x4x32xf32>
    %659 = arith.mulf %656, %658 : vector<2x4x4x32xf32>
    %660 = arith.addf %654, %659 : vector<2x4x4x32xf32>
    %661 = vector.extract_strided_slice %425 {offsets = [39, 0], sizes = [1, 32], strides = [1, 1]} : vector<49x32xf32> to vector<1x32xf32>
    %662 = vector.extract_strided_slice %422 {offsets = [0, 5, 9, 0], sizes = [2, 4, 4, 32], strides = [1, 1, 1, 1]} : vector<2x10x15x32xf32> to vector<2x4x4x32xf32>
    %663 = vector.shape_cast %661 : vector<1x32xf32> to vector<1x1x1x32xf32>
    %664 = vector.broadcast %663 : vector<1x1x1x32xf32> to vector<2x4x4x32xf32>
    %665 = arith.mulf %662, %664 : vector<2x4x4x32xf32>
    %666 = arith.addf %660, %665 : vector<2x4x4x32xf32>
    %667 = vector.extract_strided_slice %425 {offsets = [40, 0], sizes = [1, 32], strides = [1, 1]} : vector<49x32xf32> to vector<1x32xf32>
    %668 = vector.extract_strided_slice %422 {offsets = [0, 5, 10, 0], sizes = [2, 4, 4, 32], strides = [1, 1, 1, 1]} : vector<2x10x15x32xf32> to vector<2x4x4x32xf32>
    %669 = vector.shape_cast %667 : vector<1x32xf32> to vector<1x1x1x32xf32>
    %670 = vector.broadcast %669 : vector<1x1x1x32xf32> to vector<2x4x4x32xf32>
    %671 = arith.mulf %668, %670 : vector<2x4x4x32xf32>
    %672 = arith.addf %666, %671 : vector<2x4x4x32xf32>
    %673 = vector.extract_strided_slice %425 {offsets = [41, 0], sizes = [1, 32], strides = [1, 1]} : vector<49x32xf32> to vector<1x32xf32>
    %674 = vector.extract_strided_slice %422 {offsets = [0, 5, 11, 0], sizes = [2, 4, 4, 32], strides = [1, 1, 1, 1]} : vector<2x10x15x32xf32> to vector<2x4x4x32xf32>
    %675 = vector.shape_cast %673 : vector<1x32xf32> to vector<1x1x1x32xf32>
    %676 = vector.broadcast %675 : vector<1x1x1x32xf32> to vector<2x4x4x32xf32>
    %677 = arith.mulf %674, %676 : vector<2x4x4x32xf32>
    %678 = arith.addf %672, %677 : vector<2x4x4x32xf32>
    %679 = vector.extract_strided_slice %425 {offsets = [42, 0], sizes = [1, 32], strides = [1, 1]} : vector<49x32xf32> to vector<1x32xf32>
    %680 = vector.extract_strided_slice %422 {offsets = [0, 6, 5, 0], sizes = [2, 4, 4, 32], strides = [1, 1, 1, 1]} : vector<2x10x15x32xf32> to vector<2x4x4x32xf32>
    %681 = vector.shape_cast %679 : vector<1x32xf32> to vector<1x1x1x32xf32>
    %682 = vector.broadcast %681 : vector<1x1x1x32xf32> to vector<2x4x4x32xf32>
    %683 = arith.mulf %680, %682 : vector<2x4x4x32xf32>
    %684 = arith.addf %678, %683 : vector<2x4x4x32xf32>
    %685 = vector.extract_strided_slice %425 {offsets = [43, 0], sizes = [1, 32], strides = [1, 1]} : vector<49x32xf32> to vector<1x32xf32>
    %686 = vector.extract_strided_slice %422 {offsets = [0, 6, 6, 0], sizes = [2, 4, 4, 32], strides = [1, 1, 1, 1]} : vector<2x10x15x32xf32> to vector<2x4x4x32xf32>
    %687 = vector.shape_cast %685 : vector<1x32xf32> to vector<1x1x1x32xf32>
    %688 = vector.broadcast %687 : vector<1x1x1x32xf32> to vector<2x4x4x32xf32>
    %689 = arith.mulf %686, %688 : vector<2x4x4x32xf32>
    %690 = arith.addf %684, %689 : vector<2x4x4x32xf32>
    %691 = vector.extract_strided_slice %425 {offsets = [44, 0], sizes = [1, 32], strides = [1, 1]} : vector<49x32xf32> to vector<1x32xf32>
    %692 = vector.extract_strided_slice %422 {offsets = [0, 6, 7, 0], sizes = [2, 4, 4, 32], strides = [1, 1, 1, 1]} : vector<2x10x15x32xf32> to vector<2x4x4x32xf32>
    %693 = vector.shape_cast %691 : vector<1x32xf32> to vector<1x1x1x32xf32>
    %694 = vector.broadcast %693 : vector<1x1x1x32xf32> to vector<2x4x4x32xf32>
    %695 = arith.mulf %692, %694 : vector<2x4x4x32xf32>
    %696 = arith.addf %690, %695 : vector<2x4x4x32xf32>
    %697 = vector.extract_strided_slice %425 {offsets = [45, 0], sizes = [1, 32], strides = [1, 1]} : vector<49x32xf32> to vector<1x32xf32>
    %698 = vector.extract_strided_slice %422 {offsets = [0, 6, 8, 0], sizes = [2, 4, 4, 32], strides = [1, 1, 1, 1]} : vector<2x10x15x32xf32> to vector<2x4x4x32xf32>
    %699 = vector.shape_cast %697 : vector<1x32xf32> to vector<1x1x1x32xf32>
    %700 = vector.broadcast %699 : vector<1x1x1x32xf32> to vector<2x4x4x32xf32>
    %701 = arith.mulf %698, %700 : vector<2x4x4x32xf32>
    %702 = arith.addf %696, %701 : vector<2x4x4x32xf32>
    %703 = vector.extract_strided_slice %425 {offsets = [46, 0], sizes = [1, 32], strides = [1, 1]} : vector<49x32xf32> to vector<1x32xf32>
    %704 = vector.extract_strided_slice %422 {offsets = [0, 6, 9, 0], sizes = [2, 4, 4, 32], strides = [1, 1, 1, 1]} : vector<2x10x15x32xf32> to vector<2x4x4x32xf32>
    %705 = vector.shape_cast %703 : vector<1x32xf32> to vector<1x1x1x32xf32>
    %706 = vector.broadcast %705 : vector<1x1x1x32xf32> to vector<2x4x4x32xf32>
    %707 = arith.mulf %704, %706 : vector<2x4x4x32xf32>
    %708 = arith.addf %702, %707 : vector<2x4x4x32xf32>
    %709 = vector.extract_strided_slice %425 {offsets = [47, 0], sizes = [1, 32], strides = [1, 1]} : vector<49x32xf32> to vector<1x32xf32>
    %710 = vector.extract_strided_slice %422 {offsets = [0, 6, 10, 0], sizes = [2, 4, 4, 32], strides = [1, 1, 1, 1]} : vector<2x10x15x32xf32> to vector<2x4x4x32xf32>
    %711 = vector.shape_cast %709 : vector<1x32xf32> to vector<1x1x1x32xf32>
    %712 = vector.broadcast %711 : vector<1x1x1x32xf32> to vector<2x4x4x32xf32>
    %713 = arith.mulf %710, %712 : vector<2x4x4x32xf32>
    %714 = arith.addf %708, %713 : vector<2x4x4x32xf32>
    %715 = vector.extract_strided_slice %425 {offsets = [48, 0], sizes = [1, 32], strides = [1, 1]} : vector<49x32xf32> to vector<1x32xf32>
    %716 = vector.extract_strided_slice %422 {offsets = [0, 6, 11, 0], sizes = [2, 4, 4, 32], strides = [1, 1, 1, 1]} : vector<2x10x15x32xf32> to vector<2x4x4x32xf32>
    %717 = vector.shape_cast %715 : vector<1x32xf32> to vector<1x1x1x32xf32>
    %718 = vector.broadcast %717 : vector<1x1x1x32xf32> to vector<2x4x4x32xf32>
    %719 = arith.mulf %716, %718 : vector<2x4x4x32xf32>
    %720 = arith.addf %714, %719 : vector<2x4x4x32xf32>
    %c1_82 = arith.constant 1 : index
    %c0_83 = arith.constant 0 : index
    %c0_84 = arith.constant 0 : index
    %721 = vector.load %arg6[%c1_82, %c0_83, %c0_84] : memref<2x1x32xf32, #tpu.memory_space<vmem>>, vector<1x1x32xf32>
    %722 = vector.shape_cast %721 : vector<1x1x32xf32> to vector<1x32xf32>
    %723 = vector.shape_cast %722 : vector<1x32xf32> to vector<1x1x1x32xf32>
    %724 = vector.broadcast %723 : vector<1x1x1x32xf32> to vector<2x4x4x32xf32>
    %725 = arith.addf %720, %724 : vector<2x4x4x32xf32>
    %726 = vector.shape_cast %725 : vector<2x4x4x32xf32> to vector<32x32xf32>
    %c1_85 = arith.constant 1 : index
    %c0_86 = arith.constant 0 : index
    %c0_87 = arith.constant 0 : index
    %727 = vector.load %arg7[%c1_85, %c0_86, %c0_87] : memref<2x1x32xf32, #tpu.memory_space<vmem>>, vector<1x1x32xf32>
    %728 = vector.shape_cast %727 : vector<1x1x32xf32> to vector<1x32xf32>
    %c1_88 = arith.constant 1 : index
    %c0_89 = arith.constant 0 : index
    %c0_90 = arith.constant 0 : index
    %729 = vector.load %arg8[%c1_88, %c0_89, %c0_90] : memref<2x1x32xf32, #tpu.memory_space<vmem>>, vector<1x1x32xf32>
    %730 = vector.shape_cast %729 : vector<1x1x32xf32> to vector<1x32xf32>
    %cst_91 = arith.constant dense<0.000000e+00> : vector<32xf32>
    %731 = vector.multi_reduction <add>, %726, %cst_91 [1] : vector<32x32xf32> to vector<32xf32>
    %732 = vector.shape_cast %731 : vector<32xf32> to vector<32x1xf32>
    %cst_92 = arith.constant 3.200000e+01 : f32
    %733 = vector.broadcast %cst_92 : f32 to vector<32x1xf32>
    %734 = arith.divf %732, %733 : vector<32x1xf32>
    %735 = vector.broadcast %734 : vector<32x1xf32> to vector<32x32xf32>
    %736 = arith.subf %726, %735 : vector<32x32xf32>
    %737 = arith.mulf %736, %736 : vector<32x32xf32>
    %cst_93 = arith.constant dense<0.000000e+00> : vector<32xf32>
    %738 = vector.multi_reduction <add>, %737, %cst_93 [1] : vector<32x32xf32> to vector<32xf32>
    %739 = vector.shape_cast %738 : vector<32xf32> to vector<32x1xf32>
    %cst_94 = arith.constant 3.200000e+01 : f32
    %740 = vector.broadcast %cst_94 : f32 to vector<32x1xf32>
    %741 = arith.divf %739, %740 : vector<32x1xf32>
    %742 = vector.broadcast %734 : vector<32x1xf32> to vector<32x32xf32>
    %743 = arith.subf %726, %742 : vector<32x32xf32>
    %cst_95 = arith.constant 9.99999997E-7 : f32
    %744 = vector.broadcast %cst_95 : f32 to vector<32x1xf32>
    %745 = arith.addf %741, %744 : vector<32x1xf32>
    %746 = math.rsqrt %745 : vector<32x1xf32>
    %747 = vector.broadcast %746 : vector<32x1xf32> to vector<32x32xf32>
    %748 = arith.mulf %743, %747 : vector<32x32xf32>
    %749 = vector.broadcast %728 : vector<1x32xf32> to vector<32x32xf32>
    %750 = arith.mulf %748, %749 : vector<32x32xf32>
    %751 = vector.broadcast %730 : vector<1x32xf32> to vector<32x32xf32>
    %752 = arith.addf %750, %751 : vector<32x32xf32>
    %c1_96 = arith.constant 1 : index
    %c0_97 = arith.constant 0 : index
    %c0_98 = arith.constant 0 : index
    %753 = vector.load %arg9[%c1_96, %c0_97, %c0_98] : memref<2x32x128xf32, #tpu.memory_space<vmem>>, vector<1x32x128xf32>
    %754 = vector.shape_cast %753 : vector<1x32x128xf32> to vector<32x128xf32>
    %cst_99 = arith.constant dense<0.000000e+00> : vector<32x128xf32>
    %755 = tpu.matmul %752, %754, %cst_99 {dimension_numbers = #tpu.dot_dimension_numbers<[1], [0], [0], [1], [0, 0, 1, 1], [], []>} : vector<32x32xf32>, vector<32x128xf32>, vector<32x128xf32> -> vector<32x128xf32>
    %c1_100 = arith.constant 1 : index
    %c0_101 = arith.constant 0 : index
    %c0_102 = arith.constant 0 : index
    %756 = vector.load %arg10[%c1_100, %c0_101, %c0_102] : memref<2x1x128xf32, #tpu.memory_space<vmem>>, vector<1x1x128xf32>
    %757 = vector.shape_cast %756 : vector<1x1x128xf32> to vector<1x128xf32>
    %758 = vector.broadcast %757 : vector<1x128xf32> to vector<32x128xf32>
    %759 = arith.addf %755, %758 : vector<32x128xf32>
    %760 = arith.mulf %759, %759 : vector<32x128xf32>
    %761 = arith.mulf %759, %760 : vector<32x128xf32>
    %cst_103 = arith.constant 4.471500e-02 : f32
    %762 = vector.broadcast %cst_103 : f32 to vector<32x128xf32>
    %763 = arith.mulf %762, %761 : vector<32x128xf32>
    %764 = arith.addf %759, %763 : vector<32x128xf32>
    %cst_104 = arith.constant 0.797884583 : f32
    %765 = vector.broadcast %cst_104 : f32 to vector<32x128xf32>
    %766 = arith.mulf %765, %764 : vector<32x128xf32>
    %767 = math.tanh %766 : vector<32x128xf32>
    %cst_105 = arith.constant 1.000000e+00 : f32
    %768 = vector.broadcast %cst_105 : f32 to vector<32x128xf32>
    %769 = arith.addf %768, %767 : vector<32x128xf32>
    %cst_106 = arith.constant 5.000000e-01 : f32
    %770 = vector.broadcast %cst_106 : f32 to vector<32x128xf32>
    %771 = arith.mulf %770, %769 : vector<32x128xf32>
    %772 = arith.mulf %759, %771 : vector<32x128xf32>
    %773 = vector.shape_cast %772 : vector<32x128xf32> to vector<2x16x128xf32>
    %774 = arith.mulf %773, %773 : vector<2x16x128xf32>
    %cst_107 = arith.constant dense<0.000000e+00> : vector<2x128xf32>
    %775 = vector.multi_reduction <add>, %774, %cst_107 [1] : vector<2x16x128xf32> to vector<2x128xf32>
    %776 = vector.shape_cast %775 : vector<2x128xf32> to vector<2x1x128xf32>
    %777 = math.sqrt %776 : vector<2x1x128xf32>
    %cst_108 = arith.constant dense<0.000000e+00> : vector<2x1xf32>
    %778 = vector.multi_reduction <add>, %777, %cst_108 [2] : vector<2x1x128xf32> to vector<2x1xf32>
    %779 = vector.shape_cast %778 : vector<2x1xf32> to vector<2x1x1xf32>
    %cst_109 = arith.constant 1.280000e+02 : f32
    %780 = vector.broadcast %cst_109 : f32 to vector<2x1x1xf32>
    %781 = arith.divf %779, %780 : vector<2x1x1xf32>
    %cst_110 = arith.constant 9.99999997E-7 : f32
    %782 = vector.broadcast %cst_110 : f32 to vector<2x1x1xf32>
    %783 = arith.addf %781, %782 : vector<2x1x1xf32>
    %784 = vector.broadcast %783 : vector<2x1x1xf32> to vector<2x1x128xf32>
    %785 = arith.divf %777, %784 : vector<2x1x128xf32>
    %c1_111 = arith.constant 1 : index
    %c0_112 = arith.constant 0 : index
    %c0_113 = arith.constant 0 : index
    %786 = vector.load %arg11[%c1_111, %c0_112, %c0_113] : memref<2x1x128xf32, #tpu.memory_space<vmem>>, vector<1x1x128xf32>
    %787 = vector.shape_cast %786 : vector<1x1x128xf32> to vector<1x128xf32>
    %788 = vector.broadcast %785 : vector<2x1x128xf32> to vector<2x16x128xf32>
    %789 = arith.mulf %773, %788 : vector<2x16x128xf32>
    %790 = vector.shape_cast %787 : vector<1x128xf32> to vector<1x1x128xf32>
    %791 = vector.broadcast %790 : vector<1x1x128xf32> to vector<2x16x128xf32>
    %792 = arith.mulf %791, %789 : vector<2x16x128xf32>
    %c1_114 = arith.constant 1 : index
    %c0_115 = arith.constant 0 : index
    %c0_116 = arith.constant 0 : index
    %793 = vector.load %arg12[%c1_114, %c0_115, %c0_116] : memref<2x1x128xf32, #tpu.memory_space<vmem>>, vector<1x1x128xf32>
    %794 = vector.shape_cast %793 : vector<1x1x128xf32> to vector<1x128xf32>
    %795 = vector.shape_cast %794 : vector<1x128xf32> to vector<1x1x128xf32>
    %796 = vector.broadcast %795 : vector<1x1x128xf32> to vector<2x16x128xf32>
    %797 = arith.addf %792, %796 : vector<2x16x128xf32>
    %798 = arith.addf %797, %773 : vector<2x16x128xf32>
    %799 = vector.shape_cast %798 : vector<2x16x128xf32> to vector<32x128xf32>
    %c1_117 = arith.constant 1 : index
    %c0_118 = arith.constant 0 : index
    %c0_119 = arith.constant 0 : index
    %800 = vector.load %arg13[%c1_117, %c0_118, %c0_119] : memref<2x128x32xf32, #tpu.memory_space<vmem>>, vector<1x128x32xf32>
    %801 = vector.shape_cast %800 : vector<1x128x32xf32> to vector<128x32xf32>
    %cst_120 = arith.constant dense<0.000000e+00> : vector<32x32xf32>
    %802 = tpu.matmul %799, %801, %cst_120 {dimension_numbers = #tpu.dot_dimension_numbers<[1], [0], [0], [1], [0, 0, 1, 1], [], []>} : vector<32x128xf32>, vector<128x32xf32>, vector<32x32xf32> -> vector<32x32xf32>
    %c1_121 = arith.constant 1 : index
    %c0_122 = arith.constant 0 : index
    %c0_123 = arith.constant 0 : index
    %803 = vector.load %arg14[%c1_121, %c0_122, %c0_123] : memref<2x1x32xf32, #tpu.memory_space<vmem>>, vector<1x1x32xf32>
    %804 = vector.shape_cast %803 : vector<1x1x32xf32> to vector<1x32xf32>
    %805 = vector.broadcast %804 : vector<1x32xf32> to vector<32x32xf32>
    %806 = arith.addf %802, %805 : vector<32x32xf32>
    %807 = vector.shape_cast %806 : vector<32x32xf32> to vector<2x4x4x32xf32>
    %808 = arith.addf %423, %807 : vector<2x4x4x32xf32>
    %c0_124 = arith.constant 0 : index
    %c3_125 = arith.constant 3 : index
    %c8_126 = arith.constant 8 : index
    %c0_127 = arith.constant 0 : index
    %809 = vector.load %arg18[%c0_124, %c3_125, %c8_126, %c0_127] : memref<2x10x15x32xf32, #tpu.memory_space<vmem>>, vector<2x4x4x32xf32>
    tpu.vector_store %arg18[%c0_124, %c3_125, %c8_126, %c0_127], %808 {strides = array<i32>} : memref<2x10x15x32xf32, #tpu.memory_space<vmem>>, vector<2x4x4x32xf32>,
    %c0_128 = arith.constant 0 : index
    %c3_129 = arith.constant 3 : index
    %c8_130 = arith.constant 8 : index
    %c0_131 = arith.constant 0 : index
    %810 = vector.load %arg18[%c0_128, %c3_129, %c8_130, %c0_131] : memref<2x10x15x32xf32, #tpu.memory_space<vmem>>, vector<2x4x4x32xf32>
    %811 = vector.shape_cast %810 : vector<2x4x4x32xf32> to vector<2x16x32xf32>
    %cst_132 = arith.constant dense<0.000000e+00> : vector<2x32xf32>
    %812 = vector.multi_reduction <add>, %811, %cst_132 [1] : vector<2x16x32xf32> to vector<2x32xf32>
    %cst_133 = arith.constant 1.600000e+01 : f32
    %813 = vector.broadcast %cst_133 : f32 to vector<2x32xf32>
    %814 = arith.divf %812, %813 : vector<2x32xf32>
    %c0_134 = arith.constant 0 : index
    %c0_135 = arith.constant 0 : index
    %815 = vector.load %arg15[%c0_134, %c0_135] : memref<1x32xf32, #tpu.memory_space<vmem>>, vector<1x32xf32>
    %c0_136 = arith.constant 0 : index
    %c0_137 = arith.constant 0 : index
    %816 = vector.load %arg16[%c0_136, %c0_137] : memref<1x32xf32, #tpu.memory_space<vmem>>, vector<1x32xf32>
    %cst_138 = arith.constant dense<0.000000e+00> : vector<2xf32>
    %817 = vector.multi_reduction <add>, %814, %cst_138 [1] : vector<2x32xf32> to vector<2xf32>
    %818 = vector.shape_cast %817 : vector<2xf32> to vector<2x1xf32>
    %cst_139 = arith.constant 3.200000e+01 : f32
    %819 = vector.broadcast %cst_139 : f32 to vector<2x1xf32>
    %820 = arith.divf %818, %819 : vector<2x1xf32>
    %821 = vector.broadcast %820 : vector<2x1xf32> to vector<2x32xf32>
    %822 = arith.subf %814, %821 : vector<2x32xf32>
    %823 = arith.mulf %822, %822 : vector<2x32xf32>
    %cst_140 = arith.constant dense<0.000000e+00> : vector<2xf32>
    %824 = vector.multi_reduction <add>, %823, %cst_140 [1] : vector<2x32xf32> to vector<2xf32>
    %825 = vector.shape_cast %824 : vector<2xf32> to vector<2x1xf32>
    %cst_141 = arith.constant 3.200000e+01 : f32
    %826 = vector.broadcast %cst_141 : f32 to vector<2x1xf32>
    %827 = arith.divf %825, %826 : vector<2x1xf32>
    %828 = vector.broadcast %820 : vector<2x1xf32> to vector<2x32xf32>
    %829 = arith.subf %814, %828 : vector<2x32xf32>
    %cst_142 = arith.constant 9.99999997E-7 : f32
    %830 = vector.broadcast %cst_142 : f32 to vector<2x1xf32>
    %831 = arith.addf %827, %830 : vector<2x1xf32>
    %832 = math.rsqrt %831 : vector<2x1xf32>
    %833 = vector.broadcast %832 : vector<2x1xf32> to vector<2x32xf32>
    %834 = arith.mulf %829, %833 : vector<2x32xf32>
    %835 = vector.broadcast %815 : vector<1x32xf32> to vector<2x32xf32>
    %836 = arith.mulf %834, %835 : vector<2x32xf32>
    %837 = vector.broadcast %816 : vector<1x32xf32> to vector<2x32xf32>
    %838 = arith.addf %836, %837 : vector<2x32xf32>
    %c0_143 = arith.constant 0 : index
    %c0_144 = arith.constant 0 : index
    %839 = vector.load %arg17[%c0_143, %c0_144] : memref<2x32xf32, #tpu.memory_space<vmem>>, vector<2x32xf32>
    tpu.vector_store %arg17[%c0_143, %c0_144], %838 {strides = array<i32>} : memref<2x32xf32, #tpu.memory_space<vmem>>, vector<2x32xf32>,
    return
  }
}

</mosaic_0001>

<bundles_post_ra>
// kernel: backbone_forward.1
= control target key start
LH: loop header
LB: loop body
LE: loop exit
PB: predicated region body
PF: predicated region fallthrough
CT: control target
= control target key end

     0   :  { %s12627_s0 = inlined_call_operand.vmem [shape: f32[32,48], index: 0, kind: input, shape index: {}]   ;;  %s12628_s1 = inlined_call_operand.vmem [shape: f32[48,32], index: 1, kind: input, shape index: {}]   ;;  %s12629_s2 = inlined_call_operand.vmem [shape: f32[1,32], index: 2, kind: input, shape index: {}]   ;;  %s12630_s3 = inlined_call_operand.vmem [shape: f32[1,32], index: 3, kind: input, shape index: {}]   ;;  %s12631_s4 = inlined_call_operand.vmem [shape: f32[1,32], index: 4, kind: input, shape index: {}]   ;;  %s12632_s5 = inlined_call_operand.vmem [shape: f32[2,49,32], index: 5, kind: input, shape index: {}]   ;;  %s12633_s6 = inlined_call_operand.vmem [shape: f32[2,1,32], index: 6, kind: input, shape index: {}]   ;;  %s12634_s7 = inlined_call_operand.vmem [shape: f32[2,1,32], index: 7, kind: input, shape index: {}]   ;;  %s12635_s8 = inlined_call_operand.vmem [shape: f32[2,1,32], index: 8, kind: input, shape index: {}]   ;;  %s12636_s9 = inlined_call_operand.vmem [shape: f32[2,32,128], index: 9, kind: input, shape index: {}]   ;;  %s12637_s10 = inlined_call_operand.vmem [shape: f32[2,1,128], index: 10, kind: input, shape index: {}]   ;;  %s12638_s11 = inlined_call_operand.vmem [shape: f32[2,1,128], index: 11, kind: input, shape index: {}]   ;;  %s12639_s12 = inlined_call_operand.vmem [shape: f32[2,1,128], index: 12, kind: input, shape index: {}]   ;;  %s12640_s13 = inlined_call_operand.vmem [shape: f32[2,128,32], index: 13, kind: input, shape index: {}]   ;;  %s12641_s14 = inlined_call_operand.vmem [shape: f32[2,1,32], index: 14, kind: input, shape index: {}]   ;;  %s12642_s15 = inlined_call_operand.vmem [shape: f32[1,32], index: 15, kind: input, shape index: {}]   ;;  %s12643_s16 = inlined_call_operand.vmem [shape: f32[1,32], index: 16, kind: input, shape index: {}]   ;;  %s12644_s17 = inlined_call_operand.hbm [shape: f32[2,32], index: 17, kind: output, shape index: {}]  }
   0x1   :  { %12892 = sst [smem:[#allocation120_spill]] %s12627_s0 }
   0x2   :  { %12893 = sst [smem:[#allocation121_spill]] %s12628_s1 }
   0x3   :  { %s12894_s26 = sld [smem:[#allocation121_spill]]  ;;  %vm74_vm0 = vcmask 392192   ;;  %s12895_s24 = sld [smem:[#allocation120_spill]] }
   0x9   :  { %v61_v0 = vld [vmem:[%s12894_s26] sm:$0xff]  ;;  %v62_v1 = vld [vmem:[%s12894_s26 + $0x8] sm:$0xff]  ;;  %v63_v2 = vld [vmem:[%s12894_s26 + $0x10] sm:$0xff] }
   0xa   :  { %v8216_v3 = vpack.c.bf16 %v62_v1, %v61_v0  ;;  %v64_v4 = vld [vmem:[%s12894_s26 + $0x18] sm:$0xff]  ;;  %v65_v6 = vld [vmem:[%s12894_s26 + $0x20] sm:$0xff]  ;;  %v66_v7 = vld [vmem:[%s12894_s26 + $0x28] sm:$0xff] }
   0xb   :  { %v8220_v5 = vpack.c.bf16 %v64_v4, %v63_v2  ;;  %v57_v8 = vld [vmem:[%s12895_s24] sm:$0xff] }
   0xc   :  { %8217 = vmatprep.subr.bf16.mxu0 %v8216_v3  ;;  %8106 = vmatprep.mubr.msk.f32.mxu0 %vm74_vm0, %v57_v8 }
   0xd   :  { %22 = vsyncpa [#allocation4], 0  ;;  %8219 = vmatpush3.bf16.msra.mxu0 %v8216_v3  ;;  %v8224_v9 = vpack.c.bf16 %v66_v7, %v65_v6  ;;  %v58_v10 = vld [vmem:[%s12895_s24 + $0x8] sm:$0xff]  ;;  %v59_v11 = vld [vmem:[%s12895_s24 + $0x10] sm:$0xff]  ;;  %vm174_vm1 = vcmask 261120   ;;  %vm249_vm2 = vcmask 260096   ;;  %v358_v31 = vlaneseq }
   0xe   :  { %8221 = vmatprep.subr.bf16.mxu0 %v8220_v5  ;;  %v60_v12 = vld [vmem:[%s12895_s24 + $0x18] sm:$0xff]  ;;  %v7945_v13 = vld [vmem:[%s12629_s2] ss:$0 sm:$0xff]  ;;  %v8470_v26 = vmov 0.0   ;;  %vm430_vm3 = vcmask 1046528   ;;  %vm523_vm4 = vcmask 1045504  }
   0xf   :  { %256 = vst.msk [vmem:[#allocation2 + $0x38] sm:$0x7f] %vm249_vm2, %v8470_v26  ;;  %258 = vst.msk [vmem:[#allocation2 + $0x48] sm:$0x7f] %vm249_vm2, %v8470_v26  ;;  %v8652_v37 = vshrl.u32 %v358_v31, 7  ;;  %v8672_v46 = vld [vmem:[%s12632_s5] sm:$0xff] }
  0x10   :  { %248 = vst.msk [vmem:[#allocation2] sm:$0xff] %vm174_vm1, %v8470_v26  ;;  %251 = vst.msk [vmem:[#allocation2 + $0x10] sm:$0xff] %vm174_vm1, %v8470_v26  ;;  %vm302_vm5 = vcmask 257024   ;;  %vm3403_vm6 = vcmask 1042432   ;;  %vm3404_vm7 = vcmask 1046532  }
  0x11   :  { %8223 = vmatpush3.bf16.msra.mxu0 %v8220_v5  ;;  %250 = vst.msk [vmem:[#allocation2 + $0x8] sm:$0x7f] %vm249_vm2, %v8470_v26  ;;  %252 = vst.msk [vmem:[#allocation2 + $0x18] sm:$0x7f] %vm249_vm2, %v8470_v26  ;;  %v8665_v44 = vsub.s32 1, %v8652_v37  ;;  %v8683_v51 = vsub.s32 2, %v8652_v37 }
  0x12   :  { %8225 = vmatprep.subr.bf16.mxu0 %v8224_v9  ;;  %253 = vst.msk [vmem:[#allocation2 + $0x20] sm:$0xff] %vm174_vm1, %v8470_v26  ;;  %255 = vst.msk [vmem:[#allocation2 + $0x30] sm:$0xff] %vm174_vm1, %v8470_v26  ;;  %v8689_v55 = vsub.s32 0, %v8652_v37  ;;  %v8703_v60 = vsub.s32 3, %v8652_v37  ;;  %v8709_v1 = vsub.s32 4, %v8652_v37 }
  0x13   :  { %254 = vst.msk [vmem:[#allocation2 + $0x28] sm:$0x7f] %vm249_vm2, %v8470_v26  ;;  %260 = vst.msk [vmem:[#allocation2 + $0x58] sm:$0x7f] %vm249_vm2, %v8470_v26  ;;  %v8680_v50 = vrot.slane %v8672_v46, %v8665_v44  ;;  %v8696_v58 = vrot.slane %v8672_v46, %v8683_v51 }
  0x14   :  { %257 = vst.msk [vmem:[#allocation2 + $0x40] sm:$0xff] %vm174_vm1, %v8470_v26  ;;  %259 = vst.msk [vmem:[#allocation2 + $0x50] sm:$0xff] %vm174_vm1, %v8470_v26  ;;  %v8700_v59 = vrot.slane %v8672_v46, %v8689_v55  ;;  %v8718_v5 = vrot.slane %v8672_v46, %v8703_v60 }
  0x15   :  { %8227 = vmatpush3.bf16.msra.mxu0 %v8224_v9  ;;  %261 = vst.msk [vmem:[#allocation2 + $0x60] sm:$0xff] %vm174_vm1, %v8470_v26  ;;  %263 = vst.msk [vmem:[#allocation2 + $0x70] sm:$0xff] %vm174_vm1, %v8470_v26 }
  0x16   :  { %262 = vst.msk [vmem:[#allocation2 + $0x68] sm:$0x7f] %vm249_vm2, %v8470_v26  ;;  %264 = vst.msk [vmem:[#allocation2 + $0x78] sm:$0x7f] %vm249_vm2, %v8470_v26 }
  0x17   :  { %265 = vst.msk [vmem:[#allocation2 + $0x80] sm:$0xff] %vm174_vm1, %v8470_v26  ;;  %267 = vst.msk [vmem:[#allocation2 + $0x90] sm:$0xff] %vm174_vm1, %v8470_v26  ;;  %v311_v52 = vld [vmem:[#allocation2] sm:$0xff]  ;;  %v8711_v2 = vld [vmem:[#allocation2 + $0x10] sm:$0xff] }
  0x18   :  { %8107 = vmatmul.mubr.msk.f32.vlgmr.msra.gmra.mrb[0].mxu0 %vm74_vm0, %v58_v10  ;;  %266 = vst.msk [vmem:[#allocation2 + $0x88] sm:$0x7f] %vm249_vm2, %v8470_v26  ;;  %268 = vst.msk [vmem:[#allocation2 + $0x98] sm:$0x7f] %vm249_vm2, %v8470_v26  ;;  %v8685_v53 = vld [vmem:[#allocation2 + $0x8] sm:$0x7f]  ;;  %v398_v56 = vmul.f32 %v8680_v50, %v311_v52  ;;  %v491_v63 = vmul.f32 %v8696_v58, %v311_v52  ;;  %v362_v4 = vmul.f32 %v8700_v59, %v311_v52 }
  0x19   :  { %8109 = vmatprep.mubr.msk.f32.mxu0 %vm74_vm0, %v59_v11  ;;  %269 = vst.msk [vmem:[#allocation2 + $0xa0] sm:$0xff] %vm174_vm1, %v8470_v26  ;;  %271 = vst.msk [vmem:[#allocation2 + $0xb0] sm:$0xff] %vm174_vm1, %v8470_v26  ;;  %v399_v57 = vmul.f32 %v8680_v50, %v8685_v53  ;;  %v492_v0 = vmul.f32 %v8696_v58, %v8685_v53  ;;  %v8713_v3 = vld [vmem:[#allocation2 + $0x18] sm:$0x7f]  ;;  %v363_v6 = vmul.f32 %v8700_v59, %v8685_v53 }
  0x1a   :  { %270 = vst.msk [vmem:[#allocation2 + $0xa8] sm:$0x7f] %vm249_vm2, %v8470_v26  ;;  %272 = vst.msk [vmem:[#allocation2 + $0xb8] sm:$0x7f] %vm249_vm2, %v8470_v26  ;;  %v431_v61 = vrot.slane %v398_v56, 1  ;;  %v524_v8 = vrot.slane %v491_v63, 2  ;;  %v400_v10 = vmul.f32 %v8680_v50, %v8711_v2  ;;  %v401_v11 = vmul.f32 %v8680_v50, %v8713_v3 }
  0x1b   :  { %273 = vst.msk [vmem:[#allocation2 + $0xc0] sm:$0xff] %vm174_vm1, %v8470_v26  ;;  %275 = vst.msk [vmem:[#allocation2 + $0xd0] sm:$0xff] %vm174_vm1, %v8470_v26  ;;  %v432_v62 = vrot.slane %v399_v57, 1  ;;  %v525_v9 = vrot.slane %v492_v0, 2  ;;  %v8772_v57 = vsub.s32 7, %v8652_v37 }
  0x1c   :  { %8110 = vmatmul.mubr.msk.f32.gmra.mrb[2].mxu0 %vm74_vm0, %v60_v12  ;;  %274 = vst.msk [vmem:[#allocation2 + $0xc8] sm:$0x7f] %vm249_vm2, %v8470_v26  ;;  %276 = vst.msk [vmem:[#allocation2 + $0xd8] sm:$0x7f] %vm249_vm2, %v8470_v26  ;;  %v8729_v12 = vrot.slane %v8672_v46, %v8709_v1 }
  0x1d   :  { %277 = vst.msk [vmem:[#allocation2 + $0xe0] sm:$0xff] %vm174_vm1, %v8470_v26  ;;  %279 = vst.msk [vmem:[#allocation2 + $0xf0] sm:$0xff] %vm174_vm1, %v8470_v26  ;;  %v433_v7 = vsel %vm430_vm3, %v431_v61, %v432_v62 }
  0x1e   :  { %278 = vst.msk [vmem:[#allocation2 + $0xe8] sm:$0x7f] %vm249_vm2, %v8470_v26  ;;  %280 = vst.msk [vmem:[#allocation2 + $0xf8] sm:$0x7f] %vm249_vm2, %v8470_v26  ;;  %v637_v56 = vmul.f32 %v8729_v12, %v8713_v3 }
  0x1f   :  { %281 = vst.msk [vmem:[#allocation2 + $0x100] sm:$0xff] %vm174_vm1, %v8470_v26  ;;  %283 = vst.msk [vmem:[#allocation2 + $0x110] sm:$0xff] %vm174_vm1, %v8470_v26 }
  0x20   :  { %282 = vst.msk [vmem:[#allocation2 + $0x108] sm:$0x7f] %vm249_vm2, %v8470_v26  ;;  %284 = vst.msk [vmem:[#allocation2 + $0x118] sm:$0x7f] %vm249_vm2, %v8470_v26 }
  0x21   :  { %285 = vst.msk [vmem:[#allocation2 + $0x120] sm:$0xff] %vm174_vm1, %v8470_v26  ;;  %287 = vst.msk [vmem:[#allocation2 + $0x130] sm:$0xff] %vm174_vm1, %v8470_v26 }
  0x22   :  { %286 = vst.msk [vmem:[#allocation2 + $0x128] sm:$0x7f] %vm249_vm2, %v8470_v26  ;;  %288 = vst.msk [vmem:[#allocation2 + $0x138] sm:$0x7f] %vm249_vm2, %v8470_v26  ;;  %vm7876_vm2 = vcmask 1041409  }
  0x23   :  { %12898 = vst [vmem:[#allocation8_spill] sm:$0xff] %v8652_v37  ;;  %12901 = vst [vmem:[#allocation11_spill] sm:$0xff] %v8665_v44 }
  0x24   :  { %12902 = vst [vmem:[#allocation12_spill] sm:$0xff] %v8680_v50  ;;  %12903 = vst [vmem:[#allocation13_spill] sm:$0xff] %v8683_v51 }
  0x25   :  { %12904 = vst [vmem:[#allocation14_spill] sm:$0xff] %v8689_v55  ;;  %12905 = vst [vmem:[#allocation15_spill] sm:$0xff] %v8696_v58 }
  0x26   :  { %12906 = vst [vmem:[#allocation16_spill] sm:$0xff] %v8700_v59  ;;  %12907 = vst [vmem:[#allocation17_spill] sm:$0xff] %v8703_v60 }
  0x27   :  { %12908 = vst [vmem:[#allocation18_spill] sm:$0xff] %v8709_v1  ;;  %12909 = vst [vmem:[#allocation19_spill] sm:$0xff] %v8718_v5 }
  0x28   :  { %12910 = vst [vmem:[#allocation20_spill] sm:$0xff] %v8729_v12  ;;  %12915 = vst [vmem:[#allocation25_spill] sm:$0xff] %v8772_v57 }
  0x29   :  { %vm9736_vm8 = vmor %vm3403_vm6, %vm3404_vm7 }
  0xeb   :  { %v8108_v14 = vpop.f32.mrb[0].mxu0 }
  0xec   :  { %v159_v15 = vadd.f32 %v8108_v14, %v7945_v13  ;;  %v153_v16 = vpop.f32.mrb[1].mxu0  ;;  %v584_v14 = vmul.f32 %v8718_v5, %v8685_v53 }
  0xed   :  { %v154_v17 = vadd.f32 %v7945_v13, %v153_v16  ;;  %v472_v16 = vadd.f32 %v432_v62, %v363_v6 }
  0xee   :  { %v178_v18 = vsel %vm174_vm1, %v159_v15, 0.0 }
  0xef   :  { %179 = vadd.xlane.f32.xlu1 %v178_v18  ;;  %v8111_v19 = vpop.f32.mrb[2].mxu0  ;;  %v175_v20 = vsel %vm174_vm1, %v154_v17, 0.0  ;;  %v434_v18 = vrot.slane %v400_v10, 1 }
  0xf0   :  { %v8603_v21 = vadd.f32 %v8111_v19, %v7945_v13  ;;  %v163_v22 = vpop.f32.mrb[3].mxu0  ;;  %176 = vadd.xlane.f32.xlu0 %v175_v20  ;;  %v435_v19 = vrot.slane %v401_v11, 1  ;;  %v493_v20 = vmul.f32 %v8696_v58, %v8711_v2 }
  0xf1   :  { %v164_v23 = vadd.f32 %v7945_v13, %v163_v22  ;;  %v471_v13 = vadd.f32 %v433_v7, %v362_v4  ;;  %v365_v22 = vmul.f32 %v8700_v59, %v8713_v3  ;;  %v653_v7 = vrot.slane %v637_v56, 4 }
  0xf2   :  { %v184_v24 = vsel %vm174_vm1, %v8603_v21, 0.0 }
  0xf3   :  { %185 = vadd.xlane.f32.xlu1 %v184_v24  ;;  %v181_v25 = vsel %vm174_vm1, %v164_v23, 0.0 }
  0xf4   :  { %182 = vadd.xlane.f32.xlu0 %v181_v25  ;;  %v600_v25 = vrot.slane %v584_v14, 3 }
 0x17c   :  { %v180_v27 = vpop.xlane.xlu1 %179 }
 0x17d   :  { %v189_v28 = vmul.f32 0.03125, %v180_v27  ;;  %v177_v29 = vpop.xlane.xlu0 %176  ;;  %v8750_v27 = vsub.s32 6, %v8652_v37 }
 0x17e   :  { %v188_v30 = vmul.f32 0.03125, %v177_v29  ;;  %v436_v29 = vsel %vm430_vm3, %v434_v18, %v435_v19 }
 0x17f   :  { %v8648_v32 = vsub.f32 %v159_v15, %v189_v28  ;;  %v8734_v15 = vsub.s32 5, %v8652_v37  ;;  %12913 = vst [vmem:[#allocation23_spill] sm:$0xff] %v8750_v27  ;;  %v364_v28 = vmul.f32 %v8700_v59, %v8711_v2 }
 0x180   :  { %v8650_v33 = vsub.f32 %v154_v17, %v188_v30  ;;  %v186_v34 = vpop.xlane.xlu1 %185  ;;  %v526_v17 = vsel %vm523_vm4, %v524_v8, %v525_v9  ;;  %v527_v30 = vrot.slane %v493_v20, 2 }
 0x181   :  { %12896 = vst [vmem:[#allocation6_spill] sm:$0xff] %v8648_v32  ;;  %v191_v35 = vmul.f32 0.03125, %v186_v34  ;;  %v183_v36 = vpop.xlane.xlu0 %182  ;;  %v197_v43 = vmul.f32 %v8648_v32, %v8648_v32  ;;  %12911 = vst [vmem:[#allocation21_spill] sm:$0xff] %v8734_v15  ;;  %v564_v24 = vadd.f32 %v526_v17, %v471_v13  ;;  %v8747_v26 = vrot.slane %v8672_v46, %v8734_v15 }
 0x182   :  { %12897 = vst [vmem:[#allocation7_spill] sm:$0xff] %v8650_v33  ;;  %v190_v38 = vmul.f32 0.03125, %v183_v36  ;;  %v196_v39 = vmul.f32 %v8650_v33, %v8650_v33  ;;  %v565_v34 = vadd.f32 %v525_v9, %v472_v16  ;;  %v585_v36 = vmul.f32 %v8718_v5, %v8713_v3 }
 0x183   :  { %v8657_v40 = vsub.f32 %v8603_v21, %v191_v35  ;;  %v203_v47 = vsel %vm174_vm1, %v197_v43, 0.0  ;;  %v494_v21 = vmul.f32 %v8696_v58, %v8713_v3  ;;  %12912 = vst [vmem:[#allocation22_spill] sm:$0xff] %v8747_v26  ;;  %v474_v35 = vadd.f32 %v435_v19, %v365_v22 }
 0x184   :  { %v8659_v41 = vsub.f32 %v164_v23, %v190_v38  ;;  %v200_v42 = vsel %vm174_vm1, %v196_v39, 0.0  ;;  %v636_v23 = vmul.f32 %v8729_v12, %v8685_v53  ;;  %v616_v38 = vadd.f32 %v600_v25, %v564_v24 }
 0x185   :  { %12899 = vst [vmem:[#allocation9_spill] sm:$0xff] %v8657_v40  ;;  %201 = vadd.xlane.f32.xlu0 %v200_v42  ;;  %v199_v49 = vmul.f32 %v8657_v40, %v8657_v40  ;;  %v528_v31 = vrot.slane %v494_v21, 2  ;;  %v688_v42 = vmul.f32 %v8747_v26, %v8685_v53  ;;  %v8761_v43 = vrot.slane %v8672_v46, %v8750_v27 }
 0x186   :  { %12900 = vst [vmem:[#allocation10_spill] sm:$0xff] %v8659_v41  ;;  %v198_v45 = vmul.f32 %v8659_v41, %v8659_v41  ;;  %v652_v39 = vrot.slane %v636_v23, 4  ;;  %v689_v9 = vmul.f32 %v8747_v26, %v8713_v3  ;;  %v8784_v13 = vrot.slane %v8672_v46, %v8772_v57 }
 0x187   :  { %v209_v54 = vsel %vm174_vm1, %v199_v49, 0.0  ;;  %12914 = vst [vmem:[#allocation24_spill] sm:$0xff] %v8761_v43  ;;  %v617_v49 = vadd.f32 %v600_v25, %v565_v34  ;;  %v567_v52 = vadd.f32 %v528_v31, %v474_v35  ;;  %v704_v62 = vrot.slane %v688_v42, 5 }
 0x188   :  { %v206_v48 = vsel %vm174_vm1, %v198_v45, 0.0  ;;  %v8766_v45 = vld [vmem:[%s12632_s5 + $0x8] sm:$0xff]  ;;  %v668_v61 = vadd.f32 %v652_v39, %v616_v38  ;;  %v740_v63 = vmul.f32 %v8761_v43, %v8685_v53  ;;  %12917 = vst [vmem:[#allocation27_spill] sm:$0xff] %v8784_v13  ;;  %v705_v19 = vrot.slane %v689_v9, 5 }
 0x189   :  { %204 = vadd.xlane.f32.xlu0 %v203_v47  ;;  %207 = vadd.xlane.f32.xlu1 %v206_v48  ;;  %v473_v47 = vadd.f32 %v436_v29, %v364_v28  ;;  %v529_v48 = vsel %vm523_vm4, %v527_v30, %v528_v31  ;;  %v8778_v0 = vrot.slane %v8766_v45, %v8689_v55  ;;  %v8802_v30 = vld [vmem:[#allocation2 + $0x20] sm:$0xff]  ;;  %v8804_v31 = vld [vmem:[#allocation2 + $0x28] sm:$0x7f] }
 0x18a   :  { %v669_v8 = vadd.f32 %v652_v39, %v617_v49  ;;  %v720_v10 = vadd.f32 %v704_v62, %v668_v61  ;;  %v756_v11 = vrot.slane %v740_v63, 6  ;;  %v8792_v17 = vrot.slane %v8766_v45, %v8665_v44  ;;  %12919 = vst [vmem:[#allocation29_spill] sm:$0xff] %v8804_v31 }
 0x18b   :  { %12916 = vst [vmem:[#allocation26_spill] sm:$0xff] %v8778_v0  ;;  %v566_v4 = vadd.f32 %v529_v48, %v473_v47  ;;  %v828_v53 = vmul.f32 %v8778_v0, %v8711_v2  ;;  %v829_v16 = vmul.f32 %v8778_v0, %v8713_v3  ;;  %v741_v20 = vmul.f32 %v8761_v43, %v8713_v3 }
 0x18c   :  { %12918 = vst [vmem:[#allocation28_spill] sm:$0xff] %v8792_v17  ;;  %v721_v21 = vadd.f32 %v704_v62, %v669_v8  ;;  %v772_v22 = vadd.f32 %v756_v11, %v720_v10  ;;  %v792_v46 = vmul.f32 %v8784_v13, %v8711_v2  ;;  %v920_v28 = vmul.f32 %v8792_v17, %v8711_v2 }
 0x18d   :  { %210 = vadd.xlane.f32.xlu1 %v209_v54  ;;  %v601_v54 = vrot.slane %v585_v36, 3  ;;  %v860_v23 = vrot.slane %v828_v53, 1  ;;  %v861_v25 = vrot.slane %v829_v16, 1  ;;  %v921_v29 = vmul.f32 %v8792_v17, %v8713_v3 }
 0x18e   :  { %v757_v35 = vrot.slane %v741_v20, 6  ;;  %v773_v36 = vadd.f32 %v756_v11, %v721_v21  ;;  %v793_v38 = vmul.f32 %v8784_v13, %v8713_v3  ;;  %v808_v39 = vadd.f32 %v792_v46, %v772_v22 }
 0x18f   :  { %v619_v6 = vadd.f32 %v601_v54, %v567_v52  ;;  %v618_v14 = vadd.f32 %v601_v54, %v566_v4  ;;  %v8810_v42 = vrot.slane %v8766_v45, %v8683_v51  ;;  %v862_v2 = vsel %vm430_vm3, %v860_v23, %v861_v25 }
 0x190   :  { %v952_v48 = vrot.slane %v920_v28, 2  ;;  %v953_v49 = vrot.slane %v921_v29, 2  ;;  %v830_v52 = vmul.f32 %v8778_v0, %v8802_v30  ;;  %v831_v54 = vmul.f32 %v8778_v0, %v8804_v31 }
 0x191   :  { %v671_v18 = vadd.f32 %v653_v7, %v619_v6  ;;  %v670_v24 = vadd.f32 %v653_v7, %v618_v14  ;;  %12920 = vst [vmem:[#allocation30_spill] sm:$0xff] %v8810_v42  ;;  %v795_v61 = vmul.f32 %v8784_v13, %v8804_v31  ;;  %v809_v62 = vadd.f32 %v793_v38, %v773_v36 }
 0x192   :  { %v900_v63 = vadd.f32 %v862_v2, %v808_v39  ;;  %v1012_v4 = vmul.f32 %v8810_v42, %v8713_v3  ;;  %v794_v7 = vmul.f32 %v8784_v13, %v8802_v30  ;;  %v954_v8 = vsel %vm523_vm4, %v952_v48, %v953_v49  ;;  %v331_v48 = vld [vmem:[#allocation2 + $0xa0] sm:$0xff] }
 0x193   :  { %v723_v34 = vadd.f32 %v705_v19, %v671_v18  ;;  %v722_v47 = vadd.f32 %v705_v19, %v670_v24  ;;  %v8826_v9 = vrot.slane %v8766_v45, %v8703_v60  ;;  %v863_v10 = vrot.slane %v830_v52, 1 }
 0x194   :  { %v864_v11 = vrot.slane %v831_v54, 1  ;;  %v922_v53 = vmul.f32 %v8792_v17, %v8802_v30  ;;  %v923_v14 = vmul.f32 %v8792_v17, %v8804_v31  ;;  %v901_v18 = vadd.f32 %v861_v25, %v809_v62 }
 0x195   :  { %v775_v56 = vadd.f32 %v757_v35, %v723_v34  ;;  %v774_v6 = vadd.f32 %v757_v35, %v722_v47  ;;  %12921 = vst [vmem:[#allocation31_spill] sm:$0xff] %v8826_v9  ;;  %v992_v20 = vadd.f32 %v954_v8, %v900_v63  ;;  %v1028_v21 = vrot.slane %v1012_v4, 3 }
 0x196   :  { %v1064_v22 = vmul.f32 %v8826_v9, %v8713_v3  ;;  %v865_v46 = vsel %vm430_vm3, %v863_v10, %v864_v11  ;;  %v955_v23 = vrot.slane %v922_v53, 2  ;;  %v956_v24 = vrot.slane %v923_v14, 2 }
 0x197   :  { %v811_v16 = vadd.f32 %v795_v61, %v775_v56  ;;  %v810_v19 = vadd.f32 %v794_v7, %v774_v6  ;;  %v8837_v28 = vrot.slane %v8766_v45, %v8709_v1  ;;  %v1013_v34 = vmul.f32 %v8810_v42, %v8804_v31  ;;  %v8850_v61 = vld [vmem:[#allocation2 + $0xa8] sm:$0x7f] }
 0x198   :  { %v993_v35 = vadd.f32 %v953_v49, %v901_v18  ;;  %v1044_v36 = vadd.f32 %v1028_v21, %v992_v20  ;;  %v1065_v38 = vmul.f32 %v8826_v9, %v8804_v31  ;;  %v1080_v39 = vrot.slane %v1064_v22, 4 }
 0x199   :  { %12922 = vst [vmem:[#allocation32_spill] sm:$0xff] %v8837_v28  ;;  %v903_v29 = vadd.f32 %v864_v11, %v811_v16  ;;  %v902_v25 = vadd.f32 %v865_v46, %v810_v19  ;;  %v957_v47 = vsel %vm523_vm4, %v955_v23, %v956_v24  ;;  %v1116_v2 = vmul.f32 %v8837_v28, %v8713_v3 }
 0x19a   :  { %v1029_v54 = vrot.slane %v1013_v34, 3  ;;  %v8848_v56 = vrot.slane %v8766_v45, %v8734_v15  ;;  %v1045_v49 = vadd.f32 %v1028_v21, %v993_v35  ;;  %v1081_v63 = vrot.slane %v1065_v38, 4 }
 0x19b   :  { %v995_v52 = vadd.f32 %v956_v24, %v903_v29  ;;  %v994_v62 = vadd.f32 %v957_v47, %v902_v25  ;;  %v1096_v4 = vadd.f32 %v1080_v39, %v1044_v36  ;;  %v406_v6 = vmul.f32 %v8680_v50, %v331_v48 }
 0x19c   :  { %12923 = vst [vmem:[#allocation33_spill] sm:$0xff] %v8848_v56  ;;  %v1117_v7 = vmul.f32 %v8837_v28, %v8804_v31  ;;  %v1132_v8 = vrot.slane %v1116_v2, 5  ;;  %v407_v10 = vmul.f32 %v8680_v50, %v8850_v61  ;;  %v499_v11 = vmul.f32 %v8696_v58, %v331_v48 }
 0x19d   :  { %v1047_v53 = vadd.f32 %v1029_v54, %v995_v52  ;;  %v1168_v14 = vmul.f32 %v8848_v56, %v8713_v3  ;;  %v443_v16 = vrot.slane %v406_v6, 1  ;;  %v500_v18 = vmul.f32 %v8696_v58, %v8850_v61 }
 0x19e   :  { %v8864_v19 = vrot.slane %v8766_v45, %v8772_v57  ;;  %v444_v20 = vrot.slane %v407_v10, 1  ;;  %v1046_v21 = vadd.f32 %v1029_v54, %v994_v62  ;;  %v1097_v22 = vadd.f32 %v1080_v39, %v1045_v49  ;;  %v8883_v62 = vld [vmem:[#allocation2 + $0x30] sm:$0xff] }
 0x19f   :  { %v8868_v46 = vrot.slane %v8766_v45, %v8750_v27  ;;  %v370_v23 = vmul.f32 %v8700_v59, %v331_v48  ;;  %v1133_v24 = vrot.slane %v1117_v7, 5  ;;  %v1148_v29 = vadd.f32 %v1132_v8, %v1096_v4  ;;  %12925 = vst [vmem:[#allocation35_spill] sm:$0xff] %v8883_v62 }
 0x1a0   :  { %v536_v3 = vrot.slane %v499_v11, 2  ;;  %v537_v34 = vrot.slane %v500_v18, 2  ;;  %v1099_v35 = vadd.f32 %v1081_v63, %v1047_v53  ;;  %v1169_v25 = vmul.f32 %v8848_v56, %v8804_v31  ;;  %v8890_v11 = vld [vmem:[%s12632_s5 + $0x10] sm:$0xff] }
 0x1a1   :  { %12924 = vst [vmem:[#allocation34_spill] sm:$0xff] %v8868_v46  ;;  %v1184_v36 = vrot.slane %v1168_v14, 6  ;;  %v445_v38 = vsel %vm430_vm3, %v443_v16, %v444_v20  ;;  %v1256_v39 = vmul.f32 %v8864_v19, %v8802_v30  ;;  %v1257_v45 = vmul.f32 %v8864_v19, %v8804_v31 }
 0x1a2   :  { %v371_v47 = vmul.f32 %v8700_v59, %v8850_v61  ;;  %v479_v2 = vadd.f32 %v445_v38, %v370_v23  ;;  %v588_v48 = vmul.f32 %v8718_v5, %v8850_v61  ;;  %v1098_v52 = vadd.f32 %v1081_v63, %v1046_v21  ;;  %v8892_v63 = vld [vmem:[#allocation2 + $0xb0] sm:$0xff] }
 0x1a3   :  { %v1149_v54 = vadd.f32 %v1132_v8, %v1097_v22  ;;  %v538_v49 = vsel %vm523_vm4, %v536_v3, %v537_v34  ;;  %v1151_v4 = vadd.f32 %v1133_v24, %v1099_v35  ;;  %v1185_v6 = vrot.slane %v1169_v25, 6  ;;  %v8894_v8 = vld [vmem:[#allocation2 + $0xb8] sm:$0x7f] }
 0x1a4   :  { %v1200_v7 = vadd.f32 %v1184_v36, %v1148_v29  ;;  %v1220_v10 = vmul.f32 %v8868_v46, %v8802_v30  ;;  %v1288_v53 = vrot.slane %v1256_v39, 1  ;;  %v1289_v14 = vrot.slane %v1257_v45, 1 }
 0x1a5   :  { %v480_v16 = vadd.f32 %v444_v20, %v371_v47  ;;  %v572_v18 = vadd.f32 %v538_v49, %v479_v2  ;;  %v604_v21 = vrot.slane %v588_v48, 3  ;;  %v640_v22 = vmul.f32 %v8729_v12, %v8850_v61 }
 0x1a6   :  { %v1150_v23 = vadd.f32 %v1133_v24, %v1098_v52  ;;  %v1201_v29 = vadd.f32 %v1184_v36, %v1149_v54  ;;  %v1221_v3 = vmul.f32 %v8868_v46, %v8804_v31  ;;  %v8902_v35 = vmul.f32 %v8864_v19, %v8883_v62 }
 0x1a7   :  { %v8904_v25 = vadd.f32 %v1185_v6, %v1151_v4  ;;  %v1236_v20 = vadd.f32 %v1220_v10, %v1200_v7  ;;  %v8908_v38 = vrot.slane %v8890_v11, %v8689_v55  ;;  %v1290_v39 = vsel %vm430_vm3, %v1288_v53, %v1289_v14 }
 0x1a8   :  { %12926 = vst [vmem:[#allocation36_spill] sm:$0xff] %v8902_v35  ;;  %v408_v24 = vmul.f32 %v8680_v50, %v8892_v63  ;;  %v409_v36 = vmul.f32 %v8680_v50, %v8894_v8  ;;  %v573_v45 = vadd.f32 %v537_v34, %v480_v16  ;;  %v1222_v47 = vmul.f32 %v8868_v46, %v8883_v62 }
 0x1a9   :  { %12927 = vst [vmem:[#allocation37_spill] sm:$0xff] %v8904_v25  ;;  %v624_v2 = vadd.f32 %v604_v21, %v572_v18  ;;  %v656_v48 = vrot.slane %v640_v22, 4  ;;  %v692_v52 = vmul.f32 %v8747_v26, %v8850_v61  ;;  %v1202_v54 = vadd.f32 %v1185_v6, %v1150_v23 }
 0x1aa   :  { %v1237_v49 = vadd.f32 %v1221_v3, %v1201_v29  ;;  %v8922_v7 = vrot.slane %v8890_v11, %v8665_v44  ;;  %v1328_v10 = vadd.f32 %v1290_v39, %v1236_v20  ;;  %v1348_v34 = vmul.f32 %v8908_v38, %v8802_v30 }
 0x1ab   :  { %v1349_v53 = vmul.f32 %v8908_v38, %v8804_v31  ;;  %v8930_v16 = vrot.slane %v8890_v11, %v8683_v51  ;;  %v446_v18 = vrot.slane %v408_v24, 1  ;;  %v447_v6 = vrot.slane %v409_v36, 1 }
 0x1ac   :  { %v501_v22 = vmul.f32 %v8696_v58, %v8892_v63  ;;  %v625_v23 = vadd.f32 %v604_v21, %v573_v45  ;;  %v502_v29 = vmul.f32 %v8696_v58, %v8894_v8  ;;  %v676_v3 = vadd.f32 %v656_v48, %v624_v2 }
 0x1ad   :  { %v708_v20 = vrot.slane %v692_v52, 5  ;;  %v744_v39 = vmul.f32 %v8761_v43, %v8850_v61  ;;  %v8938_v4 = vadd.f32 %v1222_v47, %v1202_v54  ;;  %v1329_v37 = vadd.f32 %v1289_v14, %v1237_v49 }
 0x1ae   :  { %v8942_v35 = vmul.f32 %v8908_v38, %v8883_v62  ;;  %v1440_v24 = vmul.f32 %v8922_v7, %v8804_v31  ;;  %v1380_v36 = vrot.slane %v1348_v34, 2  ;;  %v8948_v21 = vmul.f32 %v8930_v16, %v8804_v31 }
 0x1af   :  { %12928 = vst [vmem:[#allocation38_spill] sm:$0xff] %v8938_v4  ;;  %v8952_v45 = vrot.slane %v8890_v11, %v8703_v60  ;;  %v8956_v61 = vrot.slane %v8890_v11, %v8709_v1  ;;  %v1381_v14 = vrot.slane %v1349_v53, 2  ;;  %v372_v47 = vmul.f32 %v8700_v59, %v8892_v63 }
 0x1b0   :  { %12929 = vst [vmem:[#allocation39_spill] sm:$0xff] %v8942_v35  ;;  %v448_v2 = vsel %vm430_vm3, %v446_v18, %v447_v6  ;;  %v677_v52 = vadd.f32 %v656_v48, %v625_v23  ;;  %v539_v54 = vrot.slane %v501_v22, 2  ;;  %v540_v49 = vrot.slane %v502_v29, 2 }
 0x1b1   :  { %v728_v34 = vadd.f32 %v708_v20, %v676_v3  ;;  %v760_v4 = vrot.slane %v744_v39, 6  ;;  %v8964_v40 = vrot.slane %v8890_v11, %v8734_v15  ;;  %v836_v32 = vmul.f32 %v8778_v0, %v8892_v63 }
 0x1b2   :  { %v837_v53 = vmul.f32 %v8778_v0, %v8894_v8  ;;  %v1456_v41 = vrot.slane %v1440_v24, 3  ;;  %v1508_v18 = vrot.slane %v8948_v21, 4  ;;  %v8973_v48 = vmul.f32 %v8952_v45, %v8804_v31 }
 0x1b3   :  { %v373_v22 = vmul.f32 %v8700_v59, %v8894_v8  ;;  %v1382_v23 = vsel %vm523_vm4, %v1380_v36, %v1381_v14  ;;  %v481_v29 = vadd.f32 %v448_v2, %v372_v47  ;;  %v589_v3 = vmul.f32 %v8718_v5, %v8894_v8 }
 0x1b4   :  { %v729_v39 = vadd.f32 %v708_v20, %v677_v52  ;;  %v8982_v25 = vmul.f32 %v8956_v61, %v8804_v31  ;;  %v541_v24 = vsel %vm523_vm4, %v539_v54, %v540_v49  ;;  %v780_v21 = vadd.f32 %v760_v4, %v728_v34 }
 0x1b5   :  { %v800_v35 = vmul.f32 %v8784_v13, %v8892_v63  ;;  %v1421_v33 = vadd.f32 %v1381_v14, %v1329_v37  ;;  %v872_v58 = vrot.slane %v836_v32, 1  ;;  %v873_v59 = vrot.slane %v837_v53, 1 }
 0x1b6   :  { %v928_v36 = vmul.f32 %v8792_v17, %v8892_v63  ;;  %v1420_v47 = vadd.f32 %v1382_v23, %v1328_v10  ;;  %v8991_v20 = vrot.slane %v8890_v11, %v8750_v27  ;;  %v482_v2 = vadd.f32 %v447_v6, %v373_v22  ;;  %v9004_v6 = vld [vmem:[#allocation2 + $0x40] sm:$0xff] }
 0x1b7   :  { %v641_v52 = vmul.f32 %v8729_v12, %v8894_v8  ;;  %v574_v54 = vadd.f32 %v541_v24, %v481_v29  ;;  %v605_v34 = vrot.slane %v589_v3, 3  ;;  %v781_v5 = vadd.f32 %v760_v4, %v729_v39 }
 0x1b8   :  { %v801_v37 = vmul.f32 %v8784_v13, %v8894_v8  ;;  %v1560_v32 = vrot.slane %v8973_v48, 5  ;;  %v9000_v63 = vmul.f32 %v8964_v40, %v8883_v62  ;;  %v816_v10 = vadd.f32 %v800_v35, %v780_v21  ;;  %v9014_v48 = vld [vmem:[%s12632_s5 + $0x18] sm:$0xff] }
 0x1b9   :  { %v929_v14 = vmul.f32 %v8792_v17, %v8894_v8  ;;  %v1473_v53 = vadd.f32 %v1456_v41, %v1421_v33  ;;  %v9008_v22 = vrot.slane %v8890_v11, %v8772_v57  ;;  %v874_v4 = vsel %vm430_vm3, %v872_v58, %v873_v59 }
 0x1ba   :  { %v964_v23 = vrot.slane %v928_v36, 2  ;;  %v1472_v29 = vadd.f32 %v1456_v41, %v1420_v47  ;;  %v9018_v35 = vmul.f32 %v8991_v20, %v8883_v62  ;;  %v575_v3 = vadd.f32 %v540_v49, %v482_v2 }
 0x1bb   :  { %v965_v39 = vrot.slane %v929_v14, 2  ;;  %v626_v33 = vadd.f32 %v605_v34, %v574_v54  ;;  %v657_v24 = vrot.slane %v641_v52, 4  ;;  %v693_v11 = vmul.f32 %v8747_v26, %v8894_v8 }
 0x1bc   :  { %v817_v21 = vadd.f32 %v801_v37, %v781_v5  ;;  %v1612_v58 = vrot.slane %v8982_v25, 6  ;;  %v9025_v36 = vmul.f32 %v8991_v20, %v9004_v6  ;;  %v908_v12 = vadd.f32 %v874_v4, %v816_v10 }
 0x1bd   :  { %v1016_v41 = vmul.f32 %v8810_v42, %v8894_v8  ;;  %v9031_v49 = vmul.f32 %v9008_v22, %v8883_v62  ;;  %v9035_v47 = vmul.f32 %v9008_v22, %v9004_v6  ;;  %v9039_v5 = vrot.slane %v9014_v48, %v8689_v55 }
 0x1be   :  { %12930 = vst [vmem:[#allocation40_spill] sm:$0xff] %v9025_v36  ;;  %v966_v25 = vsel %vm523_vm4, %v964_v23, %v965_v39  ;;  %v1524_v2 = vadd.f32 %v1508_v18, %v1472_v29  ;;  %v1525_v52 = vadd.f32 %v1508_v18, %v1473_v53  ;;  %v9044_v54 = vrot.slane %v9014_v48, %v8665_v44 }
 0x1bf   :  { %12931 = vst [vmem:[#allocation41_spill] sm:$0xff] %v9031_v49  ;;  %12932 = vst [vmem:[#allocation42_spill] sm:$0xff] %v9035_v47  ;;  %v627_v37 = vadd.f32 %v605_v34, %v575_v3  ;;  %v678_v14 = vadd.f32 %v657_v24, %v626_v33  ;;  %v709_v4 = vrot.slane %v693_v11, 5  ;;  %v909_v26 = vadd.f32 %v873_v59, %v817_v21  ;;  %v9064_v11 = vld [vmem:[#allocation2 + $0xc8] sm:$0x7f] }
 0x1c0   :  { %12933 = vst [vmem:[#allocation43_spill] sm:$0xff] %v9044_v54  ;;  %v745_v62 = vmul.f32 %v8761_v43, %v8894_v8  ;;  %v1000_v31 = vadd.f32 %v966_v25, %v908_v12  ;;  %v1032_v50 = vrot.slane %v1016_v41, 3  ;;  %v1068_v23 = vmul.f32 %v8826_v9, %v8894_v8  ;;  %v9062_v12 = vld [vmem:[#allocation2 + $0xc0] sm:$0xff] }
 0x1c1   :  { %v9056_v34 = vrot.slane %v9014_v48, %v8683_v51  ;;  %v1576_v3 = vadd.f32 %v1560_v32, %v1524_v2  ;;  %v1577_v59 = vadd.f32 %v1560_v32, %v1525_v52  ;;  %v9060_v33 = vrot.slane %v9014_v48, %v8734_v15  ;;  %v9074_v32 = vld [vmem:[#allocation2 + $0x50] sm:$0xff] }
 0x1c2   :  { %v679_v21 = vadd.f32 %v657_v24, %v627_v37  ;;  %v9068_v41 = vrot.slane %v9014_v48, %v8703_v60  ;;  %v9072_v25 = vrot.slane %v9014_v48, %v8750_v27  ;;  %v730_v29 = vadd.f32 %v709_v4, %v678_v14 }
 0x1c3   :  { %12934 = vst [vmem:[#allocation44_spill] sm:$0xff] %v9056_v34  ;;  %v1001_v2 = vadd.f32 %v965_v39, %v909_v26  ;;  %v761_v52 = vrot.slane %v745_v62, 6  ;;  %v1052_v53 = vadd.f32 %v1032_v50, %v1000_v31  ;;  %v1084_v18 = vrot.slane %v1068_v23, 4 }
 0x1c4   :  { %12935 = vst [vmem:[#allocation45_spill] sm:$0xff] %v9068_v41  ;;  %v1120_v10 = vmul.f32 %v8837_v28, %v8894_v8  ;;  %v9080_v24 = vmul.f32 %v8964_v40, %v9004_v6  ;;  %v9084_v37 = vrot.slane %v9014_v48, %v8709_v1  ;;  %v838_v14 = vmul.f32 %v8778_v0, %v9062_v12 }
 0x1c5   :  { %v839_v26 = vmul.f32 %v8778_v0, %v9064_v11  ;;  %v1628_v62 = vadd.f32 %v1612_v58, %v1576_v3  ;;  %v9090_v31 = vadd.f32 %v1612_v58, %v1577_v59  ;;  %v9094_v39 = vmul.f32 %v9060_v33, %v9004_v6 }
 0x1c6   :  { %12936 = vst [vmem:[#allocation46_spill] sm:$0xff] %v9080_v24  ;;  %v731_v23 = vadd.f32 %v709_v4, %v679_v21  ;;  %v9098_v43 = vmul.f32 %v9060_v33, %v9074_v32  ;;  %v9102_v24 = vmul.f32 %v9072_v25, %v9004_v6  ;;  %v802_v41 = vmul.f32 %v8784_v13, %v9062_v12 }
 0x1c7   :  { %v1053_v0 = vadd.f32 %v1032_v50, %v1001_v2  ;;  %v782_v3 = vadd.f32 %v761_v52, %v730_v29  ;;  %v1104_v58 = vadd.f32 %v1084_v18, %v1052_v53  ;;  %v1136_v59 = vrot.slane %v1120_v10, 5  ;;  %v355_v50 = vld [vmem:[%s12632_s5 + $0x20] sm:$0xff] }
 0x1c8   :  { %12937 = vst [vmem:[#allocation47_spill] sm:$0xff] %v9102_v24  ;;  %v1172_v34 = vmul.f32 %v8848_v56, %v8894_v8  ;;  %v9110_v4 = vmul.f32 %v9072_v25, %v9074_v32  ;;  %v9114_v21 = vrot.slane %v9014_v48, %v8772_v57  ;;  %v875_v54 = vrot.slane %v838_v14, 1 }
 0x1c9   :  { %v876_v47 = vrot.slane %v839_v26, 1  ;;  %v783_v29 = vadd.f32 %v761_v52, %v731_v23  ;;  %v803_v10 = vmul.f32 %v8784_v13, %v9064_v11  ;;  %v930_v8 = vmul.f32 %v8792_v17, %v9062_v12 }
 0x1ca   :  { %12938 = vst [vmem:[#allocation48_spill] sm:$0xff] %v9110_v4  ;;  %12939 = vst [vmem:[#allocation49_spill] sm:$0xff] %v9114_v21  ;;  %v931_v53 = vmul.f32 %v8792_v17, %v9064_v11  ;;  %v9126_v2 = vadd.f32 %v9000_v63, %v1628_v62  ;;  %v1105_v26 = vadd.f32 %v1084_v18, %v1053_v0  ;;  %v1188_v49 = vrot.slane %v1172_v34, 6 }
 0x1cb   :  { %v818_v52 = vadd.f32 %v802_v41, %v782_v3  ;;  %v1156_v23 = vadd.f32 %v1136_v59, %v1104_v58  ;;  %v9132_v13 = vrot.slane %v355_v50, %v8689_v55  ;;  %v877_v36 = vsel %vm430_vm3, %v875_v54, %v876_v47 }
 0x1cc   :  { %v1264_v17 = vmul.f32 %v8864_v19, %v9062_v12  ;;  %v1265_v63 = vmul.f32 %v8864_v19, %v9064_v11  ;;  %v819_v14 = vadd.f32 %v803_v10, %v783_v29  ;;  %v967_v0 = vrot.slane %v930_v8, 2  ;;  %v9153_v10 = vld [vmem:[#allocation2 + $0x60] sm:$0xff] }
 0x1cd   :  { %12940 = vst [vmem:[#allocation50_spill] sm:$0xff] %v9132_v13  ;;  %v968_v18 = vrot.slane %v931_v53, 2  ;;  %v9141_v41 = vrot.slane %v355_v50, %v8665_v44  ;;  %v9144_v34 = vrot.slane %v355_v50, %v8709_v1  ;;  %v9147_v3 = vrot.slane %v355_v50, %v8734_v15 }
 0x1ce   :  { %v1157_v54 = vadd.f32 %v1136_v59, %v1105_v26  ;;  %v910_v58 = vadd.f32 %v877_v36, %v818_v52  ;;  %v1017_v21 = vmul.f32 %v8810_v42, %v9064_v11  ;;  %v1208_v48 = vadd.f32 %v1188_v49, %v1156_v23 }
 0x1cf   :  { %12941 = vst [vmem:[#allocation51_spill] sm:$0xff] %v9141_v41  ;;  %12942 = vst [vmem:[#allocation52_spill] sm:$0xff] %v9144_v34  ;;  %v1228_v29 = vmul.f32 %v8868_v46, %v9062_v12  ;;  %v1300_v8 = vrot.slane %v1264_v17, 1  ;;  %v1301_v53 = vrot.slane %v1265_v63, 1  ;;  %v1356_v62 = vmul.f32 %v8908_v38, %v9062_v12 }
 0x1d0   :  { %12943 = vst [vmem:[#allocation53_spill] sm:$0xff] %v9147_v3  ;;  %v1357_v41 = vmul.f32 %v8908_v38, %v9064_v11  ;;  %v9161_v36 = vmul.f32 %v9084_v37, %v9004_v6  ;;  %v9164_v59 = vrot.slane %v355_v50, %v8683_v51  ;;  %v911_v26 = vadd.f32 %v876_v47, %v819_v14 }
 0x1d1   :  { %v969_v52 = vsel %vm523_vm4, %v967_v0, %v968_v18  ;;  %v9169_v17 = vmul.f32 %v9144_v34, %v9074_v32  ;;  %v9173_v12 = vmul.f32 %v9147_v3, %v9074_v32  ;;  %v1209_v23 = vadd.f32 %v1188_v49, %v1157_v54 }
 0x1d2   :  { %12944 = vst [vmem:[#allocation54_spill] sm:$0xff] %v9164_v59  ;;  %v1229_v63 = vmul.f32 %v8868_v46, %v9064_v11  ;;  %v9179_v6 = vmul.f32 %v9144_v34, %v9153_v10  ;;  %v1033_v42 = vrot.slane %v1017_v21, 3  ;;  %v1069_v47 = vmul.f32 %v8826_v9, %v9064_v11 }
 0x1d3   :  { %12945 = vst [vmem:[#allocation55_spill] sm:$0xff] %v9169_v17  ;;  %12946 = vst [vmem:[#allocation56_spill] sm:$0xff] %v9173_v12  ;;  %v1244_v14 = vadd.f32 %v1228_v29, %v1208_v48  ;;  %v1002_v0 = vadd.f32 %v969_v52, %v910_v58  ;;  %v1302_v59 = vsel %vm430_vm3, %v1300_v8, %v1301_v53  ;;  %v1392_v13 = vrot.slane %v1356_v62, 2 }
 0x1d4   :  { %12947 = vst [vmem:[#allocation57_spill] sm:$0xff] %v9179_v6  ;;  %v1393_v4 = vrot.slane %v1357_v41, 2  ;;  %v9186_v49 = vmul.f32 %v9084_v37, %v9074_v32  ;;  %v9189_v54 = vrot.slane %v355_v50, %v8703_v60  ;;  %v9193_v24 = vmul.f32 %v9147_v3, %v9153_v10  ;;  %v356_v41 = vld [vmem:[%s12632_s5 + $0x28] sm:$0xff] }
 0x1d5   :  { %v1003_v21 = vadd.f32 %v968_v18, %v911_v26  ;;  %v9198_v58 = vrot.slane %v355_v50, %v8750_v27  ;;  %v1245_v62 = vadd.f32 %v1229_v63, %v1209_v23  ;;  %v9205_v8 = vrot.slane %v355_v50, %v8772_v57  ;;  %v326_v63 = vld [vmem:[#allocation2 + $0x78] sm:$0x7f] }
 0x1d6   :  { %12948 = vst [vmem:[#allocation58_spill] sm:$0xff] %v9189_v54  ;;  %12949 = vst [vmem:[#allocation59_spill] sm:$0xff] %v9193_v24  ;;  %v1336_v52 = vadd.f32 %v1302_v59, %v1244_v14  ;;  %v1444_v18 = vmul.f32 %v8922_v7, %v9064_v11  ;;  %v1054_v26 = vadd.f32 %v1033_v42, %v1002_v0  ;;  %v1085_v9 = vrot.slane %v1069_v47, 4  ;;  %v325_v0 = vld [vmem:[#allocation2 + $0x70] sm:$0xff] }
 0x1d7   :  { %12950 = vst [vmem:[#allocation60_spill] sm:$0xff] %v9198_v58  ;;  %12951 = vst [vmem:[#allocation61_spill] sm:$0xff] %v9205_v8  ;;  %v1121_v48 = vmul.f32 %v8837_v28, %v9064_v11  ;;  %v1394_v23 = vsel %vm523_vm4, %v1392_v13, %v1393_v4  ;;  %v9214_v58 = vrot.slane %v356_v41, %v8703_v60 }
 0x1d8   :  { %v9217_v29 = vrot.slane %v356_v41, %v8709_v1  ;;  %v1055_v50 = vadd.f32 %v1033_v42, %v1003_v21  ;;  %v9221_v59 = vmul.f32 %v9189_v54, %v9074_v32  ;;  %v9224_v47 = vrot.slane %v356_v41, %v8689_v55 }
 0x1d9   :  { %12952 = vst [vmem:[#allocation62_spill] sm:$0xff] %v9214_v58  ;;  %v9227_v14 = vrot.slane %v356_v41, %v8665_v44  ;;  %v1337_v13 = vadd.f32 %v1301_v53, %v1245_v62  ;;  %v9231_v60 = vmul.f32 %v9189_v54, %v9153_v10  ;;  %v1428_v1 = vadd.f32 %v1394_v23, %v1336_v52 }
 0x1da   :  { %12953 = vst [vmem:[#allocation63_spill] sm:$0xff] %v9217_v29  ;;  %12954 = vst [vmem:[#allocation64_spill] sm:$0xff] %v9224_v47  ;;  %v1460_v28 = vrot.slane %v1444_v18, 3  ;;  %v1496_v42 = vmul.f32 %v8930_v16, %v9064_v11  ;;  %v9236_v32 = vrot.slane %v356_v41, %v8683_v51  ;;  %v1106_v21 = vadd.f32 %v1085_v9, %v1054_v26 }
 0x1db   :  { %12955 = vst [vmem:[#allocation65_spill] sm:$0xff] %v9227_v14  ;;  %12956 = vst [vmem:[#allocation66_spill] sm:$0xff] %v9231_v60  ;;  %v1137_v55 = vrot.slane %v1121_v48, 5  ;;  %v1173_v44 = vmul.f32 %v8848_v56, %v9064_v11  ;;  %v9242_v53 = vmul.f32 %v9214_v58, %v9153_v10  ;;  %v9246_v62 = vmul.f32 %v9217_v29, %v9153_v10 }
 0x1dc   :  { %12957 = vst [vmem:[#allocation67_spill] sm:$0xff] %v9236_v32  ;;  %v9249_v52 = vrot.slane %v356_v41, %v8734_v15  ;;  %v1107_v18 = vadd.f32 %v1085_v9, %v1055_v50  ;;  %v2970_v23 = vmul.f32 %v9214_v58, %v325_v0  ;;  %v9253_v26 = vmul.f32 %v9214_v58, %v326_v63 }
 0x1dd   :  { %12958 = vst [vmem:[#allocation68_spill] sm:$0xff] %v9246_v62  ;;  %v3062_v48 = vmul.f32 %v9217_v29, %v325_v0  ;;  %v1429_v51 = vadd.f32 %v1393_v4, %v1337_v13  ;;  %v9257_v56 = vmul.f32 %v9217_v29, %v326_v63  ;;  %v1480_v60 = vadd.f32 %v1460_v28, %v1428_v1  ;;  %v337_v13 = vld [vmem:[#allocation2 + $0xd0] sm:$0xff] }
 0x1de   :  { %12959 = vst [vmem:[#allocation69_spill] sm:$0xff] %v9249_v52  ;;  %12960 = vst [vmem:[#allocation70_spill] sm:$0xff] %v9253_v26  ;;  %v1512_v14 = vrot.slane %v1496_v42, 4  ;;  %v1548_v47 = vmul.f32 %v8952_v45, %v9064_v11  ;;  %v9262_v15 = vrot.slane %v356_v41, %v8750_v27  ;;  %v9265_v9 = vrot.slane %v356_v41, %v8772_v57 }
 0x1df   :  { %12961 = vst [vmem:[#allocation71_spill] sm:$0xff] %v9257_v56  ;;  %v1158_v50 = vadd.f32 %v1137_v55, %v1106_v21  ;;  %v1189_v8 = vrot.slane %v1173_v44, 6  ;;  %v9269_v24 = vmul.f32 %v9236_v32, %v9153_v10  ;;  %v1159_v42 = vadd.f32 %v1137_v55, %v1107_v18 }
 0x1e0   :  { %12962 = vst [vmem:[#allocation72_spill] sm:$0xff] %v9262_v15  ;;  %12963 = vst [vmem:[#allocation73_spill] sm:$0xff] %v9265_v9  ;;  %v3003_v12 = vrot.slane %v2970_v23, 1  ;;  %v12724_v6 = vrot.slane %v9253_v26, 1  ;;  %v3095_v27 = vrot.slane %v3062_v48, 2  ;;  %v1481_v17 = vadd.f32 %v1460_v28, %v1429_v51 }
 0x1e1   :  { %12964 = vst [vmem:[#allocation74_spill] sm:$0xff] %v9269_v24  ;;  %v12725_v41 = vrot.slane %v9257_v56, 2  ;;  %v1532_v57 = vadd.f32 %v1512_v14, %v1480_v60  ;;  %v1564_v21 = vrot.slane %v1548_v47, 5  ;;  %v1600_v44 = vmul.f32 %v8956_v61, %v9064_v11  ;;  %v339_v60 = vld [vmem:[#allocation2 + $0xe0] sm:$0xff]  ;;  %v9298_v47 = vld [vmem:[%s12632_s5 + $0x30] ss:$0 sm:$0xff] }
 0x1e2   :  { %v9278_v10 = vmul.f32 %v9236_v32, %v325_v0  ;;  %v9281_v4 = vmul.f32 %v9249_v52, %v326_v63  ;;  %v1210_v1 = vadd.f32 %v1189_v8, %v1158_v50  ;;  %v1230_v55 = vmul.f32 %v8868_v46, %v337_v13  ;;  %12971 = vst [vmem:[#allocation81_spill] sm:$0xff] %v9298_v47 }
 0x1e3   :  { %v9285_v18 = vmul.f32 %v9236_v32, %v326_v63  ;;  %v9288_v51 = vmul.f32 %v9262_v15, %v326_v63  ;;  %v9290_v28 = vadd.f32 %v1189_v8, %v1159_v42  ;;  %v9293_v11 = vmul.f32 %v8864_v19, %v337_v13 }
 0x1e4   :  { %12965 = vst [vmem:[#allocation75_spill] sm:$0xff] %v9278_v10  ;;  %12966 = vst [vmem:[#allocation76_spill] sm:$0xff] %v9281_v4  ;;  %v9303_v0 = vsel %vm430_vm3, %v3003_v12, %v12724_v6  ;;  %v9306_v23 = vmul.f32 %v9265_v9, %v326_v63  ;;  %v9309_v48 = vmul.f32 %v8908_v38, %v337_v13  ;;  %v1616_v26 = vrot.slane %v1600_v44, 6 }
 0x1e5   :  { %12967 = vst [vmem:[#allocation77_spill] sm:$0xff] %v9285_v18  ;;  %12968 = vst [vmem:[#allocation78_spill] sm:$0xff] %v9288_v51  ;;  %v1533_v8 = vadd.f32 %v1512_v14, %v1481_v17  ;;  %v9314_v50 = vsel %vm523_vm4, %v3095_v27, %v12725_v41  ;;  %v9317_v42 = vmul.f32 %v9298_v47, %v326_v63 }
 0x1e6   :  { %12969 = vst [vmem:[#allocation79_spill] sm:$0xff] %v9290_v28  ;;  %12970 = vst [vmem:[#allocation80_spill] sm:$0xff] %v9293_v11  ;;  %v1584_v10 = vadd.f32 %v1564_v21, %v1532_v57  ;;  %v9320_v6 = vadd.f32 %v1230_v55, %v1210_v1  ;;  %v9326_v17 = vmul.f32 %v8991_v20, %v339_v60  ;;  %v346_v11 = vld [vmem:[#allocation2 + $0x118] sm:$0x7f] }
 0x1e7   :  { %12972 = vst [vmem:[#allocation82_spill] sm:$0xff] %v9303_v0  ;;  %12973 = vst [vmem:[#allocation83_spill] sm:$0xff] %v9306_v23  ;;  %v9323_v0 = vmul.f32 %v8991_v20, %v337_v13  ;;  %v9331_v63 = vmul.f32 %v9008_v22, %v337_v13  ;;  %v1585_v1 = vadd.f32 %v1564_v21, %v1533_v8 }
 0x1e8   :  { %12974 = vst [vmem:[#allocation84_spill] sm:$0xff] %v9309_v48  ;;  %12975 = vst [vmem:[#allocation85_spill] sm:$0xff] %v9314_v50  ;;  %v9336_v55 = vmul.f32 %v9008_v22, %v339_v60  ;;  %v341_v50 = vld [vmem:[#allocation2 + $0xf0] sm:$0xff]  ;;  %v1656_v27 = vmul.f32 %v8964_v40, %v337_v13  ;;  %v9343_v57 = vmul.f32 %v9060_v33, %v339_v60 }
 0x1e9   :  { %12976 = vst [vmem:[#allocation86_spill] sm:$0xff] %v9317_v42  ;;  %12977 = vst [vmem:[#allocation87_spill] sm:$0xff] %v9320_v6  ;;  %v9346_v21 = vmul.f32 %v9072_v25, %v339_v60  ;;  %v9352_v13 = vmul.f32 %v8964_v40, %v339_v60  ;;  %v9356_v6 = vmul.f32 %v9060_v33, %v341_v50  ;;  %v345_v48 = vld [vmem:[#allocation2 + $0x110] sm:$0xff] }
 0x1ea   :  { %12978 = vst [vmem:[#allocation88_spill] sm:$0xff] %v9323_v0  ;;  %12979 = vst [vmem:[#allocation89_spill] sm:$0xff] %v9326_v17 }
 0x1eb   :  { %12980 = vst [vmem:[#allocation90_spill] sm:$0xff] %v9331_v63  ;;  %12981 = vst [vmem:[#allocation91_spill] sm:$0xff] %v9336_v55  ;;  %v343_v55 = vld [vmem:[#allocation2 + $0x100] sm:$0xff] }
 0x1ec   :  { %12982 = vst [vmem:[#allocation92_spill] sm:$0xff] %v9343_v57  ;;  %12983 = vst [vmem:[#allocation93_spill] sm:$0xff] %v9346_v21  ;;  %v9382_v57 = vmul.f32 %v9144_v34, %v341_v50  ;;  %v9408_v42 = vmul.f32 %v9214_v58, %v343_v55 }
 0x1ed   :  { %12985 = vst [vmem:[#allocation95_spill] sm:$0xff] %v9352_v13  ;;  %12986 = vst [vmem:[#allocation96_spill] sm:$0xff] %v9356_v6 }
 0x1ee   :  { %13001 = vst [vmem:[#allocation106_spill] sm:$0xff] %v9408_v42 }
 0x212   :  { %v202_v18 = vpop.xlane.xlu0 %201 }
 0x213   :  { %v212_v14 = vmul.f32 0.03125, %v202_v18  ;;  %v1636_v18 = vadd.f32 %v1616_v26, %v1584_v10  ;;  %v9349_v10 = vadd.f32 %v1616_v26, %v1585_v1  ;;  %v9367_v26 = vmul.f32 %v9084_v37, %v341_v50 }
 0x215   :  { %v216_v12 = vadd.f32 1e-06, %v212_v14  ;;  %12984 = vst [vmem:[#allocation94_spill] sm:$0xff] %v9349_v10  ;;  %v9358_v0 = vadd.f32 %v1656_v27, %v1636_v18  ;;  %12990 = vst [vmem:[#allocation100_spill] sm:$0xff] %v9367_v26  ;;  %v12992_v18 = vld [vmem:[#allocation29_spill] sm:$0xff]  ;;  %v9411_v10 = vmul.f32 %v9217_v29, %v343_v55 }
 0x216   :  { %v208_v51 = vpop.xlane.xlu1 %207  ;;  %v205_v41 = vpop.xlane.xlu0 %204  ;;  %12994 = vst [vmem:[#allocation29_spill] sm:$0xff] %v9382_v57 }
 0x217   :  { %8316 = vrsqrt.f32 %v216_v12  ;;  %v214_v8 = vmul.f32 0.03125, %v208_v51  ;;  %v213_v14 = vmul.f32 0.03125, %v205_v41  ;;  %12987 = vst [vmem:[#allocation97_spill] sm:$0xff] %v9358_v0  ;;  %v9361_v12 = vmul.f32 %v9072_v25, %v341_v50  ;;  %13002 = vst [vmem:[#allocation107_spill] sm:$0xff] %v9411_v10 }
 0x218   :  { %v9364_v51 = vmul.f32 %v9084_v37, %v339_v60  ;;  %v12996_v60 = vld [vmem:[#allocation15_spill] sm:$0xff]  ;;  %v9392_v0 = vmul.f32 %v9144_v34, %v343_v55 }
 0x219   :  { %v218_v44 = vadd.f32 1e-06, %v214_v8  ;;  %v217_v17 = vadd.f32 1e-06, %v213_v14  ;;  %12988 = vst [vmem:[#allocation98_spill] sm:$0xff] %v9361_v12  ;;  %v12991_v8 = vld [vmem:[#allocation12_spill] sm:$0xff]  ;;  %v495_v6 = vmul.f32 %v12996_v60, %v8802_v30  ;;  %v496_v26 = vmul.f32 %v12996_v60, %v12992_v18 }
 0x21a   :  { %v211_v41 = vpop.xlane.xlu1 %210  ;;  %12989 = vst [vmem:[#allocation99_spill] sm:$0xff] %v9364_v51  ;;  %v402_v27 = vmul.f32 %v12991_v8, %v8802_v30  ;;  %v403_v14 = vmul.f32 %v12991_v8, %v12992_v18  ;;  %v12993_v51 = vld [vmem:[#allocation16_spill] sm:$0xff]  ;;  %12997 = vst [vmem:[#allocation102_spill] sm:$0xff] %v9392_v0 }
 0x21b   :  { %8318 = vrsqrt.f32 %v218_v44  ;;  %v215_v4 = vmul.f32 0.03125, %v211_v41  ;;  %v366_v63 = vmul.f32 %v12993_v51, %v8802_v30  ;;  %v367_v1 = vmul.f32 %v12993_v51, %v12992_v18 }
 0x21c   :  { %8320 = vrsqrt.f32 %v217_v17  ;;  %v437_v41 = vrot.slane %v402_v27, 1  ;;  %v438_v21 = vrot.slane %v403_v14, 1  ;;  %v9385_v17 = vmul.f32 %v9147_v3, %v341_v50 }
 0x21d   :  { %v219_v56 = vadd.f32 1e-06, %v215_v4  ;;  %v9395_v4 = vmul.f32 %v9147_v3, %v343_v55  ;;  %v9399_v14 = vmul.f32 %v9189_v54, %v341_v50  ;;  %v9402_v44 = vmul.f32 %v9189_v54, %v343_v55  ;;  %v7951_v50 = vld [vmem:[%s12631_s4] ss:$0 sm:$0xff] }
 0x21e   :  { %12995 = vst [vmem:[#allocation101_spill] sm:$0xff] %v9385_v17  ;;  %v439_v27 = vsel %vm430_vm3, %v437_v41, %v438_v21  ;;  %v476_v30 = vadd.f32 %v438_v21, %v367_v1  ;;  %v530_v41 = vrot.slane %v495_v6, 2  ;;  %v531_v23 = vrot.slane %v496_v26, 2  ;;  %v13005_v26 = vld [vmem:[#allocation35_spill] sm:$0xff]  ;;  %v13008_v6 = vld [vmem:[#allocation20_spill] sm:$0xff]  ;;  %v13011_v1 = vld [vmem:[#allocation6_spill] sm:$0xff] }
 0x21f   :  { %8322 = vrsqrt.f32 %v219_v56  ;;  %12998 = vst [vmem:[#allocation103_spill] sm:$0xff] %v9395_v4  ;;  %12999 = vst [vmem:[#allocation104_spill] sm:$0xff] %v9399_v14  ;;  %v475_v12 = vadd.f32 %v439_v27, %v366_v63  ;;  %v7950_v56 = vld [vmem:[%s12630_s3] ss:$0 sm:$0xff]  ;;  %v13004_v27 = vld [vmem:[#allocation19_spill] sm:$0xff]  ;;  %v9425_v47 = vmul.f32 %v12993_v51, %v13005_v26  ;;  %v638_v4 = vmul.f32 %v13008_v6, %v12992_v18 }
 0x220   :  { %13000 = vst [vmem:[#allocation105_spill] sm:$0xff] %v9402_v44  ;;  %v13003_v44 = vld [vmem:[#allocation7_spill] sm:$0xff]  ;;  %v586_v14 = vmul.f32 %v13004_v27, %v12992_v18  ;;  %v532_v62 = vsel %vm523_vm4, %v530_v41, %v531_v23  ;;  %v569_v21 = vadd.f32 %v531_v23, %v476_v30  ;;  %v9431_v27 = vmul.f32 %v9236_v32, %v343_v55  ;;  %v13016_v6 = vld [vmem:[#allocation9_spill] sm:$0xff] }
 0x221   :  { %v8317_v13 = vpop.eup %8316  ;;  %13006 = vst [vmem:[#allocation7_spill] sm:$0xff] %v9425_v47  ;;  %v568_v57 = vadd.f32 %v532_v62, %v475_v12  ;;  %v13009_v47 = vld [vmem:[#allocation10_spill] sm:$0xff]  ;;  %v2978_v41 = vmul.f32 %v9214_v58, %v345_v48  ;;  %v9442_v30 = vmul.f32 %v9236_v32, %v345_v48  ;;  %v9445_v62 = vmul.f32 %v9236_v32, %v346_v11 }
 0x222   :  { %v224_v63 = vmul.f32 %v8317_v13, %v13003_v44  ;;  %13007 = vst [vmem:[#allocation35_spill] sm:$0xff] %v9431_v27  ;;  %v602_v28 = vrot.slane %v586_v14, 3  ;;  %v3070_v44 = vmul.f32 %v9217_v29, %v345_v48 }
 0x223   :  { %13012 = vst [vmem:[#allocation6_spill] sm:$0xff] %v9442_v30  ;;  %13013 = vst [vmem:[#allocation108_spill] sm:$0xff] %v9445_v62  ;;  %v3015_v14 = vrot.slane %v2978_v41, 1  ;;  %v654_v41 = vrot.slane %v638_v4, 4 }
 0x224   :  { %v234_v13 = vmul.f32 %v7950_v56, %v224_v63  ;;  %v9438_v63 = vmul.f32 %v9214_v58, %v346_v11  ;;  %v620_v55 = vadd.f32 %v602_v28, %v568_v57  ;;  %v621_v62 = vadd.f32 %v602_v28, %v569_v21 }
 0x225   :  { %v8319_v17 = vpop.eup %8318  ;;  %v9477_v28 = vmul.f32 %v12996_v60, %v13005_v26 }
 0x226   :  { %v8321_v0 = vpop.eup %8320  ;;  %v244_v51 = vadd.f32 %v7951_v50, %v234_v13  ;;  %v226_v24 = vmul.f32 %v8319_v17, %v13009_v47  ;;  %13010 = vst [vmem:[#allocation10_spill] sm:$0xff] %v9438_v63 }
 0x227   :  { %v225_v23 = vmul.f32 %v8321_v0, %v13011_v1  ;;  %v9451_v0 = vmul.f32 %v9217_v29, %v346_v11  ;;  %v9455_v1 = vmul.f32 %v12991_v8, %v13005_v26  ;;  %v13018_v8 = vrot.slane %v9438_v63, 1  ;;  %13021 = vst [vmem:[#allocation113_spill] sm:$0xff] %v9477_v28 }
 0x228   :  { %v293_v12 = vcombine.high %v244_v51, %v244_v51  ;;  %303 = vst.msk [vmem:[#allocation2 + $0x38] sm:$0xf] %vm302_vm5, %v244_v51  ;;  %v236_v18 = vmul.f32 %v7950_v56, %v226_v24  ;;  %v9460_v24 = vmul.f32 %v9249_v52, %v346_v11 }
 0x229   :  { %v8323_v17 = vpop.eup %8322  ;;  %v235_v13 = vmul.f32 %v7950_v56, %v225_v23  ;;  %13014 = vst [vmem:[#allocation109_spill] sm:$0xff] %v9451_v0  ;;  %13015 = vst [vmem:[#allocation110_spill] sm:$0xff] %v9455_v1  ;;  %v3107_v23 = vrot.slane %v3070_v44, 2  ;;  %v12753_v48 = vrot.slane %v9451_v0, 2 }
 0x22a   :  { %304 = vst.msk [vmem:[#allocation2 + $0x48] sm:$0xf] %vm302_vm5, %v293_v12  ;;  %v246_v57 = vadd.f32 %v7951_v50, %v236_v18  ;;  %v227_v51 = vmul.f32 %v8323_v17, %v13016_v6  ;;  %13017 = vst [vmem:[#allocation9_spill] sm:$0xff] %v9460_v24  ;;  %v9467_v12 = vsel %vm430_vm3, %v3015_v14, %v13018_v8  ;;  %v13032_v24 = vld [vmem:[#allocation39_spill] sm:$0xff] }
 0x22b   :  { %v245_v47 = vadd.f32 %v7951_v50, %v235_v13  ;;  %13019 = vst [vmem:[#allocation111_spill] sm:$0xff] %v9467_v12  ;;  %v9470_v6 = vmul.f32 %v9262_v15, %v346_v11  ;;  %v9483_v8 = vsel %vm523_vm4, %v3107_v23, %v12753_v48  ;;  %v9486_v14 = vadd.f32 %v654_v41, %v620_v55 }
 0x22c   :  { %v295_v30 = vcombine.high %v246_v57, %v246_v57  ;;  %307 = vst.msk [vmem:[#allocation2 + $0xd8] sm:$0xf] %vm302_vm5, %v246_v57  ;;  %v237_v27 = vmul.f32 %v7950_v56, %v227_v51  ;;  %13022 = vst [vmem:[#allocation114_spill] sm:$0xff] %v9483_v8  ;;  %v9492_v17 = vmul.f32 %v9265_v9, %v346_v11  ;;  %v13033_v60 = vrot.slane %v13032_v24, 2  ;;  %v13036_v8 = vld [vmem:[#allocation40_spill] sm:$0xff] }
 0x22d   :  { %13020 = vst [vmem:[#allocation112_spill] sm:$0xff] %v9470_v6  ;;  %v294_v18 = vcombine.high %v245_v47, %v245_v47  ;;  %305 = vst.msk [vmem:[#allocation2 + $0x58] sm:$0xf] %vm302_vm5, %v245_v47  ;;  %v13037_v63 = vrot.slane %v13036_v8, 1  ;;  %v13042_v8 = vld [vmem:[#allocation43_spill] sm:$0xff] }
 0x22e   :  { %308 = vst.msk [vmem:[#allocation2 + $0xe8] sm:$0xf] %vm302_vm5, %v295_v30  ;;  %v247_v56 = vadd.f32 %v7951_v50, %v237_v27  ;;  %13023 = vst [vmem:[#allocation115_spill] sm:$0xff] %v9486_v14  ;;  %v9495_v30 = vadd.f32 %v654_v41, %v621_v62  ;;  %v8374_v50 = vld [vmem:[#allocation2 + $0x28] sm:$0x7f] }
 0x22f   :  { %v9488_v47 = vld [vmem:[#allocation2 + $0x38] sm:$0x7f]  ;;  %306 = vst.msk [vmem:[#allocation2 + $0x68] sm:$0xf] %vm302_vm5, %v294_v18  ;;  %13025 = vst [vmem:[#allocation117_spill] sm:$0xff] %v9492_v17  ;;  %v13027_v27 = vld [vmem:[#allocation22_spill] sm:$0xff] }
 0x230   :  { %13024 = vst [vmem:[#allocation116_spill] sm:$0xff] %v9488_v47  ;;  %13026 = vst [vmem:[#allocation118_spill] sm:$0xff] %v9495_v30  ;;  %v9498_v13 = vmul.f32 %v8374_v50, %v13027_v27  ;;  %v296_v57 = vcombine.high %v247_v56, %v247_v56  ;;  %v1223_v55 = vmul.f32 %v8868_v46, %v9488_v47  ;;  %v13029_v50 = vld [vmem:[#allocation37_spill] sm:$0xff]  ;;  %v13030_v27 = vld [vmem:[#allocation36_spill] sm:$0xff] }
 0x231   :  { %309 = vst.msk [vmem:[#allocation2 + $0xf8] sm:$0xf] %vm302_vm5, %v247_v56  ;;  %v1259_v51 = vmul.f32 %v8864_v19, %v9488_v47  ;;  %v1351_v11 = vmul.f32 %v8908_v38, %v9488_v47  ;;  %v9507_v23 = vld [vmem:[#allocation2 + $0x48] sm:$0x7f]  ;;  %v1441_v62 = vmul.f32 %v8922_v7, %v9488_v47  ;;  %v1493_v41 = vmul.f32 %v8930_v16, %v9488_v47 }
 0x232   :  { %13028 = vst [vmem:[#allocation119_spill] sm:$0xff] %v9498_v13  ;;  %v1545_v18 = vmul.f32 %v8952_v45, %v9488_v47  ;;  %v1597_v56 = vmul.f32 %v8956_v61, %v9488_v47  ;;  %310 = vst.msk [vmem:[#allocation2 + $0x108] sm:$0xf] %vm302_vm5, %v296_v57  ;;  %v1239_v26 = vadd.f32 %v1223_v55, %v13029_v50  ;;  %v13031_v28 = vrot.slane %v13030_v27, 1 }
 0x233   :  { %v1292_v21 = vrot.slane %v1259_v51, 1  ;;  %v1384_v44 = vrot.slane %v1351_v11, 2  ;;  %v1649_v4 = vmul.f32 %v8964_v40, %v9488_v47  ;;  %v1457_v48 = vrot.slane %v1441_v62, 3  ;;  %v13034_v51 = vld [vmem:[#allocation38_spill] sm:$0xff] }
 0x234   :  { %v1509_v30 = vrot.slane %v1493_v41, 4  ;;  %v1561_v14 = vrot.slane %v1545_v18, 5  ;;  %v1613_v13 = vrot.slane %v1597_v56, 6  ;;  %v1651_v55 = vmul.f32 %v8964_v40, %v9507_v23 }
 0x235   :  { %v1293_v6 = vsel %vm430_vm3, %v13031_v28, %v1292_v21  ;;  %v1331_v1 = vadd.f32 %v1292_v21, %v1239_v26  ;;  %v1385_v57 = vsel %vm523_vm4, %v13033_v60, %v1384_v44  ;;  %v1665_v50 = vadd.f32 %v1649_v4, %v9090_v31 }
 0x236   :  { %v1330_v11 = vadd.f32 %v1293_v6, %v13034_v51  ;;  %v1685_v62 = vmul.f32 %v8991_v20, %v9488_v47  ;;  %v1687_v27 = vmul.f32 %v8991_v20, %v9507_v23  ;;  %v1777_v28 = vmul.f32 %v9008_v22, %v9488_v47 }
 0x237   :  { %v1423_v41 = vadd.f32 %v1384_v44, %v1331_v1  ;;  %v1779_v60 = vmul.f32 %v9008_v22, %v9507_v23  ;;  %v1868_v24 = vmul.f32 %v9039_v5, %v9488_v47  ;;  %v9543_v31 = vmul.f32 %v9039_v5, %v9507_v23 }
 0x238   :  { %v1422_v21 = vadd.f32 %v1385_v57, %v1330_v11  ;;  %v1717_v6 = vrot.slane %v1685_v62, 1  ;;  %v1720_v26 = vrot.slane %v1687_v27, 1  ;;  %v1809_v18 = vrot.slane %v1777_v28, 2  ;;  %v13038_v27 = vld [vmem:[#allocation41_spill] sm:$0xff]  ;;  %v13040_v28 = vld [vmem:[#allocation42_spill] sm:$0xff] }
 0x239   :  { %v1475_v4 = vadd.f32 %v1457_v48, %v1423_v41  ;;  %v1812_v56 = vrot.slane %v1779_v60, 2  ;;  %v1884_v1 = vrot.slane %v1868_v24, 3  ;;  %v13035_v51 = vrot.slane %v9018_v35, 1 }
 0x23a   :  { %v1474_v44 = vadd.f32 %v1457_v48, %v1422_v21  ;;  %v1721_v12 = vsel %vm430_vm3, %v13037_v63, %v1720_v26  ;;  %v1757_v57 = vadd.f32 %v1717_v6, %v1665_v50  ;;  %v13039_v17 = vrot.slane %v13038_v27, 2 }
 0x23b   :  { %v1718_v0 = vsel %vm430_vm3, %v13035_v51, %v1717_v6  ;;  %v1527_v11 = vadd.f32 %v1509_v30, %v1475_v4  ;;  %v13041_v60 = vrot.slane %v13040_v28, 2  ;;  %v1885_v21 = vrot.slane %v9543_v31, 3 }
 0x23c   :  { %v1756_v62 = vadd.f32 %v1718_v0, %v9126_v2  ;;  %v1810_v41 = vsel %vm523_vm4, %v13039_v17, %v1809_v18  ;;  %v1526_v24 = vadd.f32 %v1509_v30, %v1474_v44  ;;  %v1849_v35 = vadd.f32 %v1809_v18, %v1757_v57  ;;  %v13043_v0 = vld [vmem:[#allocation44_spill] sm:$0xff] }
 0x23d   :  { %v1813_v48 = vsel %vm523_vm4, %v13041_v60, %v1812_v56  ;;  %v1920_v51 = vmul.f32 %v13042_v8, %v9488_v47  ;;  %v1579_v63 = vadd.f32 %v1561_v14, %v1527_v11  ;;  %v1921_v2 = vmul.f32 %v13042_v8, %v9507_v23  ;;  %v9567_v18 = vld [vmem:[#allocation2 + $0x58] sm:$0x7f] }
 0x23e   :  { %v1848_v50 = vadd.f32 %v1810_v41, %v1756_v62  ;;  %v1972_v6 = vmul.f32 %v13043_v0, %v9488_v47  ;;  %v1578_v17 = vadd.f32 %v1561_v14, %v1526_v24  ;;  %v1901_v4 = vadd.f32 %v1884_v1, %v1849_v35  ;;  %v13044_v60 = vld [vmem:[#allocation45_spill] sm:$0xff]  ;;  %v13045_v35 = vld [vmem:[#allocation46_spill] sm:$0xff] }
 0x23f   :  { %v1936_v27 = vrot.slane %v1920_v51, 4  ;;  %v1973_v30 = vmul.f32 %v13043_v0, %v9507_v23  ;;  %v1631_v31 = vadd.f32 %v1613_v13, %v1579_v63  ;;  %v1937_v57 = vrot.slane %v1921_v2, 4 }
 0x240   :  { %v1900_v44 = vadd.f32 %v1884_v1, %v1848_v50  ;;  %v1988_v28 = vrot.slane %v1972_v6, 5  ;;  %v1630_v11 = vadd.f32 %v1613_v13, %v1578_v17  ;;  %v2024_v10 = vmul.f32 %v13044_v60, %v9488_v47 }
 0x241   :  { %v1953_v62 = vadd.f32 %v1936_v27, %v1901_v4  ;;  %v1989_v41 = vrot.slane %v1973_v30, 5  ;;  %v1667_v42 = vadd.f32 %v1651_v55, %v1631_v31  ;;  %v2025_v14 = vmul.f32 %v13044_v60, %v9507_v23 }
 0x242   :  { %v1952_v8 = vadd.f32 %v1936_v27, %v1900_v44  ;;  %v2077_v24 = vmul.f32 %v9084_v37, %v9507_v23  ;;  %v1666_v51 = vadd.f32 %v13045_v35, %v1630_v11  ;;  %v2040_v1 = vrot.slane %v2024_v10, 6 }
 0x243   :  { %v2005_v63 = vadd.f32 %v1988_v28, %v1953_v62  ;;  %v2079_v13 = vmul.f32 %v9084_v37, %v9567_v18  ;;  %v1759_v50 = vadd.f32 %v1720_v26, %v1667_v42  ;;  %v2041_v6 = vrot.slane %v2025_v14, 6 }
 0x244   :  { %v2004_v2 = vadd.f32 %v1988_v28, %v1952_v8  ;;  %v2113_v55 = vmul.f32 %v9060_v33, %v9507_v23  ;;  %v1758_v17 = vadd.f32 %v1721_v12, %v1666_v51  ;;  %v2115_v27 = vmul.f32 %v9060_v33, %v9567_v18 }
 0x245   :  { %v2057_v4 = vadd.f32 %v2040_v1, %v2005_v63  ;;  %v2205_v30 = vmul.f32 %v9072_v25, %v9507_v23  ;;  %v1851_v31 = vadd.f32 %v1812_v56, %v1759_v50  ;;  %v2207_v11 = vmul.f32 %v9072_v25, %v9567_v18 }
 0x246   :  { %v2056_v44 = vadd.f32 %v2040_v1, %v2004_v2  ;;  %v2145_v10 = vrot.slane %v2113_v55, 1  ;;  %v1850_v42 = vadd.f32 %v1813_v48, %v1758_v17  ;;  %v2148_v8 = vrot.slane %v2115_v27, 1  ;;  %v13048_v2 = vld [vmem:[#allocation47_spill] sm:$0xff] }
 0x247   :  { %v2093_v26 = vadd.f32 %v2077_v24, %v2057_v4  ;;  %v2237_v28 = vrot.slane %v2205_v30, 2  ;;  %v1903_v62 = vadd.f32 %v1885_v21, %v1851_v31  ;;  %v13046_v14 = vrot.slane %v9094_v39, 1  ;;  %v13050_v4 = vld [vmem:[#allocation48_spill] sm:$0xff]  ;;  %v13052_v39 = vld [vmem:[#allocation49_spill] sm:$0xff] }
 0x248   :  { %v2092_v12 = vadd.f32 %v9161_v36, %v2056_v44  ;;  %v2240_v51 = vrot.slane %v2207_v11, 2  ;;  %v1902_v63 = vadd.f32 %v1885_v21, %v1850_v42  ;;  %v13047_v56 = vrot.slane %v9098_v43, 1  ;;  %v13053_v44 = vld [vmem:[#allocation50_spill] sm:$0xff] }
 0x249   :  { %v2146_v35 = vsel %vm430_vm3, %v13046_v14, %v2145_v10  ;;  %v2185_v50 = vadd.f32 %v2145_v10, %v2093_v26  ;;  %v13049_v55 = vrot.slane %v13048_v2, 2  ;;  %v1955_v24 = vadd.f32 %v1937_v57, %v1903_v62 }
 0x24a   :  { %v2149_v1 = vsel %vm430_vm3, %v13047_v56, %v2148_v8  ;;  %v2184_v17 = vadd.f32 %v2146_v35, %v2092_v12  ;;  %v13051_v27 = vrot.slane %v13050_v4, 2  ;;  %v2296_v30 = vmul.f32 %v13052_v39, %v9507_v23  ;;  %v13054_v56 = vld [vmem:[#allocation51_spill] sm:$0xff] }
 0x24b   :  { %v2238_v48 = vsel %vm523_vm4, %v13049_v55, %v2237_v28  ;;  %v1954_v31 = vadd.f32 %v1937_v57, %v1902_v63  ;;  %v2277_v21 = vadd.f32 %v2237_v28, %v2185_v50  ;;  %v2297_v43 = vmul.f32 %v13052_v39, %v9567_v18 }
 0x24c   :  { %v2241_v36 = vsel %vm523_vm4, %v13051_v27, %v2240_v51  ;;  %v2348_v10 = vmul.f32 %v13053_v44, %v9507_v23  ;;  %v2007_v11 = vadd.f32 %v1989_v41, %v1955_v24  ;;  %v2276_v42 = vadd.f32 %v2238_v48, %v2184_v17  ;;  %v13055_v48 = vld [vmem:[#allocation54_spill] sm:$0xff] }
 0x24d   :  { %v2312_v26 = vrot.slane %v2296_v30, 3  ;;  %v2349_v62 = vmul.f32 %v13053_v44, %v9567_v18  ;;  %v2006_v12 = vadd.f32 %v1989_v41, %v1954_v31  ;;  %v2313_v14 = vrot.slane %v2297_v43, 3  ;;  %v9613_v27 = vld [vmem:[#allocation2 + $0x68] sm:$0x7f] }
 0x24e   :  { %v2364_v35 = vrot.slane %v2348_v10, 4  ;;  %v2400_v2 = vmul.f32 %v13054_v56, %v9507_v23  ;;  %v2059_v57 = vadd.f32 %v2041_v6, %v2007_v11  ;;  %v2401_v4 = vmul.f32 %v13054_v56, %v9567_v18 }
 0x24f   :  { %v2328_v28 = vadd.f32 %v2312_v26, %v2276_v42  ;;  %v2329_v63 = vadd.f32 %v2312_v26, %v2277_v21  ;;  %v2365_v50 = vrot.slane %v2349_v62, 4  ;;  %v2058_v55 = vadd.f32 %v2041_v6, %v2006_v12 }
 0x250   :  { %v2416_v24 = vrot.slane %v2400_v2, 5  ;;  %v2452_v17 = vmul.f32 %v13055_v48, %v9507_v23  ;;  %v2095_v41 = vadd.f32 %v2079_v13, %v2059_v57  ;;  %v2453_v43 = vmul.f32 %v13055_v48, %v9567_v18 }
 0x251   :  { %v2380_v30 = vadd.f32 %v2364_v35, %v2328_v28  ;;  %v2381_v31 = vadd.f32 %v2364_v35, %v2329_v63  ;;  %v2094_v10 = vadd.f32 %v9186_v49, %v2058_v55  ;;  %v2417_v21 = vrot.slane %v2401_v4, 5 }
 0x252   :  { %v2468_v11 = vrot.slane %v2452_v17, 6  ;;  %v2505_v6 = vmul.f32 %v9189_v54, %v9567_v18  ;;  %v2187_v42 = vadd.f32 %v2148_v8, %v2095_v41  ;;  %v2469_v12 = vrot.slane %v2453_v43, 6  ;;  %v13056_v43 = vld [vmem:[#allocation55_spill] sm:$0xff] }
 0x253   :  { %v2432_v26 = vadd.f32 %v2416_v24, %v2380_v30  ;;  %v2433_v62 = vadd.f32 %v2416_v24, %v2381_v31  ;;  %v2186_v23 = vadd.f32 %v2149_v1, %v2094_v10  ;;  %v2507_v13 = vmul.f32 %v9189_v54, %v9613_v27 }
 0x254   :  { %v2541_v35 = vmul.f32 %v9144_v34, %v9567_v18  ;;  %v2543_v2 = vmul.f32 %v9144_v34, %v9613_v27  ;;  %v2279_v49 = vadd.f32 %v2240_v51, %v2187_v42  ;;  %v2633_v63 = vmul.f32 %v9147_v3, %v9567_v18 }
 0x255   :  { %v2484_v57 = vadd.f32 %v2468_v11, %v2432_v26  ;;  %v2485_v28 = vadd.f32 %v2468_v11, %v2433_v62  ;;  %v2278_v8 = vadd.f32 %v2241_v36, %v2186_v23  ;;  %v2635_v1 = vmul.f32 %v9147_v3, %v9613_v27  ;;  %v13058_v11 = vld [vmem:[#allocation57_spill] sm:$0xff] }
 0x256   :  { %v2573_v55 = vrot.slane %v2541_v35, 1  ;;  %v2576_v4 = vrot.slane %v2543_v2, 1  ;;  %v2331_v24 = vadd.f32 %v2313_v14, %v2279_v49  ;;  %v2665_v30 = vrot.slane %v2633_v63, 2  ;;  %v13060_v2 = vld [vmem:[#allocation56_spill] sm:$0xff] }
 0x257   :  { %v2520_v17 = vadd.f32 %v9221_v59, %v2484_v57  ;;  %v2521_v41 = vadd.f32 %v2505_v6, %v2485_v28  ;;  %v2330_v31 = vadd.f32 %v2313_v14, %v2278_v8  ;;  %v13057_v10 = vrot.slane %v13056_v43, 1  ;;  %v13062_v6 = vld [vmem:[#allocation59_spill] sm:$0xff]  ;;  %v13064_v28 = vld [vmem:[#allocation60_spill] sm:$0xff] }
 0x258   :  { %v13059_v42 = vrot.slane %v13058_v11, 1  ;;  %v2668_v36 = vrot.slane %v2635_v1, 2  ;;  %v2383_v62 = vadd.f32 %v2365_v50, %v2331_v24  ;;  %v13061_v47 = vrot.slane %v13060_v2, 2  ;;  %v13066_v11 = vld [vmem:[#allocation64_spill] sm:$0xff] }
 0x259   :  { %v2574_v51 = vsel %vm430_vm3, %v13057_v10, %v2573_v55  ;;  %v2613_v35 = vadd.f32 %v2573_v55, %v2521_v41  ;;  %v2382_v59 = vadd.f32 %v2365_v50, %v2330_v31  ;;  %v13063_v57 = vrot.slane %v13062_v6, 2  ;;  %v13065_v55 = vld [vmem:[#allocation61_spill] sm:$0xff] }
 0x25a   :  { %v2577_v26 = vsel %vm430_vm3, %v13059_v42, %v2576_v4  ;;  %v2612_v23 = vadd.f32 %v2574_v51, %v2520_v17  ;;  %v2666_v49 = vsel %vm523_vm4, %v13061_v47, %v2665_v30  ;;  %v2724_v63 = vmul.f32 %v13064_v28, %v9567_v18 }
 0x25b   :  { %v2669_v14 = vsel %vm523_vm4, %v13063_v57, %v2668_v36  ;;  %v2725_v8 = vmul.f32 %v13064_v28, %v9613_v27  ;;  %v2435_v43 = vadd.f32 %v2417_v21, %v2383_v62  ;;  %v2705_v24 = vadd.f32 %v2665_v30, %v2613_v35 }
 0x25c   :  { %v2704_v1 = vadd.f32 %v2666_v49, %v2612_v23  ;;  %v2776_v17 = vmul.f32 %v13065_v55, %v9567_v18  ;;  %v2434_v41 = vadd.f32 %v2417_v21, %v2382_v59  ;;  %v2740_v10 = vrot.slane %v2724_v63, 3  ;;  %v13067_v59 = vld [vmem:[#allocation65_spill] sm:$0xff]  ;;  %v13068_v63 = vld [vmem:[#allocation66_spill] sm:$0xff] }
 0x25d   :  { %v2741_v47 = vrot.slane %v2725_v8, 3  ;;  %v2777_v50 = vmul.f32 %v13065_v55, %v9613_v27  ;;  %v2487_v31 = vadd.f32 %v2469_v12, %v2435_v43  ;;  %v2828_v42 = vmul.f32 %v13066_v11, %v9567_v18 }
 0x25e   :  { %v2792_v51 = vrot.slane %v2776_v17, 4  ;;  %v2829_v2 = vmul.f32 %v13066_v11, %v9613_v27  ;;  %v2486_v62 = vadd.f32 %v2469_v12, %v2434_v41  ;;  %v2756_v23 = vadd.f32 %v2740_v10, %v2704_v1 }
 0x25f   :  { %v2757_v30 = vadd.f32 %v2740_v10, %v2705_v24  ;;  %v2793_v35 = vrot.slane %v2777_v50, 4  ;;  %v2523_v49 = vadd.f32 %v2507_v13, %v2487_v31  ;;  %v2844_v6 = vrot.slane %v2828_v42, 5 }
 0x260   :  { %v2845_v21 = vrot.slane %v2829_v2, 5  ;;  %v2880_v57 = vmul.f32 %v13067_v59, %v9567_v18  ;;  %v2522_v8 = vadd.f32 %v13068_v63, %v2486_v62  ;;  %v2808_v43 = vadd.f32 %v2792_v51, %v2756_v23  ;;  %v9670_v23 = vld [vmem:[#allocation2 + $0xd8] sm:$0x7f] }
 0x261   :  { %v2809_v17 = vadd.f32 %v2792_v51, %v2757_v30  ;;  %v2881_v55 = vmul.f32 %v13067_v59, %v9613_v27  ;;  %v2615_v28 = vadd.f32 %v2576_v4, %v2523_v49  ;;  %v2933_v12 = vmul.f32 %v9236_v32, %v9613_v27 }
 0x262   :  { %v2896_v3 = vrot.slane %v2880_v57, 6  ;;  %v2969_v13 = vmul.f32 %v9214_v58, %v9613_v27  ;;  %v2614_v1 = vadd.f32 %v2577_v26, %v2522_v8  ;;  %v2860_v24 = vadd.f32 %v2844_v6, %v2808_v43  ;;  %v13071_v43 = vld [vmem:[#allocation68_spill] sm:$0xff] }
 0x263   :  { %v2861_v41 = vadd.f32 %v2844_v6, %v2809_v17  ;;  %v2897_v10 = vrot.slane %v2881_v55, 6  ;;  %v2707_v18 = vadd.f32 %v2668_v36, %v2615_v28  ;;  %v3061_v31 = vmul.f32 %v9217_v29, %v9613_v27  ;;  %v13070_v6 = vld [vmem:[#allocation74_spill] sm:$0xff] }
 0x264   :  { %v3001_v50 = vrot.slane %v2969_v13, 1  ;;  %v3152_v51 = vmul.f32 %v9249_v52, %v9613_v27  ;;  %v2706_v4 = vadd.f32 %v2669_v14, %v2614_v1  ;;  %v2912_v42 = vadd.f32 %v2896_v3, %v2860_v24  ;;  %v13073_v1 = vld [vmem:[#allocation81_spill] sm:$0xff] }
 0x265   :  { %v2913_v2 = vadd.f32 %v2896_v3, %v2861_v41  ;;  %v3204_v62 = vmul.f32 %v9262_v15, %v9613_v27  ;;  %v2759_v26 = vadd.f32 %v2741_v47, %v2707_v18  ;;  %v13069_v30 = vrot.slane %v9242_v53, 1 }
 0x266   :  { %v3093_v28 = vrot.slane %v3061_v31, 2  ;;  %v3168_v55 = vrot.slane %v3152_v51, 3  ;;  %v2758_v49 = vadd.f32 %v2741_v47, %v2706_v4  ;;  %v2948_v57 = vadd.f32 %v13070_v6, %v2912_v42 }
 0x267   :  { %v3002_v36 = vsel %vm430_vm3, %v13069_v30, %v3001_v50  ;;  %v2949_v63 = vadd.f32 %v2933_v12, %v2913_v2  ;;  %v3220_v8 = vrot.slane %v3204_v62, 4  ;;  %v2811_v14 = vadd.f32 %v2793_v35, %v2759_v26  ;;  %v13074_v26 = vld [vmem:[#allocation79_spill] sm:$0xff] }
 0x268   :  { %v13072_v3 = vrot.slane %v13071_v43, 2  ;;  %v3256_v13 = vmul.f32 %v9265_v9, %v9613_v27  ;;  %v3308_v53 = vmul.f32 %v13073_v1, %v9613_v27  ;;  %v2810_v24 = vadd.f32 %v2793_v35, %v2758_v49  ;;  %v13078_v1 = vld [vmem:[#allocation75_spill] sm:$0xff] }
 0x269   :  { %v3040_v41 = vadd.f32 %v3002_v36, %v2948_v57  ;;  %v3041_v18 = vadd.f32 %v3001_v50, %v2949_v63  ;;  %v1231_v47 = vmul.f32 %v8868_v46, %v9670_v23  ;;  %v2863_v31 = vadd.f32 %v2845_v21, %v2811_v14  ;;  %v13075_v57 = vld [vmem:[#allocation77_spill] sm:$0xff]  ;;  %v13076_v63 = vld [vmem:[#allocation80_spill] sm:$0xff] }
 0x26a   :  { %v3094_v17 = vsel %vm523_vm4, %v13072_v3, %v3093_v28  ;;  %v3272_v12 = vrot.slane %v3256_v13, 5  ;;  %v3324_v51 = vrot.slane %v3308_v53, 6  ;;  %v1267_v4 = vmul.f32 %v8864_v19, %v9670_v23 }
 0x26b   :  { %v2862_v42 = vadd.f32 %v2845_v21, %v2810_v24  ;;  %v3132_v2 = vadd.f32 %v3094_v17, %v3040_v41  ;;  %v3133_v62 = vadd.f32 %v3093_v28, %v3041_v18  ;;  %v1247_v30 = vadd.f32 %v1231_v47, %v13074_v26 }
 0x26c   :  { %v2915_v6 = vadd.f32 %v2897_v10, %v2863_v31  ;;  %v1304_v43 = vrot.slane %v1267_v4, 1  ;;  %v1359_v27 = vmul.f32 %v8908_v38, %v9670_v23  ;;  %v1445_v35 = vmul.f32 %v8922_v7, %v9670_v23  ;;  %v13082_v4 = vld [vmem:[#allocation84_spill] sm:$0xff] }
 0x26d   :  { %v2914_v50 = vadd.f32 %v2897_v10, %v2862_v42  ;;  %v3184_v36 = vadd.f32 %v3168_v55, %v3132_v2  ;;  %v3185_v49 = vadd.f32 %v3168_v55, %v3133_v62  ;;  %v1497_v21 = vmul.f32 %v8930_v16, %v9670_v23  ;;  %v13079_v10 = vld [vmem:[#allocation87_spill] sm:$0xff]  ;;  %v13080_v55 = vld [vmem:[#allocation70_spill] sm:$0xff] }
 0x26e   :  { %v2951_v28 = vadd.f32 %v13075_v57, %v2915_v6  ;;  %v13077_v14 = vrot.slane %v13076_v63, 1  ;;  %v1339_v17 = vadd.f32 %v1304_v43, %v1247_v30  ;;  %v1396_v13 = vrot.slane %v1359_v27, 2  ;;  %v13084_v6 = vld [vmem:[#allocation82_spill] sm:$0xff]  ;;  %v13085_v27 = vld [vmem:[#allocation71_spill] sm:$0xff] }
 0x26f   :  { %v2950_v53 = vadd.f32 %v13078_v1, %v2914_v50  ;;  %v3236_v24 = vadd.f32 %v3220_v8, %v3184_v36  ;;  %v3237_v41 = vadd.f32 %v3220_v8, %v3185_v49  ;;  %v13081_v47 = vrot.slane %v13080_v55, 1  ;;  %v9711_v8 = vld [vmem:[%s12633_s6] ss:$0 sm:$0xff]  ;;  %v9720_v55 = vld [vmem:[#allocation2 + $0xe8] sm:$0x7f] }
 0x270   :  { %v1305_v3 = vsel %vm430_vm3, %v13077_v14, %v1304_v43  ;;  %v13083_v42 = vrot.slane %v13082_v4, 2  ;;  %v1431_v62 = vadd.f32 %v1396_v13, %v1339_v17  ;;  %v1461_v26 = vrot.slane %v1445_v35, 3 }
 0x271   :  { %v1338_v18 = vadd.f32 %v1305_v3, %v13079_v10  ;;  %v3043_v31 = vadd.f32 %v13081_v47, %v2951_v28  ;;  %v3042_v57 = vadd.f32 %v13084_v6, %v2950_v53  ;;  %v3288_v63 = vadd.f32 %v3272_v12, %v3236_v24  ;;  %v13087_v3 = vld [vmem:[#allocation85_spill] sm:$0xff] }
 0x272   :  { %v1397_v2 = vsel %vm523_vm4, %v13083_v42, %v1396_v13  ;;  %v3289_v30 = vadd.f32 %v3272_v12, %v3237_v41  ;;  %v13086_v50 = vrot.slane %v13085_v27, 2  ;;  %v1483_v49 = vadd.f32 %v1461_v26, %v1431_v62  ;;  %v13088_v12 = vld [vmem:[#allocation76_spill] sm:$0xff] }
 0x273   :  { %v1430_v43 = vadd.f32 %v1397_v2, %v1338_v18  ;;  %v1513_v28 = vrot.slane %v1497_v21, 4  ;;  %v1549_v14 = vmul.f32 %v8952_v45, %v9670_v23  ;;  %v3134_v35 = vadd.f32 %v13087_v3, %v3042_v57 }
 0x274   :  { %v3135_v36 = vadd.f32 %v13086_v50, %v3043_v31  ;;  %v3340_v17 = vadd.f32 %v3324_v51, %v3288_v63  ;;  %v3341_v13 = vadd.f32 %v3324_v51, %v3289_v30  ;;  %v13089_v53 = vrot.slane %v13088_v12, 3  ;;  %v13091_v51 = vld [vmem:[#allocation78_spill] sm:$0xff] }
 0x275   :  { %v1482_v1 = vadd.f32 %v1461_v26, %v1430_v43  ;;  %v1535_v41 = vadd.f32 %v1513_v28, %v1483_v49  ;;  %v1565_v10 = vrot.slane %v1549_v14, 5  ;;  %v1601_v18 = vmul.f32 %v8956_v61, %v9670_v23 }
 0x276   :  { %v3187_v24 = vadd.f32 %v13089_v53, %v3135_v36  ;;  %v13090_v21 = vmov %v13089_v53  ;;  %v3363_v31 = vadd.f32 %v9711_v8, %v3340_v17  ;;  %v3364_v4 = vadd.f32 %v9711_v8, %v3341_v13  ;;  %v13094_v36 = vld [vmem:[#allocation83_spill] sm:$0xff]  ;;  %v13098_v17 = vld [vmem:[#allocation94_spill] sm:$0xff] }
 0x277   :  { %v3186_v47 = vadd.f32 %v13090_v21, %v3134_v35  ;;  %v1534_v42 = vadd.f32 %v1513_v28, %v1482_v1  ;;  %v13092_v2 = vrot.slane %v13091_v51, 4  ;;  %v1587_v26 = vadd.f32 %v1565_v10, %v1535_v41 }
 0x278   :  { %v1617_v6 = vrot.slane %v1601_v18, 6  ;;  %v1657_v57 = vmul.f32 %v8964_v40, %v9670_v23  ;;  %v3395_v43 = vcombine.high %v3363_v31, %v3363_v31  ;;  %v3408_v27 = vrot.slane %v3364_v4, 5 }
 0x279   :  { %v3239_v62 = vadd.f32 %v13092_v2, %v3187_v24  ;;  %v13093_v63 = vmov %v13092_v2  ;;  %v1586_v50 = vadd.f32 %v1565_v10, %v1534_v42  ;;  %v13095_v49 = vrot.slane %v13094_v36, 5  ;;  %v13100_v10 = vld [vmem:[#allocation86_spill] sm:$0xff]  ;;  %v13105_v36 = vld [vmem:[#allocation88_spill] sm:$0xff] }
 0x27a   :  { %v3238_v30 = vadd.f32 %v13093_v63, %v3186_v47  ;;  %v1639_v3 = vadd.f32 %v1617_v6, %v1587_v26  ;;  %v1659_v35 = vmul.f32 %v8964_v40, %v9720_v55  ;;  %v1673_v13 = vadd.f32 %v1657_v57, %v13098_v17  ;;  %v13107_v17 = vld [vmem:[#allocation89_spill] sm:$0xff] }
 0x27b   :  { %v3291_v14 = vadd.f32 %v13095_v49, %v3239_v62  ;;  %v13099_v1 = vmov %v13095_v49  ;;  %v7954_v53 = vrot.slane %v3395_v43, 9  ;;  %v1638_v24 = vadd.f32 %v1617_v6, %v1586_v50  ;;  %v13104_v62 = vld [vmem:[#allocation95_spill] sm:$0xff] }
 0x27c   :  { %v3290_v12 = vadd.f32 %v13099_v1, %v3238_v30  ;;  %v1693_v41 = vmul.f32 %v8991_v20, %v9670_v23  ;;  %v13101_v18 = vrot.slane %v13100_v10, 6  ;;  %v1675_v47 = vadd.f32 %v1659_v35, %v1639_v3 }
 0x27d   :  { %v1695_v31 = vmul.f32 %v8991_v20, %v9720_v55  ;;  %v1785_v4 = vmul.f32 %v9008_v22, %v9670_v23  ;;  %v9757_v2 = vsel %vm9736_vm8, %v7954_v53, %v3408_v27  ;;  %v1674_v26 = vadd.f32 %v13104_v62, %v1638_v24  ;;  %v13109_v53 = vld [vmem:[#allocation97_spill] sm:$0xff] }
 0x27e   :  { %v3343_v21 = vadd.f32 %v13101_v18, %v3291_v14  ;;  %v13102_v42 = vmov %v13101_v18  ;;  %13103 = vst [vmem:[#allocation37_spill] sm:$0xff] %v9757_v2  ;;  %v1729_v6 = vrot.slane %v1693_v41, 1  ;;  %v1787_v30 = vmul.f32 %v9008_v22, %v9720_v55 }
 0x27f   :  { %v3342_v51 = vadd.f32 %v13102_v42, %v3290_v12  ;;  %v1732_v63 = vrot.slane %v1695_v31, 1  ;;  %v1821_v43 = vrot.slane %v1785_v4, 2  ;;  %v13106_v49 = vrot.slane %v13105_v36, 1  ;;  %v13112_v36 = vld [vmem:[#allocation91_spill] sm:$0xff] }
 0x280   :  { %v3366_v57 = vadd.f32 %v9711_v8, %v3343_v21  ;;  %v1765_v3 = vadd.f32 %v1729_v6, %v1673_v13  ;;  %v1872_v27 = vmul.f32 %v9039_v5, %v9670_v23  ;;  %v13108_v1 = vrot.slane %v13107_v17, 1  ;;  %v13110_v21 = vld [vmem:[#allocation90_spill] sm:$0xff] }
 0x281   :  { %v3365_v50 = vadd.f32 %v9711_v8, %v3342_v51  ;;  %v1730_v14 = vsel %vm430_vm3, %v13106_v49, %v1729_v6  ;;  %v1767_v41 = vadd.f32 %v1732_v63, %v1675_v47  ;;  %v13111_v31 = vrot.slane %v13110_v21, 2  ;;  %v13114_v47 = vld [vmem:[#allocation43_spill] sm:$0xff] }
 0x282   :  { %v3412_v35 = vrot.slane %v3366_v57, 5  ;;  %v1733_v12 = vsel %vm430_vm3, %v13108_v1, %v1732_v63  ;;  %v1764_v24 = vadd.f32 %v1730_v14, %v13109_v53  ;;  %v1824_v42 = vrot.slane %v1787_v30, 2 }
 0x283   :  { %v3396_v10 = vcombine.high %v3365_v50, %v3365_v50  ;;  %v1766_v18 = vadd.f32 %v1733_v12, %v1674_v26  ;;  %v1822_v4 = vsel %vm523_vm4, %v13111_v31, %v1821_v43  ;;  %v1857_v13 = vadd.f32 %v1821_v43, %v1765_v3 }
 0x284   :  { %v1856_v51 = vadd.f32 %v1822_v4, %v1764_v24  ;;  %v1873_v62 = vmul.f32 %v9039_v5, %v9720_v55  ;;  %v1888_v6 = vrot.slane %v1872_v27, 3  ;;  %v13113_v49 = vrot.slane %v13112_v36, 2 }
 0x285   :  { %v7955_v57 = vrot.slane %v3396_v10, 9  ;;  %v1859_v14 = vadd.f32 %v1824_v42, %v1767_v41  ;;  %v1924_v26 = vmul.f32 %v13114_v47, %v9670_v23  ;;  %v1925_v43 = vmul.f32 %v13114_v47, %v9720_v55 }
 0x286   :  { %v1825_v17 = vsel %vm523_vm4, %v13113_v49, %v1824_v42  ;;  %v1889_v50 = vrot.slane %v1873_v62, 3  ;;  %v1908_v1 = vadd.f32 %v1888_v6, %v1856_v51  ;;  %v1909_v12 = vadd.f32 %v1888_v6, %v1857_v13 }
 0x287   :  { %v1858_v63 = vadd.f32 %v1825_v17, %v1766_v18  ;;  %v9785_v30 = vsel %vm9736_vm8, %v7955_v57, %v3412_v35  ;;  %v1940_v3 = vrot.slane %v1924_v26, 4  ;;  %v1976_v27 = vmul.f32 %v13043_v0, %v9670_v23  ;;  %v9795_v18 = vld [vmem:[#allocation2 + $0xf8] sm:$0x7f] }
 0x288   :  { %13115 = vst [vmem:[#allocation36_spill] sm:$0xff] %v9785_v30  ;;  %v3448_v53 = vcombine.low %v9757_v2, %v9785_v30  ;;  %v1911_v41 = vadd.f32 %v1889_v50, %v1859_v14  ;;  %v1977_v10 = vmul.f32 %v13043_v0, %v9720_v55  ;;  %v1941_v21 = vrot.slane %v1925_v43, 4 }
 0x289   :  { %v1910_v24 = vadd.f32 %v1889_v50, %v1858_v63  ;;  %v1960_v35 = vadd.f32 %v1940_v3, %v1908_v1  ;;  %v1961_v31 = vadd.f32 %v1940_v3, %v1909_v12  ;;  %v1992_v4 = vrot.slane %v1976_v27, 5 }
 0x28a   :  { %v3456_v42 = vsel %vm174_vm1, %v3448_v53, 0.0  ;;  %v1993_v51 = vrot.slane %v1977_v10, 5  ;;  %v2028_v13 = vmul.f32 %v13044_v60, %v9670_v23  ;;  %v2029_v62 = vmul.f32 %v13044_v60, %v9720_v55 }
 0x28b   :  { %3457 = vadd.xlane.f32.xlu0 %v3456_v42  ;;  %v1962_v6 = vadd.f32 %v1941_v21, %v1910_v24  ;;  %v1963_v57 = vadd.f32 %v1941_v21, %v1911_v41  ;;  %v2012_v36 = vadd.f32 %v1992_v4, %v1960_v35  ;;  %v2013_v49 = vadd.f32 %v1992_v4, %v1961_v31  ;;  %v13116_v35 = vld [vmem:[#allocation99_spill] sm:$0xff] }
 0x28c   :  { %v2044_v17 = vrot.slane %v2028_v13, 6  ;;  %v2045_v14 = vrot.slane %v2029_v62, 6  ;;  %v2085_v26 = vmul.f32 %v9084_v37, %v9720_v55  ;;  %v2087_v63 = vmul.f32 %v9084_v37, %v9795_v18  ;;  %v13117_v13 = vld [vmem:[#allocation100_spill] sm:$0xff] }
 0x28d   :  { %v2014_v50 = vadd.f32 %v1993_v51, %v1962_v6  ;;  %v2015_v1 = vadd.f32 %v1993_v51, %v1963_v57  ;;  %v2121_v23 = vmul.f32 %v9060_v33, %v9720_v55  ;;  %v2123_v12 = vmul.f32 %v9060_v33, %v9795_v18  ;;  %v13118_v57 = vld [vmem:[#allocation92_spill] sm:$0xff] }
 0x28e   :  { %v2064_v43 = vadd.f32 %v2044_v17, %v2012_v36  ;;  %v2065_v3 = vadd.f32 %v2044_v17, %v2013_v49  ;;  %v2213_v27 = vmul.f32 %v9072_v25, %v9720_v55  ;;  %v2215_v53 = vmul.f32 %v9072_v25, %v9795_v18  ;;  %v13120_v17 = vld [vmem:[#allocation96_spill] sm:$0xff] }
 0x28f   :  { %v2066_v24 = vadd.f32 %v2045_v14, %v2014_v50  ;;  %v2067_v41 = vadd.f32 %v2045_v14, %v2015_v1  ;;  %v2157_v10 = vrot.slane %v2121_v23, 1  ;;  %v2160_v21 = vrot.slane %v2123_v12, 1  ;;  %v13122_v1 = vld [vmem:[#allocation93_spill] sm:$0xff] }
 0x290   :  { %v2100_v31 = vadd.f32 %v13116_v35, %v2064_v43  ;;  %v2101_v4 = vadd.f32 %v2085_v26, %v2065_v3  ;;  %v2249_v42 = vrot.slane %v2213_v27, 2  ;;  %v2252_v51 = vrot.slane %v2215_v53, 2  ;;  %v13124_v26 = vld [vmem:[#allocation98_spill] sm:$0xff] }
 0x291   :  { %v2102_v62 = vadd.f32 %v13117_v13, %v2066_v24  ;;  %v2103_v6 = vadd.f32 %v2087_v63, %v2067_v41  ;;  %v13119_v36 = vrot.slane %v13118_v57, 1  ;;  %v13121_v30 = vrot.slane %v13120_v17, 1 }
 0x292   :  { %v2193_v14 = vadd.f32 %v2157_v10, %v2101_v4  ;;  %v13123_v23 = vrot.slane %v13122_v1, 2  ;;  %v13125_v43 = vrot.slane %v13124_v26, 2  ;;  %v2300_v53 = vmul.f32 %v13052_v39, %v9720_v55 }
 0x293   :  { %v2158_v49 = vsel %vm430_vm3, %v13119_v36, %v2157_v10  ;;  %v2161_v2 = vsel %vm430_vm3, %v13121_v30, %v2160_v21  ;;  %v2195_v63 = vadd.f32 %v2160_v21, %v2103_v6  ;;  %v2301_v24 = vmul.f32 %v13052_v39, %v9795_v18  ;;  %v9840_v36 = vld [vmem:[#allocation2 + $0x108] sm:$0x7f] }
 0x294   :  { %v2192_v50 = vadd.f32 %v2158_v49, %v2100_v31  ;;  %v2250_v12 = vsel %vm523_vm4, %v13123_v23, %v2249_v42  ;;  %v2253_v3 = vsel %vm523_vm4, %v13125_v43, %v2252_v51  ;;  %v2194_v27 = vadd.f32 %v2161_v2, %v2102_v62 }
 0x295   :  { %v2285_v30 = vadd.f32 %v2249_v42, %v2193_v14  ;;  %v2352_v10 = vmul.f32 %v13053_v44, %v9720_v55  ;;  %v2353_v35 = vmul.f32 %v13053_v44, %v9795_v18  ;;  %v2287_v4 = vadd.f32 %v2252_v51, %v2195_v63 }
 0x296   :  { %v2284_v41 = vadd.f32 %v2250_v12, %v2192_v50  ;;  %v2286_v31 = vadd.f32 %v2253_v3, %v2194_v27  ;;  %v2316_v13 = vrot.slane %v2300_v53, 3  ;;  %v2317_v57 = vrot.slane %v2301_v24, 3 }
 0x297   :  { %v2368_v2 = vrot.slane %v2352_v10, 4  ;;  %v2369_v21 = vrot.slane %v2353_v35, 4  ;;  %v2404_v62 = vmul.f32 %v13054_v56, %v9720_v55  ;;  %v2405_v6 = vmul.f32 %v13054_v56, %v9795_v18 }
 0x298   :  { %v2336_v42 = vadd.f32 %v2316_v13, %v2284_v41  ;;  %v2337_v49 = vadd.f32 %v2316_v13, %v2285_v30  ;;  %v2338_v17 = vadd.f32 %v2317_v57, %v2286_v31  ;;  %v2339_v50 = vadd.f32 %v2317_v57, %v2287_v4  ;;  %v13126_v4 = vld [vmem:[#allocation53_spill] sm:$0xff] }
 0x299   :  { %v2420_v14 = vrot.slane %v2404_v62, 5  ;;  %v2421_v1 = vrot.slane %v2405_v6, 5  ;;  %v2456_v51 = vmul.f32 %v13055_v48, %v9720_v55  ;;  %v2457_v23 = vmul.f32 %v13055_v48, %v9795_v18 }
 0x29a   :  { %v2388_v12 = vadd.f32 %v2368_v2, %v2336_v42  ;;  %v2389_v26 = vadd.f32 %v2368_v2, %v2337_v49  ;;  %v2390_v43 = vadd.f32 %v2369_v21, %v2338_v17  ;;  %v2391_v3 = vadd.f32 %v2369_v21, %v2339_v50 }
 0x29b   :  { %v2472_v27 = vrot.slane %v2456_v51, 6  ;;  %v2473_v63 = vrot.slane %v2457_v23, 6  ;;  %v2513_v53 = vmul.f32 %v9189_v54, %v9795_v18  ;;  %v2515_v24 = vmul.f32 %v9189_v54, %v9840_v36  ;;  %v13128_v23 = vld [vmem:[#allocation105_spill] sm:$0xff]  ;;  %v13131_v54 = vld [vmem:[#allocation102_spill] sm:$0xff] }
 0x29c   :  { %v2440_v41 = vadd.f32 %v2420_v14, %v2388_v12  ;;  %v2441_v30 = vadd.f32 %v2420_v14, %v2389_v26  ;;  %v2442_v10 = vadd.f32 %v2421_v1, %v2390_v43  ;;  %v2443_v35 = vadd.f32 %v2421_v1, %v2391_v3  ;;  %v13127_v14 = vld [vmem:[#allocation104_spill] sm:$0xff]  ;;  %v13129_v43 = vld [vmem:[#allocation29_spill] sm:$0xff] }
 0x29d   :  { %v2549_v55 = vmul.f32 %v9144_v34, %v9795_v18  ;;  %v2551_v31 = vmul.f32 %v9144_v34, %v9840_v36  ;;  %v2641_v13 = vmul.f32 %v13126_v4, %v9795_v18  ;;  %v2643_v57 = vmul.f32 %v13126_v4, %v9840_v36 }
 0x29e   :  { %v2492_v2 = vadd.f32 %v2472_v27, %v2440_v41  ;;  %v2493_v21 = vadd.f32 %v2472_v27, %v2441_v30  ;;  %v2494_v62 = vadd.f32 %v2473_v63, %v2442_v10  ;;  %v2495_v6 = vadd.f32 %v2473_v63, %v2443_v35  ;;  %v13133_v41 = vld [vmem:[#allocation101_spill] sm:$0xff]  ;;  %v13135_v10 = vld [vmem:[#allocation103_spill] sm:$0xff] }
 0x29f   :  { %v2585_v42 = vrot.slane %v2549_v55, 1  ;;  %v2588_v49 = vrot.slane %v2551_v31, 1  ;;  %v2677_v17 = vrot.slane %v2641_v13, 2  ;;  %v2680_v50 = vrot.slane %v2643_v57, 2  ;;  %v13137_v57 = vld [vmem:[#allocation60_spill] sm:$0xff] }
 0x2a0   :  { %v2528_v1 = vadd.f32 %v13127_v14, %v2492_v2  ;;  %v2529_v51 = vadd.f32 %v2513_v53, %v2493_v21  ;;  %v2530_v12 = vadd.f32 %v13128_v23, %v2494_v62  ;;  %v2531_v26 = vadd.f32 %v2515_v24, %v2495_v6 }
 0x2a1   :  { %v13130_v3 = vrot.slane %v13129_v43, 1  ;;  %v13132_v4 = vrot.slane %v13131_v54, 1  ;;  %v13134_v63 = vrot.slane %v13133_v41, 2  ;;  %v13136_v35 = vrot.slane %v13135_v10, 2 }
 0x2a2   :  { %v2621_v31 = vadd.f32 %v2585_v42, %v2529_v51  ;;  %v2623_v24 = vadd.f32 %v2588_v49, %v2531_v26  ;;  %v2728_v2 = vmul.f32 %v13137_v57, %v9795_v18  ;;  %v2729_v54 = vmul.f32 %v13137_v57, %v9840_v36 }
 0x2a3   :  { %v2586_v34 = vsel %vm430_vm3, %v13130_v3, %v2585_v42  ;;  %v2589_v27 = vsel %vm430_vm3, %v13132_v4, %v2588_v49  ;;  %v2678_v30 = vsel %vm523_vm4, %v13134_v63, %v2677_v17  ;;  %v2681_v55 = vsel %vm523_vm4, %v13136_v35, %v2680_v50  ;;  %v13138_v4 = vld [vmem:[#allocation61_spill] sm:$0xff] }
 0x2a4   :  { %v2620_v53 = vadd.f32 %v2586_v34, %v2528_v1  ;;  %v2622_v13 = vadd.f32 %v2589_v27, %v2530_v12  ;;  %v2780_v21 = vmul.f32 %v13138_v4, %v9795_v18  ;;  %v2781_v62 = vmul.f32 %v13138_v4, %v9840_v36 }
 0x2a5   :  { %v2713_v14 = vadd.f32 %v2677_v17, %v2621_v31  ;;  %v2715_v43 = vadd.f32 %v2680_v50, %v2623_v24  ;;  %v2744_v34 = vrot.slane %v2728_v2, 3  ;;  %v2745_v42 = vrot.slane %v2729_v54, 3 }
 0x2a6   :  { %v2712_v6 = vadd.f32 %v2678_v30, %v2620_v53  ;;  %v2714_v23 = vadd.f32 %v2681_v55, %v2622_v13  ;;  %v2796_v1 = vrot.slane %v2780_v21, 4  ;;  %v2797_v49 = vrot.slane %v2781_v62, 4 }
 0x2a7   :  { %v2832_v51 = vmul.f32 %v13066_v11, %v9795_v18  ;;  %v2833_v12 = vmul.f32 %v13066_v11, %v9840_v36  ;;  %v2884_v26 = vmul.f32 %v13067_v59, %v9795_v18  ;;  %v2885_v3 = vmul.f32 %v13067_v59, %v9840_v36 }
 0x2a8   :  { %v2764_v27 = vadd.f32 %v2744_v34, %v2712_v6  ;;  %v2765_v17 = vadd.f32 %v2744_v34, %v2713_v14  ;;  %v2766_v41 = vadd.f32 %v2745_v42, %v2714_v23  ;;  %v2767_v50 = vadd.f32 %v2745_v42, %v2715_v43 }
 0x2a9   :  { %v2848_v63 = vrot.slane %v2832_v51, 5  ;;  %v2849_v30 = vrot.slane %v2833_v12, 5  ;;  %v2900_v10 = vrot.slane %v2884_v26, 6  ;;  %v2901_v35 = vrot.slane %v2885_v3, 6  ;;  %v13139_v26 = vld [vmem:[#allocation106_spill] sm:$0xff] }
 0x2aa   :  { %v2816_v55 = vadd.f32 %v2796_v1, %v2764_v27  ;;  %v2817_v53 = vadd.f32 %v2796_v1, %v2765_v17  ;;  %v2818_v31 = vadd.f32 %v2797_v49, %v2766_v41  ;;  %v2819_v13 = vadd.f32 %v2797_v49, %v2767_v50  ;;  %v13141_v17 = vld [vmem:[#allocation107_spill] sm:$0xff] }
 0x2ab   :  { %v2941_v24 = vmul.f32 %v9236_v32, %v9840_v36  ;;  %v2977_v18 = vmul.f32 %v9214_v58, %v9840_v36  ;;  %v3069_v2 = vmul.f32 %v9217_v29, %v9840_v36  ;;  %v3156_v54 = vmul.f32 %v9249_v52, %v9840_v36 }
 0x2ac   :  { %v2868_v21 = vadd.f32 %v2848_v63, %v2816_v55  ;;  %v2869_v62 = vadd.f32 %v2848_v63, %v2817_v53  ;;  %v2870_v6 = vadd.f32 %v2849_v30, %v2818_v31  ;;  %v2871_v14 = vadd.f32 %v2849_v30, %v2819_v13  ;;  %v13143_v55 = vld [vmem:[#allocation35_spill] sm:$0xff]  ;;  %v13144_v13 = vld [vmem:[#allocation6_spill] sm:$0xff] }
 0x2ad   :  { %v3013_v23 = vrot.slane %v2977_v18, 1  ;;  %v3105_v43 = vrot.slane %v3069_v2, 2  ;;  %v3172_v34 = vrot.slane %v3156_v54, 3  ;;  %v3208_v42 = vmul.f32 %v9262_v15, %v9840_v36  ;;  %v13146_v54 = vld [vmem:[#allocation117_spill] sm:$0xff]  ;;  %v13154_v15 = vld [vmem:[#allocation114_spill] sm:$0xff] }
 0x2ae   :  { %v2920_v1 = vadd.f32 %v2900_v10, %v2868_v21  ;;  %v2921_v49 = vadd.f32 %v2900_v10, %v2869_v62  ;;  %v2922_v51 = vadd.f32 %v2901_v35, %v2870_v6  ;;  %v2923_v12 = vadd.f32 %v2901_v35, %v2871_v14  ;;  %v13145_v10 = vld [vmem:[#allocation108_spill] sm:$0xff]  ;;  %v9913_v62 = vld [vmem:[%s12632_s5 + $0x30] ss:$0 sm:$0xff] }
 0x2af   :  { %v13140_v3 = vrot.slane %v13139_v26, 1  ;;  %v13142_v41 = vrot.slane %v13141_v17, 2  ;;  %v3224_v63 = vrot.slane %v3208_v42, 4  ;;  %v3260_v30 = vmul.f32 %v9265_v9, %v9840_v36  ;;  %13147 = vst [vmem:[#allocation39_spill] sm:$0xff] %v9913_v62  ;;  %v8376_v14 = vld [vmem:[#allocation2 + $0x118] sm:$0x7f] }
 0x2b0   :  { %v2956_v53 = vadd.f32 %v13143_v55, %v2920_v1  ;;  %v2957_v31 = vadd.f32 %v2941_v24, %v2921_v49  ;;  %v2958_v18 = vadd.f32 %v13144_v13, %v2922_v51  ;;  %v2959_v2 = vadd.f32 %v13145_v10, %v2923_v12  ;;  %v13148_v49 = vld [vmem:[#allocation111_spill] sm:$0xff]  ;;  %v13149_v26 = vld [vmem:[#allocation10_spill] sm:$0xff]  ;;  %v13152_v55 = vld [vmem:[#allocation16_spill] sm:$0xff] }
 0x2b1   :  { %v3014_v27 = vsel %vm430_vm3, %v13140_v3, %v3013_v23  ;;  %v3106_v50 = vsel %vm523_vm4, %v13142_v41, %v3105_v43  ;;  %v3276_v35 = vrot.slane %v3260_v30, 5  ;;  %v3277_v21 = vrot.slane %v13146_v54, 5  ;;  %v13151_v30 = vld [vmem:[#allocation116_spill] sm:$0xff] }
 0x2b2   :  { %v3312_v6 = vmul.f32 %v9913_v62, %v9840_v36  ;;  %v3313_v42 = vmul.f32 %v8376_v14, %v9913_v62  ;;  %v3048_v1 = vadd.f32 %v3014_v27, %v2956_v53  ;;  %v3049_v24 = vadd.f32 %v3013_v23, %v2957_v31  ;;  %v13153_v10 = vld [vmem:[#allocation12_spill] sm:$0xff]  ;;  %v13155_v14 = vld [vmem:[#allocation109_spill] sm:$0xff] }
 0x2b3   :  { %v3050_v51 = vadd.f32 %v13148_v49, %v2958_v18  ;;  %v13150_v12 = vrot.slane %v13149_v26, 1  ;;  %v369_v13 = vmul.f32 %v13152_v55, %v13151_v30  ;;  %v405_v54 = vmul.f32 %v13153_v10, %v13151_v30  ;;  %v9928_v31 = vld [vmem:[#allocation2 + $0x38] sm:$0x7f]  ;;  %v13157_v18 = vld [vmem:[#allocation15_spill] sm:$0xff] }
 0x2b4   :  { %v3328_v17 = vrot.slane %v3312_v6, 6  ;;  %v3329_v41 = vrot.slane %v3313_v42, 6  ;;  %v3140_v9 = vadd.f32 %v3106_v50, %v3048_v1  ;;  %v3141_v36 = vadd.f32 %v3105_v43, %v3049_v24  ;;  %v13158_v6 = vld [vmem:[#allocation19_spill] sm:$0xff]  ;;  %v13159_v49 = vld [vmem:[#allocation20_spill] sm:$0xff]  ;;  %v13160_v43 = vld [vmem:[#allocation9_spill] sm:$0xff] }
 0x2b5   :  { %v3051_v3 = vadd.f32 %v13150_v12, %v2959_v2  ;;  %v3142_v52 = vadd.f32 %v13154_v15, %v3050_v51  ;;  %v13156_v27 = vrot.slane %v13155_v14, 2  ;;  %v441_v53 = vrot.slane %v405_v54, 1  ;;  %v13165_v55 = vld [vmem:[#allocation112_spill] sm:$0xff] }
 0x2b6   :  { %v498_v2 = vmul.f32 %v9928_v31, %v13157_v18  ;;  %v587_v42 = vmul.f32 %v9928_v31, %v13158_v6  ;;  %v639_v26 = vmul.f32 %v9928_v31, %v13159_v49  ;;  %v3192_v12 = vadd.f32 %v3172_v34, %v3140_v9 }
 0x2b7   :  { %v3143_v23 = vadd.f32 %v13156_v27, %v3051_v3  ;;  %v3193_v50 = vadd.f32 %v3172_v34, %v3141_v36  ;;  %v13161_v1 = vrot.slane %v13160_v43, 3  ;;  %v13163_v3 = vld [vmem:[#allocation110_spill] sm:$0xff]  ;;  %v478_v14 = vadd.f32 %v441_v53, %v369_v13  ;;  %v13168_v36 = vld [vmem:[#allocation7_spill] sm:$0xff] }
 0x2b8   :  { %v13164_v30 = vrot.slane %v13163_v3, 1  ;;  %v534_v27 = vrot.slane %v498_v2, 2  ;;  %v603_v18 = vrot.slane %v587_v42, 3  ;;  %v3244_v10 = vadd.f32 %v3224_v63, %v3192_v12  ;;  %v13171_v12 = vld [vmem:[#allocation22_spill] sm:$0xff] }
 0x2b9   :  { %v3194_v15 = vadd.f32 %v13161_v1, %v3142_v52  ;;  %v13162_v24 = vmov %v13161_v1  ;;  %v3245_v6 = vadd.f32 %v3224_v63, %v3193_v50  ;;  %v13166_v62 = vrot.slane %v13165_v55, 4  ;;  %v13169_v1 = vld [vmem:[#allocation113_spill] sm:$0xff]  ;;  %v13172_v50 = vld [vmem:[#allocation119_spill] sm:$0xff] }
 0x2ba   :  { %v3195_v51 = vadd.f32 %v13162_v24, %v3143_v23  ;;  %v442_v54 = vsel %vm430_vm3, %v13164_v30, %v441_v53  ;;  %v13170_v43 = vrot.slane %v13169_v1, 2  ;;  %v571_v24 = vadd.f32 %v534_v27, %v478_v14  ;;  %v13173_v14 = vld [vmem:[#allocation115_spill] sm:$0xff] }
 0x2bb   :  { %v3246_v49 = vadd.f32 %v13166_v62, %v3194_v15  ;;  %v13167_v9 = vmov %v13166_v62  ;;  %v477_v52 = vadd.f32 %v442_v54, %v13168_v36  ;;  %v655_v3 = vrot.slane %v639_v26, 4 }
 0x2bc   :  { %v3247_v34 = vadd.f32 %v13167_v9, %v3195_v51  ;;  %v535_v23 = vsel %vm523_vm4, %v13170_v43, %v534_v27  ;;  %v3296_v30 = vadd.f32 %v3276_v35, %v3244_v10  ;;  %v3297_v13 = vadd.f32 %v3276_v35, %v3245_v6  ;;  %v13174_v27 = vld [vmem:[#allocation118_spill] sm:$0xff] }
 0x2bd   :  { %v3298_v53 = vadd.f32 %v3277_v21, %v3246_v49  ;;  %v570_v42 = vadd.f32 %v535_v23, %v477_v52  ;;  %v623_v63 = vadd.f32 %v603_v18, %v571_v24  ;;  %v691_v62 = vmul.f32 %v9928_v31, %v13171_v12  ;;  %v13175_v23 = vld [vmem:[#allocation24_spill] sm:$0xff] }
 0x2be   :  { %v3299_v2 = vadd.f32 %v3277_v21, %v3247_v34  ;;  %v706_v55 = vrot.slane %v13172_v50, 5  ;;  %v3348_v15 = vadd.f32 %v3328_v17, %v3296_v30  ;;  %v3349_v51 = vadd.f32 %v3328_v17, %v3297_v13  ;;  %v8378_v17 = vld [vmem:[#allocation2 + $0x28] sm:$0x7f] }
 0x2bf   :  { %v3350_v54 = vadd.f32 %v3329_v41, %v3298_v53  ;;  %v622_v36 = vadd.f32 %v603_v18, %v570_v42  ;;  %v675_v1 = vadd.f32 %v655_v3, %v623_v63  ;;  %v707_v43 = vrot.slane %v691_v62, 5  ;;  %v8379_v63 = vld [vmem:[#allocation2 + $0x30] sm:$0xff] }
 0x2c0   :  { %v3351_v9 = vadd.f32 %v3329_v41, %v3299_v2  ;;  %v724_v26 = vadd.f32 %v706_v55, %v13173_v14  ;;  %v3371_v35 = vadd.f32 %v9711_v8, %v3348_v15  ;;  %v3372_v21 = vadd.f32 %v9711_v8, %v3349_v51  ;;  %v13176_v62 = vld [vmem:[#allocation27_spill] sm:$0xff]  ;;  %v9966_v15 = vld [vmem:[#allocation2 + $0x40] sm:$0xff] }
 0x2c1   :  { %v3373_v10 = vadd.f32 %v9711_v8, %v3350_v54  ;;  %v674_v49 = vadd.f32 %v655_v3, %v622_v36  ;;  %v725_v34 = vadd.f32 %v706_v55, %v13174_v27  ;;  %v727_v52 = vadd.f32 %v707_v43, %v675_v1  ;;  %v9970_v1 = vld [vmem:[#allocation2 + $0x48] sm:$0x7f] }
 0x2c2   :  { %v3374_v6 = vadd.f32 %v9711_v8, %v3351_v9  ;;  %v742_v41 = vmul.f32 %v8378_v17, %v13175_v23  ;;  %v3399_v18 = vcombine.high %v3371_v35, %v3371_v35  ;;  %v3424_v30 = vrot.slane %v3372_v21, 5  ;;  %v13179_v21 = vld [vmem:[#allocation26_spill] sm:$0xff] }
 0x2c3   :  { %v3400_v24 = vcombine.high %v3373_v10, %v3373_v10  ;;  %v726_v53 = vadd.f32 %v707_v43, %v674_v49  ;;  %v743_v2 = vmul.f32 %v9928_v31, %v13175_v23  ;;  %v796_v50 = vmul.f32 %v8379_v63, %v13176_v62 }
 0x2c4   :  { %v3428_v13 = vrot.slane %v3374_v6, 5  ;;  %v758_v42 = vrot.slane %v742_v41, 6  ;;  %v7958_v8 = vrot.slane %v3399_v18, 9  ;;  %v797_v55 = vmul.f32 %v9928_v31, %v13176_v62 }
 0x2c5   :  { %v7959_v3 = vrot.slane %v3400_v24, 9  ;;  %v798_v51 = vmul.f32 %v9966_v15, %v13176_v62  ;;  %v759_v54 = vrot.slane %v743_v2, 6  ;;  %v799_v43 = vmul.f32 %v9970_v1, %v13176_v62 }
 0x2c6   :  { %v776_v9 = vadd.f32 %v758_v42, %v724_v26  ;;  %v777_v36 = vadd.f32 %v758_v42, %v725_v34  ;;  %v9976_v14 = vsel %vm9736_vm8, %v7958_v8, %v3424_v30  ;;  %v832_v10 = vmul.f32 %v8379_v63, %v13179_v21 }
 0x2c7   :  { %13177 = vst [vmem:[#allocation38_spill] sm:$0xff] %v9976_v14  ;;  %v9980_v35 = vsel %vm9736_vm8, %v7959_v3, %v3428_v13  ;;  %v833_v6 = vmul.f32 %v9928_v31, %v13179_v21  ;;  %v778_v49 = vadd.f32 %v759_v54, %v726_v53  ;;  %v779_v27 = vadd.f32 %v759_v54, %v727_v52 }
 0x2c8   :  { %13178 = vst [vmem:[#allocation40_spill] sm:$0xff] %v9980_v35  ;;  %v3450_v26 = vcombine.low %v9976_v14, %v9980_v35  ;;  %v812_v34 = vadd.f32 %v796_v50, %v776_v9  ;;  %v813_v17 = vadd.f32 %v797_v55, %v777_v36  ;;  %v834_v41 = vmul.f32 %v9966_v15, %v13179_v21  ;;  %v13180_v35 = vld [vmem:[#allocation28_spill] sm:$0xff] }
 0x2c9   :  { %v835_v18 = vmul.f32 %v9970_v1, %v13179_v21  ;;  %v866_v24 = vrot.slane %v832_v10, 1  ;;  %v814_v13 = vadd.f32 %v798_v51, %v778_v49  ;;  %v815_v2 = vadd.f32 %v799_v43, %v779_v27  ;;  %v13181_v27 = vld [vmem:[#allocation30_spill] sm:$0xff] }
 0x2ca   :  { %v3462_v30 = vsel %vm174_vm1, %v3450_v26, 0.0  ;;  %v867_v42 = vrot.slane %v833_v6, 1  ;;  %v869_v8 = vrot.slane %v834_v41, 1  ;;  %v924_v53 = vmul.f32 %v8379_v63, %v13180_v35 }
 0x2cb   :  { %3463 = vadd.xlane.f32.xlu0 %v3462_v30  ;;  %v870_v3 = vrot.slane %v835_v18, 1  ;;  %v925_v52 = vmul.f32 %v9928_v31, %v13180_v35  ;;  %v926_v54 = vmul.f32 %v9966_v15, %v13180_v35  ;;  %v927_v9 = vmul.f32 %v9970_v1, %v13180_v35  ;;  %v13182_v18 = vld [vmem:[#allocation31_spill] sm:$0xff] }
 0x2cc   :  { %v868_v50 = vsel %vm430_vm3, %v866_v24, %v867_v42  ;;  %v905_v55 = vadd.f32 %v867_v42, %v813_v17  ;;  %v958_v10 = vrot.slane %v924_v53, 2  ;;  %v1014_v41 = vmul.f32 %v9928_v31, %v13181_v27 }
 0x2cd   :  { %v871_v51 = vsel %vm430_vm3, %v869_v8, %v870_v3  ;;  %v904_v36 = vadd.f32 %v868_v50, %v812_v34  ;;  %v907_v43 = vadd.f32 %v870_v3, %v815_v2  ;;  %v959_v26 = vrot.slane %v925_v52, 2 }
 0x2ce   :  { %v906_v6 = vadd.f32 %v871_v51, %v814_v13  ;;  %v961_v63 = vrot.slane %v926_v54, 2  ;;  %v962_v49 = vrot.slane %v927_v9, 2  ;;  %v1015_v17 = vmul.f32 %v9970_v1, %v13181_v27  ;;  %v13183_v9 = vld [vmem:[#allocation32_spill] sm:$0xff] }
 0x2cf   :  { %v1066_v24 = vmul.f32 %v9928_v31, %v13182_v18  ;;  %v1067_v30 = vmul.f32 %v9970_v1, %v13182_v18  ;;  %v960_v34 = vsel %vm523_vm4, %v958_v10, %v959_v26  ;;  %v997_v13 = vadd.f32 %v959_v26, %v905_v55  ;;  %v13184_v55 = vld [vmem:[#allocation33_spill] sm:$0xff] }
 0x2d0   :  { %v963_v2 = vsel %vm523_vm4, %v961_v63, %v962_v49  ;;  %v999_v42 = vadd.f32 %v962_v49, %v907_v43  ;;  %v996_v8 = vadd.f32 %v960_v34, %v904_v36  ;;  %v1030_v53 = vrot.slane %v1014_v41, 3 }
 0x2d1   :  { %v998_v3 = vadd.f32 %v963_v2, %v906_v6  ;;  %v1031_v52 = vrot.slane %v1015_v17, 3  ;;  %v1082_v50 = vrot.slane %v1066_v24, 4  ;;  %v1083_v54 = vrot.slane %v1067_v30, 4 }
 0x2d2   :  { %v1118_v51 = vmul.f32 %v9928_v31, %v13183_v9  ;;  %v1119_v14 = vmul.f32 %v9970_v1, %v13183_v9  ;;  %v1048_v27 = vadd.f32 %v1030_v53, %v996_v8  ;;  %v1049_v18 = vadd.f32 %v1030_v53, %v997_v13 }
 0x2d3   :  { %v1050_v35 = vadd.f32 %v1031_v52, %v998_v3  ;;  %v1051_v10 = vadd.f32 %v1031_v52, %v999_v42  ;;  %v1170_v36 = vmul.f32 %v9928_v31, %v13184_v55  ;;  %v1171_v43 = vmul.f32 %v9970_v1, %v13184_v55  ;;  %v10023_v31 = vld [vmem:[#allocation2 + $0x50] sm:$0xff] }
 0x2d4   :  { %v1134_v21 = vrot.slane %v1118_v51, 5  ;;  %v1135_v63 = vrot.slane %v1119_v14, 5  ;;  %v1100_v6 = vadd.f32 %v1082_v50, %v1048_v27  ;;  %v1101_v26 = vadd.f32 %v1082_v50, %v1049_v18  ;;  %v10027_v18 = vld [vmem:[#allocation2 + $0x58] sm:$0x7f] }
 0x2d5   :  { %v1102_v49 = vadd.f32 %v1083_v54, %v1050_v35  ;;  %v1103_v41 = vadd.f32 %v1083_v54, %v1051_v10  ;;  %v1186_v17 = vrot.slane %v1170_v36, 6  ;;  %v1187_v24 = vrot.slane %v1171_v43, 6 }
 0x2d6   :  { %v1224_v30 = vmul.f32 %v9966_v15, %v8868_v46  ;;  %v1225_v34 = vmul.f32 %v9970_v1, %v8868_v46  ;;  %v1152_v2 = vadd.f32 %v1134_v21, %v1100_v6  ;;  %v1153_v14 = vadd.f32 %v1134_v21, %v1101_v26 }
 0x2d7   :  { %v1154_v13 = vadd.f32 %v1135_v63, %v1102_v49  ;;  %v1155_v42 = vadd.f32 %v1135_v63, %v1103_v41  ;;  %v1226_v27 = vmul.f32 %v10023_v31, %v8868_v46  ;;  %v1227_v35 = vmul.f32 %v10027_v18, %v8868_v46 }
 0x2d8   :  { %v1260_v8 = vmul.f32 %v9966_v15, %v8864_v19  ;;  %v1261_v3 = vmul.f32 %v9970_v1, %v8864_v19  ;;  %v1204_v53 = vadd.f32 %v1186_v17, %v1152_v2  ;;  %v1205_v21 = vadd.f32 %v1186_v17, %v1153_v14 }
 0x2d9   :  { %v1206_v52 = vadd.f32 %v1187_v24, %v1154_v13  ;;  %v1207_v50 = vadd.f32 %v1187_v24, %v1155_v42  ;;  %v1262_v54 = vmul.f32 %v10023_v31, %v8864_v19  ;;  %v1263_v51 = vmul.f32 %v10027_v18, %v8864_v19 }
 0x2da   :  { %v1294_v10 = vrot.slane %v1260_v8, 1  ;;  %v1295_v63 = vrot.slane %v1261_v3, 1  ;;  %v1240_v36 = vadd.f32 %v1224_v30, %v1204_v53  ;;  %v1241_v43 = vadd.f32 %v1225_v34, %v1205_v21 }
 0x2db   :  { %v1242_v6 = vadd.f32 %v1226_v27, %v1206_v52  ;;  %v1243_v26 = vadd.f32 %v1227_v35, %v1207_v50  ;;  %v1297_v41 = vrot.slane %v1262_v54, 1  ;;  %v1298_v46 = vrot.slane %v1263_v51, 1 }
 0x2dc   :  { %v1296_v49 = vsel %vm430_vm3, %v1294_v10, %v1295_v63  ;;  %v1352_v17 = vmul.f32 %v9966_v15, %v8908_v38  ;;  %v1333_v2 = vadd.f32 %v1295_v63, %v1241_v43  ;;  %v1353_v14 = vmul.f32 %v9970_v1, %v8908_v38 }
 0x2dd   :  { %v1332_v24 = vadd.f32 %v1296_v49, %v1240_v36  ;;  %v1354_v13 = vmul.f32 %v10023_v31, %v8908_v38  ;;  %v1299_v30 = vsel %vm430_vm3, %v1297_v41, %v1298_v46  ;;  %v1335_v34 = vadd.f32 %v1298_v46, %v1243_v26 }
 0x2de   :  { %v1355_v42 = vmul.f32 %v10027_v18, %v8908_v38  ;;  %v1386_v27 = vrot.slane %v1352_v17, 2  ;;  %v1334_v35 = vadd.f32 %v1299_v30, %v1242_v6  ;;  %v1387_v8 = vrot.slane %v1353_v14, 2 }
 0x2df   :  { %v1389_v3 = vrot.slane %v1354_v13, 2  ;;  %v1442_v15 = vmul.f32 %v9970_v1, %v8922_v7  ;;  %v1443_v21 = vmul.f32 %v10027_v18, %v8922_v7  ;;  %v1494_v52 = vmul.f32 %v9970_v1, %v8930_v16 }
 0x2e0   :  { %v1390_v53 = vrot.slane %v1355_v42, 2  ;;  %v1495_v46 = vmul.f32 %v10027_v18, %v8930_v16  ;;  %v1388_v50 = vsel %vm523_vm4, %v1386_v27, %v1387_v8  ;;  %v1425_v54 = vadd.f32 %v1387_v8, %v1333_v2 }
 0x2e1   :  { %v1458_v51 = vrot.slane %v1442_v15, 3  ;;  %v1546_v10 = vmul.f32 %v9970_v1, %v8952_v45  ;;  %v1424_v36 = vadd.f32 %v1388_v50, %v1332_v24  ;;  %v1459_v6 = vrot.slane %v1443_v21, 3 }
 0x2e2   :  { %v1391_v63 = vsel %vm523_vm4, %v1389_v3, %v1390_v53  ;;  %v1427_v43 = vadd.f32 %v1390_v53, %v1335_v34  ;;  %v1510_v41 = vrot.slane %v1494_v52, 4  ;;  %v1511_v17 = vrot.slane %v1495_v46, 4 }
 0x2e3   :  { %v1426_v26 = vadd.f32 %v1391_v63, %v1334_v35  ;;  %v1477_v49 = vadd.f32 %v1458_v51, %v1425_v54  ;;  %v1476_v14 = vadd.f32 %v1458_v51, %v1424_v36  ;;  %v1547_v30 = vmul.f32 %v10027_v18, %v8952_v45 }
 0x2e4   :  { %v1479_v13 = vadd.f32 %v1459_v6, %v1427_v43  ;;  %v1562_v42 = vrot.slane %v1546_v10, 5  ;;  %v1598_v8 = vmul.f32 %v9970_v1, %v8956_v61  ;;  %v1599_v24 = vmul.f32 %v10027_v18, %v8956_v61  ;;  %v10071_v10 = vld [vmem:[#allocation2 + $0x60] sm:$0xff]  ;;  %v10075_v43 = vld [vmem:[#allocation2 + $0x68] sm:$0x7f] }
 0x2e5   :  { %v1478_v2 = vadd.f32 %v1459_v6, %v1426_v26  ;;  %v1529_v27 = vadd.f32 %v1510_v41, %v1477_v49  ;;  %v1528_v34 = vadd.f32 %v1510_v41, %v1476_v14  ;;  %v1563_v35 = vrot.slane %v1547_v30, 5 }
 0x2e6   :  { %v1531_v3 = vadd.f32 %v1511_v17, %v1479_v13  ;;  %v1652_v15 = vmul.f32 %v10023_v31, %v8964_v40  ;;  %v1614_v52 = vrot.slane %v1598_v8, 6  ;;  %v1615_v46 = vrot.slane %v1599_v24, 6 }
 0x2e7   :  { %v1530_v53 = vadd.f32 %v1511_v17, %v1478_v2  ;;  %v1581_v21 = vadd.f32 %v1562_v42, %v1529_v27  ;;  %v1580_v50 = vadd.f32 %v1562_v42, %v1528_v34  ;;  %v1653_v51 = vmul.f32 %v10027_v18, %v8964_v40 }
 0x2e8   :  { %v1583_v54 = vadd.f32 %v1563_v35, %v1531_v3  ;;  %v1654_v1 = vmul.f32 %v10071_v10, %v8964_v40  ;;  %v1655_v6 = vmul.f32 %v10075_v43, %v8964_v40  ;;  %v1688_v26 = vmul.f32 %v10023_v31, %v8991_v20 }
 0x2e9   :  { %v1582_v63 = vadd.f32 %v1563_v35, %v1530_v53  ;;  %v1633_v36 = vadd.f32 %v1614_v52, %v1581_v21  ;;  %v1632_v49 = vadd.f32 %v1614_v52, %v1580_v50  ;;  %v1689_v17 = vmul.f32 %v10027_v18, %v8991_v20 }
 0x2ea   :  { %v1635_v41 = vadd.f32 %v1615_v46, %v1583_v54  ;;  %v1690_v14 = vmul.f32 %v10071_v10, %v8991_v20  ;;  %v1691_v42 = vmul.f32 %v10075_v43, %v8991_v20  ;;  %v1722_v2 = vrot.slane %v1688_v26, 1 }
 0x2eb   :  { %v1634_v13 = vadd.f32 %v1615_v46, %v1582_v63  ;;  %v1669_v30 = vadd.f32 %v1653_v51, %v1633_v36  ;;  %v1668_v27 = vadd.f32 %v1652_v15, %v1632_v49  ;;  %v1723_v24 = vrot.slane %v1689_v17, 1 }
 0x2ec   :  { %v1671_v8 = vadd.f32 %v1655_v6, %v1635_v41  ;;  %v1725_v34 = vrot.slane %v1690_v14, 1  ;;  %v1726_v35 = vrot.slane %v1691_v42, 1  ;;  %v1780_v53 = vmul.f32 %v10023_v31, %v9008_v22 }
 0x2ed   :  { %v1670_v3 = vadd.f32 %v1654_v1, %v1634_v13  ;;  %v1781_v21 = vmul.f32 %v10027_v18, %v9008_v22  ;;  %v1724_v52 = vsel %vm430_vm3, %v1722_v2, %v1723_v24  ;;  %v1761_v46 = vadd.f32 %v1723_v24, %v1669_v30 }
 0x2ee   :  { %v1782_v50 = vmul.f32 %v10071_v10, %v9008_v22  ;;  %v1783_v15 = vmul.f32 %v10075_v43, %v9008_v22  ;;  %v1727_v54 = vsel %vm430_vm3, %v1725_v34, %v1726_v35  ;;  %v1760_v51 = vadd.f32 %v1724_v52, %v1668_v27 }
 0x2ef   :  { %v1763_v1 = vadd.f32 %v1726_v35, %v1671_v8  ;;  %v1814_v63 = vrot.slane %v1780_v53, 2  ;;  %v1762_v36 = vadd.f32 %v1727_v54, %v1670_v3  ;;  %v1815_v6 = vrot.slane %v1781_v21, 2 }
 0x2f0   :  { %v1817_v31 = vrot.slane %v1782_v50, 2  ;;  %v1818_v26 = vrot.slane %v1783_v15, 2  ;;  %v1870_v49 = vmul.f32 %v10027_v18, %v9039_v5  ;;  %v1871_v41 = vmul.f32 %v10075_v43, %v9039_v5 }
 0x2f1   :  { %v1922_v17 = vmul.f32 %v10027_v18, %v13114_v47  ;;  %v1923_v14 = vmul.f32 %v10075_v43, %v13114_v47  ;;  %v1816_v13 = vsel %vm523_vm4, %v1814_v63, %v1815_v6  ;;  %v1853_v42 = vadd.f32 %v1815_v6, %v1761_v46 }
 0x2f2   :  { %v1819_v30 = vsel %vm523_vm4, %v1817_v31, %v1818_v26  ;;  %v1855_v2 = vadd.f32 %v1818_v26, %v1763_v1  ;;  %v1852_v27 = vadd.f32 %v1816_v13, %v1760_v51  ;;  %v1886_v24 = vrot.slane %v1870_v49, 3 }
 0x2f3   :  { %v1854_v8 = vadd.f32 %v1819_v30, %v1762_v36  ;;  %v1887_v34 = vrot.slane %v1871_v41, 3  ;;  %v1938_v3 = vrot.slane %v1922_v17, 4  ;;  %v1939_v35 = vrot.slane %v1923_v14, 4 }
 0x2f4   :  { %v1974_v53 = vmul.f32 %v10027_v18, %v13043_v0  ;;  %v1975_v21 = vmul.f32 %v10075_v43, %v13043_v0  ;;  %v1904_v52 = vadd.f32 %v1886_v24, %v1852_v27  ;;  %v1905_v50 = vadd.f32 %v1886_v24, %v1853_v42 }
 0x2f5   :  { %v1906_v15 = vadd.f32 %v1887_v34, %v1854_v8  ;;  %v1907_v54 = vadd.f32 %v1887_v34, %v1855_v2  ;;  %v2026_v46 = vmul.f32 %v10027_v18, %v13044_v60  ;;  %v2027_v51 = vmul.f32 %v10075_v43, %v13044_v60  ;;  %v10119_v18 = vld [vmem:[#allocation2 + $0x70] sm:$0xff]  ;;  %v10123_v8 = vld [vmem:[#allocation2 + $0x78] sm:$0x7f] }
 0x2f6   :  { %v1990_v63 = vrot.slane %v1974_v53, 5  ;;  %v1991_v31 = vrot.slane %v1975_v21, 5  ;;  %v1956_v1 = vadd.f32 %v1938_v3, %v1904_v52  ;;  %v1957_v36 = vadd.f32 %v1938_v3, %v1905_v50 }
 0x2f7   :  { %v1958_v6 = vadd.f32 %v1939_v35, %v1906_v15  ;;  %v1959_v26 = vadd.f32 %v1939_v35, %v1907_v54  ;;  %v2042_v49 = vrot.slane %v2026_v46, 6  ;;  %v2043_v41 = vrot.slane %v2027_v51, 6 }
 0x2f8   :  { %v2080_v17 = vmul.f32 %v10071_v10, %v9084_v37  ;;  %v2081_v14 = vmul.f32 %v10075_v43, %v9084_v37  ;;  %v2008_v13 = vadd.f32 %v1990_v63, %v1956_v1  ;;  %v2009_v30 = vadd.f32 %v1990_v63, %v1957_v36 }
 0x2f9   :  { %v2010_v42 = vadd.f32 %v1991_v31, %v1958_v6  ;;  %v2011_v2 = vadd.f32 %v1991_v31, %v1959_v26  ;;  %v2082_v27 = vmul.f32 %v10119_v18, %v9084_v37  ;;  %v2083_v24 = vmul.f32 %v10123_v8, %v9084_v37 }
 0x2fa   :  { %v2116_v34 = vmul.f32 %v10071_v10, %v9060_v33  ;;  %v2117_v3 = vmul.f32 %v10075_v43, %v9060_v33  ;;  %v2060_v35 = vadd.f32 %v2042_v49, %v2008_v13  ;;  %v2061_v53 = vadd.f32 %v2042_v49, %v2009_v30 }
 0x2fb   :  { %v2062_v21 = vadd.f32 %v2043_v41, %v2010_v42  ;;  %v2063_v52 = vadd.f32 %v2043_v41, %v2011_v2  ;;  %v2118_v50 = vmul.f32 %v10119_v18, %v9060_v33  ;;  %v2119_v15 = vmul.f32 %v10123_v8, %v9060_v33 }
 0x2fc   :  { %v2150_v54 = vrot.slane %v2116_v34, 1  ;;  %v2151_v63 = vrot.slane %v2117_v3, 1  ;;  %v2096_v31 = vadd.f32 %v2080_v17, %v2060_v35  ;;  %v2097_v46 = vadd.f32 %v2081_v14, %v2061_v53 }
 0x2fd   :  { %v2098_v51 = vadd.f32 %v2082_v27, %v2062_v21  ;;  %v2099_v1 = vadd.f32 %v2083_v24, %v2063_v52  ;;  %v2153_v6 = vrot.slane %v2118_v50, 1  ;;  %v2154_v26 = vrot.slane %v2119_v15, 1 }
 0x2fe   :  { %v2152_v36 = vsel %vm430_vm3, %v2150_v54, %v2151_v63  ;;  %v2208_v49 = vmul.f32 %v10071_v10, %v9072_v25  ;;  %v2189_v13 = vadd.f32 %v2151_v63, %v2097_v46  ;;  %v2209_v30 = vmul.f32 %v10075_v43, %v9072_v25 }
 0x2ff   :  { %v2188_v41 = vadd.f32 %v2152_v36, %v2096_v31  ;;  %v2210_v42 = vmul.f32 %v10119_v18, %v9072_v25  ;;  %v2155_v17 = vsel %vm430_vm3, %v2153_v6, %v2154_v26  ;;  %v2191_v14 = vadd.f32 %v2154_v26, %v2099_v1 }
 0x300   :  { %v2211_v2 = vmul.f32 %v10123_v8, %v9072_v25  ;;  %v2242_v27 = vrot.slane %v2208_v49, 2  ;;  %v2190_v24 = vadd.f32 %v2155_v17, %v2098_v51  ;;  %v2243_v34 = vrot.slane %v2209_v30, 2 }
 0x301   :  { %v2245_v3 = vrot.slane %v2210_v42, 2  ;;  %v2298_v10 = vmul.f32 %v10075_v43, %v13052_v39  ;;  %v2299_v53 = vmul.f32 %v10123_v8, %v13052_v39  ;;  %v2350_v21 = vmul.f32 %v10075_v43, %v13053_v44 }
 0x302   :  { %v2246_v35 = vrot.slane %v2211_v2, 2  ;;  %v2351_v52 = vmul.f32 %v10123_v8, %v13053_v44  ;;  %v2244_v50 = vsel %vm523_vm4, %v2242_v27, %v2243_v34  ;;  %v2281_v15 = vadd.f32 %v2243_v34, %v2189_v13  ;;  %v10159_v13 = vld [vmem:[#allocation2 + $0x80] sm:$0xff] }
 0x303   :  { %v2314_v54 = vrot.slane %v2298_v10, 3  ;;  %v2402_v63 = vmul.f32 %v10075_v43, %v13054_v56  ;;  %v2280_v46 = vadd.f32 %v2244_v50, %v2188_v41  ;;  %v2315_v1 = vrot.slane %v2299_v53, 3  ;;  %v13185_v53 = vld [vmem:[#allocation58_spill] sm:$0xff] }
 0x304   :  { %v2247_v31 = vsel %vm523_vm4, %v2245_v3, %v2246_v35  ;;  %v2283_v51 = vadd.f32 %v2246_v35, %v2191_v14  ;;  %v2366_v26 = vrot.slane %v2350_v21, 4  ;;  %v2367_v49 = vrot.slane %v2351_v52, 4  ;;  %v10165_v14 = vld [vmem:[#allocation2 + $0x88] sm:$0x7f] }
 0x305   :  { %v2282_v36 = vadd.f32 %v2247_v31, %v2190_v24  ;;  %v2333_v6 = vadd.f32 %v2314_v54, %v2281_v15  ;;  %v2332_v30 = vadd.f32 %v2314_v54, %v2280_v46  ;;  %v2403_v17 = vmul.f32 %v10123_v8, %v13054_v56 }
 0x306   :  { %v2335_v42 = vadd.f32 %v2315_v1, %v2283_v51  ;;  %v2418_v2 = vrot.slane %v2402_v63, 5  ;;  %v2454_v3 = vmul.f32 %v10075_v43, %v13055_v48  ;;  %v2455_v41 = vmul.f32 %v10123_v8, %v13055_v48 }
 0x307   :  { %v2334_v27 = vadd.f32 %v2315_v1, %v2282_v36  ;;  %v2385_v34 = vadd.f32 %v2366_v26, %v2333_v6  ;;  %v2384_v24 = vadd.f32 %v2366_v26, %v2332_v30  ;;  %v2419_v35 = vrot.slane %v2403_v17, 5  ;;  %v13186_v6 = vld [vmem:[#allocation52_spill] sm:$0xff] }
 0x308   :  { %v2387_v10 = vadd.f32 %v2367_v49, %v2335_v42  ;;  %v2508_v21 = vmul.f32 %v10119_v18, %v13185_v53  ;;  %v2470_v15 = vrot.slane %v2454_v3, 6  ;;  %v2471_v54 = vrot.slane %v2455_v41, 6 }
 0x309   :  { %v2386_v52 = vadd.f32 %v2367_v49, %v2334_v27  ;;  %v2437_v50 = vadd.f32 %v2418_v2, %v2385_v34  ;;  %v2436_v63 = vadd.f32 %v2418_v2, %v2384_v24  ;;  %v2509_v43 = vmul.f32 %v10123_v8, %v13185_v53 }
 0x30a   :  { %v2439_v31 = vadd.f32 %v2419_v35, %v2387_v10  ;;  %v2510_v46 = vmul.f32 %v13185_v53, %v10159_v13  ;;  %v2511_v36 = vmul.f32 %v13185_v53, %v10165_v14  ;;  %v2544_v26 = vmul.f32 %v10119_v18, %v13186_v6 }
 0x30b   :  { %v2438_v51 = vadd.f32 %v2419_v35, %v2386_v52  ;;  %v2489_v1 = vadd.f32 %v2470_v15, %v2437_v50  ;;  %v2488_v49 = vadd.f32 %v2470_v15, %v2436_v63  ;;  %v2545_v42 = vmul.f32 %v10123_v8, %v13186_v6  ;;  %v13187_v15 = vld [vmem:[#allocation53_spill] sm:$0xff] }
 0x30c   :  { %v2491_v30 = vadd.f32 %v2471_v54, %v2439_v31  ;;  %v2546_v17 = vmul.f32 %v13186_v6, %v10159_v13  ;;  %v2547_v34 = vmul.f32 %v13186_v6, %v10165_v14  ;;  %v2578_v3 = vrot.slane %v2544_v26, 1 }
 0x30d   :  { %v2490_v2 = vadd.f32 %v2471_v54, %v2438_v51  ;;  %v2525_v27 = vadd.f32 %v2509_v43, %v2489_v1  ;;  %v2524_v41 = vadd.f32 %v2508_v21, %v2488_v49  ;;  %v2579_v10 = vrot.slane %v2545_v42, 1 }
 0x30e   :  { %v2527_v24 = vadd.f32 %v2511_v36, %v2491_v30  ;;  %v2581_v35 = vrot.slane %v2546_v17, 1  ;;  %v2582_v50 = vrot.slane %v2547_v34, 1  ;;  %v2636_v63 = vmul.f32 %v10119_v18, %v13187_v15 }
 0x30f   :  { %v2526_v52 = vadd.f32 %v2510_v46, %v2490_v2  ;;  %v2637_v31 = vmul.f32 %v10123_v8, %v13187_v15  ;;  %v2580_v53 = vsel %vm430_vm3, %v2578_v3, %v2579_v10  ;;  %v2617_v54 = vadd.f32 %v2579_v10, %v2525_v27 }
 0x310   :  { %v2638_v43 = vmul.f32 %v13187_v15, %v10159_v13  ;;  %v2639_v21 = vmul.f32 %v13187_v15, %v10165_v14  ;;  %v2583_v51 = vsel %vm430_vm3, %v2581_v35, %v2582_v50  ;;  %v2616_v1 = vadd.f32 %v2580_v53, %v2524_v41 }
 0x311   :  { %v2619_v46 = vadd.f32 %v2582_v50, %v2527_v24  ;;  %v2670_v36 = vrot.slane %v2636_v63, 2  ;;  %v2618_v26 = vadd.f32 %v2583_v51, %v2526_v52  ;;  %v2671_v49 = vrot.slane %v2637_v31, 2 }
 0x312   :  { %v2673_v18 = vrot.slane %v2638_v43, 2  ;;  %v2674_v30 = vrot.slane %v2639_v21, 2  ;;  %v2726_v42 = vmul.f32 %v10123_v8, %v13137_v57  ;;  %v2727_v17 = vmul.f32 %v13137_v57, %v10165_v14 }
 0x313   :  { %v2778_v2 = vmul.f32 %v10123_v8, %v13138_v4  ;;  %v2779_v27 = vmul.f32 %v13138_v4, %v10165_v14  ;;  %v2672_v53 = vsel %vm523_vm4, %v2670_v36, %v2671_v49  ;;  %v2709_v3 = vadd.f32 %v2671_v49, %v2617_v54 }
 0x314   :  { %v2675_v34 = vsel %vm523_vm4, %v2673_v18, %v2674_v30  ;;  %v2711_v41 = vadd.f32 %v2674_v30, %v2619_v46  ;;  %v2708_v24 = vadd.f32 %v2672_v53, %v2616_v1  ;;  %v2742_v35 = vrot.slane %v2726_v42, 3  ;;  %v329_v46 = vld [vmem:[#allocation2 + $0x90] sm:$0xff] }
 0x315   :  { %v2710_v10 = vadd.f32 %v2675_v34, %v2618_v26  ;;  %v2743_v52 = vrot.slane %v2727_v17, 3  ;;  %v2794_v50 = vrot.slane %v2778_v2, 4  ;;  %v2795_v63 = vrot.slane %v2779_v27, 4  ;;  %v10211_v26 = vld [vmem:[#allocation2 + $0x98] sm:$0x7f] }
 0x316   :  { %v2830_v31 = vmul.f32 %v10123_v8, %v13066_v11  ;;  %v2831_v43 = vmul.f32 %v13066_v11, %v10165_v14  ;;  %v2760_v21 = vadd.f32 %v2742_v35, %v2708_v24  ;;  %v2761_v51 = vadd.f32 %v2742_v35, %v2709_v3 }
 0x317   :  { %v2762_v4 = vadd.f32 %v2743_v52, %v2710_v10  ;;  %v2763_v36 = vadd.f32 %v2743_v52, %v2711_v41  ;;  %v2882_v54 = vmul.f32 %v10123_v8, %v13067_v59  ;;  %v2883_v1 = vmul.f32 %v13067_v59, %v10165_v14 }
 0x318   :  { %v2846_v57 = vrot.slane %v2830_v31, 5  ;;  %v2847_v18 = vrot.slane %v2831_v43, 5  ;;  %v2812_v49 = vadd.f32 %v2794_v50, %v2760_v21  ;;  %v2813_v30 = vadd.f32 %v2794_v50, %v2761_v51 }
 0x319   :  { %v2814_v42 = vadd.f32 %v2795_v63, %v2762_v4  ;;  %v2815_v17 = vadd.f32 %v2795_v63, %v2763_v36  ;;  %v2898_v2 = vrot.slane %v2882_v54, 6  ;;  %v2899_v27 = vrot.slane %v2883_v1, 6 }
 0x31a   :  { %v2936_v53 = vmul.f32 %v9236_v32, %v10159_v13  ;;  %v2937_v34 = vmul.f32 %v9236_v32, %v10165_v14  ;;  %v2864_v3 = vadd.f32 %v2846_v57, %v2812_v49  ;;  %v2865_v8 = vadd.f32 %v2846_v57, %v2813_v30 }
 0x31b   :  { %v2866_v41 = vadd.f32 %v2847_v18, %v2814_v42  ;;  %v2867_v24 = vadd.f32 %v2847_v18, %v2815_v17  ;;  %v2938_v10 = vmul.f32 %v9236_v32, %v329_v46  ;;  %v2939_v35 = vmul.f32 %v9236_v32, %v10211_v26 }
 0x31c   :  { %v2972_v4 = vmul.f32 %v9214_v58, %v10159_v13  ;;  %v2973_v52 = vmul.f32 %v9214_v58, %v10165_v14  ;;  %v2916_v50 = vadd.f32 %v2898_v2, %v2864_v3  ;;  %v2917_v63 = vadd.f32 %v2898_v2, %v2865_v8 }
 0x31d   :  { %v2918_v31 = vadd.f32 %v2899_v27, %v2866_v41  ;;  %v2919_v43 = vadd.f32 %v2899_v27, %v2867_v24  ;;  %v2974_v21 = vmul.f32 %v9214_v58, %v329_v46  ;;  %v2975_v57 = vmul.f32 %v9214_v58, %v10211_v26 }
 0x31e   :  { %v3006_v51 = vrot.slane %v2972_v4, 1  ;;  %v3007_v36 = vrot.slane %v2973_v52, 1  ;;  %v2952_v18 = vadd.f32 %v2936_v53, %v2916_v50  ;;  %v2953_v54 = vadd.f32 %v2937_v34, %v2917_v63  ;;  %v13188_v50 = vld [vmem:[#allocation69_spill] sm:$0xff] }
 0x31f   :  { %v2954_v1 = vadd.f32 %v2938_v10, %v2918_v31  ;;  %v2955_v49 = vadd.f32 %v2939_v35, %v2919_v43  ;;  %v3009_v42 = vrot.slane %v2974_v21, 1  ;;  %v3010_v17 = vrot.slane %v2975_v57, 1  ;;  %v13189_v43 = vld [vmem:[#allocation72_spill] sm:$0xff] }
 0x320   :  { %v3008_v30 = vsel %vm430_vm3, %v3006_v51, %v3007_v36  ;;  %v3064_v2 = vmul.f32 %v9217_v29, %v10159_v13  ;;  %v3045_v27 = vadd.f32 %v3007_v36, %v2953_v54  ;;  %v3065_v8 = vmul.f32 %v9217_v29, %v10165_v14 }
 0x321   :  { %v3044_v3 = vadd.f32 %v3008_v30, %v2952_v18  ;;  %v3066_v41 = vmul.f32 %v9217_v29, %v329_v46  ;;  %v3011_v24 = vsel %vm430_vm3, %v3009_v42, %v3010_v17  ;;  %v3047_v53 = vadd.f32 %v3010_v17, %v2955_v49  ;;  %v13190_v18 = vld [vmem:[#allocation73_spill] sm:$0xff] }
 0x322   :  { %v3067_v34 = vmul.f32 %v9217_v29, %v10211_v26  ;;  %v3098_v10 = vrot.slane %v3064_v2, 2  ;;  %v3046_v35 = vadd.f32 %v3011_v24, %v2954_v1  ;;  %v3099_v4 = vrot.slane %v3065_v8, 2 }
 0x323   :  { %v3101_v52 = vrot.slane %v3066_v41, 2  ;;  %v3154_v13 = vmul.f32 %v13188_v50, %v10165_v14  ;;  %v3155_v31 = vmul.f32 %v13188_v50, %v10211_v26  ;;  %v3206_v46 = vmul.f32 %v13189_v43, %v10165_v14 }
 0x324   :  { %v3102_v63 = vrot.slane %v3067_v34, 2  ;;  %v3207_v21 = vmul.f32 %v13189_v43, %v10211_v26  ;;  %v3100_v57 = vsel %vm523_vm4, %v3098_v10, %v3099_v4  ;;  %v3137_v51 = vadd.f32 %v3099_v4, %v3045_v27 }
 0x325   :  { %v3170_v36 = vrot.slane %v3154_v13, 3  ;;  %v3258_v54 = vmul.f32 %v13190_v18, %v10165_v14  ;;  %v3136_v49 = vadd.f32 %v3100_v57, %v3044_v3  ;;  %v3171_v42 = vrot.slane %v3155_v31, 3  ;;  %v13191_v13 = vld [vmem:[#allocation39_spill] sm:$0xff]  ;;  %v13192_v31 = vld [vmem:[#allocation16_spill] sm:$0xff] }
 0x326   :  { %v3103_v1 = vsel %vm523_vm4, %v3101_v52, %v3102_v63  ;;  %v3139_v30 = vadd.f32 %v3102_v63, %v3047_v53  ;;  %v3222_v8 = vrot.slane %v3206_v46, 4  ;;  %v3223_v41 = vrot.slane %v3207_v21, 4  ;;  %v8388_v63 = vld [vmem:[#allocation2 + $0xc0] sm:$0xff] }
 0x327   :  { %v3138_v17 = vadd.f32 %v3103_v1, %v3046_v35  ;;  %v3189_v2 = vadd.f32 %v3170_v36, %v3137_v51  ;;  %v3188_v24 = vadd.f32 %v3170_v36, %v3136_v49  ;;  %v3259_v43 = vmul.f32 %v13190_v18, %v10211_v26  ;;  %v10255_v49 = vld [vmem:[#allocation2 + $0xc8] sm:$0x7f] }
 0x328   :  { %v3191_v34 = vadd.f32 %v3171_v42, %v3139_v30  ;;  %v3274_v10 = vrot.slane %v3258_v54, 5  ;;  %v3310_v50 = vmul.f32 %v13191_v13, %v10165_v14  ;;  %v3311_v3 = vmul.f32 %v13191_v13, %v10211_v26  ;;  %v10259_v30 = vld [vmem:[#allocation2 + $0xd0] sm:$0xff] }
 0x329   :  { %v3190_v27 = vadd.f32 %v3171_v42, %v3138_v17  ;;  %v3241_v4 = vadd.f32 %v3222_v8, %v3189_v2  ;;  %v3240_v53 = vadd.f32 %v3222_v8, %v3188_v24  ;;  %v3275_v35 = vrot.slane %v3259_v43, 5  ;;  %v10263_v17 = vld [vmem:[#allocation2 + $0xd8] sm:$0x7f] }
 0x32a   :  { %v3243_v52 = vadd.f32 %v3223_v41, %v3191_v34  ;;  %v374_v46 = vmul.f32 %v8388_v63, %v13192_v31  ;;  %v3326_v51 = vrot.slane %v3310_v50, 6  ;;  %v3327_v36 = vrot.slane %v3311_v3, 6  ;;  %v13193_v2 = vld [vmem:[#allocation12_spill] sm:$0xff] }
 0x32b   :  { %v3242_v21 = vadd.f32 %v3223_v41, %v3190_v27  ;;  %v3293_v57 = vadd.f32 %v3274_v10, %v3241_v4  ;;  %v3292_v1 = vadd.f32 %v3274_v10, %v3240_v53  ;;  %v375_v14 = vmul.f32 %v10255_v49, %v13192_v31  ;;  %v10275_v4 = vld [vmem:[%s12633_s6] ss:$0 sm:$0xff] }
 0x32c   :  { %v3295_v54 = vadd.f32 %v3275_v35, %v3243_v52  ;;  %v376_v26 = vmul.f32 %v10259_v30, %v13192_v31  ;;  %v377_v50 = vmul.f32 %v10263_v17, %v13192_v31  ;;  %v410_v8 = vmul.f32 %v8388_v63, %v13193_v2 }
 0x32d   :  { %v3294_v43 = vadd.f32 %v3275_v35, %v3242_v21  ;;  %v3345_v42 = vadd.f32 %v3326_v51, %v3293_v57  ;;  %v3344_v41 = vadd.f32 %v3326_v51, %v3292_v1  ;;  %v411_v34 = vmul.f32 %v10255_v49, %v13193_v2  ;;  %v13194_v1 = vld [vmem:[#allocation15_spill] sm:$0xff] }
 0x32e   :  { %v3347_v24 = vadd.f32 %v3327_v36, %v3295_v54  ;;  %v412_v10 = vmul.f32 %v10259_v30, %v13193_v2  ;;  %v413_v3 = vmul.f32 %v10263_v17, %v13193_v2  ;;  %v449_v53 = vrot.slane %v410_v8, 1 }
 0x32f   :  { %v3346_v27 = vadd.f32 %v3327_v36, %v3294_v43  ;;  %v3368_v13 = vadd.f32 %v10275_v4, %v3345_v42  ;;  %v3367_v52 = vadd.f32 %v10275_v4, %v3344_v41  ;;  %v450_v31 = vrot.slane %v411_v34, 1 }
 0x330   :  { %v3370_v35 = vadd.f32 %v10275_v4, %v3347_v24  ;;  %v452_v21 = vrot.slane %v412_v10, 1  ;;  %v453_v36 = vrot.slane %v413_v3, 1  ;;  %v503_v54 = vmul.f32 %v8388_v63, %v13194_v1  ;;  %v13195_v3 = vld [vmem:[#allocation19_spill] sm:$0xff] }
 0x331   :  { %v3369_v57 = vadd.f32 %v10275_v4, %v3346_v27  ;;  %v3416_v51 = vrot.slane %v3368_v13, 5  ;;  %v3397_v43 = vcombine.high %v3367_v52, %v3367_v52  ;;  %v451_v42 = vsel %vm430_vm3, %v449_v53, %v450_v31 }
 0x332   :  { %v3420_v18 = vrot.slane %v3370_v35, 5  ;;  %v484_v29 = vadd.f32 %v450_v31, %v375_v14  ;;  %v454_v2 = vsel %vm430_vm3, %v452_v21, %v453_v36  ;;  %v483_v8 = vadd.f32 %v451_v42, %v374_v46  ;;  %v13196_v31 = vld [vmem:[#allocation20_spill] sm:$0xff] }
 0x333   :  { %v3398_v58 = vcombine.high %v3369_v57, %v3369_v57  ;;  %v486_v41 = vadd.f32 %v453_v36, %v377_v50  ;;  %v7956_v32 = vrot.slane %v3397_v43, 9  ;;  %v485_v24 = vadd.f32 %v454_v2, %v376_v26 }
 0x334   :  { %v504_v34 = vmul.f32 %v10255_v49, %v13194_v1  ;;  %v505_v10 = vmul.f32 %v10259_v30, %v13194_v1  ;;  %v506_v63 = vmul.f32 %v10263_v17, %v13194_v1  ;;  %v542_v13 = vrot.slane %v503_v54, 2 }
 0x335   :  { %v7957_v27 = vrot.slane %v3398_v58, 9  ;;  %v590_v14 = vmul.f32 %v10255_v49, %v13195_v3  ;;  %v10296_v46 = vsel %vm9736_vm8, %v7956_v32, %v3416_v51  ;;  %v591_v53 = vmul.f32 %v10263_v17, %v13195_v3 }
 0x336   :  { %v543_v50 = vrot.slane %v504_v34, 2  ;;  %v545_v26 = vrot.slane %v505_v10, 2  ;;  %v546_v58 = vrot.slane %v506_v63, 2  ;;  %v642_v21 = vmul.f32 %v10255_v49, %v13196_v31 }
 0x337   :  { %v10302_v52 = vsel %vm9736_vm8, %v7957_v27, %v3420_v18  ;;  %v606_v35 = vrot.slane %v590_v14, 3  ;;  %v607_v36 = vrot.slane %v591_v53, 3  ;;  %v643_v18 = vmul.f32 %v10263_v17, %v13196_v31 }
 0x338   :  { %v3449_v57 = vcombine.low %v10296_v46, %v10302_v52  ;;  %v544_v32 = vsel %vm523_vm4, %v542_v13, %v543_v50  ;;  %v577_v51 = vadd.f32 %v543_v50, %v484_v29  ;;  %v547_v1 = vsel %vm523_vm4, %v545_v26, %v546_v58 }
 0x339   :  { %v576_v54 = vadd.f32 %v544_v32, %v483_v8  ;;  %v579_v43 = vadd.f32 %v546_v58, %v486_v41  ;;  %v578_v2 = vadd.f32 %v547_v1, %v485_v24  ;;  %v658_v10 = vrot.slane %v642_v21, 4  ;;  %v10325_v1 = vld [vmem:[#allocation2 + $0xe0] sm:$0xff] }
 0x33a   :  { %v3459_v42 = vsel %vm174_vm1, %v3449_v57, 0.0  ;;  %v629_v34 = vadd.f32 %v606_v35, %v577_v51  ;;  %v659_v3 = vrot.slane %v643_v18, 4  ;;  %v694_v29 = vmul.f32 %v10255_v49, %v13171_v12 }
 0x33b   :  { %3460 = vadd.xlane.f32.xlu1 %v3459_v42  ;;  %v628_v27 = vadd.f32 %v606_v35, %v576_v54  ;;  %v631_v63 = vadd.f32 %v607_v36, %v579_v43  ;;  %v630_v13 = vadd.f32 %v607_v36, %v578_v2  ;;  %v695_v8 = vmul.f32 %v10263_v17, %v13171_v12  ;;  %v13197_v2 = vld [vmem:[#allocation26_spill] sm:$0xff] }
 0x33c   :  { %v681_v14 = vadd.f32 %v658_v10, %v629_v34  ;;  %v746_v41 = vmul.f32 %v10255_v49, %v13175_v23  ;;  %v710_v24 = vrot.slane %v694_v29, 5  ;;  %v747_v53 = vmul.f32 %v10263_v17, %v13175_v23  ;;  %v10329_v23 = vld [vmem:[#allocation2 + $0xe8] sm:$0x7f] }
 0x33d   :  { %v680_v50 = vadd.f32 %v658_v10, %v628_v27  ;;  %v683_v26 = vadd.f32 %v659_v3, %v631_v63  ;;  %v682_v58 = vadd.f32 %v659_v3, %v630_v13  ;;  %v711_v35 = vrot.slane %v695_v8, 5 }
 0x33e   :  { %v762_v31 = vrot.slane %v746_v41, 6  ;;  %v804_v21 = vmul.f32 %v10259_v30, %v13176_v62  ;;  %v733_v32 = vadd.f32 %v710_v24, %v681_v14  ;;  %v763_v51 = vrot.slane %v747_v53, 6 }
 0x33f   :  { %v732_v57 = vadd.f32 %v710_v24, %v680_v50  ;;  %v805_v12 = vmul.f32 %v10263_v17, %v13176_v62  ;;  %v734_v36 = vadd.f32 %v711_v35, %v682_v58  ;;  %v735_v49 = vadd.f32 %v711_v35, %v683_v26  ;;  %v13198_v35 = vld [vmem:[#allocation28_spill] sm:$0xff] }
 0x340   :  { %v806_v54 = vmul.f32 %v10325_v1, %v13176_v62  ;;  %v807_v43 = vmul.f32 %v10329_v23, %v13176_v62  ;;  %v785_v42 = vadd.f32 %v762_v31, %v733_v32  ;;  %v840_v34 = vmul.f32 %v10259_v30, %v13197_v2 }
 0x341   :  { %v784_v18 = vadd.f32 %v762_v31, %v732_v57  ;;  %v841_v10 = vmul.f32 %v10263_v17, %v13197_v2  ;;  %v786_v27 = vadd.f32 %v763_v51, %v734_v36  ;;  %v787_v63 = vadd.f32 %v763_v51, %v735_v49 }
 0x342   :  { %v842_v3 = vmul.f32 %v10325_v1, %v13197_v2  ;;  %v843_v29 = vmul.f32 %v10329_v23, %v13197_v2  ;;  %v821_v14 = vadd.f32 %v805_v12, %v785_v42  ;;  %v878_v8 = vrot.slane %v840_v34, 1  ;;  %v13199_v42 = vld [vmem:[#allocation30_spill] sm:$0xff]  ;;  %v13200_v34 = vld [vmem:[#allocation31_spill] sm:$0xff] }
 0x343   :  { %v820_v13 = vadd.f32 %v804_v21, %v784_v18  ;;  %v879_v62 = vrot.slane %v841_v10, 1  ;;  %v822_v41 = vadd.f32 %v806_v54, %v786_v27  ;;  %v823_v50 = vadd.f32 %v807_v43, %v787_v63 }
 0x344   :  { %v881_v26 = vrot.slane %v842_v3, 1  ;;  %v882_v24 = vrot.slane %v843_v29, 1  ;;  %v932_v31 = vmul.f32 %v10259_v30, %v13198_v35  ;;  %v933_v57 = vmul.f32 %v10263_v17, %v13198_v35 }
 0x345   :  { %v880_v53 = vsel %vm430_vm3, %v878_v8, %v879_v62  ;;  %v913_v58 = vadd.f32 %v879_v62, %v821_v14  ;;  %v934_v12 = vmul.f32 %v10325_v1, %v13198_v35  ;;  %v935_v49 = vmul.f32 %v10329_v23, %v13198_v35 }
 0x346   :  { %v883_v32 = vsel %vm430_vm3, %v881_v26, %v882_v24  ;;  %v912_v51 = vadd.f32 %v880_v53, %v820_v13  ;;  %v915_v21 = vadd.f32 %v882_v24, %v823_v50  ;;  %v970_v54 = vrot.slane %v932_v31, 2 }
 0x347   :  { %v914_v36 = vadd.f32 %v883_v32, %v822_v41  ;;  %v971_v43 = vrot.slane %v933_v57, 2  ;;  %v973_v18 = vrot.slane %v934_v12, 2  ;;  %v1018_v30 = vmul.f32 %v10263_v17, %v13199_v42 }
 0x348   :  { %v1019_v2 = vmul.f32 %v10329_v23, %v13199_v42  ;;  %v1070_v10 = vmul.f32 %v10263_v17, %v13200_v34  ;;  %v974_v63 = vrot.slane %v935_v49, 2  ;;  %v1071_v29 = vmul.f32 %v10329_v23, %v13200_v34 }
 0x349   :  { %v972_v27 = vsel %vm523_vm4, %v970_v54, %v971_v43  ;;  %v1005_v3 = vadd.f32 %v971_v43, %v913_v58  ;;  %v1034_v14 = vrot.slane %v1018_v30, 3  ;;  %v1122_v24 = vmul.f32 %v10263_v17, %v13183_v9  ;;  %v13201_v30 = vld [vmem:[#allocation34_spill] sm:$0xff] }
 0x34a   :  { %v1004_v13 = vadd.f32 %v972_v27, %v912_v51  ;;  %v1035_v8 = vrot.slane %v1019_v2, 3  ;;  %v1086_v62 = vrot.slane %v1070_v10, 4  ;;  %v975_v41 = vsel %vm523_vm4, %v973_v18, %v974_v63 }
 0x34b   :  { %v1007_v50 = vadd.f32 %v974_v63, %v915_v21  ;;  %v1087_v26 = vrot.slane %v1071_v29, 4  ;;  %v1006_v53 = vadd.f32 %v975_v41, %v914_v36  ;;  %v1057_v31 = vadd.f32 %v1034_v14, %v1005_v3  ;;  %v10373_v63 = vld [vmem:[#allocation2 + $0xf0] sm:$0xff]  ;;  %v10377_v3 = vld [vmem:[#allocation2 + $0xf8] sm:$0x7f] }
 0x34c   :  { %v1056_v35 = vadd.f32 %v1034_v14, %v1004_v13  ;;  %v1123_v58 = vmul.f32 %v10329_v23, %v13183_v9  ;;  %v1138_v32 = vrot.slane %v1122_v24, 5  ;;  %v1174_v51 = vmul.f32 %v10263_v17, %v13184_v55 }
 0x34d   :  { %v1059_v57 = vadd.f32 %v1035_v8, %v1007_v50  ;;  %v1175_v12 = vmul.f32 %v10329_v23, %v13184_v55  ;;  %v1058_v49 = vadd.f32 %v1035_v8, %v1006_v53  ;;  %v1109_v54 = vadd.f32 %v1086_v62, %v1057_v31 }
 0x34e   :  { %v1108_v21 = vadd.f32 %v1086_v62, %v1056_v35  ;;  %v1139_v43 = vrot.slane %v1123_v58, 5  ;;  %v1190_v42 = vrot.slane %v1174_v51, 6  ;;  %v1232_v2 = vmul.f32 %v10325_v1, %v13201_v30 }
 0x34f   :  { %v1111_v18 = vadd.f32 %v1087_v26, %v1059_v57  ;;  %v1191_v36 = vrot.slane %v1175_v12, 6  ;;  %v1110_v34 = vadd.f32 %v1087_v26, %v1058_v49  ;;  %v1161_v10 = vadd.f32 %v1138_v32, %v1109_v54 }
 0x350   :  { %v1160_v9 = vadd.f32 %v1138_v32, %v1108_v21  ;;  %v1233_v27 = vmul.f32 %v10329_v23, %v13201_v30  ;;  %v1234_v55 = vmul.f32 %v10373_v63, %v13201_v30  ;;  %v1235_v29 = vmul.f32 %v10377_v3, %v13201_v30 }
 0x351   :  { %v1163_v17 = vadd.f32 %v1139_v43, %v1111_v18  ;;  %v1268_v13 = vmul.f32 %v10325_v1, %v8864_v19  ;;  %v1162_v14 = vadd.f32 %v1139_v43, %v1110_v34  ;;  %v1213_v62 = vadd.f32 %v1190_v42, %v1161_v10 }
 0x352   :  { %v1212_v8 = vadd.f32 %v1190_v42, %v1160_v9  ;;  %v1269_v41 = vmul.f32 %v10329_v23, %v8864_v19  ;;  %v1270_v26 = vmul.f32 %v10373_v63, %v8864_v19  ;;  %v1271_v24 = vmul.f32 %v10377_v3, %v8864_v19 }
 0x353   :  { %v1215_v50 = vadd.f32 %v1191_v36, %v1163_v17  ;;  %v1306_v53 = vrot.slane %v1268_v13, 1  ;;  %v1214_v35 = vadd.f32 %v1191_v36, %v1162_v14  ;;  %v1249_v58 = vadd.f32 %v1233_v27, %v1213_v62 }
 0x354   :  { %v1248_v31 = vadd.f32 %v1232_v2, %v1212_v8  ;;  %v1307_v57 = vrot.slane %v1269_v41, 1  ;;  %v1309_v51 = vrot.slane %v1270_v26, 1  ;;  %v1310_v12 = vrot.slane %v1271_v24, 1 }
 0x355   :  { %v1251_v32 = vadd.f32 %v1235_v29, %v1215_v50  ;;  %v1360_v49 = vmul.f32 %v10325_v1, %v8908_v38  ;;  %v1250_v21 = vadd.f32 %v1234_v55, %v1214_v35  ;;  %v1361_v18 = vmul.f32 %v10329_v23, %v8908_v38 }
 0x356   :  { %v1308_v54 = vsel %vm430_vm3, %v1306_v53, %v1307_v57  ;;  %v1341_v43 = vadd.f32 %v1307_v57, %v1249_v58  ;;  %v1311_v19 = vsel %vm430_vm3, %v1309_v51, %v1310_v12  ;;  %v1362_v30 = vmul.f32 %v10373_v63, %v8908_v38 }
 0x357   :  { %v1340_v42 = vadd.f32 %v1308_v54, %v1248_v31  ;;  %v1343_v36 = vadd.f32 %v1310_v12, %v1251_v32  ;;  %v1342_v2 = vadd.f32 %v1311_v19, %v1250_v21  ;;  %v1363_v34 = vmul.f32 %v10377_v3, %v8908_v38 }
 0x358   :  { %v1398_v9 = vrot.slane %v1360_v49, 2  ;;  %v1399_v1 = vrot.slane %v1361_v18, 2  ;;  %v1401_v10 = vrot.slane %v1362_v30, 2  ;;  %v1446_v27 = vmul.f32 %v10329_v23, %v8922_v7 }
 0x359   :  { %v1447_v17 = vmul.f32 %v10377_v3, %v8922_v7  ;;  %v1498_v55 = vmul.f32 %v10329_v23, %v8930_v16  ;;  %v1402_v13 = vrot.slane %v1363_v34, 2  ;;  %v1499_v8 = vmul.f32 %v10377_v3, %v8930_v16 }
 0x35a   :  { %v1400_v29 = vsel %vm523_vm4, %v1398_v9, %v1399_v1  ;;  %v1433_v14 = vadd.f32 %v1399_v1, %v1341_v43  ;;  %v1462_v62 = vrot.slane %v1446_v27, 3  ;;  %v1550_v7 = vmul.f32 %v10329_v23, %v8952_v45  ;;  %v10421_v9 = vld [vmem:[#allocation2 + $0x100] sm:$0xff]  ;;  %v10425_v1 = vld [vmem:[#allocation2 + $0x108] sm:$0x7f] }
 0x35b   :  { %v1432_v38 = vadd.f32 %v1400_v29, %v1340_v42  ;;  %v1463_v41 = vrot.slane %v1447_v17, 3  ;;  %v1514_v50 = vrot.slane %v1498_v55, 4  ;;  %v1403_v26 = vsel %vm523_vm4, %v1401_v10, %v1402_v13 }
 0x35c   :  { %v1435_v24 = vadd.f32 %v1402_v13, %v1343_v36  ;;  %v1515_v53 = vrot.slane %v1499_v8, 4  ;;  %v1434_v35 = vadd.f32 %v1403_v26, %v1342_v2  ;;  %v1485_v58 = vadd.f32 %v1462_v62, %v1433_v14 }
 0x35d   :  { %v1484_v31 = vadd.f32 %v1462_v62, %v1432_v38  ;;  %v1551_v57 = vmul.f32 %v10377_v3, %v8952_v45  ;;  %v1566_v51 = vrot.slane %v1550_v7, 5  ;;  %v1602_v16 = vmul.f32 %v10329_v23, %v8956_v61 }
 0x35e   :  { %v1487_v32 = vadd.f32 %v1463_v41, %v1435_v24  ;;  %v1603_v12 = vmul.f32 %v10377_v3, %v8956_v61  ;;  %v1486_v49 = vadd.f32 %v1463_v41, %v1434_v35  ;;  %v1537_v54 = vadd.f32 %v1514_v50, %v1485_v58 }
 0x35f   :  { %v1536_v21 = vadd.f32 %v1514_v50, %v1484_v31  ;;  %v1567_v43 = vrot.slane %v1551_v57, 5  ;;  %v1618_v19 = vrot.slane %v1602_v16, 6  ;;  %v1660_v36 = vmul.f32 %v10373_v63, %v8964_v40 }
 0x360   :  { %v1539_v18 = vadd.f32 %v1515_v53, %v1487_v32  ;;  %v1619_v42 = vrot.slane %v1603_v12, 6  ;;  %v1538_v30 = vadd.f32 %v1515_v53, %v1486_v49  ;;  %v1589_v2 = vadd.f32 %v1566_v51, %v1537_v54 }
 0x361   :  { %v1588_v45 = vadd.f32 %v1566_v51, %v1536_v21  ;;  %v1661_v34 = vmul.f32 %v10377_v3, %v8964_v40  ;;  %v1662_v61 = vmul.f32 %v10421_v9, %v8964_v40  ;;  %v1663_v10 = vmul.f32 %v10425_v1, %v8964_v40 }
 0x362   :  { %v1591_v23 = vadd.f32 %v1567_v43, %v1539_v18  ;;  %v1696_v27 = vmul.f32 %v10373_v63, %v8991_v20  ;;  %v1590_v17 = vadd.f32 %v1567_v43, %v1538_v30  ;;  %v1641_v29 = vadd.f32 %v1618_v19, %v1589_v2 }
 0x363   :  { %v1640_v55 = vadd.f32 %v1618_v19, %v1588_v45  ;;  %v1697_v13 = vmul.f32 %v10377_v3, %v8991_v20  ;;  %v1698_v8 = vmul.f32 %v10421_v9, %v8991_v20  ;;  %v1699_v38 = vmul.f32 %v10425_v1, %v8991_v20 }
 0x364   :  { %v1643_v14 = vadd.f32 %v1619_v42, %v1591_v23  ;;  %v1734_v62 = vrot.slane %v1696_v27, 1  ;;  %v1642_v41 = vadd.f32 %v1619_v42, %v1590_v17  ;;  %v1677_v40 = vadd.f32 %v1661_v34, %v1641_v29 }
 0x365   :  { %v1676_v50 = vadd.f32 %v1660_v36, %v1640_v55  ;;  %v1735_v26 = vrot.slane %v1697_v13, 1  ;;  %v1737_v53 = vrot.slane %v1698_v8, 1  ;;  %v1738_v7 = vrot.slane %v1699_v38, 1 }
 0x366   :  { %v1679_v24 = vadd.f32 %v1663_v10, %v1643_v14  ;;  %v1788_v35 = vmul.f32 %v10373_v63, %v9008_v22  ;;  %v1678_v31 = vadd.f32 %v1662_v61, %v1642_v41  ;;  %v1789_v32 = vmul.f32 %v10377_v3, %v9008_v22 }
 0x367   :  { %v1736_v58 = vsel %vm430_vm3, %v1734_v62, %v1735_v26  ;;  %v1769_v57 = vadd.f32 %v1735_v26, %v1677_v40  ;;  %v1739_v20 = vsel %vm430_vm3, %v1737_v53, %v1738_v7  ;;  %v1790_v12 = vmul.f32 %v10421_v9, %v9008_v22 }
 0x368   :  { %v1768_v51 = vadd.f32 %v1736_v58, %v1676_v50  ;;  %v1771_v16 = vadd.f32 %v1738_v7, %v1679_v24  ;;  %v1770_v49 = vadd.f32 %v1739_v20, %v1678_v31  ;;  %v1791_v21 = vmul.f32 %v10425_v1, %v9008_v22  ;;  %v10473_v20 = vld [vmem:[#allocation2 + $0x118] sm:$0x7f] }
 0x369   :  { %v1826_v54 = vrot.slane %v1788_v35, 2  ;;  %v1827_v63 = vrot.slane %v1789_v32, 2  ;;  %v1829_v43 = vrot.slane %v1790_v12, 2  ;;  %v1874_v18 = vmul.f32 %v10377_v3, %v9039_v5  ;;  %v10469_v32 = vld [vmem:[#allocation2 + $0x110] sm:$0xff] }
 0x36a   :  { %v1875_v19 = vmul.f32 %v10425_v1, %v9039_v5  ;;  %v1926_v42 = vmul.f32 %v10377_v3, %v13114_v47  ;;  %v1830_v30 = vrot.slane %v1791_v21, 2  ;;  %v1927_v2 = vmul.f32 %v10425_v1, %v13114_v47 }
 0x36b   :  { %v1828_v36 = vsel %vm523_vm4, %v1826_v54, %v1827_v63  ;;  %v1861_v45 = vadd.f32 %v1827_v63, %v1769_v57  ;;  %v1890_v34 = vrot.slane %v1874_v18, 3  ;;  %v1978_v5 = vmul.f32 %v10377_v3, %v13043_v0 }
 0x36c   :  { %v1860_v22 = vadd.f32 %v1828_v36, %v1768_v51  ;;  %v1891_v23 = vrot.slane %v1875_v19, 3  ;;  %v1942_v61 = vrot.slane %v1926_v42, 4  ;;  %v1831_v10 = vsel %vm523_vm4, %v1829_v43, %v1830_v30 }
 0x36d   :  { %v1863_v27 = vadd.f32 %v1830_v30, %v1771_v16  ;;  %v1943_v17 = vrot.slane %v1927_v2, 4  ;;  %v1862_v55 = vadd.f32 %v1831_v10, %v1770_v49  ;;  %v1913_v13 = vadd.f32 %v1890_v34, %v1861_v45 }
 0x36e   :  { %v1912_v29 = vadd.f32 %v1890_v34, %v1860_v22  ;;  %v1979_v14 = vmul.f32 %v10425_v1, %v13043_v0  ;;  %v1994_v38 = vrot.slane %v1978_v5, 5  ;;  %v2030_v47 = vmul.f32 %v10377_v3, %v13044_v60 }
 0x36f   :  { %v1915_v8 = vadd.f32 %v1891_v23, %v1863_v27  ;;  %v2031_v62 = vmul.f32 %v10425_v1, %v13044_v60  ;;  %v1914_v41 = vadd.f32 %v1891_v23, %v1862_v55  ;;  %v1965_v40 = vadd.f32 %v1942_v61, %v1913_v13 }
 0x370   :  { %v1964_v50 = vadd.f32 %v1942_v61, %v1912_v29  ;;  %v1995_v26 = vrot.slane %v1979_v14, 5  ;;  %v2046_v53 = vrot.slane %v2030_v47, 6  ;;  %v2088_v35 = vmul.f32 %v10421_v9, %v9084_v37 }
 0x371   :  { %v1967_v24 = vadd.f32 %v1943_v17, %v1915_v8  ;;  %v2047_v7 = vrot.slane %v2031_v62, 6  ;;  %v1966_v31 = vadd.f32 %v1943_v17, %v1914_v41  ;;  %v2017_v58 = vadd.f32 %v1994_v38, %v1965_v40 }
 0x372   :  { %v2016_v0 = vadd.f32 %v1994_v38, %v1964_v50  ;;  %v2089_v57 = vmul.f32 %v10425_v1, %v9084_v37  ;;  %v2090_v60 = vmul.f32 %v10469_v32, %v9084_v37  ;;  %v2091_v51 = vmul.f32 %v10473_v20, %v9084_v37 }
 0x373   :  { %v2019_v3 = vadd.f32 %v1995_v26, %v1967_v24  ;;  %v2124_v16 = vmul.f32 %v10421_v9, %v9060_v33  ;;  %v2018_v12 = vadd.f32 %v1995_v26, %v1966_v31  ;;  %v2069_v21 = vadd.f32 %v2046_v53, %v2017_v58 }
 0x374   :  { %v2068_v49 = vadd.f32 %v2046_v53, %v2016_v0  ;;  %v2125_v54 = vmul.f32 %v10425_v1, %v9060_v33  ;;  %v2126_v43 = vmul.f32 %v10469_v32, %v9060_v33  ;;  %v2127_v18 = vmul.f32 %v10473_v20, %v9060_v33 }
 0x375   :  { %v2071_v63 = vadd.f32 %v2047_v7, %v2019_v3  ;;  %v2162_v19 = vrot.slane %v2124_v16, 1  ;;  %v2070_v42 = vadd.f32 %v2047_v7, %v2018_v12  ;;  %v2105_v37 = vadd.f32 %v2089_v57, %v2069_v21  ;;  %v10515_v21 = vld [vmem:[#allocation2 + $0x128] sm:$0x7f] }
 0x376   :  { %v2104_v36 = vadd.f32 %v2088_v35, %v2068_v49  ;;  %v2163_v30 = vrot.slane %v2125_v54, 1  ;;  %v2165_v2 = vrot.slane %v2126_v43, 1  ;;  %v2166_v22 = vrot.slane %v2127_v18, 1  ;;  %v10513_v49 = vld [vmem:[#allocation2 + $0x120] sm:$0xff] }
 0x377   :  { %v2107_v45 = vadd.f32 %v2091_v51, %v2071_v63  ;;  %v2216_v34 = vmul.f32 %v10421_v9, %v9072_v25  ;;  %v2106_v23 = vadd.f32 %v2090_v60, %v2070_v42  ;;  %v2217_v27 = vmul.f32 %v10425_v1, %v9072_v25 }
 0x378   :  { %v2164_v61 = vsel %vm430_vm3, %v2162_v19, %v2163_v30  ;;  %v2197_v10 = vadd.f32 %v2163_v30, %v2105_v37  ;;  %v2167_v33 = vsel %vm430_vm3, %v2165_v2, %v2166_v22  ;;  %v2218_v55 = vmul.f32 %v10469_v32, %v9072_v25 }
 0x379   :  { %v2196_v17 = vadd.f32 %v2164_v61, %v2104_v36  ;;  %v2199_v5 = vadd.f32 %v2166_v22, %v2107_v45  ;;  %v2198_v29 = vadd.f32 %v2167_v33, %v2106_v23  ;;  %v2219_v13 = vmul.f32 %v10473_v20, %v9072_v25 }
 0x37a   :  { %v2254_v14 = vrot.slane %v2216_v34, 2  ;;  %v2255_v9 = vrot.slane %v2217_v27, 2  ;;  %v2257_v8 = vrot.slane %v2218_v55, 2  ;;  %v2302_v38 = vmul.f32 %v10425_v1, %v13052_v39 }
 0x37b   :  { %v2303_v47 = vmul.f32 %v10473_v20, %v13052_v39  ;;  %v2354_v62 = vmul.f32 %v10425_v1, %v13053_v44  ;;  %v2258_v50 = vrot.slane %v2219_v13, 2  ;;  %v2355_v26 = vmul.f32 %v10473_v20, %v13053_v44 }
 0x37c   :  { %v2256_v41 = vsel %vm523_vm4, %v2254_v14, %v2255_v9  ;;  %v2289_v40 = vadd.f32 %v2255_v9, %v2197_v10  ;;  %v2318_v24 = vrot.slane %v2302_v38, 3  ;;  %v2406_v39 = vmul.f32 %v10425_v1, %v13054_v56 }
 0x37d   :  { %v2288_v25 = vadd.f32 %v2256_v41, %v2196_v17  ;;  %v2319_v53 = vrot.slane %v2303_v47, 3  ;;  %v2370_v7 = vrot.slane %v2354_v62, 4  ;;  %v2259_v35 = vsel %vm523_vm4, %v2257_v8, %v2258_v50 }
 0x37e   :  { %v2291_v31 = vadd.f32 %v2258_v50, %v2199_v5  ;;  %v2371_v0 = vrot.slane %v2355_v26, 4  ;;  %v2290_v58 = vadd.f32 %v2259_v35, %v2198_v29  ;;  %v2341_v3 = vadd.f32 %v2318_v24, %v2289_v40 }
 0x37f   :  { %v2340_v57 = vadd.f32 %v2318_v24, %v2288_v25  ;;  %v2407_v60 = vmul.f32 %v10473_v20, %v13054_v56  ;;  %v2422_v16 = vrot.slane %v2406_v39, 5  ;;  %v2458_v44 = vmul.f32 %v10425_v1, %v13055_v48  ;;  %v13202_v56 = vld [vmem:[#allocation58_spill] sm:$0xff] }
 0x380   :  { %v2343_v51 = vadd.f32 %v2319_v53, %v2291_v31  ;;  %v2459_v12 = vmul.f32 %v10473_v20, %v13055_v48  ;;  %v2342_v54 = vadd.f32 %v2319_v53, %v2290_v58  ;;  %v2393_v43 = vadd.f32 %v2370_v7, %v2341_v3  ;;  %v13203_v58 = vld [vmem:[#allocation60_spill] sm:$0xff] }
 0x381   :  { %v2392_v63 = vadd.f32 %v2370_v7, %v2340_v57  ;;  %v2423_v18 = vrot.slane %v2407_v60, 5  ;;  %v2474_v42 = vrot.slane %v2458_v44, 6  ;;  %v2516_v37 = vmul.f32 %v10469_v32, %v13202_v56  ;;  %v13204_v60 = vld [vmem:[#allocation61_spill] sm:$0xff] }
 0x382   :  { %v2395_v19 = vadd.f32 %v2371_v0, %v2343_v51  ;;  %v2475_v36 = vrot.slane %v2459_v12, 6  ;;  %v2394_v30 = vadd.f32 %v2371_v0, %v2342_v54  ;;  %v2445_v1 = vadd.f32 %v2422_v16, %v2393_v43 }
 0x383   :  { %v2444_v45 = vadd.f32 %v2422_v16, %v2392_v63  ;;  %v2517_v48 = vmul.f32 %v10473_v20, %v13202_v56  ;;  %v2518_v22 = vmul.f32 %v13202_v56, %v10513_v49  ;;  %v2519_v34 = vmul.f32 %v13202_v56, %v10515_v21 }
 0x384   :  { %v2447_v2 = vadd.f32 %v2423_v18, %v2395_v19  ;;  %v2552_v23 = vmul.f32 %v10469_v32, %v13186_v6  ;;  %v2446_v61 = vadd.f32 %v2423_v18, %v2394_v30  ;;  %v2497_v27 = vadd.f32 %v2474_v42, %v2445_v1 }
 0x385   :  { %v2496_v10 = vadd.f32 %v2474_v42, %v2444_v45  ;;  %v2553_v33 = vmul.f32 %v10473_v20, %v13186_v6  ;;  %v2554_v5 = vmul.f32 %v13186_v6, %v10513_v49  ;;  %v2555_v55 = vmul.f32 %v13186_v6, %v10515_v21 }
 0x386   :  { %v2499_v17 = vadd.f32 %v2475_v36, %v2447_v2  ;;  %v2590_v29 = vrot.slane %v2552_v23, 1  ;;  %v2498_v13 = vadd.f32 %v2475_v36, %v2446_v61  ;;  %v2533_v9 = vadd.f32 %v2517_v48, %v2497_v27  ;;  %v349_v23 = vld [vmem:[#allocation2 + $0x130] sm:$0xff]  ;;  %v10561_v61 = vld [vmem:[#allocation2 + $0x138] sm:$0x7f] }
 0x387   :  { %v2532_v14 = vadd.f32 %v2516_v37, %v2496_v10  ;;  %v2591_v8 = vrot.slane %v2553_v33, 1  ;;  %v2593_v47 = vrot.slane %v2554_v5, 1  ;;  %v2594_v62 = vrot.slane %v2555_v55, 1 }
 0x388   :  { %v2535_v38 = vadd.f32 %v2519_v34, %v2499_v17  ;;  %v2644_v41 = vmul.f32 %v10469_v32, %v13187_v15  ;;  %v2534_v50 = vadd.f32 %v2518_v22, %v2498_v13  ;;  %v2645_v25 = vmul.f32 %v10473_v20, %v13187_v15 }
 0x389   :  { %v2592_v40 = vsel %vm430_vm3, %v2590_v29, %v2591_v8  ;;  %v2625_v26 = vadd.f32 %v2591_v8, %v2533_v9  ;;  %v2595_v6 = vsel %vm430_vm3, %v2593_v47, %v2594_v62  ;;  %v2646_v7 = vmul.f32 %v13187_v15, %v10513_v49 }
 0x38a   :  { %v2624_v24 = vadd.f32 %v2592_v40, %v2532_v14  ;;  %v2627_v53 = vadd.f32 %v2594_v62, %v2535_v38  ;;  %v2626_v35 = vadd.f32 %v2595_v6, %v2534_v50  ;;  %v2647_v31 = vmul.f32 %v13187_v15, %v10515_v21  ;;  %v13206_v62 = vld [vmem:[#allocation62_spill] sm:$0xff] }
 0x38b   :  { %v2682_v0 = vrot.slane %v2644_v41, 2  ;;  %v2683_v32 = vrot.slane %v2645_v25, 2  ;;  %v2685_v39 = vrot.slane %v2646_v7, 2  ;;  %v2730_v57 = vmul.f32 %v10473_v20, %v13203_v58 }
 0x38c   :  { %v2731_v3 = vmul.f32 %v13203_v58, %v10515_v21  ;;  %v2782_v51 = vmul.f32 %v10473_v20, %v13204_v60  ;;  %v2686_v44 = vrot.slane %v2647_v31, 2  ;;  %v2783_v54 = vmul.f32 %v13204_v60, %v10515_v21 }
 0x38d   :  { %v2684_v16 = vsel %vm523_vm4, %v2682_v0, %v2683_v32  ;;  %v2717_v12 = vadd.f32 %v2683_v32, %v2625_v26  ;;  %v2746_v63 = vrot.slane %v2730_v57, 3  ;;  %v2834_v56 = vmul.f32 %v10473_v20, %v13066_v11 }
 0x38e   :  { %v2716_v15 = vadd.f32 %v2684_v16, %v2624_v24  ;;  %v2747_v43 = vrot.slane %v2731_v3, 3  ;;  %v2798_v18 = vrot.slane %v2782_v51, 4  ;;  %v2687_v19 = vsel %vm523_vm4, %v2685_v39, %v2686_v44  ;;  %v13207_v3 = vld [vmem:[#allocation63_spill] sm:$0xff] }
 0x38f   :  { %v2719_v42 = vadd.f32 %v2686_v44, %v2627_v53  ;;  %v2799_v36 = vrot.slane %v2783_v54, 4  ;;  %v2718_v37 = vadd.f32 %v2687_v19, %v2626_v35  ;;  %v2769_v45 = vadd.f32 %v2746_v63, %v2717_v12 }
 0x390   :  { %v2768_v30 = vadd.f32 %v2746_v63, %v2716_v15  ;;  %v2835_v1 = vmul.f32 %v13066_v11, %v10515_v21  ;;  %v2850_v2 = vrot.slane %v2834_v56, 5  ;;  %v2886_v22 = vmul.f32 %v10473_v20, %v13067_v59  ;;  %v13205_v11 = vld [vmem:[#allocation67_spill] sm:$0xff]  ;;  %v13208_v56 = vld [vmem:[#allocation69_spill] sm:$0xff] }
 0x391   :  { %v2771_v48 = vadd.f32 %v2747_v43, %v2719_v42  ;;  %v2887_v34 = vmul.f32 %v13067_v59, %v10515_v21  ;;  %v2770_v10 = vadd.f32 %v2747_v43, %v2718_v37  ;;  %v2821_v33 = vadd.f32 %v2798_v18, %v2769_v45  ;;  %v13209_v45 = vld [vmem:[#allocation72_spill] sm:$0xff] }
 0x392   :  { %v2820_v27 = vadd.f32 %v2798_v18, %v2768_v30  ;;  %v2851_v17 = vrot.slane %v2835_v1, 5  ;;  %v2902_v55 = vrot.slane %v2886_v22, 6  ;;  %v2944_v13 = vmul.f32 %v13205_v11, %v10513_v49 }
 0x393   :  { %v2823_v5 = vadd.f32 %v2799_v36, %v2771_v48  ;;  %v2903_v29 = vrot.slane %v2887_v34, 6  ;;  %v2822_v14 = vadd.f32 %v2799_v36, %v2770_v10  ;;  %v2873_v8 = vadd.f32 %v2850_v2, %v2821_v33 }
 0x394   :  { %v2872_v9 = vadd.f32 %v2850_v2, %v2820_v27  ;;  %v2945_v20 = vmul.f32 %v13205_v11, %v10515_v21  ;;  %v2946_v38 = vmul.f32 %v13205_v11, %v349_v23  ;;  %v2947_v47 = vmul.f32 %v13205_v11, %v10561_v61  ;;  %v13210_v11 = vld [vmem:[#allocation73_spill] sm:$0xff] }
 0x395   :  { %v2875_v59 = vadd.f32 %v2851_v17, %v2823_v5  ;;  %v2980_v41 = vmul.f32 %v13206_v62, %v10513_v49  ;;  %v2874_v50 = vadd.f32 %v2851_v17, %v2822_v14  ;;  %v2925_v26 = vadd.f32 %v2902_v55, %v2873_v8  ;;  %v3458_v17 = vpop.xlane.xlu0 %3457 }
 0x396   :  { %v2924_v40 = vadd.f32 %v2902_v55, %v2872_v9  ;;  %v2981_v25 = vmul.f32 %v13206_v62, %v10515_v21  ;;  %v2982_v24 = vmul.f32 %v13206_v62, %v349_v23  ;;  %v2983_v53 = vmul.f32 %v13206_v62, %v10561_v61 }
 0x397   :  { %v2927_v6 = vadd.f32 %v2903_v29, %v2875_v59  ;;  %v3018_v7 = vrot.slane %v2980_v41, 1  ;;  %v2926_v35 = vadd.f32 %v2903_v29, %v2874_v50  ;;  %v2961_v0 = vadd.f32 %v2945_v20, %v2925_v26 }
 0x398   :  { %v2960_v31 = vadd.f32 %v2944_v13, %v2924_v40  ;;  %v3019_v32 = vrot.slane %v2981_v25, 1  ;;  %v3021_v58 = vrot.slane %v2982_v24, 1  ;;  %v3022_v57 = vrot.slane %v2983_v53, 1 }
 0x399   :  { %v2963_v39 = vadd.f32 %v2947_v47, %v2927_v6  ;;  %v3072_v60 = vmul.f32 %v13207_v3, %v10513_v49  ;;  %v2962_v51 = vadd.f32 %v2946_v38, %v2926_v35  ;;  %v3073_v12 = vmul.f32 %v13207_v3, %v10515_v21  ;;  %v8401_v47 = vld [vmem:[%s12632_s5 + $0x30] ss:$0 sm:$0xff] }
 0x39a   :  { %v3020_v16 = vsel %vm430_vm3, %v3018_v7, %v3019_v32  ;;  %v3053_v44 = vadd.f32 %v3019_v32, %v2961_v0  ;;  %v3023_v54 = vsel %vm430_vm3, %v3021_v58, %v3022_v57  ;;  %v3074_v43 = vmul.f32 %v13207_v3, %v349_v23 }
 0x39b   :  { %v3052_v15 = vadd.f32 %v3020_v16, %v2960_v31  ;;  %v3055_v63 = vadd.f32 %v3022_v57, %v2963_v39  ;;  %v3054_v18 = vadd.f32 %v3023_v54, %v2962_v51  ;;  %v3075_v19 = vmul.f32 %v13207_v3, %v10561_v61  ;;  %v3464_v39 = vpop.xlane.xlu0 %3463 }
 0x39c   :  { %v3110_v42 = vrot.slane %v3072_v60, 2  ;;  %v3111_v36 = vrot.slane %v3073_v12, 2  ;;  %v3113_v49 = vrot.slane %v3074_v43, 2  ;;  %v3158_v37 = vmul.f32 %v13208_v56, %v10515_v21 }
 0x39d   :  { %v3159_v30 = vmul.f32 %v13208_v56, %v10561_v61  ;;  %v3210_v1 = vmul.f32 %v13209_v45, %v10515_v21  ;;  %v3114_v2 = vrot.slane %v3075_v19, 2  ;;  %v3211_v34 = vmul.f32 %v13209_v45, %v10561_v61 }
 0x39e   :  { %v3112_v48 = vsel %vm523_vm4, %v3110_v42, %v3111_v36  ;;  %v3145_v22 = vadd.f32 %v3111_v36, %v3053_v44  ;;  %v3174_v10 = vrot.slane %v3158_v37, 3  ;;  %v3262_v13 = vmul.f32 %v13210_v11, %v10515_v21 }
 0x39f   :  { %v3144_v23 = vadd.f32 %v3112_v48, %v3052_v15  ;;  %v3175_v27 = vrot.slane %v3159_v30, 3  ;;  %v3226_v33 = vrot.slane %v3210_v1, 4  ;;  %v3115_v5 = vsel %vm523_vm4, %v3113_v49, %v3114_v2  ;;  %v13214_v48 = vld [vmem:[#allocation37_spill] sm:$0xff] }
 0x3a0   :  { %v3147_v55 = vadd.f32 %v3114_v2, %v3055_v63  ;;  %v3227_v29 = vrot.slane %v3211_v34, 4  ;;  %v3146_v14 = vadd.f32 %v3115_v5, %v3054_v18  ;;  %v3197_v8 = vadd.f32 %v3174_v10, %v3145_v22  ;;  %v13211_v63 = vld [vmem:[#allocation8_spill] sm:$0xff] }
 0x3a1   :  { %v3196_v9 = vadd.f32 %v3174_v10, %v3144_v23  ;;  %v3263_v20 = vmul.f32 %v13210_v11, %v10561_v61  ;;  %v3278_v38 = vrot.slane %v3262_v13, 5  ;;  %v3314_v62 = vmul.f32 %v8401_v47, %v10515_v21  ;;  %v13215_v23 = vld [vmem:[#allocation38_spill] sm:$0xff] }
 0x3a2   :  { %v3199_v59 = vadd.f32 %v3175_v27, %v3147_v55  ;;  %v3315_v41 = vmul.f32 %v8401_v47, %v10561_v61  ;;  %v3198_v50 = vadd.f32 %v3175_v27, %v3146_v14  ;;  %v3249_v26 = vadd.f32 %v3226_v33, %v3197_v8  ;;  %v13217_v55 = vld [vmem:[#allocation40_spill] sm:$0xff] }
 0x3a3   :  { %v3248_v40 = vadd.f32 %v3226_v33, %v3196_v9  ;;  %v3279_v25 = vrot.slane %v3263_v20, 5  ;;  %v3330_v24 = vrot.slane %v3314_v62, 6  ;;  %v8471_v0 = vmov 839922192  }
 0x3a4   :  { %v3251_v6 = vadd.f32 %v3227_v29, %v3199_v59  ;;  %v3331_v53 = vrot.slane %v3315_v41, 6  ;;  %v3250_v7 = vadd.f32 %v3227_v29, %v3198_v50  ;;  %v3301_v31 = vadd.f32 %v3278_v38, %v3249_v26 }
 0x3a5   :  { %v3300_v35 = vadd.f32 %v3278_v38, %v3248_v40  ;;  %v3477_v32 = vunpack.c.l.s4 %v8471_v0  ;;  %v3468_v57 = vmul.f32 0.03125, %v3458_v17  ;;  %v8472_v16 = vmov 1985246804   ;;  %v13216_v17 = vld [vmem:[#allocation36_spill] sm:$0xff] }
 0x3a6   :  { %v3303_v58 = vadd.f32 %v3279_v25, %v3251_v6  ;;  %v3302_v3 = vadd.f32 %v3279_v25, %v3250_v7  ;;  %v3353_v21 = vadd.f32 %v3330_v24, %v3301_v31  ;;  %v3484_v44 = vunpack.c.l.s4 %v8472_v16 }
 0x3a7   :  { %v3352_v60 = vadd.f32 %v3330_v24, %v3300_v35  ;;  %v3478_v51 = vunpack.c.0.s8 %v3477_v32  ;;  %v3470_v12 = vmul.f32 0.03125, %v3464_v39 }
 0x3a8   :  { %v3355_v61 = vadd.f32 %v3331_v53, %v3303_v58  ;;  %v3354_v54 = vadd.f32 %v3331_v53, %v3302_v3  ;;  %v3376_v18 = vadd.f32 %v10275_v4, %v3353_v21  ;;  %v3485_v19 = vunpack.c.0.s8 %v3484_v44 }
 0x3a9   :  { %v3375_v15 = vadd.f32 %v10275_v4, %v3352_v60  ;;  %v10607_v43 = vsub.s32 %v3478_v51, %v13211_v63 }
 0x3aa   :  { %v3377_v42 = vadd.f32 %v10275_v4, %v3354_v54  ;;  %v3378_v36 = vadd.f32 %v10275_v4, %v3355_v61  ;;  %v10614_v37 = vsub.s32 %v3485_v19, %v13211_v63  ;;  %v3432_v4 = vrot.slane %v3376_v18, 5  ;;  %v10670_v63 = vld [vmem:[%s12635_s8] ss:$0 sm:$0xff] }
 0x3ab   :  { %13212 = vst [vmem:[#allocation41_spill] sm:$0xff] %v10607_v43  ;;  %v3401_v49 = vcombine.high %v3375_v15, %v3375_v15  ;;  %v3482_v56 = vrot.slane %v3468_v57, %v10607_v43  ;;  %v3510_v30 = vrot.slane %v3470_v12, %v10607_v43 }
 0x3ac   :  { %13213 = vst [vmem:[#allocation42_spill] sm:$0xff] %v10614_v37  ;;  %v3402_v45 = vcombine.high %v3377_v42, %v3377_v42  ;;  %v3489_v22 = vrot.slane %v3468_v57, %v10614_v37  ;;  %v3517_v34 = vrot.slane %v3470_v12, %v10614_v37  ;;  %v3436_v33 = vrot.slane %v3378_v36, 5  ;;  %v10665_v12 = vld [vmem:[%s12634_s7] ss:$0 sm:$0xff] }
 0x3ad   :  { %v7960_v1 = vrot.slane %v3401_v49, 9  ;;  %v3540_v2 = vsub.f32 %v13214_v48, %v3482_v56  ;;  %v10621_v10 = vsub.f32 %v13215_v23, %v3510_v30  ;;  %v3678_v42 = vcombine.high %v10665_v12, %v10665_v12 }
 0x3ae   :  { %v7961_v27 = vrot.slane %v3402_v45, 9  ;;  %v3541_v5 = vsub.f32 %v13216_v17, %v3489_v22  ;;  %v10625_v29 = vsub.f32 %v13217_v55, %v3517_v34  ;;  %v3694_v30 = vcombine.high %v10670_v63, %v10670_v63  ;;  %v3704_v55 = vld [vmem:[%s12636_s9] sm:$0xff] }
 0x3af   :  { %v3548_v11 = vmul.f32 %v3540_v2, %v3540_v2  ;;  %v3552_v13 = vmul.f32 %v10621_v10, %v10621_v10  ;;  %v3433_v14 = vsel %vm9736_vm8, %v7960_v1, %v3432_v4 }
 0x3b0   :  { %v3437_v9 = vsel %vm9736_vm8, %v7961_v27, %v3436_v33  ;;  %v3549_v20 = vmul.f32 %v3541_v5, %v3541_v5  ;;  %v3553_v59 = vmul.f32 %v10625_v29, %v10625_v29 }
 0x3b1   :  { %v3451_v8 = vcombine.low %v3433_v14, %v3437_v9 }
 0x3b2   :  { %v3564_v47 = vcombine.low %v3548_v11, %v3549_v20  ;;  %v3566_v62 = vcombine.low %v3552_v13, %v3553_v59  ;;  %v3705_v11 = vld [vmem:[%s12636_s9 + $0x8] sm:$0xff]  ;;  %v3706_v13 = vld [vmem:[%s12636_s9 + $0x10] sm:$0xff] }
 0x3b3   :  { %v3465_v38 = vsel %vm174_vm1, %v3451_v8, 0.0 }
 0x3b4   :  { %3466 = vadd.xlane.f32.xlu1 %v3465_v38  ;;  %v3572_v41 = vsel %vm174_vm1, %v3564_v47, 0.0  ;;  %v3578_v50 = vsel %vm174_vm1, %v3566_v62, 0.0 }
 0x3b5   :  { %3573 = vadd.xlane.f32.xlu0 %v3572_v41 }
 0x3b9   :  { %3579 = vadd.xlane.f32.xlu0 %v3578_v50 }
 0x3c8   :  { %v3461_v40 = vpop.xlane.xlu1 %3460 }
 0x3c9   :  { %v3469_v26 = vmul.f32 0.03125, %v3461_v40 }
 0x3cb   :  { %v3496_v25 = vrot.slane %v3469_v26, %v10607_v43  ;;  %v3503_v6 = vrot.slane %v3469_v26, %v10614_v37 }
 0x3cd   :  { %v10641_v24 = vsub.f32 %v10296_v46, %v3496_v25  ;;  %v10644_v53 = vsub.f32 %v10302_v52, %v3503_v6 }
 0x3cf   :  { %v3550_v7 = vmul.f32 %v10641_v24, %v10641_v24  ;;  %v3551_v35 = vmul.f32 %v10644_v53, %v10644_v53 }
 0x3d1   :  { %v3565_v31 = vcombine.low %v3550_v7, %v3551_v35 }
 0x3d3   :  { %v3575_v0 = vsel %vm174_vm1, %v3565_v31, 0.0 }
 0x3d4   :  { %3576 = vadd.xlane.f32.xlu1 %v3575_v0 }
 0x441   :  { %v3467_v32 = vpop.xlane.xlu1 %3466 }
 0x442   :  { %v3471_v39 = vmul.f32 0.03125, %v3467_v32  ;;  %v3574_v58 = vpop.xlane.xlu0 %3573 }
 0x443   :  { %v3584_v3 = vmul.f32 0.03125, %v3574_v58 }
 0x444   :  { %v3524_v57 = vrot.slane %v3471_v39, %v10607_v43  ;;  %v3531_v46 = vrot.slane %v3471_v39, %v10614_v37 }
 0x445   :  { %v3588_v21 = vadd.f32 1e-06, %v3584_v3 }
 0x446   :  { %v10653_v52 = vsub.f32 %v3433_v14, %v3524_v57  ;;  %v10655_v60 = vsub.f32 %v3437_v9, %v3531_v46  ;;  %v3580_v54 = vpop.xlane.xlu0 %3579  ;;  %v8228_v14 = vpack.c.bf16 %v3705_v11, %v3704_v55  ;;  %v3707_v9 = vld [vmem:[%s12636_s9 + $0x18] sm:$0xff] }
 0x447   :  { %8324 = vrsqrt.f32 %v3588_v21  ;;  %v3586_v36 = vmul.f32 0.03125, %v3580_v54  ;;  %v8232_v8 = vpack.c.bf16 %v3707_v9, %v3706_v13  ;;  %v7964_v54 = vld [vmem:[%s12637_s10] ss:$0 sm:$0xff] }
 0x448   :  { %v3554_v51 = vmul.f32 %v10653_v52, %v10653_v52  ;;  %v3555_v61 = vmul.f32 %v10655_v60, %v10655_v60  ;;  %8229 = vmatprep.subr.bf16.mxu1 %v8228_v14 }
 0x449   :  { %v3590_v48 = vadd.f32 1e-06, %v3586_v36  ;;  %8231 = vmatpush3.bf16.msra.mxu1 %v8228_v14 }
 0x44a   :  { %v3567_v16 = vcombine.low %v3554_v51, %v3555_v61  ;;  %8233 = vmatprep.subr.bf16.mxu1 %v8232_v8 }
 0x44b   :  { %8326 = vrsqrt.f32 %v3590_v48 }
 0x44c   :  { %v3581_v44 = vsel %vm174_vm1, %v3567_v16, 0.0 }
 0x44d   :  { %3582 = vadd.xlane.f32.xlu1 %v3581_v44  ;;  %8235 = vmatpush3.bf16.msra.mxu1 %v8232_v8 }
 0x451   :  { %v8325_v15 = vpop.eup %8324 }
 0x452   :  { %v3606_v18 = vrot.slane %v8325_v15, %v10607_v43  ;;  %v3613_v19 = vrot.slane %v8325_v15, %v10614_v37 }
 0x454   :  { %v3664_v49 = vmul.f32 %v3606_v18, %v3540_v2  ;;  %v3665_v56 = vmul.f32 %v3613_v19, %v3541_v5 }
 0x455   :  { %v8327_v2 = vpop.eup %8326 }
 0x456   :  { %v3680_v45 = vmul.f32 %v10665_v12, %v3664_v49  ;;  %v3681_v1 = vmul.f32 %v3678_v42, %v3665_v56  ;;  %v3634_v17 = vrot.slane %v8327_v2, %v10607_v43  ;;  %v3641_v5 = vrot.slane %v8327_v2, %v10614_v37 }
 0x458   :  { %v3696_v22 = vadd.f32 %v10670_v63, %v3680_v45  ;;  %v3697_v34 = vadd.f32 %v3694_v30, %v3681_v1  ;;  %v3668_v20 = vmul.f32 %v3634_v17, %v10621_v10  ;;  %v3669_v59 = vmul.f32 %v3641_v5, %v10625_v29 }
 0x45a   :  { %v3723_v23 = vcombine.low %v3696_v22, %v3697_v34  ;;  %v3684_v41 = vmul.f32 %v10665_v12, %v3668_v20  ;;  %v3685_v50 = vmul.f32 %v3678_v42, %v3669_v59  ;;  %v3931_v59 = vld [vmem:[%s12640_s13] sm:$0xff] }
 0x45c   :  { %8120 = vmatprep.mubr.msk.f32.mxu1 %vm174_vm1, %v3723_v23  ;;  %v3700_v29 = vadd.f32 %v10670_v63, %v3684_v41  ;;  %v3701_v6 = vadd.f32 %v3694_v30, %v3685_v50  ;;  %v3934_v50 = vld [vmem:[%s12640_s13 + $0x18] sm:$0xff] }
 0x45e   :  { %v3725_v0 = vcombine.low %v3700_v29, %v3701_v6  ;;  %v3935_v6 = vld [vmem:[%s12640_s13 + $0x20] sm:$0xff] }
 0x461   :  { %v3577_v4 = vpop.xlane.xlu1 %3576 }
 0x462   :  { %v3585_v27 = vmul.f32 0.03125, %v3577_v4 }
 0x464   :  { %v3589_v33 = vadd.f32 1e-06, %v3585_v27 }
 0x466   :  { %8328 = vrsqrt.f32 %v3589_v33 }
 0x470   :  { %v8329_v38 = vpop.eup %8328 }
 0x471   :  { %v3620_v47 = vrot.slane %v8329_v38, %v10607_v43  ;;  %v3627_v62 = vrot.slane %v8329_v38, %v10614_v37  ;;  %v3932_v38 = vld [vmem:[%s12640_s13 + $0x8] sm:$0xff] }
 0x472   :  { %v8236_v41 = vpack.c.bf16 %v3932_v38, %v3931_v59  ;;  %v3942_v59 = vld [vmem:[%s12640_s13 + $0x58] sm:$0xff] }
 0x473   :  { %v3666_v40 = vmul.f32 %v3620_v47, %v10641_v24  ;;  %v3667_v26 = vmul.f32 %v3627_v62, %v10644_v53  ;;  %v3933_v47 = vld [vmem:[%s12640_s13 + $0x10] sm:$0xff] }
 0x474   :  { %8237 = vmatprep.subr.bf16.mxu1 %v8236_v41 }
 0x475   :  { %v3682_v25 = vmul.f32 %v10665_v12, %v3666_v40  ;;  %v3683_v10 = vmul.f32 %v3678_v42, %v3667_v26  ;;  %v8240_v26 = vpack.c.bf16 %v3934_v50, %v3933_v47 }
 0x477   :  { %v3698_v7 = vadd.f32 %v10670_v63, %v3682_v25  ;;  %v3699_v35 = vadd.f32 %v3694_v30, %v3683_v10 }
 0x479   :  { %v3724_v31 = vcombine.low %v3698_v7, %v3699_v35  ;;  %v3936_v7 = vld [vmem:[%s12640_s13 + $0x28] sm:$0xff] }
 0x47a   :  { %v8244_v35 = vpack.c.bf16 %v3936_v7, %v3935_v6  ;;  %v7969_v7 = vld [vmem:[%s12638_s11] ss:$0 sm:$0xff] }
 0x47b   :  { %8121 = vmatmul.mubr.msk.f32.vlgmr.msra.gmra.mrb[0].mxu1 %vm174_vm1, %v3724_v31 }
 0x47c   :  { %8123 = vmatprep.mubr.msk.f32.mxu1 %vm174_vm1, %v3725_v0  ;;  %8239 = vmatpush3.bf16.msra.mxu1 %v8236_v41  ;;  %v3944_v41 = vld [vmem:[%s12640_s13 + $0x68] sm:$0xff] }
 0x47d   :  { %8241 = vmatprep.subr.bf16.mxu1 %v8240_v26 }
 0x480   :  { %8243 = vmatpush3.bf16.msra.mxu1 %v8240_v26  ;;  %v3946_v26 = vld [vmem:[%s12640_s13 + $0x78] sm:$0xff] }
 0x481   :  { %8245 = vmatprep.subr.bf16.mxu1 %v8244_v35 }
 0x484   :  { %8247 = vmatpush3.bf16.msra.mxu1 %v8244_v35 }
 0x4da   :  { %v3583_v32 = vpop.xlane.xlu1 %3582 }
 0x4db   :  { %v3587_v39 = vmul.f32 0.03125, %v3583_v32 }
 0x4dd   :  { %v3591_v24 = vadd.f32 1e-06, %v3587_v39 }
 0x4df   :  { %8330 = vrsqrt.f32 %v3591_v24 }
 0x4e9   :  { %v8331_v53 = vpop.eup %8330 }
 0x4ea   :  { %v3648_v58 = vrot.slane %v8331_v53, %v10607_v43  ;;  %v3655_v57 = vrot.slane %v8331_v53, %v10614_v37 }
 0x4ec   :  { %v3670_v46 = vmul.f32 %v3648_v58, %v10653_v52  ;;  %v3671_v3 = vmul.f32 %v3655_v57, %v10655_v60 }
 0x4ee   :  { %v3686_v21 = vmul.f32 %v10665_v12, %v3670_v46  ;;  %v3687_v51 = vmul.f32 %v3678_v42, %v3671_v3 }
 0x4f0   :  { %v3702_v61 = vadd.f32 %v10670_v63, %v3686_v21  ;;  %v3703_v16 = vadd.f32 %v3694_v30, %v3687_v51 }
 0x4f2   :  { %v3726_v44 = vcombine.low %v3702_v61, %v3703_v16 }
 0x4f4   :  { %8124 = vmatmul.mubr.msk.f32.gmra.mrb[2].mxu1 %vm174_vm1, %v3726_v44 }
 0x54e   :  { %v8122_v15 = vpop.f32.mrb[0].mxu1 }
 0x54f   :  { %v3807_v18 = vadd.f32 %v8122_v15, %v7964_v54  ;;  %v3801_v19 = vpop.f32.mrb[1].mxu1 }
 0x550   :  { %v3802_v36 = vadd.f32 %v7964_v54, %v3801_v19 }
 0x551   :  { %v3821_v52 = vmul.f32 %v3807_v18, %v3807_v18 }
 0x552   :  { %v3820_v49 = vmul.f32 %v3802_v36, %v3802_v36 }
 0x553   :  { %v3825_v60 = vmul.f32 %v3821_v52, %v3807_v18 }
 0x554   :  { %v3824_v56 = vmul.f32 %v3820_v49, %v3802_v36 }
 0x555   :  { %v3829_v12 = vmul.f32 0.044715, %v3825_v60 }
 0x556   :  { %v3828_v42 = vmul.f32 0.044715, %v3824_v56 }
 0x557   :  { %v3833_v45 = vadd.f32 %v3829_v12, %v3807_v18 }
 0x558   :  { %v3832_v63 = vadd.f32 %v3828_v42, %v3802_v36 }
 0x559   :  { %v3837_v30 = vmul.f32 0.7978846, %v3833_v45 }
 0x55a   :  { %v3836_v1 = vmul.f32 0.7978846, %v3832_v63 }
 0x55b   :  { %8332 = vtanh.f32 %v3837_v30 }
 0x55c   :  { %8334 = vtanh.f32 %v3836_v1 }
 0x565   :  { %v8333_v48 = vpop.eup %8332 }
 0x566   :  { %v8335_v22 = vpop.eup %8334  ;;  %v3845_v34 = vadd.f32 1.0, %v8333_v48 }
 0x567   :  { %v3844_v23 = vadd.f32 1.0, %v8335_v22 }
 0x568   :  { %v3849_v4 = vmul.f32 0.5, %v3845_v34 }
 0x569   :  { %v3848_v27 = vmul.f32 0.5, %v3844_v23 }
 0x56a   :  { %v10717_v33 = vmul.f32 %v3849_v4, %v3807_v18 }
 0x56b   :  { %v10719_v2 = vmul.f32 %v3848_v27, %v3802_v36 }
 0x56c   :  { %v3857_v17 = vmul.f32 %v10717_v33, %v10717_v33 }
 0x56d   :  { %v3856_v5 = vmul.f32 %v10719_v2, %v10719_v2 }
 0x56f   :  { %v3860_v55 = vadd.f32 %v3857_v17, %v3856_v5  ;;  %v3937_v17 = vld [vmem:[%s12640_s13 + $0x30] sm:$0xff]  ;;  %v3938_v5 = vld [vmem:[%s12640_s13 + $0x38] sm:$0xff] }
 0x571   :  { %v3861_v11 = vrot.slane %v3860_v55, 4 }
 0x573   :  { %v3862_v13 = vadd.f32 %v3861_v11, %v3860_v55  ;;  %v3939_v55 = vld [vmem:[%s12640_s13 + $0x40] sm:$0xff] }
 0x575   :  { %v3863_v14 = vrot.slane %v3862_v13, 2 }
 0x577   :  { %v3864_v9 = vadd.f32 %v3863_v14, %v3862_v13  ;;  %v8248_v13 = vpack.c.bf16 %v3938_v5, %v3937_v17  ;;  %v3940_v14 = vld [vmem:[%s12640_s13 + $0x48] sm:$0xff]  ;;  %v10813_v17 = vld [vmem:[#allocation2 + $0x10] sm:$0xff]  ;;  %v10815_v5 = vld [vmem:[#allocation2 + $0x18] sm:$0x7f] }
 0x579   :  { %v3865_v8 = vrot.slane %v3864_v9, 1  ;;  %8249 = vmatprep.subr.bf16.mxu1 %v8248_v13 }
 0x57a   :  { %8251 = vmatpush3.bf16.msra.mxu1 %v8248_v13  ;;  %v13220_v13 = vld [vmem:[#allocation11_spill] sm:$0xff] }
 0x57b   :  { %v3866_v20 = vadd.f32 %v3865_v8, %v3864_v9  ;;  %v8252_v8 = vpack.c.bf16 %v3940_v14, %v3939_v55  ;;  %v13218_v55 = vld [vmem:[#allocation14_spill] sm:$0xff] }
 0x57d   :  { %8336 = vrsqrt.f32 %v3866_v20  ;;  %vm3876_vm9 = vcmp.eq.f32.partialorder %v3866_v20, inf  ;;  %v3879_v25 = vand.u32 2147483648, %v3866_v20  ;;  %vm3878_vm10 = vcmp.eq.f32.partialorder %v3866_v20, 0.0  ;;  %8253 = vmatprep.subr.bf16.mxu1 %v8252_v8 }
 0x57e   :  { %8255 = vmatpush3.bf16.msra.mxu1 %v8252_v8 }
 0x587   :  { %v8337_v62 = vpop.eup %8336 }
 0x588   :  { %v3875_v40 = vmul.f32 %v8337_v62, %v3866_v20  ;;  %v3943_v62 = vld [vmem:[%s12640_s13 + $0x60] sm:$0xff] }
 0x589   :  { %v8260_v50 = vpack.c.bf16 %v3944_v41, %v3943_v62  ;;  %v13225_v62 = vld [vmem:[#allocation21_spill] sm:$0xff] }
 0x58a   :  { %v3877_v10 = vsel %vm3876_vm9, %v3866_v20, %v3875_v40  ;;  %v3941_v20 = vld [vmem:[%s12640_s13 + $0x50] sm:$0xff] }
 0x58b   :  { %v10737_v29 = vsel %vm3878_vm10, %v3879_v25, %v3877_v10  ;;  %v8256_v47 = vpack.c.bf16 %v3942_v59, %v3941_v20  ;;  %v3945_v40 = vld [vmem:[%s12640_s13 + $0x70] sm:$0xff]  ;;  %v13223_v20 = vld [vmem:[#allocation17_spill] sm:$0xff] }
 0x58c   :  { %3888 = vadd.xlane.f32.xlu0 %v10737_v29  ;;  %v8264_v25 = vpack.c.bf16 %v3946_v26, %v3945_v40  ;;  %v13227_v26 = vld [vmem:[#allocation25_spill] sm:$0xff] }
 0x58d   :  { %8257 = vmatprep.subr.bf16.mxu1 %v8256_v47 }
 0x58e   :  { %8259 = vmatpush3.bf16.msra.mxu1 %v8256_v47 }
 0x58f   :  { %8261 = vmatprep.subr.bf16.mxu1 %v8260_v50 }
 0x592   :  { %8263 = vmatpush3.bf16.msra.mxu1 %v8260_v50  ;;  %v13226_v50 = vld [vmem:[#allocation23_spill] sm:$0xff] }
 0x593   :  { %8265 = vmatprep.subr.bf16.mxu1 %v8264_v25 }
 0x596   :  { %8267 = vmatpush3.bf16.msra.mxu1 %v8264_v25 }
 0x5c7   :  { %v8125_v31 = vpop.f32.mrb[2].mxu1 }
 0x5c8   :  { %v3817_v0 = vadd.f32 %v8125_v31, %v7964_v54  ;;  %v3811_v32 = vpop.f32.mrb[3].mxu1 }
 0x5c9   :  { %v3812_v39 = vadd.f32 %v7964_v54, %v3811_v32 }
 0x5ca   :  { %v3823_v24 = vmul.f32 %v3817_v0, %v3817_v0 }
 0x5cb   :  { %v3822_v53 = vmul.f32 %v3812_v39, %v3812_v39 }
 0x5cc   :  { %v3827_v58 = vmul.f32 %v3823_v24, %v3817_v0 }
 0x5cd   :  { %v3826_v57 = vmul.f32 %v3822_v53, %v3812_v39 }
 0x5ce   :  { %v3831_v46 = vmul.f32 0.044715, %v3827_v58 }
 0x5cf   :  { %v3830_v3 = vmul.f32 0.044715, %v3826_v57 }
 0x5d0   :  { %v3835_v21 = vadd.f32 %v3831_v46, %v3817_v0 }
 0x5d1   :  { %v3834_v51 = vadd.f32 %v3830_v3, %v3812_v39 }
 0x5d2   :  { %v3839_v61 = vmul.f32 0.7978846, %v3835_v21 }
 0x5d3   :  { %v3838_v16 = vmul.f32 0.7978846, %v3834_v51 }
 0x5d4   :  { %8338 = vtanh.f32 %v3839_v61 }
 0x5d5   :  { %8340 = vtanh.f32 %v3838_v16 }
 0x5de   :  { %v8339_v44 = vpop.eup %8338 }
 0x5df   :  { %v8341_v15 = vpop.eup %8340  ;;  %v3847_v18 = vadd.f32 1.0, %v8339_v44 }
 0x5e0   :  { %v3846_v19 = vadd.f32 1.0, %v8341_v15 }
 0x5e1   :  { %v3851_v36 = vmul.f32 0.5, %v3847_v18 }
 0x5e2   :  { %v3850_v52 = vmul.f32 0.5, %v3846_v19 }
 0x5e3   :  { %v10746_v49 = vmul.f32 %v3851_v36, %v3817_v0  ;;  %v7970_v0 = vld [vmem:[%s12639_s12] ss:$0 sm:$0xff] }
 0x5e4   :  { %v10748_v54 = vmul.f32 %v3850_v52, %v3812_v39  ;;  %v10802_v36 = vld [vmem:[%s12641_s14] ss:$0 sm:$0xff] }
 0x5e5   :  { %v3859_v60 = vmul.f32 %v10746_v49, %v10746_v49 }
 0x5e6   :  { %v3858_v56 = vmul.f32 %v10748_v54, %v10748_v54 }
 0x5e8   :  { %v3867_v12 = vadd.f32 %v3859_v60, %v3858_v56 }
 0x5ea   :  { %v3868_v42 = vrot.slane %v3867_v12, 4 }
 0x5ec   :  { %v3869_v45 = vadd.f32 %v3868_v42, %v3867_v12 }
 0x5ee   :  { %v3870_v63 = vrot.slane %v3869_v45, 2 }
 0x5f0   :  { %v3871_v30 = vadd.f32 %v3870_v63, %v3869_v45  ;;  %v8402_v45 = vld [vmem:[#allocation2 + $0x58] sm:$0x7f] }
 0x5f2   :  { %v3872_v1 = vrot.slane %v3871_v30, 1 }
 0x5f4   :  { %v3873_v48 = vadd.f32 %v3872_v1, %v3871_v30 }
 0x5f6   :  { %8342 = vrsqrt.f32 %v3873_v48  ;;  %vm3883_vm11 = vcmp.eq.f32.partialorder %v3873_v48, inf  ;;  %v3886_v23 = vand.u32 2147483648, %v3873_v48  ;;  %vm3885_vm12 = vcmp.eq.f32.partialorder %v3873_v48, 0.0 }
 0x600   :  { %v8343_v22 = vpop.eup %8342 }
 0x601   :  { %v3882_v34 = vmul.f32 %v8343_v22, %v3873_v48  ;;  %v8405_v22 = vld [vmem:[#allocation2 + $0x48] sm:$0x7f] }
 0x603   :  { %v3884_v4 = vsel %vm3883_vm11, %v3873_v48, %v3882_v34 }
 0x604   :  { %v3887_v27 = vsel %vm3885_vm12, %v3886_v23, %v3884_v4  ;;  %v4067_v23 = vld [vmem:[#allocation2] sm:$0xff]  ;;  %v7972_v4 = vld [vmem:[%s12632_s5 + $0x38] sm:$0xff] }
 0x605   :  { %3890 = vadd.xlane.f32.xlu1 %v3887_v27  ;;  %v10821_v14 = vrot.slane %v7972_v4, %v13220_v13  ;;  %v10827_v59 = vrot.slane %v7972_v4, %v13223_v20  ;;  %v10833_v41 = vrot.slane %v7972_v4, %v13225_v62  ;;  %v10836_v40 = vrot.slane %v7972_v4, %v13226_v50 }
 0x606   :  { %v10839_v25 = vrot.slane %v7972_v4, %v13227_v26 }
 0x607   :  { %13221 = vst [vmem:[#allocation45_spill] sm:$0xff] %v10821_v14 }
 0x619   :  { %v3889_v11 = vpop.xlane.xlu0 %3888 }
 0x61a   :  { %v3893_v9 = vmul.f32 0.0078125, %v3889_v11  ;;  %v10818_v11 = vrot.slane %v7972_v4, %v13218_v55 }
 0x61c   :  { %v3895_v38 = vadd.f32 1e-06, %v3893_v9  ;;  %13219 = vst [vmem:[#allocation44_spill] sm:$0xff] %v10818_v11  ;;  %v13222_v9 = vld [vmem:[#allocation13_spill] sm:$0xff] }
 0x61d   :  { %v10824_v8 = vrot.slane %v7972_v4, %v13222_v9 }
 0x61e   :  { %8344 = vrcp.f32 %v3895_v38  ;;  %v13224_v38 = vld [vmem:[#allocation18_spill] sm:$0xff] }
 0x61f   :  { %v10830_v47 = vrot.slane %v7972_v4, %v13224_v38 }
 0x628   :  { %v8345_v10 = vpop.eup %8344 }
 0x629   :  { %v3898_v6 = vmul.f32 %v8345_v10, %v10737_v29  ;;  %v4119_v10 = vmul.f32 %v10818_v11, %v4067_v23 }
 0x62b   :  { %v3902_v35 = vmul.f32 %v3898_v6, %v10719_v2  ;;  %v3903_v31 = vmul.f32 %v3898_v6, %v10717_v33 }
 0x62d   :  { %v3912_v32 = vmul.f32 %v7969_v7, %v3902_v35  ;;  %v3913_v39 = vmul.f32 %v7969_v7, %v3903_v31  ;;  %v4122_v35 = vmul.f32 %v10818_v11, %v10815_v5  ;;  %v4155_v31 = vmul.f32 %v10821_v14, %v4067_v23 }
 0x62f   :  { %v3923_v24 = vadd.f32 %v7970_v0, %v3912_v32  ;;  %v3924_v53 = vadd.f32 %v7970_v0, %v3913_v39  ;;  %v4157_v32 = vmul.f32 %v10821_v14, %v10813_v17  ;;  %v4158_v39 = vmul.f32 %v10821_v14, %v10815_v5 }
 0x631   :  { %v3927_v58 = vadd.f32 %v3923_v24, %v10719_v2  ;;  %v3928_v29 = vadd.f32 %v3924_v53, %v10717_v33  ;;  %v4247_v24 = vmul.f32 %v10824_v8, %v4067_v23  ;;  %v4444_v23 = vmul.f32 %v10833_v41, %v10815_v5 }
 0x633   :  { %8158 = vmatprep.mubr.f32.mxu1 %v3927_v58  ;;  %v4249_v58 = vmul.f32 %v10824_v8, %v10813_v17 }
 0x634   :  { %8159 = vmatmul.mubr.f32.vlgmr.msra.gmra.mrb[4].mxu1 %v3928_v29  ;;  %v4250_v29 = vmul.f32 %v10824_v8, %v10815_v5 }
 0x692   :  { %v3891_v57 = vpop.xlane.xlu1 %3890 }
 0x693   :  { %v3894_v46 = vmul.f32 0.0078125, %v3891_v57  ;;  %v4187_v57 = vrot.slane %v4155_v31, 1  ;;  %v10877_v31 = vld [vmem:[#allocation2 + $0x28] sm:$0x7f] }
 0x695   :  { %v3896_v3 = vadd.f32 1e-06, %v3894_v46 }
 0x697   :  { %8346 = vrcp.f32 %v3896_v3  ;;  %v4190_v3 = vrot.slane %v4157_v32, 1 }
 0x6a1   :  { %v8347_v21 = vpop.eup %8346 }
 0x6a2   :  { %v3900_v51 = vmul.f32 %v8347_v21, %v3887_v27  ;;  %v4068_v27 = vld [vmem:[#allocation2 + $0x8] sm:$0x7f]  ;;  %v4191_v21 = vrot.slane %v4158_v39, 1 }
 0x6a3   :  { %v4120_v6 = vmul.f32 %v10818_v11, %v4068_v27  ;;  %v4248_v53 = vmul.f32 %v10824_v8, %v4068_v27 }
 0x6a4   :  { %v3904_v61 = vmul.f32 %v3900_v51, %v10748_v54  ;;  %v3905_v16 = vmul.f32 %v3900_v51, %v10746_v49  ;;  %v4279_v51 = vrot.slane %v4247_v24, 2 }
 0x6a6   :  { %v3914_v44 = vmul.f32 %v7969_v7, %v3904_v61  ;;  %v3915_v15 = vmul.f32 %v7969_v7, %v3905_v16  ;;  %v4121_v7 = vmul.f32 %v10818_v11, %v10813_v17  ;;  %v4280_v61 = vrot.slane %v4248_v53, 2 }
 0x6a7   :  { %v4282_v16 = vrot.slane %v4249_v58, 2  ;;  %v4460_v58 = vrot.slane %v4444_v23, 5 }
 0x6a8   :  { %v3925_v18 = vadd.f32 %v7970_v0, %v3914_v44  ;;  %v3926_v19 = vadd.f32 %v7970_v0, %v3915_v15  ;;  %v4156_v0 = vmul.f32 %v10821_v14, %v4068_v27  ;;  %v4283_v44 = vrot.slane %v4250_v29, 2 }
 0x6aa   :  { %v3929_v2 = vadd.f32 %v3925_v18, %v10748_v54  ;;  %v3930_v33 = vadd.f32 %v3926_v19, %v10746_v49  ;;  %v8403_v54 = vld [vmem:[#allocation2 + $0x38] sm:$0x7f]  ;;  %v8404_v49 = vld [vmem:[#allocation2 + $0x68] sm:$0x7f]  ;;  %v4188_v46 = vrot.slane %v4156_v0, 1  ;;  %v4192_v18 = vsel %vm430_vm3, %v4190_v3, %v4191_v21 }
 0x6ac   :  { %8161 = vmatprep.mubr.f32.mxu1 %v3929_v2  ;;  %v4189_v15 = vsel %vm430_vm3, %v4187_v57, %v4188_v46  ;;  %v4228_v19 = vadd.f32 %v4188_v46, %v4120_v6  ;;  %v4230_v2 = vadd.f32 %v4191_v21, %v4122_v35  ;;  %v4495_v6 = vmul.f32 %v10836_v40, %v4068_v27  ;;  %v10875_v35 = vld [vmem:[#allocation2 + $0x20] sm:$0xff] }
 0x6ad   :  { %8162 = vmatmul.mubr.f32.gmra.mrb[6].mxu1 %v3930_v33  ;;  %v4227_v33 = vadd.f32 %v4189_v15, %v4119_v10  ;;  %v10882_v46 = vld [vmem:[%s12632_s5 + $0x40] sm:$0xff]  ;;  %v4550_v15 = vmul.f32 %v10839_v25, %v10877_v31 }
 0x6ae   :  { %v4511_v29 = vrot.slane %v4495_v6, 6 }
 0x707   :  { %v8160_v52 = vpop.f32.mrb[4].mxu1 }
 0x708   :  { %v4026_v60 = vadd.f32 %v8160_v52, %v10802_v36  ;;  %v4020_v56 = vpop.f32.mrb[5].mxu1  ;;  %v4229_v52 = vadd.f32 %v4192_v18, %v4121_v7  ;;  %v4496_v7 = vmul.f32 %v10836_v40, %v10815_v5 }
 0x709   :  { %v4021_v12 = vadd.f32 %v10802_v36, %v4020_v56  ;;  %v4284_v56 = vsel %vm523_vm4, %v4282_v16, %v4283_v44  ;;  %v4548_v16 = vmul.f32 %v10839_v25, %v10815_v5 }
 0x70a   :  { %v4044_v42 = vcombine.high %v4026_v60, %v4026_v60  ;;  %v4053_v63 = vadd.f32 %v8402_v45, %v4026_v60  ;;  %v4281_v60 = vsel %vm523_vm4, %v4279_v51, %v4280_v61  ;;  %v4339_v45 = vmul.f32 %v10827_v59, %v4068_v27 }
 0x70b   :  { %v4043_v30 = vcombine.high %v4021_v12, %v4021_v12  ;;  %v4051_v1 = vadd.f32 %v8403_v54, %v4021_v12  ;;  %v4320_v12 = vadd.f32 %v4280_v61, %v4228_v19  ;;  %v4321_v54 = vadd.f32 %v4284_v56, %v4229_v52 }
 0x70c   :  { %v4054_v48 = vadd.f32 %v8404_v49, %v4044_v42  ;;  %4061 = vst.msk [vmem:[#allocation2 + $0x58] sm:$0xf] %vm302_vm5, %v4053_v63  ;;  %v4322_v42 = vadd.f32 %v4283_v44, %v4230_v2  ;;  %v4340_v63 = vmul.f32 %v10827_v59, %v10815_v5  ;;  %v4392_v49 = vmul.f32 %v10830_v47, %v10815_v5 }
 0x70d   :  { %v4052_v34 = vadd.f32 %v8405_v22, %v4043_v30  ;;  %4059 = vst.msk [vmem:[#allocation2 + $0x38] sm:$0xf] %vm302_vm5, %v4051_v1  ;;  %v4319_v30 = vadd.f32 %v4281_v60, %v4227_v33  ;;  %v4391_v1 = vmul.f32 %v10830_v47, %v4068_v27  ;;  %v4512_v57 = vrot.slane %v4496_v7, 6 }
 0x70e   :  { %4062 = vst.msk [vmem:[#allocation2 + $0x68] sm:$0xf] %vm302_vm5, %v4054_v48  ;;  %v4355_v48 = vrot.slane %v4339_v45, 3  ;;  %v4356_v22 = vrot.slane %v4340_v63, 3  ;;  %v4408_v10 = vrot.slane %v4392_v49, 4  ;;  %v4547_v61 = vmul.f32 %v10839_v25, %v10813_v17 }
 0x70f   :  { %4060 = vst.msk [vmem:[#allocation2 + $0x48] sm:$0xf] %vm302_vm5, %v4052_v34  ;;  %v4443_v34 = vmul.f32 %v10833_v41, %v4068_v27  ;;  %v4407_v4 = vrot.slane %v4391_v1, 4  ;;  %v4549_v44 = vmul.f32 %v10839_v25, %v10875_v35  ;;  %v10894_v52 = vrot.slane %v10882_v46, %v13218_v55 }
 0x710   :  { %v4371_v0 = vadd.f32 %v4355_v48, %v4319_v30  ;;  %v4372_v32 = vadd.f32 %v4355_v48, %v4320_v12  ;;  %v4373_v39 = vadd.f32 %v4356_v22, %v4321_v54  ;;  %v4374_v24 = vadd.f32 %v4356_v22, %v4322_v42 }
 0x711   :  { %v4459_v53 = vrot.slane %v4443_v34, 5  ;;  %v10898_v60 = vrot.slane %v10882_v46, %v13220_v13  ;;  %v10902_v56 = vrot.slane %v10882_v46, %v13222_v9  ;;  %v10906_v12 = vrot.slane %v10882_v46, %v13223_v20 }
 0x712   :  { %v4423_v27 = vadd.f32 %v4407_v4, %v4371_v0  ;;  %v4424_v3 = vadd.f32 %v4407_v4, %v4372_v32  ;;  %v4425_v21 = vadd.f32 %v4408_v10, %v4373_v39  ;;  %v4426_v51 = vadd.f32 %v4408_v10, %v4374_v24 }
 0x713   :  { %v4583_v54 = vmul.f32 %v10894_v52, %v10813_v17  ;;  %v4584_v1 = vmul.f32 %v10894_v52, %v10815_v5  ;;  %v4585_v49 = vmul.f32 %v10894_v52, %v10875_v35  ;;  %v4586_v48 = vmul.f32 %v10894_v52, %v10877_v31 }
 0x714   :  { %v4475_v18 = vadd.f32 %v4459_v53, %v4423_v27  ;;  %v4476_v19 = vadd.f32 %v4459_v53, %v4424_v3  ;;  %v4477_v2 = vadd.f32 %v4460_v58, %v4425_v21  ;;  %v4478_v33 = vadd.f32 %v4460_v58, %v4426_v51 }
 0x715   :  { %v4615_v10 = vrot.slane %v4583_v54, 1  ;;  %v4616_v6 = vrot.slane %v4584_v1, 1  ;;  %v4618_v7 = vrot.slane %v4585_v49, 1  ;;  %v4619_v0 = vrot.slane %v4586_v48, 1 }
 0x716   :  { %v4527_v42 = vadd.f32 %v4511_v29, %v4475_v18  ;;  %v4528_v45 = vadd.f32 %v4511_v29, %v4476_v19  ;;  %v4529_v63 = vadd.f32 %v4512_v57, %v4477_v2  ;;  %v4530_v30 = vadd.f32 %v4512_v57, %v4478_v33 }
 0x717   :  { %v4675_v32 = vmul.f32 %v10898_v60, %v10813_v17  ;;  %v4676_v39 = vmul.f32 %v10898_v60, %v10815_v5  ;;  %v4677_v24 = vmul.f32 %v10898_v60, %v10875_v35  ;;  %v4678_v53 = vmul.f32 %v10898_v60, %v10877_v31 }
 0x718   :  { %v4563_v22 = vadd.f32 %v4547_v61, %v4527_v42  ;;  %v4564_v34 = vadd.f32 %v4548_v16, %v4528_v45  ;;  %v4565_v23 = vadd.f32 %v4549_v44, %v4529_v63  ;;  %v4566_v4 = vadd.f32 %v4550_v15, %v4530_v30 }
 0x719   :  { %v4617_v58 = vsel %vm430_vm3, %v4615_v10, %v4616_v6  ;;  %v4620_v29 = vsel %vm430_vm3, %v4618_v7, %v4619_v0  ;;  %v4707_v51 = vrot.slane %v4675_v32, 2  ;;  %v4708_v61 = vrot.slane %v4676_v39, 2  ;;  %v10952_v32 = vld [vmem:[#allocation2 + $0x38] sm:$0x7f]  ;;  %v10954_v39 = vld [vmem:[#allocation2 + $0x30] sm:$0xff] }
 0x71a   :  { %v4656_v57 = vadd.f32 %v4616_v6, %v4564_v34  ;;  %v4658_v27 = vadd.f32 %v4619_v0, %v4566_v4  ;;  %v4655_v3 = vadd.f32 %v4617_v58, %v4563_v22  ;;  %v4657_v21 = vadd.f32 %v4620_v29, %v4565_v23 }
 0x71b   :  { %v4710_v17 = vrot.slane %v4677_v24, 2  ;;  %v4711_v16 = vrot.slane %v4678_v53, 2  ;;  %v4767_v44 = vmul.f32 %v10902_v56, %v10815_v5  ;;  %v4768_v15 = vmul.f32 %v10902_v56, %v10877_v31 }
 0x71c   :  { %v4709_v18 = vsel %vm523_vm4, %v4707_v51, %v4708_v61  ;;  %v4748_v19 = vadd.f32 %v4708_v61, %v4656_v57  ;;  %v4819_v2 = vmul.f32 %v10906_v12, %v10815_v5  ;;  %v4820_v33 = vmul.f32 %v10906_v12, %v10877_v31 }
 0x71d   :  { %v4712_v42 = vsel %vm523_vm4, %v4710_v17, %v4711_v16  ;;  %v4747_v45 = vadd.f32 %v4709_v18, %v4655_v3  ;;  %v4750_v63 = vadd.f32 %v4711_v16, %v4658_v27  ;;  %v4783_v30 = vrot.slane %v4767_v44, 3 }
 0x71e   :  { %v4749_v54 = vadd.f32 %v4712_v42, %v4657_v21  ;;  %v4784_v1 = vrot.slane %v4768_v15, 3  ;;  %v4835_v49 = vrot.slane %v4819_v2, 4  ;;  %v4836_v48 = vrot.slane %v4820_v33, 4 }
 0x71f   :  { %v4799_v22 = vadd.f32 %v4783_v30, %v4747_v45  ;;  %v4800_v34 = vadd.f32 %v4783_v30, %v4748_v19  ;;  %v10938_v23 = vrot.slane %v10882_v46, %v13224_v38  ;;  %v10942_v4 = vrot.slane %v10882_v46, %v13225_v62 }
 0x720   :  { %v4801_v10 = vadd.f32 %v4784_v1, %v4749_v54  ;;  %v4802_v6 = vadd.f32 %v4784_v1, %v4750_v63  ;;  %v10946_v7 = vrot.slane %v10882_v46, %v13226_v50  ;;  %v10950_v0 = vrot.slane %v10882_v46, %v13227_v26  ;;  %v10983_v54 = vld [vmem:[%s12632_s5 + $0x48] sm:$0xff] }
 0x721   :  { %v4851_v24 = vadd.f32 %v4835_v49, %v4799_v22  ;;  %v4852_v53 = vadd.f32 %v4835_v49, %v4800_v34  ;;  %v4871_v58 = vmul.f32 %v10938_v23, %v10815_v5  ;;  %v4872_v29 = vmul.f32 %v10938_v23, %v10877_v31 }
 0x722   :  { %v4853_v57 = vadd.f32 %v4836_v48, %v4801_v10  ;;  %v4854_v27 = vadd.f32 %v4836_v48, %v4802_v6  ;;  %v4923_v3 = vmul.f32 %v10942_v4, %v10815_v5  ;;  %v4924_v46 = vmul.f32 %v10942_v4, %v10877_v31 }
 0x723   :  { %v4887_v21 = vrot.slane %v4871_v58, 5  ;;  %v4888_v51 = vrot.slane %v4872_v29, 5  ;;  %v4975_v61 = vmul.f32 %v10946_v7, %v10875_v35  ;;  %v4976_v17 = vmul.f32 %v10946_v7, %v10877_v31 }
 0x724   :  { %v4939_v16 = vrot.slane %v4923_v3, 6  ;;  %v4940_v44 = vrot.slane %v4924_v46, 6  ;;  %v4977_v15 = vmul.f32 %v10946_v7, %v10954_v39  ;;  %v4978_v18 = vmul.f32 %v10946_v7, %v10952_v32 }
 0x725   :  { %v4903_v5 = vadd.f32 %v4887_v21, %v4851_v24  ;;  %v4904_v19 = vadd.f32 %v4887_v21, %v4852_v53  ;;  %v4905_v2 = vadd.f32 %v4888_v51, %v4853_v57  ;;  %v4906_v33 = vadd.f32 %v4888_v51, %v4854_v27 }
 0x726   :  { %v5011_v42 = vmul.f32 %v10950_v0, %v10875_v35  ;;  %v5012_v45 = vmul.f32 %v10950_v0, %v10877_v31  ;;  %v5013_v63 = vmul.f32 %v10950_v0, %v10954_v39  ;;  %v5014_v30 = vmul.f32 %v10950_v0, %v10952_v32 }
 0x727   :  { %v4955_v1 = vadd.f32 %v4939_v16, %v4903_v5  ;;  %v4956_v49 = vadd.f32 %v4939_v16, %v4904_v19  ;;  %v4957_v48 = vadd.f32 %v4940_v44, %v4905_v2  ;;  %v4958_v22 = vadd.f32 %v4940_v44, %v4906_v33 }
 0x728   :  { %v5043_v34 = vrot.slane %v5011_v42, 1  ;;  %v5044_v10 = vrot.slane %v5012_v45, 1  ;;  %v5046_v6 = vrot.slane %v5013_v63, 1  ;;  %v5047_v24 = vrot.slane %v5014_v30, 1 }
 0x729   :  { %v4991_v53 = vadd.f32 %v4975_v61, %v4955_v1  ;;  %v4992_v58 = vadd.f32 %v4976_v17, %v4956_v49  ;;  %v4993_v29 = vadd.f32 %v4977_v15, %v4957_v48  ;;  %v4994_v57 = vadd.f32 %v4978_v18, %v4958_v22 }
 0x72a   :  { %v5045_v27 = vsel %vm430_vm3, %v5043_v34, %v5044_v10  ;;  %v5048_v3 = vsel %vm430_vm3, %v5046_v6, %v5047_v24  ;;  %v10989_v46 = vrot.slane %v10983_v54, %v13218_v55  ;;  %v10993_v21 = vrot.slane %v10983_v54, %v13220_v13 }
 0x72b   :  { %v5083_v51 = vadd.f32 %v5045_v27, %v4991_v53  ;;  %v5084_v16 = vadd.f32 %v5044_v10, %v4992_v58  ;;  %v5085_v44 = vadd.f32 %v5048_v3, %v4993_v29  ;;  %v5086_v5 = vadd.f32 %v5047_v24, %v4994_v57 }
 0x72c   :  { %v5103_v61 = vmul.f32 %v10989_v46, %v10875_v35  ;;  %v5104_v17 = vmul.f32 %v10989_v46, %v10877_v31  ;;  %v5105_v15 = vmul.f32 %v10989_v46, %v10954_v39  ;;  %v5106_v18 = vmul.f32 %v10989_v46, %v10952_v32 }
 0x72d   :  { %v5195_v19 = vmul.f32 %v10993_v21, %v10877_v31  ;;  %v5196_v2 = vmul.f32 %v10993_v21, %v10952_v32  ;;  %v11009_v33 = vrot.slane %v10983_v54, %v13222_v9  ;;  %v11013_v35 = vrot.slane %v10983_v54, %v13223_v20 }
 0x72e   :  { %v5135_v42 = vrot.slane %v5103_v61, 2  ;;  %v5136_v45 = vrot.slane %v5104_v17, 2  ;;  %v5138_v63 = vrot.slane %v5105_v15, 2  ;;  %v5139_v30 = vrot.slane %v5106_v18, 2 }
 0x72f   :  { %v5211_v1 = vrot.slane %v5195_v19, 3  ;;  %v5212_v49 = vrot.slane %v5196_v2, 3  ;;  %v5247_v48 = vmul.f32 %v11009_v33, %v10877_v31  ;;  %v5248_v22 = vmul.f32 %v11009_v33, %v10952_v32 }
 0x730   :  { %v5137_v34 = vsel %vm523_vm4, %v5135_v42, %v5136_v45  ;;  %v5140_v10 = vsel %vm523_vm4, %v5138_v63, %v5139_v30  ;;  %v5176_v6 = vadd.f32 %v5136_v45, %v5084_v16  ;;  %v5178_v24 = vadd.f32 %v5139_v30, %v5086_v5  ;;  %v11033_v42 = vld [vmem:[#allocation2 + $0x48] sm:$0x7f] }
 0x731   :  { %v5175_v53 = vadd.f32 %v5137_v34, %v5083_v51  ;;  %v5177_v58 = vadd.f32 %v5140_v10, %v5085_v44  ;;  %v5263_v29 = vrot.slane %v5247_v48, 4  ;;  %v5264_v57 = vrot.slane %v5248_v22, 4  ;;  %v11043_v10 = vld [vmem:[#allocation2 + $0x40] sm:$0xff] }
 0x732   :  { %v5228_v27 = vadd.f32 %v5211_v1, %v5176_v6  ;;  %v5230_v3 = vadd.f32 %v5212_v49, %v5178_v24  ;;  %v5299_v61 = vmul.f32 %v11013_v35, %v10877_v31  ;;  %v5300_v17 = vmul.f32 %v11013_v35, %v10952_v32 }
 0x733   :  { %v5227_v15 = vadd.f32 %v5211_v1, %v5175_v53  ;;  %v5229_v18 = vadd.f32 %v5212_v49, %v5177_v58  ;;  %v11027_v19 = vrot.slane %v10983_v54, %v13224_v38  ;;  %v11031_v51 = vrot.slane %v10983_v54, %v13225_v62 }
 0x734   :  { %v5280_v16 = vadd.f32 %v5263_v29, %v5228_v27  ;;  %v5282_v44 = vadd.f32 %v5264_v57, %v5230_v3  ;;  %v5315_v5 = vrot.slane %v5299_v61, 5  ;;  %v5316_v2 = vrot.slane %v5300_v17, 5 }
 0x735   :  { %13228 = vst [vmem:[#allocation46_spill] sm:$0xff] %v11031_v51  ;;  %v5279_v45 = vadd.f32 %v5263_v29, %v5227_v15  ;;  %v5281_v63 = vadd.f32 %v5264_v57, %v5229_v18  ;;  %v5351_v30 = vmul.f32 %v11027_v19, %v10877_v31  ;;  %v5352_v1 = vmul.f32 %v11027_v19, %v10952_v32 }
 0x736   :  { %v5332_v49 = vadd.f32 %v5315_v5, %v5280_v16  ;;  %v5334_v48 = vadd.f32 %v5316_v2, %v5282_v44  ;;  %v5403_v22 = vmul.f32 %v11031_v51, %v10954_v39  ;;  %v5404_v34 = vmul.f32 %v11031_v51, %v10952_v32 }
 0x737   :  { %v5331_v6 = vadd.f32 %v5315_v5, %v5279_v45  ;;  %v5333_v24 = vadd.f32 %v5316_v2, %v5281_v63  ;;  %v5367_v53 = vrot.slane %v5351_v30, 6  ;;  %v5368_v58 = vrot.slane %v5352_v1, 6 }
 0x738   :  { %v5405_v31 = vmul.f32 %v11031_v51, %v11043_v10  ;;  %v5406_v29 = vmul.f32 %v11031_v51, %v11033_v42  ;;  %v11051_v57 = vrot.slane %v10983_v54, %v13226_v50  ;;  %v11055_v27 = vrot.slane %v10983_v54, %v13227_v26 }
 0x739   :  { %v5383_v3 = vadd.f32 %v5367_v53, %v5331_v6  ;;  %v5384_v61 = vadd.f32 %v5367_v53, %v5332_v49  ;;  %v5385_v17 = vadd.f32 %v5368_v58, %v5333_v24  ;;  %v5386_v15 = vadd.f32 %v5368_v58, %v5334_v48  ;;  %v7975_v6 = vld [vmem:[%s12632_s5 + $0x50] sm:$0xff] }
 0x73a   :  { %13229 = vst [vmem:[#allocation47_spill] sm:$0xff] %v11051_v57  ;;  %13230 = vst [vmem:[#allocation48_spill] sm:$0xff] %v11055_v27  ;;  %v5439_v18 = vmul.f32 %v11051_v57, %v10954_v39  ;;  %v5440_v16 = vmul.f32 %v11051_v57, %v10952_v32  ;;  %v5441_v44 = vmul.f32 %v11051_v57, %v11043_v10 }
 0x73b   :  { %v5442_v5 = vmul.f32 %v11051_v57, %v11033_v42  ;;  %v5419_v2 = vadd.f32 %v5403_v22, %v5383_v3  ;;  %v5420_v45 = vadd.f32 %v5404_v34, %v5384_v61  ;;  %v5421_v54 = vadd.f32 %v5405_v31, %v5385_v17 }
 0x73c   :  { %v5422_v63 = vadd.f32 %v5406_v29, %v5386_v15  ;;  %v5471_v30 = vrot.slane %v5439_v18, 1  ;;  %v5472_v1 = vrot.slane %v5440_v16, 1  ;;  %v5474_v49 = vrot.slane %v5441_v44, 1 }
 0x73d   :  { %v5475_v48 = vrot.slane %v5442_v5, 1  ;;  %v5531_v24 = vmul.f32 %v11055_v27, %v10954_v39  ;;  %v5532_v53 = vmul.f32 %v11055_v27, %v10952_v32  ;;  %v5533_v22 = vmul.f32 %v11055_v27, %v11043_v10 }
 0x73e   :  { %v5534_v34 = vmul.f32 %v11055_v27, %v11033_v42  ;;  %v5473_v58 = vsel %vm430_vm3, %v5471_v30, %v5472_v1  ;;  %v5512_v29 = vadd.f32 %v5472_v1, %v5420_v45  ;;  %v11079_v44 = vrot.slane %v7975_v6, %v13218_v55 }
 0x73f   :  { %v5476_v31 = vsel %vm430_vm3, %v5474_v49, %v5475_v48  ;;  %v5514_v3 = vadd.f32 %v5475_v48, %v5422_v63  ;;  %v5511_v61 = vadd.f32 %v5473_v58, %v5419_v2  ;;  %v5563_v15 = vrot.slane %v5531_v24, 2 }
 0x740   :  { %v5513_v17 = vadd.f32 %v5476_v31, %v5421_v54  ;;  %v5564_v18 = vrot.slane %v5532_v53, 2  ;;  %v5566_v39 = vrot.slane %v5533_v22, 2  ;;  %v5567_v16 = vrot.slane %v5534_v34, 2  ;;  %13231 = vst [vmem:[#allocation49_spill] sm:$0xff] %v11079_v44 }
 0x741   :  { %v11082_v5 = vrot.slane %v7975_v6, %v13220_v13  ;;  %v11086_v30 = vrot.slane %v7975_v6, %v13222_v9  ;;  %v11089_v45 = vrot.slane %v7975_v6, %v13223_v20  ;;  %v5623_v1 = vmul.f32 %v11079_v44, %v10952_v32 }
 0x742   :  { %v5565_v37 = vsel %vm523_vm4, %v5563_v15, %v5564_v18  ;;  %v5604_v43 = vadd.f32 %v5564_v18, %v5512_v29  ;;  %v5568_v2 = vsel %vm523_vm4, %v5566_v39, %v5567_v16  ;;  %v5606_v63 = vadd.f32 %v5567_v16, %v5514_v3 }
 0x743   :  { %13232 = vst [vmem:[#allocation50_spill] sm:$0xff] %v11082_v5  ;;  %13233 = vst [vmem:[#allocation51_spill] sm:$0xff] %v11086_v30  ;;  %v5603_v54 = vadd.f32 %v5565_v37, %v5511_v61  ;;  %v5605_v49 = vadd.f32 %v5568_v2, %v5513_v17  ;;  %v5624_v48 = vmul.f32 %v11079_v44, %v11033_v42  ;;  %v5639_v22 = vrot.slane %v5623_v1, 3  ;;  %v11108_v44 = vld [vmem:[#allocation2 + $0x58] sm:$0x7f] }
 0x744   :  { %13234 = vst [vmem:[#allocation54_spill] sm:$0xff] %v11089_v45  ;;  %v5675_v24 = vmul.f32 %v11082_v5, %v10952_v32  ;;  %v5676_v53 = vmul.f32 %v11082_v5, %v11033_v42  ;;  %v5727_v34 = vmul.f32 %v11086_v30, %v10952_v32  ;;  %v5728_v37 = vmul.f32 %v11086_v30, %v11033_v42 }
 0x745   :  { %v5779_v58 = vmul.f32 %v11089_v45, %v10952_v32  ;;  %v5640_v31 = vrot.slane %v5624_v48, 3  ;;  %v5780_v61 = vmul.f32 %v11089_v45, %v11033_v42  ;;  %v5655_v17 = vadd.f32 %v5639_v22, %v5603_v54  ;;  %v11143_v45 = vld [vmem:[%s12632_s5 + $0x58] sm:$0xff] }
 0x746   :  { %v5691_v29 = vrot.slane %v5675_v24, 4  ;;  %v5692_v3 = vrot.slane %v5676_v53, 4  ;;  %v5656_v15 = vadd.f32 %v5639_v22, %v5604_v43  ;;  %v5743_v18 = vrot.slane %v5727_v34, 5 }
 0x747   :  { %v5744_v39 = vrot.slane %v5728_v37, 5  ;;  %v5657_v16 = vadd.f32 %v5640_v31, %v5605_v49  ;;  %v5658_v2 = vadd.f32 %v5640_v31, %v5606_v63  ;;  %v5795_v1 = vrot.slane %v5779_v58, 6  ;;  %v11122_v63 = vld [vmem:[#allocation2 + $0x50] sm:$0xff] }
 0x748   :  { %v5796_v5 = vrot.slane %v5780_v61, 6  ;;  %v5707_v30 = vadd.f32 %v5691_v29, %v5655_v17  ;;  %v5708_v27 = vadd.f32 %v5691_v29, %v5656_v15  ;;  %v11111_v32 = vrot.slane %v7975_v6, %v13224_v38 }
 0x749   :  { %v11114_v48 = vrot.slane %v7975_v6, %v13225_v62  ;;  %v5709_v24 = vadd.f32 %v5692_v3, %v5657_v16  ;;  %v5710_v53 = vadd.f32 %v5692_v3, %v5658_v2  ;;  %v11117_v43 = vrot.slane %v7975_v6, %v13226_v50 }
 0x74a   :  { %13235 = vst [vmem:[#allocation55_spill] sm:$0xff] %v11111_v32  ;;  %v11120_v54 = vrot.slane %v7975_v6, %v13227_v26  ;;  %v5759_v49 = vadd.f32 %v5743_v18, %v5707_v30  ;;  %v5760_v22 = vadd.f32 %v5743_v18, %v5708_v27  ;;  %v5831_v34 = vmul.f32 %v11111_v32, %v11043_v10 }
 0x74b   :  { %13236 = vst [vmem:[#allocation57_spill] sm:$0xff] %v11114_v48  ;;  %13237 = vst [vmem:[#allocation56_spill] sm:$0xff] %v11117_v43  ;;  %v5832_v37 = vmul.f32 %v11111_v32, %v11033_v42  ;;  %v5761_v58 = vadd.f32 %v5744_v39, %v5709_v24  ;;  %v5762_v31 = vadd.f32 %v5744_v39, %v5710_v53 }
 0x74c   :  { %13238 = vst [vmem:[#allocation59_spill] sm:$0xff] %v11120_v54  ;;  %v5833_v29 = vmul.f32 %v11111_v32, %v11122_v63  ;;  %v5834_v3 = vmul.f32 %v11111_v32, %v11108_v44  ;;  %v5811_v6 = vadd.f32 %v5795_v1, %v5759_v49  ;;  %v5812_v61 = vadd.f32 %v5795_v1, %v5760_v22 }
 0x74d   :  { %v5867_v30 = vmul.f32 %v11114_v48, %v11043_v10  ;;  %v5868_v27 = vmul.f32 %v11114_v48, %v11033_v42  ;;  %v5813_v17 = vadd.f32 %v5796_v5, %v5761_v58  ;;  %v5814_v15 = vadd.f32 %v5796_v5, %v5762_v31 }
 0x74e   :  { %v5869_v18 = vmul.f32 %v11114_v48, %v11122_v63  ;;  %v5870_v39 = vmul.f32 %v11114_v48, %v11108_v44  ;;  %v5847_v16 = vadd.f32 %v5831_v34, %v5811_v6  ;;  %v5848_v2 = vadd.f32 %v5832_v37, %v5812_v61 }
 0x74f   :  { %v5899_v24 = vrot.slane %v5867_v30, 1  ;;  %v5900_v53 = vrot.slane %v5868_v27, 1  ;;  %v5849_v49 = vadd.f32 %v5833_v29, %v5813_v17  ;;  %v5850_v1 = vadd.f32 %v5834_v3, %v5814_v15 }
 0x750   :  { %v5902_v22 = vrot.slane %v5869_v18, 1  ;;  %v5903_v32 = vrot.slane %v5870_v39, 1  ;;  %v5959_v31 = vmul.f32 %v11117_v43, %v11043_v10  ;;  %v5960_v34 = vmul.f32 %v11117_v43, %v11033_v42 }
 0x751   :  { %v5901_v5 = vsel %vm430_vm3, %v5899_v24, %v5900_v53  ;;  %v5940_v58 = vadd.f32 %v5900_v53, %v5848_v2  ;;  %v5961_v6 = vmul.f32 %v11117_v43, %v11122_v63  ;;  %v5962_v30 = vmul.f32 %v11117_v43, %v11108_v44 }
 0x752   :  { %v5904_v37 = vsel %vm430_vm3, %v5902_v22, %v5903_v32  ;;  %v5939_v29 = vadd.f32 %v5901_v5, %v5847_v16  ;;  %v5942_v3 = vadd.f32 %v5903_v32, %v5850_v1  ;;  %v5991_v27 = vrot.slane %v5959_v31, 2 }
 0x753   :  { %v5941_v61 = vadd.f32 %v5904_v37, %v5849_v49  ;;  %v5992_v17 = vrot.slane %v5960_v34, 2  ;;  %v5994_v15 = vrot.slane %v5961_v6, 2  ;;  %v6051_v10 = vmul.f32 %v11120_v54, %v11033_v42 }
 0x754   :  { %v6052_v18 = vmul.f32 %v11120_v54, %v11108_v44  ;;  %v11161_v39 = vrot.slane %v11143_v45, %v13218_v55  ;;  %v5995_v16 = vrot.slane %v5962_v30, 2  ;;  %v11166_v24 = vrot.slane %v11143_v45, %v13220_v13 }
 0x755   :  { %v5993_v32 = vsel %vm523_vm4, %v5991_v27, %v5992_v17  ;;  %v6032_v2 = vadd.f32 %v5992_v17, %v5940_v58  ;;  %v6067_v49 = vrot.slane %v6051_v10, 3 }
 0x756   :  { %13239 = vst [vmem:[#allocation64_spill] sm:$0xff] %v11161_v39  ;;  %13240 = vst [vmem:[#allocation65_spill] sm:$0xff] %v11166_v24  ;;  %v6031_v53 = vadd.f32 %v5993_v32, %v5939_v29  ;;  %v6068_v1 = vrot.slane %v6052_v18, 3  ;;  %v6103_v22 = vmul.f32 %v11161_v39, %v11033_v42  ;;  %v5996_v5 = vsel %vm523_vm4, %v5994_v15, %v5995_v16 }
 0x757   :  { %v6034_v31 = vadd.f32 %v5995_v16, %v5942_v3  ;;  %v6104_v34 = vmul.f32 %v11161_v39, %v11108_v44  ;;  %v6155_v37 = vmul.f32 %v11166_v24, %v11033_v42  ;;  %v6033_v58 = vadd.f32 %v5996_v5, %v5941_v61  ;;  %v11181_v16 = vld [vmem:[#allocation2 + $0x68] sm:$0x7f] }
 0x758   :  { %v6083_v6 = vadd.f32 %v6067_v49, %v6031_v53  ;;  %v6084_v30 = vadd.f32 %v6067_v49, %v6032_v2  ;;  %v6119_v27 = vrot.slane %v6103_v22, 4  ;;  %v6156_v10 = vmul.f32 %v11166_v24, %v11108_v44  ;;  %v11191_v49 = vld [vmem:[#allocation2 + $0x60] sm:$0xff] }
 0x759   :  { %v6086_v17 = vadd.f32 %v6068_v1, %v6034_v31  ;;  %v6120_v29 = vrot.slane %v6104_v34, 4  ;;  %v6171_v18 = vrot.slane %v6155_v37, 5  ;;  %v6085_v32 = vadd.f32 %v6068_v1, %v6033_v58 }
 0x75a   :  { %v6135_v54 = vadd.f32 %v6119_v27, %v6083_v6  ;;  %v6136_v15 = vadd.f32 %v6119_v27, %v6084_v30  ;;  %v11179_v3 = vrot.slane %v11143_v45, %v13222_v9  ;;  %v6172_v61 = vrot.slane %v6156_v10, 5 }
 0x75b   :  { %v6138_v39 = vadd.f32 %v6120_v29, %v6086_v17  ;;  %v11185_v2 = vrot.slane %v11143_v45, %v13223_v20  ;;  %v11189_v53 = vrot.slane %v11143_v45, %v13224_v38  ;;  %v6137_v1 = vadd.f32 %v6120_v29, %v6085_v32 }
 0x75c   :  { %13241 = vst [vmem:[#allocation66_spill] sm:$0xff] %v11179_v3  ;;  %v6187_v22 = vadd.f32 %v6171_v18, %v6135_v54  ;;  %v6188_v5 = vadd.f32 %v6171_v18, %v6136_v15  ;;  %v6207_v31 = vmul.f32 %v11179_v3, %v11033_v42  ;;  %v6208_v37 = vmul.f32 %v11179_v3, %v11108_v44 }
 0x75d   :  { %13242 = vst [vmem:[#allocation74_spill] sm:$0xff] %v11185_v2  ;;  %13243 = vst [vmem:[#allocation68_spill] sm:$0xff] %v11189_v53  ;;  %v6190_v34 = vadd.f32 %v6172_v61, %v6138_v39  ;;  %v6259_v58 = vmul.f32 %v11185_v2, %v11122_v63  ;;  %v6260_v6 = vmul.f32 %v11185_v2, %v11108_v44 }
 0x75e   :  { %v6189_v30 = vadd.f32 %v6172_v61, %v6137_v1  ;;  %v6223_v27 = vrot.slane %v6207_v31, 6  ;;  %v6261_v17 = vmul.f32 %v11185_v2, %v11191_v49  ;;  %v6262_v54 = vmul.f32 %v11185_v2, %v11181_v16 }
 0x75f   :  { %v6224_v29 = vrot.slane %v6208_v37, 6  ;;  %v6295_v42 = vmul.f32 %v11189_v53, %v11122_v63  ;;  %v6296_v39 = vmul.f32 %v11189_v53, %v11108_v44  ;;  %v6297_v10 = vmul.f32 %v11189_v53, %v11191_v49 }
 0x760   :  { %v6239_v18 = vadd.f32 %v6223_v27, %v6187_v22  ;;  %v6240_v32 = vadd.f32 %v6223_v27, %v6188_v5  ;;  %v6298_v15 = vmul.f32 %v11189_v53, %v11181_v16  ;;  %v11215_v61 = vrot.slane %v11143_v45, %v13225_v62  ;;  %v11223_v27 = vld [vmem:[%s12632_s5 + $0x60] sm:$0xff] }
 0x761   :  { %v6241_v1 = vadd.f32 %v6224_v29, %v6189_v30  ;;  %v6242_v31 = vadd.f32 %v6224_v29, %v6190_v34  ;;  %v6327_v37 = vrot.slane %v6295_v42, 1  ;;  %v6328_v2 = vrot.slane %v6296_v39, 1 }
 0x762   :  { %v6275_v3 = vadd.f32 %v6259_v58, %v6239_v18  ;;  %v6276_v24 = vadd.f32 %v6260_v6, %v6240_v32  ;;  %v6330_v43 = vrot.slane %v6297_v10, 1  ;;  %v6331_v48 = vrot.slane %v6298_v15, 1 }
 0x763   :  { %v6277_v57 = vadd.f32 %v6261_v17, %v6241_v1  ;;  %v6278_v51 = vadd.f32 %v6262_v54, %v6242_v31  ;;  %v6329_v22 = vsel %vm430_vm3, %v6327_v37, %v6328_v2  ;;  %v6387_v5 = vmul.f32 %v11215_v61, %v11122_v63 }
 0x764   :  { %v6332_v34 = vsel %vm430_vm3, %v6330_v43, %v6331_v48  ;;  %v6367_v30 = vadd.f32 %v6329_v22, %v6275_v3  ;;  %v6368_v29 = vadd.f32 %v6328_v2, %v6276_v24  ;;  %v6388_v58 = vmul.f32 %v11215_v61, %v11108_v44 }
 0x765   :  { %v6369_v6 = vadd.f32 %v6332_v34, %v6277_v57  ;;  %v6370_v17 = vadd.f32 %v6331_v48, %v6278_v51  ;;  %v6389_v54 = vmul.f32 %v11215_v61, %v11191_v49  ;;  %v6390_v63 = vmul.f32 %v11215_v61, %v11181_v16 }
 0x766   :  { %v6419_v42 = vrot.slane %v6387_v5, 2  ;;  %v6420_v39 = vrot.slane %v6388_v58, 2  ;;  %v11234_v10 = vrot.slane %v11143_v45, %v13226_v50  ;;  %v11238_v43 = vrot.slane %v11143_v45, %v13227_v26 }
 0x767   :  { %v6422_v24 = vrot.slane %v6389_v54, 2  ;;  %v6423_v3 = vrot.slane %v6390_v63, 2  ;;  %v11242_v51 = vrot.slane %v11223_v27, %v13218_v55  ;;  %v11246_v57 = vrot.slane %v11223_v27, %v13220_v13 }
 0x768   :  { %13244 = vst [vmem:[#allocation81_spill] sm:$0xff] %v11238_v43  ;;  %v6421_v48 = vsel %vm523_vm4, %v6419_v42, %v6420_v39  ;;  %v6460_v2 = vadd.f32 %v6420_v39, %v6368_v29  ;;  %v6479_v18 = vmul.f32 %v11234_v10, %v11108_v44  ;;  %v6480_v45 = vmul.f32 %v11234_v10, %v11181_v16 }
 0x769   :  { %13245 = vst [vmem:[#allocation79_spill] sm:$0xff] %v11246_v57  ;;  %v6424_v32 = vsel %vm523_vm4, %v6422_v24, %v6423_v3  ;;  %v6459_v15 = vadd.f32 %v6421_v48, %v6367_v30  ;;  %v6462_v1 = vadd.f32 %v6423_v3, %v6370_v17  ;;  %v6531_v55 = vmul.f32 %v11238_v43, %v11108_v44 }
 0x76a   :  { %v6461_v31 = vadd.f32 %v6424_v32, %v6369_v6  ;;  %v6495_v37 = vrot.slane %v6479_v18, 3  ;;  %v6496_v13 = vrot.slane %v6480_v45, 3  ;;  %v6532_v22 = vmul.f32 %v11238_v43, %v11181_v16 }
 0x76b   :  { %v6547_v5 = vrot.slane %v6531_v55, 4  ;;  %v6583_v34 = vmul.f32 %v11242_v51, %v11108_v44  ;;  %v6584_v29 = vmul.f32 %v11242_v51, %v11181_v16  ;;  %v6635_v30 = vmul.f32 %v11246_v57, %v11108_v44 }
 0x76c   :  { %v6511_v58 = vadd.f32 %v6495_v37, %v6459_v15  ;;  %v6512_v17 = vadd.f32 %v6495_v37, %v6460_v2  ;;  %v6513_v54 = vadd.f32 %v6496_v13, %v6461_v31  ;;  %v6514_v63 = vadd.f32 %v6496_v13, %v6462_v1 }
 0x76d   :  { %v6548_v6 = vrot.slane %v6532_v22, 4  ;;  %v6599_v42 = vrot.slane %v6583_v34, 5  ;;  %v6600_v39 = vrot.slane %v6584_v29, 5  ;;  %v6636_v24 = vmul.f32 %v11246_v57, %v11181_v16  ;;  %v8407_v57 = vld [vmem:[#allocation2 + $0xd8] sm:$0x7f] }
 0x76e   :  { %v6563_v48 = vadd.f32 %v6547_v5, %v6511_v58  ;;  %v6564_v18 = vadd.f32 %v6547_v5, %v6512_v17  ;;  %v6651_v45 = vrot.slane %v6635_v30, 6  ;;  %v11268_v32 = vrot.slane %v11223_v27, %v13222_v9  ;;  %v8406_v5 = vld [vmem:[#allocation2 + $0xf8] sm:$0x7f]  ;;  %v4081_v30 = vld [vmem:[#allocation2 + $0x70] sm:$0xff] }
 0x76f   :  { %v6565_v2 = vadd.f32 %v6548_v6, %v6513_v54  ;;  %v6566_v55 = vadd.f32 %v6548_v6, %v6514_v63  ;;  %v6652_v1 = vrot.slane %v6636_v24, 6  ;;  %v11274_v58 = vld [vmem:[#allocation2 + $0x78] sm:$0x7f]  ;;  %v8408_v24 = vld [vmem:[#allocation2 + $0x108] sm:$0x7f] }
 0x770   :  { %13246 = vst [vmem:[#allocation77_spill] sm:$0xff] %v11268_v32  ;;  %v6615_v37 = vadd.f32 %v6599_v42, %v6563_v48  ;;  %v6616_v13 = vadd.f32 %v6599_v42, %v6564_v18  ;;  %v6687_v22 = vmul.f32 %v11268_v32, %v11191_v49  ;;  %v6688_v18 = vmul.f32 %v11268_v32, %v11181_v16 }
 0x771   :  { %v6617_v9 = vadd.f32 %v6600_v39, %v6565_v2  ;;  %v6618_v17 = vadd.f32 %v6600_v39, %v6566_v55  ;;  %v6689_v39 = vmul.f32 %v11268_v32, %v4081_v30  ;;  %v11286_v55 = vrot.slane %v11223_v27, %v13223_v20 }
 0x772   :  { %v6667_v63 = vadd.f32 %v6651_v45, %v6615_v37  ;;  %v6668_v6 = vadd.f32 %v6651_v45, %v6616_v13  ;;  %v11303_v20 = vrot.slane %v11223_v27, %v13227_v26 }
 0x773   :  { %v6669_v42 = vadd.f32 %v6652_v1, %v6617_v9  ;;  %v6670_v48 = vadd.f32 %v6652_v1, %v6618_v17  ;;  %v11290_v1 = vrot.slane %v11223_v27, %v13224_v38  ;;  %v6723_v38 = vmul.f32 %v11286_v55, %v11191_v49 }
 0x774   :  { %v6703_v2 = vadd.f32 %v6687_v22, %v6667_v63  ;;  %v6704_v45 = vadd.f32 %v6688_v18, %v6668_v6  ;;  %v11299_v22 = vrot.slane %v11223_v27, %v13226_v50  ;;  %13248 = vst [vmem:[#allocation75_spill] sm:$0xff] %v11303_v20 }
 0x775   :  { %v6705_v37 = vadd.f32 %v6689_v39, %v6669_v42  ;;  %v6816_v50 = vmul.f32 %v11290_v1, %v11181_v16  ;;  %v6817_v26 = vmul.f32 %v11290_v1, %v4081_v30  ;;  %v6755_v9 = vrot.slane %v6723_v38, 1 }
 0x776   :  { %13247 = vst [vmem:[#allocation80_spill] sm:$0xff] %v11299_v22 }
 0x777   :  { %v6848_v6 = vrot.slane %v6816_v50, 2 }
 0x780   :  { %v8163_v3 = vpop.f32.mrb[6].mxu1 }
 0x781   :  { %v4036_v44 = vadd.f32 %v8163_v3, %v10802_v36  ;;  %v4030_v15 = vpop.f32.mrb[7].mxu1 }
 0x782   :  { %v4031_v31 = vadd.f32 %v10802_v36, %v4030_v15 }
 0x783   :  { %v4046_v34 = vcombine.high %v4036_v44, %v4036_v44  ;;  %v4057_v29 = vadd.f32 %v8406_v5, %v4036_v44  ;;  %v8409_v44 = vld [vmem:[#allocation2 + $0xe8] sm:$0x7f]  ;;  %v6726_v5 = vmul.f32 %v11286_v55, %v11274_v58 }
 0x784   :  { %v4045_v3 = vcombine.high %v4031_v31, %v4031_v31  ;;  %v4055_v54 = vadd.f32 %v8407_v57, %v4031_v31  ;;  %v6690_v57 = vmul.f32 %v11268_v32, %v11274_v58  ;;  %v11294_v31 = vrot.slane %v11223_v27, %v13225_v62 }
 0x785   :  { %v4058_v36 = vadd.f32 %v8408_v24, %v4046_v34  ;;  %4065 = vst.msk [vmem:[#allocation2 + $0xf8] sm:$0xf] %vm302_vm5, %v4057_v29  ;;  %v6724_v34 = vmul.f32 %v11286_v55, %v11181_v16  ;;  %v6725_v62 = vmul.f32 %v11286_v55, %v4081_v30  ;;  %v6815_v29 = vmul.f32 %v11290_v1, %v11191_v49 }
 0x786   :  { %v4056_v15 = vadd.f32 %v8409_v44, %v4045_v3  ;;  %4063 = vst.msk [vmem:[#allocation2 + $0xd8] sm:$0xf] %vm302_vm5, %v4055_v54  ;;  %v6706_v13 = vadd.f32 %v6690_v57, %v6670_v48  ;;  %v6818_v27 = vmul.f32 %v11290_v1, %v11274_v58  ;;  %v6759_v54 = vrot.slane %v6726_v5, 1  ;;  %v7979_v57 = vld [vmem:[%s12632_s5 + $0x68] ss:$0 sm:$0xff] }
 0x787   :  { %4066 = vst.msk [vmem:[#allocation2 + $0x108] sm:$0xf] %vm302_vm5, %v4058_v36  ;;  %v6756_v17 = vrot.slane %v6724_v34, 1  ;;  %v6758_v3 = vrot.slane %v6725_v62, 1  ;;  %v6847_v63 = vrot.slane %v6815_v29, 2  ;;  %v6850_v24 = vrot.slane %v6817_v26, 2 }
 0x788   :  { %4064 = vst.msk [vmem:[#allocation2 + $0xe8] sm:$0xf] %vm302_vm5, %v4056_v15  ;;  %v6851_v36 = vrot.slane %v6818_v27, 2  ;;  %v6798_v18 = vadd.f32 %v6759_v54, %v6706_v13  ;;  %v6907_v62 = vmul.f32 %v11294_v31, %v11181_v16  ;;  %v6908_v5 = vmul.f32 %v11294_v31, %v11274_v58 }
 0x789   :  { %v6757_v42 = vsel %vm430_vm3, %v6755_v9, %v6756_v17  ;;  %v6760_v49 = vsel %vm430_vm3, %v6758_v3, %v6759_v54  ;;  %v6796_v48 = vadd.f32 %v6756_v17, %v6704_v45  ;;  %v6849_v30 = vsel %vm523_vm4, %v6847_v63, %v6848_v6 }
 0x78a   :  { %v6795_v44 = vadd.f32 %v6757_v42, %v6703_v2  ;;  %v6797_v15 = vadd.f32 %v6760_v49, %v6705_v37  ;;  %v6852_v39 = vsel %vm523_vm4, %v6850_v24, %v6851_v36  ;;  %v6890_v34 = vadd.f32 %v6851_v36, %v6798_v18 }
 0x78b   :  { %v6888_v38 = vadd.f32 %v6848_v6, %v6796_v48  ;;  %v6959_v2 = vmul.f32 %v11299_v22, %v11181_v16  ;;  %v6960_v37 = vmul.f32 %v11299_v22, %v11274_v58  ;;  %v6923_v29 = vrot.slane %v6907_v62, 3 }
 0x78c   :  { %v6887_v45 = vadd.f32 %v6849_v30, %v6795_v44  ;;  %v6889_v13 = vadd.f32 %v6852_v39, %v6797_v15  ;;  %v6924_v50 = vrot.slane %v6908_v5, 3  ;;  %v7011_v26 = vmul.f32 %v11303_v20, %v11181_v16  ;;  %v4087_v44 = vld [vmem:[#allocation2 + $0xa0] sm:$0xff]  ;;  %v11340_v5 = vld [vmem:[#allocation2 + $0xa8] sm:$0x7f] }
 0x78d   :  { %v7012_v27 = vmul.f32 %v11303_v20, %v11274_v58  ;;  %v6975_v9 = vrot.slane %v6959_v2, 4  ;;  %v6976_v17 = vrot.slane %v6960_v37, 4  ;;  %v7063_v3 = vmul.f32 %v7979_v57, %v11181_v16  ;;  %v11342_v2 = vld [vmem:[#allocation2 + $0xb0] sm:$0xff]  ;;  %v11344_v16 = vld [vmem:[#allocation2 + $0xb8] sm:$0x7f] }
 0x78e   :  { %v7064_v54 = vmul.f32 %v7979_v57, %v11274_v58  ;;  %v6939_v63 = vadd.f32 %v6923_v29, %v6887_v45  ;;  %v6940_v6 = vadd.f32 %v6923_v29, %v6888_v38  ;;  %v6941_v24 = vadd.f32 %v6924_v50, %v6889_v13 }
 0x78f   :  { %v6942_v36 = vadd.f32 %v6924_v50, %v6890_v34  ;;  %v7027_v42 = vrot.slane %v7011_v26, 5  ;;  %v7028_v49 = vrot.slane %v7012_v27, 5  ;;  %v7079_v48 = vrot.slane %v7063_v3, 6  ;;  %v11356_v50 = vld [vmem:[%s12633_s6 + $0x1] ss:$0 sm:$0xff] }
 0x790   :  { %v7080_v18 = vrot.slane %v7064_v54, 6  ;;  %v6991_v15 = vadd.f32 %v6975_v9, %v6939_v63  ;;  %v6992_v30 = vadd.f32 %v6975_v9, %v6940_v6  ;;  %v6993_v39 = vadd.f32 %v6976_v17, %v6941_v24 }
 0x791   :  { %v6994_v62 = vadd.f32 %v6976_v17, %v6942_v36  ;;  %v4127_v58 = vmul.f32 %v10818_v11, %v4087_v44  ;;  %v4128_v57 = vmul.f32 %v10818_v11, %v11340_v5  ;;  %v4129_v38 = vmul.f32 %v10818_v11, %v11342_v2 }
 0x792   :  { %v4130_v34 = vmul.f32 %v10818_v11, %v11344_v16  ;;  %v7043_v45 = vadd.f32 %v7027_v42, %v6991_v15  ;;  %v7044_v13 = vadd.f32 %v7027_v42, %v6992_v30  ;;  %v7045_v37 = vadd.f32 %v7028_v49, %v6993_v39 }
 0x793   :  { %v7046_v29 = vadd.f32 %v7028_v49, %v6994_v62  ;;  %v4163_v26 = vmul.f32 %v10821_v14, %v4087_v44  ;;  %v4164_v27 = vmul.f32 %v10821_v14, %v11340_v5  ;;  %v4165_v9 = vmul.f32 %v10821_v14, %v11342_v2 }
 0x794   :  { %v4166_v17 = vmul.f32 %v10821_v14, %v11344_v16  ;;  %v7095_v3 = vadd.f32 %v7079_v48, %v7043_v45  ;;  %v7096_v54 = vadd.f32 %v7079_v48, %v7044_v13  ;;  %v7097_v63 = vadd.f32 %v7080_v18, %v7045_v37 }
 0x795   :  { %v7098_v6 = vadd.f32 %v7080_v18, %v7046_v29  ;;  %v4199_v24 = vrot.slane %v4163_v26, 1  ;;  %v4200_v36 = vrot.slane %v4164_v27, 1  ;;  %v4202_v42 = vrot.slane %v4165_v9, 1 }
 0x796   :  { %v4203_v49 = vrot.slane %v4166_v17, 1  ;;  %v7119_v15 = vadd.f32 %v11356_v50, %v7095_v3  ;;  %v7120_v30 = vadd.f32 %v11356_v50, %v7096_v54  ;;  %v7121_v39 = vadd.f32 %v11356_v50, %v7097_v63 }
 0x797   :  { %v7122_v62 = vadd.f32 %v11356_v50, %v7098_v6  ;;  %v4201_v11 = vsel %vm430_vm3, %v4199_v24, %v4200_v36  ;;  %v4236_v45 = vadd.f32 %v4200_v36, %v4128_v57  ;;  %v4255_v9 = vmul.f32 %v10824_v8, %v4087_v44 }
 0x798   :  { %v4204_v14 = vsel %vm430_vm3, %v4202_v42, %v4203_v49  ;;  %v4238_v48 = vadd.f32 %v4203_v49, %v4130_v34  ;;  %v7151_v13 = vcombine.high %v7119_v15, %v7119_v15  ;;  %v7152_v18 = vcombine.high %v7121_v39, %v7121_v39 }
 0x799   :  { %v7161_v37 = vrot.slane %v7120_v30, 5  ;;  %v7165_v29 = vrot.slane %v7122_v62, 5  ;;  %v4235_v26 = vadd.f32 %v4201_v11, %v4127_v58  ;;  %v4237_v27 = vadd.f32 %v4204_v14, %v4129_v38 }
 0x79a   :  { %v4256_v17 = vmul.f32 %v10824_v8, %v11340_v5  ;;  %v7982_v3 = vrot.slane %v7151_v13, 9  ;;  %v7983_v54 = vrot.slane %v7152_v18, 9  ;;  %v4257_v63 = vmul.f32 %v10824_v8, %v11342_v2 }
 0x79b   :  { %v4258_v57 = vmul.f32 %v10824_v8, %v11344_v16  ;;  %v4291_v34 = vrot.slane %v4255_v9, 2  ;;  %v4343_v24 = vmul.f32 %v10827_v59, %v11340_v5  ;;  %v4344_v11 = vmul.f32 %v10827_v59, %v11344_v16 }
 0x79c   :  { %v4292_v6 = vrot.slane %v4256_v17, 2  ;;  %v11384_v14 = vsel %vm9736_vm8, %v7982_v3, %v7161_v37  ;;  %v11388_v44 = vsel %vm9736_vm8, %v7983_v54, %v7165_v29  ;;  %v4294_v58 = vrot.slane %v4257_v63, 2 }
 0x79d   :  { %13249 = vst [vmem:[#allocation87_spill] sm:$0xff] %v11384_v14  ;;  %13250 = vst [vmem:[#allocation70_spill] sm:$0xff] %v11388_v44  ;;  %v4295_v38 = vrot.slane %v4258_v57, 2  ;;  %v7203_v36 = vcombine.low %v11384_v14, %v11388_v44  ;;  %v4359_v15 = vrot.slane %v4343_v24, 3  ;;  %v4360_v13 = vrot.slane %v4344_v11, 3  ;;  %v11405_v57 = vld [vmem:[#allocation2 + $0xc0] sm:$0xff] }
 0x79e   :  { %v4293_v42 = vsel %vm523_vm4, %v4291_v34, %v4292_v6  ;;  %v4328_v49 = vadd.f32 %v4292_v6, %v4236_v45  ;;  %v4395_v29 = vmul.f32 %v10830_v47, %v11340_v5  ;;  %v4396_v54 = vmul.f32 %v10830_v47, %v11344_v16  ;;  %v11407_v34 = vld [vmem:[#allocation2 + $0xc8] sm:$0x7f] }
 0x79f   :  { %v4296_v30 = vsel %vm523_vm4, %v4294_v58, %v4295_v38  ;;  %v4327_v39 = vadd.f32 %v4293_v42, %v4235_v26  ;;  %v4330_v62 = vadd.f32 %v4295_v38, %v4238_v48  ;;  %v7211_v18 = vsel %vm174_vm1, %v7203_v36, 0.0 }
 0x7a0   :  { %v4329_v37 = vadd.f32 %v4296_v30, %v4237_v27  ;;  %v4380_v9 = vadd.f32 %v4359_v15, %v4328_v49  ;;  %7212 = vadd.xlane.f32.xlu0 %v7211_v18  ;;  %v4447_v45 = vmul.f32 %v10833_v41, %v11340_v5  ;;  %v4411_v26 = vrot.slane %v4395_v29, 4 }
 0x7a1   :  { %v4379_v17 = vadd.f32 %v4359_v15, %v4327_v39  ;;  %v4382_v3 = vadd.f32 %v4360_v13, %v4330_v62  ;;  %v4448_v48 = vmul.f32 %v10833_v41, %v11344_v16  ;;  %v4499_v27 = vmul.f32 %v10836_v40, %v11340_v5 }
 0x7a2   :  { %v4381_v63 = vadd.f32 %v4360_v13, %v4329_v37  ;;  %v4412_v6 = vrot.slane %v4396_v54, 4  ;;  %v4463_v24 = vrot.slane %v4447_v45, 5  ;;  %v4500_v11 = vmul.f32 %v10836_v40, %v11344_v16 }
 0x7a3   :  { %v4555_v58 = vmul.f32 %v10839_v25, %v11342_v2  ;;  %v4431_v38 = vadd.f32 %v4411_v26, %v4379_v17  ;;  %v4432_v36 = vadd.f32 %v4411_v26, %v4380_v9  ;;  %v4464_v42 = vrot.slane %v4448_v48, 5 }
 0x7a4   :  { %v4515_v49 = vrot.slane %v4499_v27, 6  ;;  %v4433_v15 = vadd.f32 %v4412_v6, %v4381_v63  ;;  %v4434_v30 = vadd.f32 %v4412_v6, %v4382_v3  ;;  %v4516_v39 = vrot.slane %v4500_v11, 6 }
 0x7a5   :  { %v4556_v5 = vmul.f32 %v10839_v25, %v11344_v16  ;;  %v4483_v62 = vadd.f32 %v4463_v24, %v4431_v38  ;;  %v4484_v13 = vadd.f32 %v4463_v24, %v4432_v36  ;;  %v4557_v18 = vmul.f32 %v10839_v25, %v11405_v57 }
 0x7a6   :  { %v4558_v37 = vmul.f32 %v10839_v25, %v11407_v34  ;;  %v4485_v29 = vadd.f32 %v4464_v42, %v4433_v15  ;;  %v4486_v54 = vadd.f32 %v4464_v42, %v4434_v30  ;;  %v4591_v9 = vmul.f32 %v10894_v52, %v11342_v2 }
 0x7a7   :  { %v4592_v17 = vmul.f32 %v10894_v52, %v11344_v16  ;;  %v4535_v3 = vadd.f32 %v4515_v49, %v4483_v62  ;;  %v4536_v45 = vadd.f32 %v4515_v49, %v4484_v13  ;;  %v4593_v63 = vmul.f32 %v10894_v52, %v11405_v57 }
 0x7a8   :  { %v4594_v26 = vmul.f32 %v10894_v52, %v11407_v34  ;;  %v4537_v48 = vadd.f32 %v4516_v39, %v4485_v29  ;;  %v4538_v27 = vadd.f32 %v4516_v39, %v4486_v54  ;;  %v4627_v6 = vrot.slane %v4591_v9, 1 }
 0x7a9   :  { %v4628_v24 = vrot.slane %v4592_v17, 1  ;;  %v4571_v11 = vadd.f32 %v4555_v58, %v4535_v3  ;;  %v4572_v38 = vadd.f32 %v4556_v5, %v4536_v45  ;;  %v4630_v36 = vrot.slane %v4593_v63, 1 }
 0x7aa   :  { %v4631_v42 = vrot.slane %v4594_v26, 1  ;;  %v4573_v15 = vadd.f32 %v4557_v18, %v4537_v48  ;;  %v4574_v30 = vadd.f32 %v4558_v37, %v4538_v27  ;;  %v4683_v49 = vmul.f32 %v10898_v60, %v11342_v2 }
 0x7ab   :  { %v4629_v44 = vsel %vm430_vm3, %v4627_v6, %v4628_v24  ;;  %v4664_v14 = vadd.f32 %v4628_v24, %v4572_v38  ;;  %v4684_v39 = vmul.f32 %v10898_v60, %v11344_v16  ;;  %v4685_v58 = vmul.f32 %v10898_v60, %v11405_v57 }
 0x7ac   :  { %v4632_v62 = vsel %vm430_vm3, %v4630_v36, %v4631_v42  ;;  %v4663_v13 = vadd.f32 %v4629_v44, %v4571_v11  ;;  %v4666_v54 = vadd.f32 %v4631_v42, %v4574_v30  ;;  %v4686_v5 = vmul.f32 %v10898_v60, %v11407_v34 }
 0x7ad   :  { %v4665_v29 = vadd.f32 %v4632_v62, %v4573_v15  ;;  %v4719_v18 = vrot.slane %v4683_v49, 2  ;;  %v4720_v37 = vrot.slane %v4684_v39, 2  ;;  %v4771_v2 = vmul.f32 %v10902_v56, %v11344_v16 }
 0x7ae   :  { %v4772_v44 = vmul.f32 %v10902_v56, %v11407_v34  ;;  %v4722_v9 = vrot.slane %v4685_v58, 2  ;;  %v4723_v17 = vrot.slane %v4686_v5, 2  ;;  %v4823_v3 = vmul.f32 %v10906_v12, %v11344_v16  ;;  %v11453_v58 = vld [vmem:[#allocation2 + $0xd0] sm:$0xff] }
 0x7af   :  { %v4824_v45 = vmul.f32 %v10906_v12, %v11407_v34  ;;  %v4721_v63 = vsel %vm523_vm4, %v4719_v18, %v4720_v37  ;;  %v4756_v26 = vadd.f32 %v4720_v37, %v4664_v14  ;;  %v4787_v48 = vrot.slane %v4771_v2, 3  ;;  %v11457_v18 = vld [vmem:[#allocation2 + $0xd8] sm:$0x7f] }
 0x7b0   :  { %v4788_v27 = vrot.slane %v4772_v44, 3  ;;  %v4724_v6 = vsel %vm523_vm4, %v4722_v9, %v4723_v17  ;;  %v4755_v24 = vadd.f32 %v4721_v63, %v4663_v13  ;;  %v4758_v11 = vadd.f32 %v4723_v17, %v4666_v54 }
 0x7b1   :  { %v4839_v38 = vrot.slane %v4823_v3, 4  ;;  %v4757_v36 = vadd.f32 %v4724_v6, %v4665_v29  ;;  %v4808_v42 = vadd.f32 %v4787_v48, %v4756_v26  ;;  %v4840_v15 = vrot.slane %v4824_v45, 4 }
 0x7b2   :  { %v4875_v30 = vmul.f32 %v10938_v23, %v11344_v16  ;;  %v4807_v49 = vadd.f32 %v4787_v48, %v4755_v24  ;;  %v4810_v62 = vadd.f32 %v4788_v27, %v4758_v11  ;;  %v4876_v39 = vmul.f32 %v10938_v23, %v11407_v34 }
 0x7b3   :  { %v4927_v14 = vmul.f32 %v10942_v4, %v11344_v16  ;;  %v4809_v5 = vadd.f32 %v4788_v27, %v4757_v36  ;;  %v4860_v13 = vadd.f32 %v4839_v38, %v4808_v42  ;;  %v4928_v29 = vmul.f32 %v10942_v4, %v11407_v34 }
 0x7b4   :  { %v4891_v54 = vrot.slane %v4875_v30, 5  ;;  %v4859_v37 = vadd.f32 %v4839_v38, %v4807_v49  ;;  %v4862_v2 = vadd.f32 %v4840_v15, %v4810_v62  ;;  %v4892_v44 = vrot.slane %v4876_v39, 5 }
 0x7b5   :  { %v4943_v9 = vrot.slane %v4927_v14, 6  ;;  %v4861_v17 = vadd.f32 %v4840_v15, %v4809_v5  ;;  %v4944_v45 = vrot.slane %v4928_v29, 6  ;;  %v4983_v16 = vmul.f32 %v10946_v7, %v11405_v57 }
 0x7b6   :  { %v4912_v3 = vadd.f32 %v4891_v54, %v4860_v13  ;;  %v4911_v63 = vadd.f32 %v4891_v54, %v4859_v37  ;;  %v4914_v26 = vadd.f32 %v4892_v44, %v4862_v2  ;;  %v4984_v48 = vmul.f32 %v10946_v7, %v11407_v34 }
 0x7b7   :  { %v4985_v27 = vmul.f32 %v10946_v7, %v11453_v58  ;;  %v4913_v6 = vadd.f32 %v4892_v44, %v4861_v17  ;;  %v4986_v11 = vmul.f32 %v10946_v7, %v11457_v18  ;;  %v5019_v38 = vmul.f32 %v10950_v0, %v11405_v57 }
 0x7b8   :  { %v4964_v24 = vadd.f32 %v4943_v9, %v4912_v3  ;;  %v4963_v36 = vadd.f32 %v4943_v9, %v4911_v63  ;;  %v4966_v42 = vadd.f32 %v4944_v45, %v4914_v26  ;;  %v5020_v15 = vmul.f32 %v10950_v0, %v11407_v34 }
 0x7b9   :  { %v5021_v30 = vmul.f32 %v10950_v0, %v11453_v58  ;;  %v4965_v49 = vadd.f32 %v4944_v45, %v4913_v6  ;;  %v5022_v39 = vmul.f32 %v10950_v0, %v11457_v18  ;;  %v5055_v14 = vrot.slane %v5019_v38, 1 }
 0x7ba   :  { %v5000_v62 = vadd.f32 %v4984_v48, %v4964_v24  ;;  %v4999_v5 = vadd.f32 %v4983_v16, %v4963_v36  ;;  %v5002_v13 = vadd.f32 %v4986_v11, %v4966_v42  ;;  %v5056_v54 = vrot.slane %v5020_v15, 1 }
 0x7bb   :  { %v5058_v29 = vrot.slane %v5021_v30, 1  ;;  %v5001_v37 = vadd.f32 %v4985_v27, %v4965_v49  ;;  %v5059_v2 = vrot.slane %v5022_v39, 1  ;;  %v5111_v44 = vmul.f32 %v10989_v46, %v11405_v57 }
 0x7bc   :  { %v5112_v9 = vmul.f32 %v10989_v46, %v11407_v34  ;;  %v5057_v17 = vsel %vm430_vm3, %v5055_v14, %v5056_v54  ;;  %v5092_v3 = vadd.f32 %v5056_v54, %v5000_v62  ;;  %v5113_v45 = vmul.f32 %v10989_v46, %v11453_v58 }
 0x7bd   :  { %v5114_v16 = vmul.f32 %v10989_v46, %v11457_v18  ;;  %v5060_v63 = vsel %vm430_vm3, %v5058_v29, %v5059_v2  ;;  %v5091_v26 = vadd.f32 %v5057_v17, %v4999_v5  ;;  %v5094_v48 = vadd.f32 %v5059_v2, %v5002_v13 }
 0x7be   :  { %v5147_v27 = vrot.slane %v5111_v44, 2  ;;  %v5093_v6 = vadd.f32 %v5060_v63, %v5001_v37  ;;  %v5148_v24 = vrot.slane %v5112_v9, 2  ;;  %v5150_v57 = vrot.slane %v5113_v45, 2 }
 0x7bf   :  { %v5151_v11 = vrot.slane %v5114_v16, 2  ;;  %v5199_v38 = vmul.f32 %v10993_v21, %v11407_v34  ;;  %v5200_v36 = vmul.f32 %v10993_v21, %v11457_v18  ;;  %v5251_v42 = vmul.f32 %v11009_v33, %v11407_v34 }
 0x7c0   :  { %v5252_v15 = vmul.f32 %v11009_v33, %v11457_v18  ;;  %v5149_v30 = vsel %vm523_vm4, %v5147_v27, %v5148_v24  ;;  %v5184_v62 = vadd.f32 %v5148_v24, %v5092_v3  ;;  %v5303_v2 = vmul.f32 %v11013_v35, %v11407_v34 }
 0x7c1   :  { %v5152_v49 = vsel %vm523_vm4, %v5150_v57, %v5151_v11  ;;  %v5186_v39 = vadd.f32 %v5151_v11, %v5094_v48  ;;  %v5183_v14 = vadd.f32 %v5149_v30, %v5091_v26  ;;  %v5215_v13 = vrot.slane %v5199_v38, 3  ;;  %v11503_v48 = vld [vmem:[#allocation2 + $0xe8] sm:$0x7f] }
 0x7c2   :  { %v5185_v5 = vadd.f32 %v5152_v49, %v5093_v6  ;;  %v5216_v54 = vrot.slane %v5200_v36, 3  ;;  %v5267_v29 = vrot.slane %v5251_v42, 4  ;;  %v5268_v37 = vrot.slane %v5252_v15, 4  ;;  %v13251_v42 = vld [vmem:[#allocation46_spill] sm:$0xff] }
 0x7c3   :  { %v5304_v44 = vmul.f32 %v11013_v35, %v11457_v18  ;;  %v5235_v9 = vadd.f32 %v5215_v13, %v5183_v14  ;;  %v5236_v17 = vadd.f32 %v5215_v13, %v5184_v62  ;;  %v5319_v63 = vrot.slane %v5303_v2, 5  ;;  %v11509_v49 = vld [vmem:[#allocation2 + $0xe0] sm:$0xff] }
 0x7c4   :  { %v5237_v45 = vadd.f32 %v5216_v54, %v5185_v5  ;;  %v5238_v16 = vadd.f32 %v5216_v54, %v5186_v39  ;;  %v5355_v3 = vmul.f32 %v11027_v19, %v11407_v34  ;;  %v5356_v26 = vmul.f32 %v11027_v19, %v11457_v18  ;;  %v13252_v54 = vld [vmem:[#allocation47_spill] sm:$0xff] }
 0x7c5   :  { %v5320_v27 = vrot.slane %v5304_v44, 5  ;;  %v5287_v6 = vadd.f32 %v5267_v29, %v5235_v9  ;;  %v5288_v24 = vadd.f32 %v5267_v29, %v5236_v17  ;;  %v5411_v15 = vmul.f32 %v13251_v42, %v11453_v58 }
 0x7c6   :  { %v5289_v57 = vadd.f32 %v5268_v37, %v5237_v45  ;;  %v5290_v11 = vadd.f32 %v5268_v37, %v5238_v16  ;;  %v5371_v38 = vrot.slane %v5355_v3, 6  ;;  %v5372_v36 = vrot.slane %v5356_v26, 6 }
 0x7c7   :  { %v5412_v30 = vmul.f32 %v13251_v42, %v11457_v18  ;;  %v5339_v34 = vadd.f32 %v5319_v63, %v5287_v6  ;;  %v5340_v62 = vadd.f32 %v5319_v63, %v5288_v24  ;;  %v5413_v5 = vmul.f32 %v13251_v42, %v11509_v49 }
 0x7c8   :  { %v5341_v39 = vadd.f32 %v5320_v27, %v5289_v57  ;;  %v5342_v14 = vadd.f32 %v5320_v27, %v5290_v11  ;;  %v5414_v13 = vmul.f32 %v13251_v42, %v11503_v48  ;;  %v5447_v29 = vmul.f32 %v13252_v54, %v11453_v58 }
 0x7c9   :  { %v5448_v37 = vmul.f32 %v13252_v54, %v11457_v18  ;;  %v5391_v2 = vadd.f32 %v5371_v38, %v5339_v34  ;;  %v5392_v44 = vadd.f32 %v5371_v38, %v5340_v62  ;;  %v5449_v45 = vmul.f32 %v13252_v54, %v11509_v49  ;;  %v13253_v38 = vld [vmem:[#allocation48_spill] sm:$0xff] }
 0x7ca   :  { %v5393_v9 = vadd.f32 %v5372_v36, %v5341_v39  ;;  %v5394_v17 = vadd.f32 %v5372_v36, %v5342_v14  ;;  %v5450_v16 = vmul.f32 %v13252_v54, %v11503_v48  ;;  %v5483_v63 = vrot.slane %v5447_v29, 1 }
 0x7cb   :  { %v5484_v27 = vrot.slane %v5448_v37, 1  ;;  %v5427_v3 = vadd.f32 %v5411_v15, %v5391_v2  ;;  %v5428_v26 = vadd.f32 %v5412_v30, %v5392_v44  ;;  %v5486_v11 = vrot.slane %v5449_v45, 1  ;;  %v13255_v45 = vld [vmem:[#allocation50_spill] sm:$0xff] }
 0x7cc   :  { %v5429_v6 = vadd.f32 %v5413_v5, %v5393_v9  ;;  %v5430_v24 = vadd.f32 %v5414_v13, %v5394_v17  ;;  %v5487_v42 = vrot.slane %v5450_v16, 1  ;;  %v5539_v34 = vmul.f32 %v13253_v38, %v11453_v58  ;;  %v13254_v58 = vld [vmem:[#allocation49_spill] sm:$0xff] }
 0x7cd   :  { %v5485_v57 = vsel %vm430_vm3, %v5483_v63, %v5484_v27  ;;  %v5520_v62 = vadd.f32 %v5484_v27, %v5428_v26  ;;  %v5540_v39 = vmul.f32 %v13253_v38, %v11457_v18  ;;  %v5541_v14 = vmul.f32 %v13253_v38, %v11509_v49  ;;  %v13256_v26 = vld [vmem:[#allocation51_spill] sm:$0xff] }
 0x7ce   :  { %v5519_v36 = vadd.f32 %v5485_v57, %v5427_v3  ;;  %v5488_v15 = vsel %vm430_vm3, %v5486_v11, %v5487_v42  ;;  %v5522_v30 = vadd.f32 %v5487_v42, %v5430_v24  ;;  %v5542_v5 = vmul.f32 %v13253_v38, %v11503_v48 }
 0x7cf   :  { %v5575_v13 = vrot.slane %v5539_v34, 2  ;;  %v5521_v29 = vadd.f32 %v5488_v15, %v5429_v6  ;;  %v5576_v37 = vrot.slane %v5540_v39, 2  ;;  %v5578_v2 = vrot.slane %v5541_v14, 2 }
 0x7d0   :  { %v5627_v44 = vmul.f32 %v13254_v58, %v11457_v18  ;;  %v5579_v9 = vrot.slane %v5542_v5, 2  ;;  %v5628_v17 = vmul.f32 %v13254_v58, %v11503_v48  ;;  %v5679_v16 = vmul.f32 %v13255_v45, %v11457_v18 }
 0x7d1   :  { %v5680_v42 = vmul.f32 %v13255_v45, %v11503_v48  ;;  %v5577_v63 = vsel %vm523_vm4, %v5575_v13, %v5576_v37  ;;  %v5612_v27 = vadd.f32 %v5576_v37, %v5520_v62  ;;  %v5731_v6 = vmul.f32 %v13256_v26, %v11457_v18 }
 0x7d2   :  { %v5643_v3 = vrot.slane %v5627_v44, 3  ;;  %v5580_v24 = vsel %vm523_vm4, %v5578_v2, %v5579_v9  ;;  %v5611_v57 = vadd.f32 %v5577_v63, %v5519_v36  ;;  %v5614_v11 = vadd.f32 %v5579_v9, %v5522_v30  ;;  %v13257_v44 = vld [vmem:[#allocation54_spill] sm:$0xff]  ;;  %v11551_v30 = vld [vmem:[#allocation2 + $0xf8] sm:$0x7f] }
 0x7d3   :  { %v5644_v34 = vrot.slane %v5628_v17, 3  ;;  %v5613_v39 = vadd.f32 %v5580_v24, %v5521_v29  ;;  %v5695_v15 = vrot.slane %v5679_v16, 4  ;;  %v5696_v5 = vrot.slane %v5680_v42, 4  ;;  %v13258_v17 = vld [vmem:[#allocation55_spill] sm:$0xff] }
 0x7d4   :  { %v5664_v14 = vadd.f32 %v5643_v3, %v5612_v27  ;;  %v5663_v58 = vadd.f32 %v5643_v3, %v5611_v57  ;;  %v5732_v45 = vmul.f32 %v13256_v26, %v11503_v48  ;;  %v5747_v13 = vrot.slane %v5731_v6, 5  ;;  %v11555_v42 = vld [vmem:[#allocation2 + $0xf0] sm:$0xff] }
 0x7d5   :  { %v5666_v38 = vadd.f32 %v5644_v34, %v5614_v11  ;;  %v5665_v62 = vadd.f32 %v5644_v34, %v5613_v39  ;;  %v5783_v54 = vmul.f32 %v13257_v44, %v11457_v18  ;;  %v5784_v36 = vmul.f32 %v13257_v44, %v11503_v48  ;;  %v13259_v34 = vld [vmem:[#allocation57_spill] sm:$0xff] }
 0x7d6   :  { %v5716_v37 = vadd.f32 %v5695_v15, %v5664_v14  ;;  %v5715_v29 = vadd.f32 %v5695_v15, %v5663_v58  ;;  %v5748_v9 = vrot.slane %v5732_v45, 5  ;;  %v5839_v16 = vmul.f32 %v13258_v17, %v11509_v49 }
 0x7d7   :  { %v5718_v2 = vadd.f32 %v5696_v5, %v5666_v38  ;;  %v5717_v63 = vadd.f32 %v5696_v5, %v5665_v62  ;;  %v5799_v3 = vrot.slane %v5783_v54, 6  ;;  %v5800_v6 = vrot.slane %v5784_v36, 6 }
 0x7d8   :  { %v5768_v27 = vadd.f32 %v5747_v13, %v5716_v37  ;;  %v5767_v24 = vadd.f32 %v5747_v13, %v5715_v29  ;;  %v5840_v18 = vmul.f32 %v13258_v17, %v11503_v48  ;;  %v5841_v11 = vmul.f32 %v13258_v17, %v11555_v42 }
 0x7d9   :  { %v5770_v57 = vadd.f32 %v5748_v9, %v5718_v2  ;;  %v5769_v58 = vadd.f32 %v5748_v9, %v5717_v63  ;;  %v5842_v45 = vmul.f32 %v13258_v17, %v11551_v30  ;;  %v5875_v39 = vmul.f32 %v13259_v34, %v11509_v49 }
 0x7da   :  { %v5820_v38 = vadd.f32 %v5799_v3, %v5768_v27  ;;  %v5819_v14 = vadd.f32 %v5799_v3, %v5767_v24  ;;  %v5876_v54 = vmul.f32 %v13259_v34, %v11503_v48  ;;  %v5877_v5 = vmul.f32 %v13259_v34, %v11555_v42  ;;  %v13260_v3 = vld [vmem:[#allocation56_spill] sm:$0xff] }
 0x7db   :  { %v5822_v15 = vadd.f32 %v5800_v6, %v5770_v57  ;;  %v5821_v13 = vadd.f32 %v5800_v6, %v5769_v58  ;;  %v5878_v37 = vmul.f32 %v13259_v34, %v11551_v30  ;;  %v5911_v36 = vrot.slane %v5875_v39, 1 }
 0x7dc   :  { %v5856_v62 = vadd.f32 %v5840_v18, %v5820_v38  ;;  %v5855_v29 = vadd.f32 %v5839_v16, %v5819_v14  ;;  %v5912_v9 = vrot.slane %v5876_v54, 1  ;;  %v5914_v63 = vrot.slane %v5877_v5, 1  ;;  %v13261_v54 = vld [vmem:[#allocation59_spill] sm:$0xff] }
 0x7dd   :  { %v5858_v2 = vadd.f32 %v5842_v45, %v5822_v15  ;;  %v5857_v27 = vadd.f32 %v5841_v11, %v5821_v13  ;;  %v5915_v17 = vrot.slane %v5878_v37, 1  ;;  %v5967_v24 = vmul.f32 %v13260_v3, %v11509_v49 }
 0x7de   :  { %v5968_v57 = vmul.f32 %v13260_v3, %v11503_v48  ;;  %v5913_v44 = vsel %vm430_vm3, %v5911_v36, %v5912_v9  ;;  %v5948_v6 = vadd.f32 %v5912_v9, %v5856_v62  ;;  %v5969_v18 = vmul.f32 %v13260_v3, %v11555_v42  ;;  %v13262_v62 = vld [vmem:[#allocation64_spill] sm:$0xff] }
 0x7df   :  { %v5970_v16 = vmul.f32 %v13260_v3, %v11551_v30  ;;  %v5916_v58 = vsel %vm430_vm3, %v5914_v63, %v5915_v17  ;;  %v5947_v38 = vadd.f32 %v5913_v44, %v5855_v29  ;;  %v5950_v11 = vadd.f32 %v5915_v17, %v5858_v2 }
 0x7e0   :  { %v6003_v45 = vrot.slane %v5967_v24, 2  ;;  %v5949_v39 = vadd.f32 %v5916_v58, %v5857_v27  ;;  %v6004_v14 = vrot.slane %v5968_v57, 2  ;;  %v6006_v49 = vrot.slane %v5969_v18, 2 }
 0x7e1   :  { %v6007_v15 = vrot.slane %v5970_v16, 2  ;;  %v6055_v5 = vmul.f32 %v13261_v54, %v11503_v48  ;;  %v6056_v13 = vmul.f32 %v13261_v54, %v11551_v30  ;;  %v6107_v37 = vmul.f32 %v13262_v62, %v11503_v48  ;;  %v13263_v16 = vld [vmem:[#allocation65_spill] sm:$0xff] }
 0x7e2   :  { %v6108_v36 = vmul.f32 %v13262_v62, %v11551_v30  ;;  %v6005_v44 = vsel %vm523_vm4, %v6003_v45, %v6004_v14  ;;  %v6040_v29 = vadd.f32 %v6004_v14, %v5948_v6  ;;  %v6159_v58 = vmul.f32 %v13263_v16, %v11503_v48  ;;  %v13264_v6 = vld [vmem:[#allocation66_spill] sm:$0xff] }
 0x7e3   :  { %v6008_v17 = vsel %vm523_vm4, %v6006_v49, %v6007_v15  ;;  %v6042_v2 = vadd.f32 %v6007_v15, %v5950_v11  ;;  %v6039_v9 = vadd.f32 %v6005_v44, %v5947_v38  ;;  %v6071_v27 = vrot.slane %v6055_v5, 3  ;;  %v13265_v44 = vld [vmem:[#allocation74_spill] sm:$0xff] }
 0x7e4   :  { %v6041_v63 = vadd.f32 %v6008_v17, %v5949_v39  ;;  %v6072_v24 = vrot.slane %v6056_v13, 3  ;;  %v6123_v57 = vrot.slane %v6107_v37, 4  ;;  %v6124_v18 = vrot.slane %v6108_v36, 4  ;;  %v11599_v39 = vld [vmem:[#allocation2 + $0x108] sm:$0x7f] }
 0x7e5   :  { %v6160_v54 = vmul.f32 %v13263_v16, %v11551_v30  ;;  %v6091_v3 = vadd.f32 %v6071_v27, %v6039_v9  ;;  %v6092_v62 = vadd.f32 %v6071_v27, %v6040_v29  ;;  %v6175_v26 = vrot.slane %v6159_v58, 5  ;;  %v11605_v29 = vld [vmem:[#allocation2 + $0x100] sm:$0xff] }
 0x7e6   :  { %v6093_v34 = vadd.f32 %v6072_v24, %v6041_v63  ;;  %v6094_v45 = vadd.f32 %v6072_v24, %v6042_v2  ;;  %v6211_v38 = vmul.f32 %v13264_v6, %v11503_v48  ;;  %v6212_v11 = vmul.f32 %v13264_v6, %v11551_v30 }
 0x7e7   :  { %v6176_v49 = vrot.slane %v6160_v54, 5  ;;  %v6143_v14 = vadd.f32 %v6123_v57, %v6091_v3  ;;  %v6144_v15 = vadd.f32 %v6123_v57, %v6092_v62  ;;  %v6267_v17 = vmul.f32 %v13265_v44, %v11555_v42 }
 0x7e8   :  { %v6145_v5 = vadd.f32 %v6124_v18, %v6093_v34  ;;  %v6146_v13 = vadd.f32 %v6124_v18, %v6094_v45  ;;  %v6227_v37 = vrot.slane %v6211_v38, 6  ;;  %v6228_v36 = vrot.slane %v6212_v11, 6 }
 0x7e9   :  { %v6268_v54 = vmul.f32 %v13265_v44, %v11551_v30  ;;  %v6195_v48 = vadd.f32 %v6175_v26, %v6143_v14  ;;  %v6196_v2 = vadd.f32 %v6175_v26, %v6144_v15  ;;  %v6269_v3 = vmul.f32 %v13265_v44, %v11605_v29 }
 0x7ea   :  { %v6197_v9 = vadd.f32 %v6176_v49, %v6145_v5  ;;  %v6198_v63 = vadd.f32 %v6176_v49, %v6146_v13  ;;  %v6270_v34 = vmul.f32 %v13265_v44, %v11599_v39  ;;  %v6303_v62 = vmul.f32 %v11189_v53, %v11555_v42 }
 0x7eb   :  { %v6304_v27 = vmul.f32 %v11189_v53, %v11551_v30  ;;  %v6247_v24 = vadd.f32 %v6227_v37, %v6195_v48  ;;  %v6248_v57 = vadd.f32 %v6227_v37, %v6196_v2  ;;  %v6305_v26 = vmul.f32 %v11189_v53, %v11605_v29 }
 0x7ec   :  { %v6249_v18 = vadd.f32 %v6228_v36, %v6197_v9  ;;  %v6250_v58 = vadd.f32 %v6228_v36, %v6198_v63  ;;  %v6306_v45 = vmul.f32 %v11189_v53, %v11599_v39  ;;  %v6339_v49 = vrot.slane %v6303_v62, 1 }
 0x7ed   :  { %v6340_v38 = vrot.slane %v6304_v27, 1  ;;  %v6283_v11 = vadd.f32 %v6267_v17, %v6247_v24  ;;  %v6284_v14 = vadd.f32 %v6268_v54, %v6248_v57  ;;  %v6342_v44 = vrot.slane %v6305_v26, 1 }
 0x7ee   :  { %v6285_v15 = vadd.f32 %v6269_v3, %v6249_v18  ;;  %v6286_v5 = vadd.f32 %v6270_v34, %v6250_v58  ;;  %v6343_v6 = vrot.slane %v6306_v45, 1  ;;  %v6395_v37 = vmul.f32 %v11215_v61, %v11555_v42 }
 0x7ef   :  { %v6341_v13 = vsel %vm430_vm3, %v6339_v49, %v6340_v38  ;;  %v6376_v48 = vadd.f32 %v6340_v38, %v6284_v14  ;;  %v6396_v2 = vmul.f32 %v11215_v61, %v11551_v30  ;;  %v6397_v9 = vmul.f32 %v11215_v61, %v11605_v29 }
 0x7f0   :  { %v6375_v36 = vadd.f32 %v6341_v13, %v6283_v11  ;;  %v6344_v17 = vsel %vm430_vm3, %v6342_v44, %v6343_v6  ;;  %v6378_v54 = vadd.f32 %v6343_v6, %v6286_v5  ;;  %v6398_v63 = vmul.f32 %v11215_v61, %v11599_v39 }
 0x7f1   :  { %v6431_v3 = vrot.slane %v6395_v37, 2  ;;  %v6377_v34 = vadd.f32 %v6344_v17, %v6285_v15  ;;  %v6432_v62 = vrot.slane %v6396_v2, 2  ;;  %v6434_v27 = vrot.slane %v6397_v9, 2 }
 0x7f2   :  { %v6483_v42 = vmul.f32 %v11234_v10, %v11551_v30  ;;  %v6435_v24 = vrot.slane %v6398_v63, 2  ;;  %v6484_v57 = vmul.f32 %v11234_v10, %v11599_v39  ;;  %v6535_v18 = vmul.f32 %v11238_v43, %v11551_v30 }
 0x7f3   :  { %v6536_v6 = vmul.f32 %v11238_v43, %v11599_v39  ;;  %v6433_v44 = vsel %vm523_vm4, %v6431_v3, %v6432_v62  ;;  %v6468_v58 = vadd.f32 %v6432_v62, %v6376_v48  ;;  %v6587_v45 = vmul.f32 %v11242_v51, %v11551_v30  ;;  %v4101_v48 = vld [vmem:[#allocation2 + $0x110] sm:$0xff] }
 0x7f4   :  { %v6499_v26 = vrot.slane %v6483_v42, 3  ;;  %v6436_v49 = vsel %vm523_vm4, %v6434_v27, %v6435_v24  ;;  %v6467_v38 = vadd.f32 %v6433_v44, %v6375_v36  ;;  %v6470_v11 = vadd.f32 %v6435_v24, %v6378_v54  ;;  %v13266_v42 = vld [vmem:[#allocation79_spill] sm:$0xff]  ;;  %v11647_v54 = vld [vmem:[#allocation2 + $0x118] sm:$0x7f] }
 0x7f5   :  { %v6500_v14 = vrot.slane %v6484_v57, 3  ;;  %v6469_v15 = vadd.f32 %v6436_v49, %v6377_v34  ;;  %v6551_v13 = vrot.slane %v6535_v18, 4  ;;  %v6552_v37 = vrot.slane %v6536_v6, 4 }
 0x7f6   :  { %v6520_v5 = vadd.f32 %v6499_v26, %v6468_v58  ;;  %v6519_v2 = vadd.f32 %v6499_v26, %v6467_v38  ;;  %v6588_v17 = vmul.f32 %v11242_v51, %v11599_v39  ;;  %v6603_v63 = vrot.slane %v6587_v45, 5 }
 0x7f7   :  { %v6522_v9 = vadd.f32 %v6500_v14, %v6470_v11  ;;  %v6521_v3 = vadd.f32 %v6500_v14, %v6469_v15  ;;  %v6639_v43 = vmul.f32 %v13266_v42, %v11551_v30  ;;  %v6640_v36 = vmul.f32 %v13266_v42, %v11599_v39 }
 0x7f8   :  { %v6572_v62 = vadd.f32 %v6551_v13, %v6520_v5  ;;  %v6571_v34 = vadd.f32 %v6551_v13, %v6519_v2  ;;  %v6604_v24 = vrot.slane %v6588_v17, 5  ;;  %v6695_v57 = vmul.f32 %v11268_v32, %v11605_v29 }
 0x7f9   :  { %v6574_v27 = vadd.f32 %v6552_v37, %v6522_v9  ;;  %v6573_v18 = vadd.f32 %v6552_v37, %v6521_v3  ;;  %v6655_v44 = vrot.slane %v6639_v43, 6  ;;  %v6656_v58 = vrot.slane %v6640_v36, 6 }
 0x7fa   :  { %v6624_v6 = vadd.f32 %v6603_v63, %v6572_v62  ;;  %v6623_v26 = vadd.f32 %v6603_v63, %v6571_v34  ;;  %v6696_v30 = vmul.f32 %v11268_v32, %v11599_v39  ;;  %v6697_v49 = vmul.f32 %v11268_v32, %v4101_v48 }
 0x7fb   :  { %v6626_v45 = vadd.f32 %v6604_v24, %v6574_v27  ;;  %v6625_v38 = vadd.f32 %v6604_v24, %v6573_v18  ;;  %v6698_v14 = vmul.f32 %v11268_v32, %v11647_v54  ;;  %v6731_v15 = vmul.f32 %v11286_v55, %v11605_v29 }
 0x7fc   :  { %v6676_v11 = vadd.f32 %v6655_v44, %v6624_v6  ;;  %v6675_v5 = vadd.f32 %v6655_v44, %v6623_v26  ;;  %v6732_v43 = vmul.f32 %v11286_v55, %v11599_v39  ;;  %v6733_v37 = vmul.f32 %v11286_v55, %v4101_v48 }
 0x7fd   :  { %v6678_v13 = vadd.f32 %v6656_v58, %v6626_v45  ;;  %v6677_v2 = vadd.f32 %v6656_v58, %v6625_v38  ;;  %v6734_v17 = vmul.f32 %v11286_v55, %v11647_v54  ;;  %v6767_v63 = vrot.slane %v6731_v15, 1 }
 0x7fe   :  { %v6712_v9 = vadd.f32 %v6696_v30, %v6676_v11  ;;  %v6711_v3 = vadd.f32 %v6695_v57, %v6675_v5  ;;  %v6768_v36 = vrot.slane %v6732_v43, 1  ;;  %v6770_v34 = vrot.slane %v6733_v37, 1 }
 0x7ff   :  { %v6714_v62 = vadd.f32 %v6698_v14, %v6678_v13  ;;  %v6713_v27 = vadd.f32 %v6697_v49, %v6677_v2  ;;  %v6771_v24 = vrot.slane %v6734_v17, 1  ;;  %v6823_v18 = vmul.f32 %v11290_v1, %v11605_v29 }
 0x800   :  { %v6824_v6 = vmul.f32 %v11290_v1, %v11599_v39  ;;  %v6769_v44 = vsel %vm430_vm3, %v6767_v63, %v6768_v36  ;;  %v6804_v58 = vadd.f32 %v6768_v36, %v6712_v9  ;;  %v6825_v26 = vmul.f32 %v11290_v1, %v4101_v48 }
 0x801   :  { %v6826_v45 = vmul.f32 %v11290_v1, %v11647_v54  ;;  %v6772_v57 = vsel %vm430_vm3, %v6770_v34, %v6771_v24  ;;  %v6803_v30 = vadd.f32 %v6769_v44, %v6711_v3  ;;  %v6806_v38 = vadd.f32 %v6771_v24, %v6714_v62 }
 0x802   :  { %v6859_v49 = vrot.slane %v6823_v18, 2  ;;  %v6805_v11 = vadd.f32 %v6772_v57, %v6713_v27  ;;  %v6860_v14 = vrot.slane %v6824_v6, 2  ;;  %v6862_v15 = vrot.slane %v6825_v26, 2 }
 0x803   :  { %v6863_v29 = vrot.slane %v6826_v45, 2  ;;  %v6911_v5 = vmul.f32 %v11294_v31, %v11599_v39  ;;  %v6912_v13 = vmul.f32 %v11294_v31, %v11647_v54  ;;  %v6963_v48 = vmul.f32 %v11299_v22, %v11599_v39 }
 0x804   :  { %v6964_v43 = vmul.f32 %v11299_v22, %v11647_v54  ;;  %v6861_v37 = vsel %vm523_vm4, %v6859_v49, %v6860_v14  ;;  %v6896_v9 = vadd.f32 %v6860_v14, %v6804_v58  ;;  %v7015_v24 = vmul.f32 %v11303_v20, %v11599_v39  ;;  %v11689_v58 = vld [vmem:[%s12632_s5 + $0x68] ss:$0 sm:$0xff] }
 0x805   :  { %v6864_v2 = vsel %vm523_vm4, %v6862_v15, %v6863_v29  ;;  %v6898_v17 = vadd.f32 %v6863_v29, %v6806_v38  ;;  %v6895_v63 = vadd.f32 %v6861_v37, %v6803_v30  ;;  %v6927_v62 = vrot.slane %v6911_v5, 3  ;;  %13267 = vst [vmem:[#allocation84_spill] sm:$0xff] %v11689_v58 }
 0x806   :  { %v6897_v3 = vadd.f32 %v6864_v2, %v6805_v11  ;;  %v6928_v36 = vrot.slane %v6912_v13, 3  ;;  %v6979_v34 = vrot.slane %v6963_v48, 4  ;;  %v6980_v27 = vrot.slane %v6964_v43, 4  ;;  %v8411_v48 = vld [vmem:[#allocation2 + $0x20] sm:$0xff]  ;;  %v13268_v43 = vld [vmem:[#allocation44_spill] sm:$0xff] }
 0x807   :  { %v7016_v18 = vmul.f32 %v11303_v20, %v11647_v54  ;;  %v6947_v6 = vadd.f32 %v6927_v62, %v6895_v63  ;;  %v6948_v44 = vadd.f32 %v6927_v62, %v6896_v9  ;;  %v7031_v57 = vrot.slane %v7015_v24, 5  ;;  %v11696_v2 = vld [vmem:[#allocation2 + $0x28] sm:$0x7f]  ;;  %v11700_v62 = vld [vmem:[#allocation2 + $0x30] sm:$0xff] }
 0x808   :  { %v6949_v26 = vadd.f32 %v6928_v36, %v6897_v3  ;;  %v6950_v45 = vadd.f32 %v6928_v36, %v6898_v17  ;;  %v7067_v30 = vmul.f32 %v11689_v58, %v11599_v39  ;;  %v7068_v38 = vmul.f32 %v11689_v58, %v11647_v54  ;;  %v11704_v36 = vld [vmem:[#allocation2 + $0x38] sm:$0x7f] }
 0x809   :  { %v7032_v49 = vrot.slane %v7016_v18, 5  ;;  %v6999_v11 = vadd.f32 %v6979_v34, %v6947_v6  ;;  %v7000_v14 = vadd.f32 %v6979_v34, %v6948_v44  ;;  %v4123_v37 = vmul.f32 %v8411_v48, %v13268_v43 }
 0x80a   :  { %v7001_v15 = vadd.f32 %v6980_v27, %v6949_v26  ;;  %v7002_v29 = vadd.f32 %v6980_v27, %v6950_v45  ;;  %v7083_v5 = vrot.slane %v7067_v30, 6  ;;  %v7084_v13 = vrot.slane %v7068_v38, 6  ;;  %v13269_v27 = vld [vmem:[#allocation45_spill] sm:$0xff] }
 0x80b   :  { %v4124_v9 = vmul.f32 %v11696_v2, %v13268_v43  ;;  %v7051_v17 = vadd.f32 %v7031_v57, %v6999_v11  ;;  %v7052_v63 = vadd.f32 %v7031_v57, %v7000_v14  ;;  %v4125_v54 = vmul.f32 %v11700_v62, %v13268_v43 }
 0x80c   :  { %v7053_v39 = vadd.f32 %v7032_v49, %v7001_v15  ;;  %v7054_v3 = vadd.f32 %v7032_v49, %v7002_v29  ;;  %v4126_v34 = vmul.f32 %v11704_v36, %v13268_v43  ;;  %v4159_v24 = vmul.f32 %v8411_v48, %v13269_v27  ;;  %v11720_v15 = vld [vmem:[%s12633_s6 + $0x1] ss:$0 sm:$0xff] }
 0x80d   :  { %v4160_v18 = vmul.f32 %v11696_v2, %v13269_v27  ;;  %v7103_v6 = vadd.f32 %v7083_v5, %v7051_v17  ;;  %v7104_v44 = vadd.f32 %v7083_v5, %v7052_v63  ;;  %v4161_v57 = vmul.f32 %v11700_v62, %v13269_v27 }
 0x80e   :  { %v7105_v26 = vadd.f32 %v7084_v13, %v7053_v39  ;;  %v7106_v45 = vadd.f32 %v7084_v13, %v7054_v3  ;;  %v4162_v49 = vmul.f32 %v11704_v36, %v13269_v27  ;;  %v4193_v30 = vrot.slane %v4159_v24, 1 }
 0x80f   :  { %v4194_v38 = vrot.slane %v4160_v18, 1  ;;  %v7127_v11 = vadd.f32 %v11356_v50, %v7103_v6  ;;  %v7128_v14 = vadd.f32 %v11356_v50, %v7104_v44  ;;  %v4196_v17 = vrot.slane %v4161_v57, 1 }
 0x810   :  { %v7129_v29 = vadd.f32 %v11720_v15, %v7105_v26  ;;  %v7130_v5 = vadd.f32 %v11720_v15, %v7106_v45  ;;  %v4197_v63 = vrot.slane %v4162_v49, 1  ;;  %v4251_v43 = vmul.f32 %v8411_v48, %v10824_v8 }
 0x811   :  { %v4195_v13 = vsel %vm430_vm3, %v4193_v30, %v4194_v38  ;;  %v4232_v39 = vadd.f32 %v4194_v38, %v4124_v9  ;;  %v7155_v3 = vcombine.high %v7127_v11, %v7127_v11  ;;  %v7177_v18 = vrot.slane %v7128_v14, 5 }
 0x812   :  { %v7156_v24 = vcombine.high %v7129_v29, %v7129_v29  ;;  %v7181_v6 = vrot.slane %v7130_v5, 5  ;;  %v4198_v50 = vsel %vm430_vm3, %v4196_v17, %v4197_v63  ;;  %v4231_v44 = vadd.f32 %v4195_v13, %v4123_v37 }
 0x813   :  { %v4234_v27 = vadd.f32 %v4197_v63, %v4126_v34  ;;  %v7986_v58 = vrot.slane %v7155_v3, 9  ;;  %v4233_v26 = vadd.f32 %v4198_v50, %v4125_v54  ;;  %v4252_v45 = vmul.f32 %v11696_v2, %v10824_v8 }
 0x814   :  { %v7987_v20 = vrot.slane %v7156_v24, 9  ;;  %v4253_v57 = vmul.f32 %v11700_v62, %v10824_v8  ;;  %v4254_v9 = vmul.f32 %v11704_v36, %v10824_v8  ;;  %v4285_v49 = vrot.slane %v4251_v43, 2 }
 0x815   :  { %v4341_v30 = vmul.f32 %v11696_v2, %v10827_v59  ;;  %v11737_v37 = vsel %vm9736_vm8, %v7986_v58, %v7177_v18  ;;  %v4286_v54 = vrot.slane %v4252_v45, 2  ;;  %v4342_v34 = vmul.f32 %v11704_v36, %v10827_v59 }
 0x816   :  { %13270 = vst [vmem:[#allocation82_spill] sm:$0xff] %v11737_v37  ;;  %v11741_v48 = vsel %vm9736_vm8, %v7987_v20, %v7181_v6  ;;  %v4288_v11 = vrot.slane %v4253_v57, 2  ;;  %v4289_v43 = vrot.slane %v4254_v9, 2  ;;  %v4393_v58 = vmul.f32 %v11696_v2, %v10830_v47 }
 0x817   :  { %13271 = vst [vmem:[#allocation71_spill] sm:$0xff] %v11741_v48  ;;  %v7205_v38 = vcombine.low %v11737_v37, %v11741_v48  ;;  %v4357_v14 = vrot.slane %v4341_v30, 3  ;;  %v4287_v29 = vsel %vm523_vm4, %v4285_v49, %v4286_v54  ;;  %v4324_v5 = vadd.f32 %v4286_v54, %v4232_v39 }
 0x818   :  { %v4358_v13 = vrot.slane %v4342_v34, 3  ;;  %v4290_v17 = vsel %vm523_vm4, %v4288_v11, %v4289_v43  ;;  %v4323_v63 = vadd.f32 %v4287_v29, %v4231_v44  ;;  %v4326_v3 = vadd.f32 %v4289_v43, %v4234_v27 }
 0x819   :  { %v7217_v20 = vsel %vm174_vm1, %v7205_v38, 0.0  ;;  %v4325_v24 = vadd.f32 %v4290_v17, %v4233_v26  ;;  %v4376_v18 = vadd.f32 %v4357_v14, %v4324_v5  ;;  %v4394_v6 = vmul.f32 %v11704_v36, %v10830_v47 }
 0x81a   :  { %7218 = vadd.xlane.f32.xlu0 %v7217_v20  ;;  %v4409_v50 = vrot.slane %v4393_v58, 4  ;;  %v4375_v45 = vadd.f32 %v4357_v14, %v4323_v63  ;;  %v4378_v57 = vadd.f32 %v4358_v13, %v4326_v3  ;;  %v4445_v39 = vmul.f32 %v11696_v2, %v10833_v41  ;;  %v11766_v63 = vld [vmem:[#allocation2 + $0x40] sm:$0xff] }
 0x81b   :  { %v4446_v9 = vmul.f32 %v11704_v36, %v10833_v41  ;;  %v4377_v49 = vadd.f32 %v4358_v13, %v4325_v24  ;;  %v4410_v30 = vrot.slane %v4394_v6, 4  ;;  %v4497_v27 = vmul.f32 %v11696_v2, %v10836_v40  ;;  %v11770_v24 = vld [vmem:[#allocation2 + $0x48] sm:$0x7f] }
 0x81c   :  { %v4428_v54 = vadd.f32 %v4409_v50, %v4376_v18  ;;  %v4427_v44 = vadd.f32 %v4409_v50, %v4375_v45  ;;  %v4461_v26 = vrot.slane %v4445_v39, 5  ;;  %v4498_v38 = vmul.f32 %v11704_v36, %v10836_v40 }
 0x81d   :  { %v4462_v34 = vrot.slane %v4446_v9, 5  ;;  %v4429_v11 = vadd.f32 %v4410_v30, %v4377_v49  ;;  %v4430_v43 = vadd.f32 %v4410_v30, %v4378_v57  ;;  %v4513_v14 = vrot.slane %v4497_v27, 6 }
 0x81e   :  { %v4551_v29 = vmul.f32 %v11700_v62, %v10839_v25  ;;  %v4479_v5 = vadd.f32 %v4461_v26, %v4427_v44  ;;  %v4480_v58 = vadd.f32 %v4461_v26, %v4428_v54  ;;  %v4514_v13 = vrot.slane %v4498_v38, 6 }
 0x81f   :  { %v4552_v20 = vmul.f32 %v11704_v36, %v10839_v25  ;;  %v4481_v17 = vadd.f32 %v4462_v34, %v4429_v11  ;;  %v4482_v2 = vadd.f32 %v4462_v34, %v4430_v43  ;;  %v4553_v3 = vmul.f32 %v11766_v63, %v10839_v25 }
 0x820   :  { %v4554_v18 = vmul.f32 %v11770_v24, %v10839_v25  ;;  %v4531_v6 = vadd.f32 %v4513_v14, %v4479_v5  ;;  %v4532_v50 = vadd.f32 %v4513_v14, %v4480_v58  ;;  %v4587_v45 = vmul.f32 %v11700_v62, %v10894_v52 }
 0x821   :  { %v4588_v57 = vmul.f32 %v11704_v36, %v10894_v52  ;;  %v4533_v39 = vadd.f32 %v4514_v13, %v4481_v17  ;;  %v4534_v9 = vadd.f32 %v4514_v13, %v4482_v2  ;;  %v4589_v49 = vmul.f32 %v11766_v63, %v10894_v52 }
 0x822   :  { %v4590_v30 = vmul.f32 %v11770_v24, %v10894_v52  ;;  %v4567_v54 = vadd.f32 %v4551_v29, %v4531_v6  ;;  %v4568_v27 = vadd.f32 %v4552_v20, %v4532_v50  ;;  %v4621_v44 = vrot.slane %v4587_v45, 1 }
 0x823   :  { %v4622_v26 = vrot.slane %v4588_v57, 1  ;;  %v4569_v34 = vadd.f32 %v4553_v3, %v4533_v39  ;;  %v4570_v38 = vadd.f32 %v4554_v18, %v4534_v9  ;;  %v4624_v11 = vrot.slane %v4589_v49, 1 }
 0x824   :  { %v4625_v43 = vrot.slane %v4590_v30, 1  ;;  %v4679_v58 = vmul.f32 %v11700_v62, %v10898_v60  ;;  %v4680_v13 = vmul.f32 %v11704_v36, %v10898_v60  ;;  %v4681_v20 = vmul.f32 %v11766_v63, %v10898_v60 }
 0x825   :  { %v4623_v14 = vsel %vm430_vm3, %v4621_v44, %v4622_v26  ;;  %v4660_v5 = vadd.f32 %v4622_v26, %v4568_v27  ;;  %v4682_v18 = vmul.f32 %v11770_v24, %v10898_v60  ;;  %v4769_v62 = vmul.f32 %v11704_v36, %v10902_v56 }
 0x826   :  { %v4626_v17 = vsel %vm430_vm3, %v4624_v11, %v4625_v43  ;;  %v4659_v2 = vadd.f32 %v4623_v14, %v4567_v54  ;;  %v4662_v29 = vadd.f32 %v4625_v43, %v4570_v38  ;;  %v4713_v6 = vrot.slane %v4679_v58, 2 }
 0x827   :  { %v4661_v3 = vadd.f32 %v4626_v17, %v4569_v34  ;;  %v4714_v50 = vrot.slane %v4680_v13, 2  ;;  %v4716_v45 = vrot.slane %v4681_v20, 2  ;;  %v4770_v57 = vmul.f32 %v11770_v24, %v10902_v56 }
 0x828   :  { %v4821_v39 = vmul.f32 %v11704_v36, %v10906_v12  ;;  %v4717_v49 = vrot.slane %v4682_v18, 2  ;;  %v4822_v54 = vmul.f32 %v11770_v24, %v10906_v12  ;;  %v4785_v44 = vrot.slane %v4769_v62, 3 }
 0x829   :  { %v4715_v9 = vsel %vm523_vm4, %v4713_v6, %v4714_v50  ;;  %v4752_v30 = vadd.f32 %v4714_v50, %v4660_v5  ;;  %v4786_v26 = vrot.slane %v4770_v57, 3  ;;  %v4873_v14 = vmul.f32 %v11704_v36, %v10938_v23 }
 0x82a   :  { %v4751_v27 = vadd.f32 %v4715_v9, %v4659_v2  ;;  %v4837_v34 = vrot.slane %v4821_v39, 4  ;;  %v4718_v38 = vsel %vm523_vm4, %v4716_v45, %v4717_v49  ;;  %v4754_v11 = vadd.f32 %v4717_v49, %v4662_v29 }
 0x82b   :  { %v4838_v43 = vrot.slane %v4822_v54, 4  ;;  %v4753_v58 = vadd.f32 %v4718_v38, %v4661_v3  ;;  %v4804_v17 = vadd.f32 %v4785_v44, %v4752_v30  ;;  %v4874_v5 = vmul.f32 %v11770_v24, %v10938_v23 }
 0x82c   :  { %v4803_v13 = vadd.f32 %v4785_v44, %v4751_v27  ;;  %v4806_v20 = vadd.f32 %v4786_v26, %v4754_v11  ;;  %v4889_v18 = vrot.slane %v4873_v14, 5  ;;  %v4925_v2 = vmul.f32 %v11704_v36, %v10942_v4  ;;  %v11814_v44 = vld [vmem:[#allocation2 + $0x50] sm:$0xff] }
 0x82d   :  { %v4926_v6 = vmul.f32 %v11770_v24, %v10942_v4  ;;  %v4805_v50 = vadd.f32 %v4786_v26, %v4753_v58  ;;  %v4856_v45 = vadd.f32 %v4837_v34, %v4804_v17  ;;  %v4890_v62 = vrot.slane %v4874_v5, 5 }
 0x82e   :  { %v4855_v29 = vadd.f32 %v4837_v34, %v4803_v13  ;;  %v4858_v57 = vadd.f32 %v4838_v43, %v4806_v20  ;;  %v4941_v39 = vrot.slane %v4925_v2, 6  ;;  %v4979_v9 = vmul.f32 %v11766_v63, %v10946_v7  ;;  %v11818_v34 = vld [vmem:[#allocation2 + $0x58] sm:$0x7f] }
 0x82f   :  { %v4942_v3 = vrot.slane %v4926_v6, 6  ;;  %v4857_v49 = vadd.f32 %v4838_v43, %v4805_v50  ;;  %v4908_v54 = vadd.f32 %v4889_v18, %v4856_v45  ;;  %v4980_v27 = vmul.f32 %v11770_v24, %v10946_v7 }
 0x830   :  { %v4907_v30 = vadd.f32 %v4889_v18, %v4855_v29  ;;  %v4910_v36 = vadd.f32 %v4890_v62, %v4858_v57  ;;  %v4981_v26 = vmul.f32 %v11814_v44, %v10946_v7  ;;  %v4982_v38 = vmul.f32 %v11818_v34, %v10946_v7 }
 0x831   :  { %v5015_v11 = vmul.f32 %v11766_v63, %v10950_v0  ;;  %v4909_v43 = vadd.f32 %v4890_v62, %v4857_v49  ;;  %v4960_v58 = vadd.f32 %v4941_v39, %v4908_v54  ;;  %v5016_v13 = vmul.f32 %v11770_v24, %v10950_v0 }
 0x832   :  { %v4959_v14 = vadd.f32 %v4941_v39, %v4907_v30  ;;  %v4962_v17 = vadd.f32 %v4942_v3, %v4910_v36  ;;  %v5017_v5 = vmul.f32 %v11814_v44, %v10950_v0  ;;  %v5018_v20 = vmul.f32 %v11818_v34, %v10950_v0 }
 0x833   :  { %v5049_v18 = vrot.slane %v5015_v11, 1  ;;  %v4961_v2 = vadd.f32 %v4942_v3, %v4909_v43  ;;  %v4996_v50 = vadd.f32 %v4980_v27, %v4960_v58  ;;  %v5050_v29 = vrot.slane %v5016_v13, 1 }
 0x834   :  { %v4995_v6 = vadd.f32 %v4979_v9, %v4959_v14  ;;  %v4998_v45 = vadd.f32 %v4982_v38, %v4962_v17  ;;  %v5052_v57 = vrot.slane %v5017_v5, 1  ;;  %v5053_v62 = vrot.slane %v5018_v20, 1 }
 0x835   :  { %v5107_v39 = vmul.f32 %v11766_v63, %v10989_v46  ;;  %v4997_v49 = vadd.f32 %v4981_v26, %v4961_v2  ;;  %v5051_v30 = vsel %vm430_vm3, %v5049_v18, %v5050_v29  ;;  %v5088_v54 = vadd.f32 %v5050_v29, %v4996_v50 }
 0x836   :  { %v5108_v36 = vmul.f32 %v11770_v24, %v10989_v46  ;;  %v5054_v48 = vsel %vm430_vm3, %v5052_v57, %v5053_v62  ;;  %v5087_v11 = vadd.f32 %v5051_v30, %v4995_v6  ;;  %v5090_v3 = vadd.f32 %v5053_v62, %v4998_v45 }
 0x837   :  { %v5109_v9 = vmul.f32 %v11814_v44, %v10989_v46  ;;  %v5089_v27 = vadd.f32 %v5054_v48, %v4997_v49  ;;  %v5110_v38 = vmul.f32 %v11818_v34, %v10989_v46  ;;  %v5141_v43 = vrot.slane %v5107_v39, 2 }
 0x838   :  { %v5142_v63 = vrot.slane %v5108_v36, 2  ;;  %v5197_v14 = vmul.f32 %v11770_v24, %v10993_v21  ;;  %v5198_v58 = vmul.f32 %v11818_v34, %v10993_v21  ;;  %v5249_v13 = vmul.f32 %v11770_v24, %v11009_v33 }
 0x839   :  { %v5144_v26 = vrot.slane %v5109_v9, 2  ;;  %v5145_v5 = vrot.slane %v5110_v38, 2  ;;  %v5250_v48 = vmul.f32 %v11818_v34, %v11009_v33  ;;  %v5301_v62 = vmul.f32 %v11770_v24, %v11013_v35 }
 0x83a   :  { %v5143_v17 = vsel %vm523_vm4, %v5141_v43, %v5142_v63  ;;  %v5180_v20 = vadd.f32 %v5142_v63, %v5088_v54  ;;  %v5213_v2 = vrot.slane %v5197_v14, 3  ;;  %v5214_v6 = vrot.slane %v5198_v58, 3 }
 0x83b   :  { %v5179_v18 = vadd.f32 %v5143_v17, %v5087_v11  ;;  %v5265_v50 = vrot.slane %v5249_v13, 4  ;;  %v5146_v29 = vsel %vm523_vm4, %v5144_v26, %v5145_v5  ;;  %v5182_v45 = vadd.f32 %v5145_v5, %v5090_v3  ;;  %v13272_v13 = vld [vmem:[#allocation46_spill] sm:$0xff] }
 0x83c   :  { %v5266_v57 = vrot.slane %v5250_v48, 4  ;;  %v5181_v39 = vadd.f32 %v5146_v29, %v5089_v27  ;;  %v5232_v30 = vadd.f32 %v5213_v2, %v5180_v20  ;;  %v5302_v54 = vmul.f32 %v11818_v34, %v11013_v35 }
 0x83d   :  { %v5231_v49 = vadd.f32 %v5213_v2, %v5179_v18  ;;  %v5234_v36 = vadd.f32 %v5214_v6, %v5182_v45  ;;  %v5317_v9 = vrot.slane %v5301_v62, 5  ;;  %v5353_v11 = vmul.f32 %v11770_v24, %v11027_v19  ;;  %v11862_v2 = vld [vmem:[#allocation2 + $0x60] sm:$0xff]  ;;  %v13273_v45 = vld [vmem:[#allocation47_spill] sm:$0xff] }
 0x83e   :  { %v5354_v38 = vmul.f32 %v11818_v34, %v11027_v19  ;;  %v5233_v43 = vadd.f32 %v5214_v6, %v5181_v39  ;;  %v5284_v63 = vadd.f32 %v5265_v50, %v5232_v30  ;;  %v5318_v26 = vrot.slane %v5302_v54, 5 }
 0x83f   :  { %v5283_v3 = vadd.f32 %v5265_v50, %v5231_v49  ;;  %v5286_v14 = vadd.f32 %v5266_v57, %v5234_v36  ;;  %v5369_v58 = vrot.slane %v5353_v11, 6  ;;  %v5407_v17 = vmul.f32 %v11814_v44, %v13272_v13  ;;  %v11866_v50 = vld [vmem:[#allocation2 + $0x68] sm:$0x7f] }
 0x840   :  { %v5370_v27 = vrot.slane %v5354_v38, 6  ;;  %v5285_v5 = vadd.f32 %v5266_v57, %v5233_v43  ;;  %v5336_v48 = vadd.f32 %v5317_v9, %v5284_v63  ;;  %v5408_v18 = vmul.f32 %v11818_v34, %v13272_v13 }
 0x841   :  { %v5335_v20 = vadd.f32 %v5317_v9, %v5283_v3  ;;  %v5338_v24 = vadd.f32 %v5318_v26, %v5286_v14  ;;  %v5409_v6 = vmul.f32 %v11862_v2, %v13272_v13  ;;  %v5410_v29 = vmul.f32 %v11866_v50, %v13272_v13 }
 0x842   :  { %v5443_v62 = vmul.f32 %v11814_v44, %v13273_v45  ;;  %v5337_v57 = vadd.f32 %v5318_v26, %v5285_v5  ;;  %v5388_v49 = vadd.f32 %v5369_v58, %v5336_v48  ;;  %v5444_v30 = vmul.f32 %v11818_v34, %v13273_v45  ;;  %v13274_v5 = vld [vmem:[#allocation48_spill] sm:$0xff] }
 0x843   :  { %v5387_v39 = vadd.f32 %v5369_v58, %v5335_v20  ;;  %v5390_v54 = vadd.f32 %v5370_v27, %v5338_v24  ;;  %v5445_v36 = vmul.f32 %v11862_v2, %v13273_v45  ;;  %v5446_v9 = vmul.f32 %v11866_v50, %v13273_v45 }
 0x844   :  { %v5477_v11 = vrot.slane %v5443_v62, 1  ;;  %v5389_v38 = vadd.f32 %v5370_v27, %v5337_v57  ;;  %v5424_v3 = vadd.f32 %v5408_v18, %v5388_v49  ;;  %v5478_v63 = vrot.slane %v5444_v30, 1 }
 0x845   :  { %v5423_v43 = vadd.f32 %v5407_v17, %v5387_v39  ;;  %v5426_v14 = vadd.f32 %v5410_v29, %v5390_v54  ;;  %v5480_v37 = vrot.slane %v5445_v36, 1  ;;  %v5481_v26 = vrot.slane %v5446_v9, 1  ;;  %v13275_v39 = vld [vmem:[#allocation49_spill] sm:$0xff]  ;;  %v13276_v54 = vld [vmem:[#allocation50_spill] sm:$0xff] }
 0x846   :  { %v5535_v58 = vmul.f32 %v11814_v44, %v13274_v5  ;;  %v5425_v20 = vadd.f32 %v5409_v6, %v5389_v38  ;;  %v5479_v48 = vsel %vm430_vm3, %v5477_v11, %v5478_v63  ;;  %v5516_v24 = vadd.f32 %v5478_v63, %v5424_v3 }
 0x847   :  { %v5536_v13 = vmul.f32 %v11818_v34, %v13274_v5  ;;  %v5482_v45 = vsel %vm430_vm3, %v5480_v37, %v5481_v26  ;;  %v5515_v62 = vadd.f32 %v5479_v48, %v5423_v43  ;;  %v5518_v27 = vadd.f32 %v5481_v26, %v5426_v14 }
 0x848   :  { %v5537_v17 = vmul.f32 %v11862_v2, %v13274_v5  ;;  %v5517_v18 = vadd.f32 %v5482_v45, %v5425_v20  ;;  %v5538_v29 = vmul.f32 %v11866_v50, %v13274_v5  ;;  %v5569_v57 = vrot.slane %v5535_v58, 2  ;;  %v13277_v58 = vld [vmem:[#allocation51_spill] sm:$0xff] }
 0x849   :  { %v5570_v44 = vrot.slane %v5536_v13, 2  ;;  %v5625_v49 = vmul.f32 %v11818_v34, %v13275_v39  ;;  %v5626_v30 = vmul.f32 %v11866_v50, %v13275_v39  ;;  %v5677_v37 = vmul.f32 %v11818_v34, %v13276_v54 }
 0x84a   :  { %v5572_v6 = vrot.slane %v5537_v17, 2  ;;  %v5573_v9 = vrot.slane %v5538_v29, 2  ;;  %v5678_v45 = vmul.f32 %v11866_v50, %v13276_v54  ;;  %v5729_v20 = vmul.f32 %v11818_v34, %v13277_v58 }
 0x84b   :  { %v5571_v36 = vsel %vm523_vm4, %v5569_v57, %v5570_v44  ;;  %v5608_v11 = vadd.f32 %v5570_v44, %v5516_v24  ;;  %v5641_v43 = vrot.slane %v5625_v49, 3  ;;  %v5642_v13 = vrot.slane %v5626_v30, 3  ;;  %v13278_v44 = vld [vmem:[#allocation54_spill] sm:$0xff] }
 0x84c   :  { %v5607_v38 = vadd.f32 %v5571_v36, %v5515_v62  ;;  %v5693_v3 = vrot.slane %v5677_v37, 4  ;;  %v5574_v63 = vsel %vm523_vm4, %v5572_v6, %v5573_v9  ;;  %v5610_v14 = vadd.f32 %v5573_v9, %v5518_v27 }
 0x84d   :  { %v5694_v26 = vrot.slane %v5678_v45, 4  ;;  %v5609_v48 = vadd.f32 %v5574_v63, %v5517_v18  ;;  %v5660_v39 = vadd.f32 %v5641_v43, %v5608_v11  ;;  %v5730_v24 = vmul.f32 %v11866_v50, %v13277_v58  ;;  %v13279_v45 = vld [vmem:[#allocation55_spill] sm:$0xff] }
 0x84e   :  { %v5659_v17 = vadd.f32 %v5641_v43, %v5607_v38  ;;  %v5662_v29 = vadd.f32 %v5642_v13, %v5610_v14  ;;  %v5745_v57 = vrot.slane %v5729_v20, 5  ;;  %v5781_v62 = vmul.f32 %v11818_v34, %v13278_v44  ;;  %v11910_v20 = vld [vmem:[#allocation2 + $0x70] sm:$0xff] }
 0x84f   :  { %v5782_v49 = vmul.f32 %v11866_v50, %v13278_v44  ;;  %v5661_v6 = vadd.f32 %v5642_v13, %v5609_v48  ;;  %v5712_v30 = vadd.f32 %v5693_v3, %v5660_v39  ;;  %v5746_v37 = vrot.slane %v5730_v24, 5  ;;  %v11914_v39 = vld [vmem:[#allocation2 + $0x78] sm:$0x7f] }
 0x850   :  { %v5711_v27 = vadd.f32 %v5693_v3, %v5659_v17  ;;  %v5714_v36 = vadd.f32 %v5694_v26, %v5662_v29  ;;  %v5797_v9 = vrot.slane %v5781_v62, 6  ;;  %v5835_v11 = vmul.f32 %v11862_v2, %v13279_v45  ;;  %v13280_v48 = vld [vmem:[#allocation57_spill] sm:$0xff] }
 0x851   :  { %v5798_v18 = vrot.slane %v5782_v49, 6  ;;  %v5713_v38 = vadd.f32 %v5694_v26, %v5661_v6  ;;  %v5764_v63 = vadd.f32 %v5745_v57, %v5712_v30  ;;  %v5836_v14 = vmul.f32 %v11866_v50, %v13279_v45 }
 0x852   :  { %v5763_v43 = vadd.f32 %v5745_v57, %v5711_v27  ;;  %v5766_v34 = vadd.f32 %v5746_v37, %v5714_v36  ;;  %v5837_v13 = vmul.f32 %v11910_v20, %v13279_v45  ;;  %v5838_v3 = vmul.f32 %v11914_v39, %v13279_v45 }
 0x853   :  { %v5871_v17 = vmul.f32 %v11862_v2, %v13280_v48  ;;  %v5765_v26 = vadd.f32 %v5746_v37, %v5713_v38  ;;  %v5816_v29 = vadd.f32 %v5797_v9, %v5764_v63  ;;  %v5872_v57 = vmul.f32 %v11866_v50, %v13280_v48  ;;  %v13281_v38 = vld [vmem:[#allocation56_spill] sm:$0xff] }
 0x854   :  { %v5815_v24 = vadd.f32 %v5797_v9, %v5763_v43  ;;  %v5818_v62 = vadd.f32 %v5798_v18, %v5766_v34  ;;  %v5873_v49 = vmul.f32 %v11910_v20, %v13280_v48  ;;  %v5874_v6 = vmul.f32 %v11914_v39, %v13280_v48 }
 0x855   :  { %v5905_v27 = vrot.slane %v5871_v17, 1  ;;  %v5817_v30 = vadd.f32 %v5798_v18, %v5765_v26  ;;  %v5852_v45 = vadd.f32 %v5836_v14, %v5816_v29  ;;  %v5906_v44 = vrot.slane %v5872_v57, 1  ;;  %v13283_v29 = vld [vmem:[#allocation64_spill] sm:$0xff] }
 0x856   :  { %v5851_v36 = vadd.f32 %v5835_v11, %v5815_v24  ;;  %v5854_v58 = vadd.f32 %v5838_v3, %v5818_v62  ;;  %v5908_v54 = vrot.slane %v5873_v49, 1  ;;  %v5909_v37 = vrot.slane %v5874_v6, 1  ;;  %v13282_v24 = vld [vmem:[#allocation59_spill] sm:$0xff] }
 0x857   :  { %v5963_v9 = vmul.f32 %v11862_v2, %v13281_v38  ;;  %v5853_v43 = vadd.f32 %v5837_v13, %v5817_v30  ;;  %v5907_v63 = vsel %vm430_vm3, %v5905_v27, %v5906_v44  ;;  %v5944_v34 = vadd.f32 %v5906_v44, %v5852_v45 }
 0x858   :  { %v5964_v5 = vmul.f32 %v11866_v50, %v13281_v38  ;;  %v5910_v48 = vsel %vm430_vm3, %v5908_v54, %v5909_v37  ;;  %v5943_v17 = vadd.f32 %v5907_v63, %v5851_v36  ;;  %v5946_v18 = vadd.f32 %v5909_v37, %v5854_v58 }
 0x859   :  { %v5965_v11 = vmul.f32 %v11910_v20, %v13281_v38  ;;  %v5945_v14 = vadd.f32 %v5910_v48, %v5853_v43  ;;  %v5966_v3 = vmul.f32 %v11914_v39, %v13281_v38  ;;  %v5997_v26 = vrot.slane %v5963_v9, 2 }
 0x85a   :  { %v5998_v2 = vrot.slane %v5964_v5, 2  ;;  %v6053_v44 = vmul.f32 %v11866_v50, %v13282_v24  ;;  %v6054_v45 = vmul.f32 %v11914_v39, %v13282_v24  ;;  %v6105_v54 = vmul.f32 %v11866_v50, %v13283_v29 }
 0x85b   :  { %v6000_v13 = vrot.slane %v5965_v11, 2  ;;  %v6001_v57 = vrot.slane %v5966_v3, 2  ;;  %v6106_v48 = vmul.f32 %v11914_v39, %v13283_v29  ;;  %v6157_v9 = vmul.f32 %v11866_v50, %v13263_v16 }
 0x85c   :  { %v5999_v58 = vsel %vm523_vm4, %v5997_v26, %v5998_v2  ;;  %v6036_v62 = vadd.f32 %v5998_v2, %v5944_v34  ;;  %v6069_v6 = vrot.slane %v6053_v44, 3  ;;  %v6070_v5 = vrot.slane %v6054_v45, 3  ;;  %v13284_v2 = vld [vmem:[#allocation66_spill] sm:$0xff] }
 0x85d   :  { %v6035_v49 = vadd.f32 %v5999_v58, %v5943_v17  ;;  %v6121_v27 = vrot.slane %v6105_v54, 4  ;;  %v6002_v30 = vsel %vm523_vm4, %v6000_v13, %v6001_v57  ;;  %v6038_v36 = vadd.f32 %v6001_v57, %v5946_v18  ;;  %v11954_v13 = vld [vmem:[#allocation2 + $0x80] sm:$0xff]  ;;  %v11956_v18 = vld [vmem:[#allocation2 + $0x88] sm:$0x7f] }
 0x85e   :  { %v6122_v37 = vrot.slane %v6106_v48, 4  ;;  %v6037_v43 = vadd.f32 %v6002_v30, %v5945_v14  ;;  %v6088_v11 = vadd.f32 %v6069_v6, %v6036_v62  ;;  %v6158_v34 = vmul.f32 %v11914_v39, %v13263_v16 }
 0x85f   :  { %v6087_v63 = vadd.f32 %v6069_v6, %v6035_v49  ;;  %v6090_v3 = vadd.f32 %v6070_v5, %v6038_v36  ;;  %v6173_v26 = vrot.slane %v6157_v9, 5  ;;  %v6209_v17 = vmul.f32 %v11866_v50, %v13284_v2  ;;  %v13285_v49 = vld [vmem:[#allocation74_spill] sm:$0xff] }
 0x860   :  { %v6210_v44 = vmul.f32 %v11914_v39, %v13284_v2  ;;  %v6089_v45 = vadd.f32 %v6070_v5, %v6037_v43  ;;  %v6140_v14 = vadd.f32 %v6121_v27, %v6088_v11  ;;  %v6174_v58 = vrot.slane %v6158_v34, 5 }
 0x861   :  { %v6139_v54 = vadd.f32 %v6121_v27, %v6087_v63  ;;  %v6142_v57 = vadd.f32 %v6122_v37, %v6090_v3  ;;  %v6225_v62 = vrot.slane %v6209_v17, 6  ;;  %v6263_v6 = vmul.f32 %v11910_v20, %v13285_v49 }
 0x862   :  { %v6226_v48 = vrot.slane %v6210_v44, 6  ;;  %v6141_v30 = vadd.f32 %v6122_v37, %v6089_v45  ;;  %v6192_v50 = vadd.f32 %v6173_v26, %v6140_v14  ;;  %v6264_v9 = vmul.f32 %v11914_v39, %v13285_v49 }
 0x863   :  { %v6191_v36 = vadd.f32 %v6173_v26, %v6139_v54  ;;  %v6194_v2 = vadd.f32 %v6174_v58, %v6142_v57  ;;  %v6265_v16 = vmul.f32 %v13285_v49, %v11954_v13  ;;  %v6266_v5 = vmul.f32 %v13285_v49, %v11956_v18 }
 0x864   :  { %v6299_v27 = vmul.f32 %v11910_v20, %v11189_v53  ;;  %v6193_v43 = vadd.f32 %v6174_v58, %v6141_v30  ;;  %v6244_v11 = vadd.f32 %v6225_v62, %v6192_v50  ;;  %v6300_v37 = vmul.f32 %v11914_v39, %v11189_v53 }
 0x865   :  { %v6243_v63 = vadd.f32 %v6225_v62, %v6191_v36  ;;  %v6246_v34 = vadd.f32 %v6226_v48, %v6194_v2  ;;  %v6301_v3 = vmul.f32 %v11189_v53, %v11954_v13  ;;  %v6302_v26 = vmul.f32 %v11189_v53, %v11956_v18 }
 0x866   :  { %v6333_v17 = vrot.slane %v6299_v27, 1  ;;  %v6245_v44 = vadd.f32 %v6226_v48, %v6193_v43  ;;  %v6280_v54 = vadd.f32 %v6264_v9, %v6244_v11  ;;  %v6334_v14 = vrot.slane %v6300_v37, 1  ;;  %v13286_v37 = vld [vmem:[#allocation81_spill] sm:$0xff] }
 0x867   :  { %v6279_v45 = vadd.f32 %v6263_v6, %v6243_v63  ;;  %v6282_v57 = vadd.f32 %v6266_v5, %v6246_v34  ;;  %v6336_v49 = vrot.slane %v6301_v3, 1  ;;  %v6337_v58 = vrot.slane %v6302_v26, 1 }
 0x868   :  { %v6391_v62 = vmul.f32 %v11910_v20, %v11215_v61  ;;  %v6281_v30 = vadd.f32 %v6265_v16, %v6245_v44  ;;  %v6335_v2 = vsel %vm430_vm3, %v6333_v17, %v6334_v14  ;;  %v6372_v36 = vadd.f32 %v6334_v14, %v6280_v54 }
 0x869   :  { %v6392_v50 = vmul.f32 %v11914_v39, %v11215_v61  ;;  %v6338_v53 = vsel %vm430_vm3, %v6336_v49, %v6337_v58  ;;  %v6371_v27 = vadd.f32 %v6335_v2, %v6279_v45  ;;  %v6374_v48 = vadd.f32 %v6337_v58, %v6282_v57 }
 0x86a   :  { %v6393_v6 = vmul.f32 %v11215_v61, %v11954_v13  ;;  %v6373_v9 = vadd.f32 %v6338_v53, %v6281_v30  ;;  %v6394_v5 = vmul.f32 %v11215_v61, %v11956_v18  ;;  %v6425_v43 = vrot.slane %v6391_v62, 2 }
 0x86b   :  { %v6426_v20 = vrot.slane %v6392_v50, 2  ;;  %v6481_v63 = vmul.f32 %v11914_v39, %v11234_v10  ;;  %v6482_v11 = vmul.f32 %v11234_v10, %v11956_v18  ;;  %v6533_v49 = vmul.f32 %v11914_v39, %v13286_v37 }
 0x86c   :  { %v6428_v16 = vrot.slane %v6393_v6, 2  ;;  %v6429_v3 = vrot.slane %v6394_v5, 2  ;;  %v6534_v53 = vmul.f32 %v13286_v37, %v11956_v18  ;;  %v6585_v62 = vmul.f32 %v11914_v39, %v11242_v51 }
 0x86d   :  { %v6427_v34 = vsel %vm523_vm4, %v6425_v43, %v6426_v20  ;;  %v6464_v26 = vadd.f32 %v6426_v20, %v6372_v36  ;;  %v6497_v44 = vrot.slane %v6481_v63, 3  ;;  %v6498_v45 = vrot.slane %v6482_v11, 3  ;;  %v4085_v20 = vld [vmem:[#allocation2 + $0x90] sm:$0xff] }
 0x86e   :  { %v6463_v17 = vadd.f32 %v6427_v34, %v6371_v27  ;;  %v6549_v54 = vrot.slane %v6533_v49, 4  ;;  %v6430_v14 = vsel %vm523_vm4, %v6428_v16, %v6429_v3  ;;  %v6466_v57 = vadd.f32 %v6429_v3, %v6374_v48  ;;  %v12002_v48 = vld [vmem:[#allocation2 + $0x98] sm:$0x7f] }
 0x86f   :  { %v6550_v58 = vrot.slane %v6534_v53, 4  ;;  %v6465_v30 = vadd.f32 %v6430_v14, %v6373_v9  ;;  %v6516_v50 = vadd.f32 %v6497_v44, %v6464_v26  ;;  %v6586_v36 = vmul.f32 %v11242_v51, %v11956_v18 }
 0x870   :  { %v6515_v2 = vadd.f32 %v6497_v44, %v6463_v17  ;;  %v6518_v6 = vadd.f32 %v6498_v45, %v6466_v57  ;;  %v6601_v5 = vrot.slane %v6585_v62, 5  ;;  %v6637_v27 = vmul.f32 %v11914_v39, %v13266_v42 }
 0x871   :  { %v6638_v43 = vmul.f32 %v13266_v42, %v11956_v18  ;;  %v6517_v16 = vadd.f32 %v6498_v45, %v6465_v30  ;;  %v6568_v11 = vadd.f32 %v6549_v54, %v6516_v50  ;;  %v6602_v9 = vrot.slane %v6586_v36, 5 }
 0x872   :  { %v6567_v63 = vadd.f32 %v6549_v54, %v6515_v2  ;;  %v6570_v49 = vadd.f32 %v6550_v58, %v6518_v6  ;;  %v6653_v34 = vrot.slane %v6637_v27, 6  ;;  %v6691_v26 = vmul.f32 %v11268_v32, %v11954_v13 }
 0x873   :  { %v6654_v3 = vrot.slane %v6638_v43, 6  ;;  %v6569_v53 = vadd.f32 %v6550_v58, %v6517_v16  ;;  %v6620_v44 = vadd.f32 %v6601_v5, %v6568_v11  ;;  %v6692_v39 = vmul.f32 %v11268_v32, %v11956_v18 }
 0x874   :  { %v6619_v17 = vadd.f32 %v6601_v5, %v6567_v63  ;;  %v6622_v14 = vadd.f32 %v6602_v9, %v6570_v49  ;;  %v6693_v57 = vmul.f32 %v11268_v32, %v4085_v20  ;;  %v6694_v45 = vmul.f32 %v11268_v32, %v12002_v48 }
 0x875   :  { %v6727_v54 = vmul.f32 %v11286_v55, %v11954_v13  ;;  %v6621_v62 = vadd.f32 %v6602_v9, %v6569_v53  ;;  %v6672_v2 = vadd.f32 %v6653_v34, %v6620_v44  ;;  %v6728_v58 = vmul.f32 %v11286_v55, %v11956_v18 }
 0x876   :  { %v6671_v30 = vadd.f32 %v6653_v34, %v6619_v17  ;;  %v6674_v50 = vadd.f32 %v6654_v3, %v6622_v14  ;;  %v6729_v36 = vmul.f32 %v11286_v55, %v4085_v20  ;;  %v6730_v6 = vmul.f32 %v11286_v55, %v12002_v48 }
 0x877   :  { %v6761_v5 = vrot.slane %v6727_v54, 1  ;;  %v6673_v27 = vadd.f32 %v6654_v3, %v6621_v62  ;;  %v6708_v16 = vadd.f32 %v6692_v39, %v6672_v2  ;;  %v6762_v63 = vrot.slane %v6728_v58, 1 }
 0x878   :  { %v6707_v43 = vadd.f32 %v6691_v26, %v6671_v30  ;;  %v6710_v11 = vadd.f32 %v6694_v45, %v6674_v50  ;;  %v6764_v49 = vrot.slane %v6729_v36, 1  ;;  %v6765_v32 = vrot.slane %v6730_v6, 1 }
 0x879   :  { %v6819_v9 = vmul.f32 %v11290_v1, %v11954_v13  ;;  %v6709_v34 = vadd.f32 %v6693_v57, %v6673_v27  ;;  %v6763_v53 = vsel %vm430_vm3, %v6761_v5, %v6762_v63  ;;  %v6800_v17 = vadd.f32 %v6762_v63, %v6708_v16 }
 0x87a   :  { %v6820_v44 = vmul.f32 %v11290_v1, %v11956_v18  ;;  %v6766_v14 = vsel %vm430_vm3, %v6764_v49, %v6765_v32  ;;  %v6799_v54 = vadd.f32 %v6763_v53, %v6707_v43  ;;  %v6802_v3 = vadd.f32 %v6765_v32, %v6710_v11  ;;  %v13287_v49 = vld [vmem:[#allocation75_spill] sm:$0xff] }
 0x87b   :  { %v6821_v26 = vmul.f32 %v11290_v1, %v4085_v20  ;;  %v6801_v39 = vadd.f32 %v6766_v14, %v6709_v34  ;;  %v6822_v45 = vmul.f32 %v11290_v1, %v12002_v48  ;;  %v6853_v62 = vrot.slane %v6819_v9, 2 }
 0x87c   :  { %v6854_v30 = vrot.slane %v6820_v44, 2  ;;  %v6909_v57 = vmul.f32 %v11294_v31, %v11956_v18  ;;  %v6910_v2 = vmul.f32 %v11294_v31, %v12002_v48  ;;  %v6961_v58 = vmul.f32 %v11299_v22, %v11956_v18 }
 0x87d   :  { %v6856_v13 = vrot.slane %v6821_v26, 2  ;;  %v6857_v50 = vrot.slane %v6822_v45, 2  ;;  %v6962_v36 = vmul.f32 %v11299_v22, %v12002_v48  ;;  %v7013_v9 = vmul.f32 %v13287_v49, %v11956_v18 }
 0x87e   :  { %v6855_v32 = vsel %vm523_vm4, %v6853_v62, %v6854_v30  ;;  %v6892_v20 = vadd.f32 %v6854_v30, %v6800_v17  ;;  %v6925_v5 = vrot.slane %v6909_v57, 3  ;;  %v6926_v27 = vrot.slane %v6910_v2, 3 }
 0x87f   :  { %v6891_v6 = vadd.f32 %v6855_v32, %v6799_v54  ;;  %v6977_v43 = vrot.slane %v6961_v58, 4  ;;  %v6858_v16 = vsel %vm523_vm4, %v6856_v13, %v6857_v50  ;;  %v6894_v63 = vadd.f32 %v6857_v50, %v6802_v3  ;;  %v13288_v54 = vld [vmem:[#allocation84_spill] sm:$0xff]  ;;  %v8424_v32 = vld [vmem:[#allocation2 + $0xc0] sm:$0xff] }
 0x880   :  { %v6978_v11 = vrot.slane %v6962_v36, 4  ;;  %v6893_v34 = vadd.f32 %v6858_v16, %v6801_v39  ;;  %v6944_v44 = vadd.f32 %v6925_v5, %v6892_v20  ;;  %v7014_v17 = vmul.f32 %v13287_v49, %v12002_v48  ;;  %v13289_v50 = vld [vmem:[#allocation44_spill] sm:$0xff]  ;;  %v12046_v16 = vld [vmem:[#allocation2 + $0xc8] sm:$0x7f] }
 0x881   :  { %v6943_v53 = vadd.f32 %v6925_v5, %v6891_v6  ;;  %v6946_v14 = vadd.f32 %v6926_v27, %v6894_v63  ;;  %v7029_v26 = vrot.slane %v7013_v9, 5  ;;  %v7065_v45 = vmul.f32 %v13288_v54, %v11956_v18 }
 0x882   :  { %v7066_v62 = vmul.f32 %v13288_v54, %v12002_v48  ;;  %v6945_v30 = vadd.f32 %v6926_v27, %v6893_v34  ;;  %v6996_v13 = vadd.f32 %v6977_v43, %v6944_v44  ;;  %v7030_v57 = vrot.slane %v7014_v17, 5  ;;  %v12050_v48 = vld [vmem:[#allocation2 + $0xd0] sm:$0xff]  ;;  %v13290_v34 = vld [vmem:[#allocation45_spill] sm:$0xff] }
 0x883   :  { %v6995_v3 = vadd.f32 %v6977_v43, %v6943_v53  ;;  %v6998_v2 = vadd.f32 %v6978_v11, %v6946_v14  ;;  %v7081_v58 = vrot.slane %v7065_v45, 6  ;;  %v4131_v20 = vmul.f32 %v8424_v32, %v13289_v50  ;;  %v12054_v43 = vld [vmem:[#allocation2 + $0xd8] sm:$0x7f] }
 0x884   :  { %v7082_v39 = vrot.slane %v7066_v62, 6  ;;  %v6997_v36 = vadd.f32 %v6978_v11, %v6945_v30  ;;  %v7048_v5 = vadd.f32 %v7029_v26, %v6996_v13  ;;  %v4132_v18 = vmul.f32 %v12046_v16, %v13289_v50 }
 0x885   :  { %v7047_v6 = vadd.f32 %v7029_v26, %v6995_v3  ;;  %v7050_v63 = vadd.f32 %v7030_v57, %v6998_v2  ;;  %v4133_v27 = vmul.f32 %v12050_v48, %v13289_v50  ;;  %v4134_v9 = vmul.f32 %v12054_v43, %v13289_v50 }
 0x886   :  { %v4167_v11 = vmul.f32 %v8424_v32, %v13290_v34  ;;  %v7049_v53 = vadd.f32 %v7030_v57, %v6997_v36  ;;  %v7100_v17 = vadd.f32 %v7081_v58, %v7048_v5  ;;  %v4168_v14 = vmul.f32 %v12046_v16, %v13290_v34 }
 0x887   :  { %v7099_v44 = vadd.f32 %v7081_v58, %v7047_v6  ;;  %v7102_v26 = vadd.f32 %v7082_v39, %v7050_v63  ;;  %v4169_v54 = vmul.f32 %v12050_v48, %v13290_v34  ;;  %v4170_v45 = vmul.f32 %v12054_v43, %v13290_v34 }
 0x888   :  { %v4205_v62 = vrot.slane %v4167_v11, 1  ;;  %v7101_v30 = vadd.f32 %v7082_v39, %v7049_v53  ;;  %v7124_v13 = vadd.f32 %v11720_v15, %v7100_v17  ;;  %v4206_v2 = vrot.slane %v4168_v14, 1 }
 0x889   :  { %v7123_v3 = vadd.f32 %v11720_v15, %v7099_v44  ;;  %v7126_v57 = vadd.f32 %v11720_v15, %v7102_v26  ;;  %v4208_v58 = vrot.slane %v4169_v54, 1  ;;  %v4209_v50 = vrot.slane %v4170_v45, 1 }
 0x88a   :  { %v4259_v36 = vmul.f32 %v8424_v32, %v10824_v8  ;;  %v7125_v6 = vadd.f32 %v11720_v15, %v7101_v30  ;;  %v7169_v63 = vrot.slane %v7124_v13, 5  ;;  %v4207_v49 = vsel %vm430_vm3, %v4205_v62, %v4206_v2 }
 0x88b   :  { %v7153_v5 = vcombine.high %v7123_v3, %v7123_v3  ;;  %v7173_v34 = vrot.slane %v7126_v57, 5  ;;  %v4210_v39 = vsel %vm430_vm3, %v4208_v58, %v4209_v50  ;;  %v4239_v11 = vadd.f32 %v4207_v49, %v4131_v20 }
 0x88c   :  { %v4240_v53 = vadd.f32 %v4206_v2, %v4132_v18  ;;  %v7154_v44 = vcombine.high %v7125_v6, %v7125_v6  ;;  %v4241_v14 = vadd.f32 %v4210_v39, %v4133_v27  ;;  %v4242_v22 = vadd.f32 %v4209_v50, %v4134_v9 }
 0x88d   :  { %v7984_v17 = vrot.slane %v7153_v5, 9  ;;  %v4260_v26 = vmul.f32 %v12046_v16, %v10824_v8  ;;  %v4261_v32 = vmul.f32 %v12050_v48, %v10824_v8  ;;  %v4262_v15 = vmul.f32 %v12054_v43, %v10824_v8 }
 0x88e   :  { %v4297_v54 = vrot.slane %v4259_v36, 2  ;;  %v7985_v49 = vrot.slane %v7154_v44, 9  ;;  %v4345_v20 = vmul.f32 %v12046_v16, %v10827_v59  ;;  %v4346_v18 = vmul.f32 %v12054_v43, %v10827_v59 }
 0x88f   :  { %v12080_v45 = vsel %vm9736_vm8, %v7984_v17, %v7169_v63  ;;  %v4298_v27 = vrot.slane %v4260_v26, 2  ;;  %v4300_v9 = vrot.slane %v4261_v32, 2  ;;  %v4301_v62 = vrot.slane %v4262_v15, 2 }
 0x890   :  { %v4397_v30 = vmul.f32 %v12046_v16, %v10830_v47  ;;  %v12090_v8 = vsel %vm9736_vm8, %v7985_v49, %v7173_v34  ;;  %v4361_v3 = vrot.slane %v4345_v20, 3  ;;  %v4362_v13 = vrot.slane %v4346_v18, 3 }
 0x891   :  { %v4398_v2 = vmul.f32 %v12054_v43, %v10830_v47  ;;  %v7204_v57 = vcombine.low %v12080_v45, %v12090_v8  ;;  %v4299_v59 = vsel %vm523_vm4, %v4297_v54, %v4298_v27  ;;  %v4302_v58 = vsel %vm523_vm4, %v4300_v9, %v4301_v62 }
 0x892   :  { %v4332_v50 = vadd.f32 %v4298_v27, %v4240_v53  ;;  %v4331_v36 = vadd.f32 %v4299_v59, %v4239_v11  ;;  %v4333_v6 = vadd.f32 %v4302_v58, %v4241_v14  ;;  %v4334_v5 = vadd.f32 %v4301_v62, %v4242_v22  ;;  %v12115_v59 = vld [vmem:[#allocation2 + $0xe8] sm:$0x7f] }
 0x893   :  { %v4413_v63 = vrot.slane %v4397_v30, 4  ;;  %v7214_v34 = vsel %vm174_vm1, %v7204_v57, 0.0  ;;  %v4414_v44 = vrot.slane %v4398_v2, 4  ;;  %v4449_v17 = vmul.f32 %v12046_v16, %v10833_v41  ;;  %v12111_v57 = vld [vmem:[#allocation2 + $0xe0] sm:$0xff] }
 0x894   :  { %v4384_v39 = vadd.f32 %v4361_v3, %v4332_v50  ;;  %7215 = vadd.xlane.f32.xlu1 %v7214_v34  ;;  %v4383_v47 = vadd.f32 %v4361_v3, %v4331_v36  ;;  %v4385_v26 = vadd.f32 %v4362_v13, %v4333_v6  ;;  %v4386_v32 = vadd.f32 %v4362_v13, %v4334_v5 }
 0x895   :  { %v4450_v15 = vmul.f32 %v12054_v43, %v10833_v41  ;;  %v4465_v53 = vrot.slane %v4449_v17, 5  ;;  %v4501_v22 = vmul.f32 %v12046_v16, %v10836_v40  ;;  %v4502_v11 = vmul.f32 %v12054_v43, %v10836_v40 }
 0x896   :  { %v4436_v54 = vadd.f32 %v4413_v63, %v4384_v39  ;;  %v4435_v14 = vadd.f32 %v4413_v63, %v4383_v47  ;;  %v4437_v49 = vadd.f32 %v4414_v44, %v4385_v26  ;;  %v4438_v20 = vadd.f32 %v4414_v44, %v4386_v32 }
 0x897   :  { %v4466_v18 = vrot.slane %v4450_v15, 5  ;;  %v4517_v9 = vrot.slane %v4501_v22, 6  ;;  %v4518_v62 = vrot.slane %v4502_v11, 6  ;;  %v4559_v30 = vmul.f32 %v12050_v48, %v10839_v25 }
 0x898   :  { %v4488_v27 = vadd.f32 %v4465_v53, %v4436_v54  ;;  %v4487_v3 = vadd.f32 %v4465_v53, %v4435_v14  ;;  %v4560_v2 = vmul.f32 %v12054_v43, %v10839_v25  ;;  %v4561_v40 = vmul.f32 %v12111_v57, %v10839_v25 }
 0x899   :  { %v4489_v41 = vadd.f32 %v4466_v18, %v4437_v49  ;;  %v4490_v13 = vadd.f32 %v4466_v18, %v4438_v20  ;;  %v4562_v58 = vmul.f32 %v12115_v59, %v10839_v25  ;;  %v4595_v50 = vmul.f32 %v12050_v48, %v10894_v52 }
 0x89a   :  { %v4540_v16 = vadd.f32 %v4517_v9, %v4488_v27  ;;  %v4539_v36 = vadd.f32 %v4517_v9, %v4487_v3  ;;  %v4596_v63 = vmul.f32 %v12054_v43, %v10894_v52  ;;  %v4597_v39 = vmul.f32 %v12111_v57, %v10894_v52 }
 0x89b   :  { %v4541_v6 = vadd.f32 %v4518_v62, %v4489_v41  ;;  %v4542_v5 = vadd.f32 %v4518_v62, %v4490_v13  ;;  %v4598_v44 = vmul.f32 %v12115_v59, %v10894_v52  ;;  %v4633_v17 = vrot.slane %v4595_v50, 1 }
 0x89c   :  { %v4576_v34 = vadd.f32 %v4560_v2, %v4540_v16  ;;  %v4575_v47 = vadd.f32 %v4559_v30, %v4539_v36  ;;  %v4634_v32 = vrot.slane %v4596_v63, 1  ;;  %v4636_v15 = vrot.slane %v4597_v39, 1 }
 0x89d   :  { %v4577_v26 = vadd.f32 %v4561_v40, %v4541_v6  ;;  %v4578_v25 = vadd.f32 %v4562_v58, %v4542_v5  ;;  %v4637_v54 = vrot.slane %v4598_v44, 1  ;;  %v4687_v53 = vmul.f32 %v12050_v48, %v10898_v60 }
 0x89e   :  { %v4688_v22 = vmul.f32 %v12054_v43, %v10898_v60  ;;  %v4635_v11 = vsel %vm430_vm3, %v4633_v17, %v4634_v32  ;;  %v4668_v14 = vadd.f32 %v4634_v32, %v4576_v34  ;;  %v4689_v49 = vmul.f32 %v12111_v57, %v10898_v60 }
 0x89f   :  { %v4690_v52 = vmul.f32 %v12115_v59, %v10898_v60  ;;  %v4638_v20 = vsel %vm430_vm3, %v4636_v15, %v4637_v54  ;;  %v4667_v18 = vadd.f32 %v4635_v11, %v4575_v47  ;;  %v4670_v27 = vadd.f32 %v4637_v54, %v4578_v25 }
 0x8a0   :  { %v4725_v9 = vrot.slane %v4687_v53, 2  ;;  %v4669_v62 = vadd.f32 %v4638_v20, %v4577_v26  ;;  %v4726_v30 = vrot.slane %v4688_v22, 2  ;;  %v4728_v48 = vrot.slane %v4689_v49, 2 }
 0x8a1   :  { %v4729_v3 = vrot.slane %v4690_v52, 2  ;;  %v4773_v41 = vmul.f32 %v12054_v43, %v10902_v56  ;;  %v4774_v13 = vmul.f32 %v12115_v59, %v10902_v56  ;;  %v4825_v2 = vmul.f32 %v12054_v43, %v10906_v12 }
 0x8a2   :  { %v4826_v60 = vmul.f32 %v12115_v59, %v10906_v12  ;;  %v4727_v16 = vsel %vm523_vm4, %v4725_v9, %v4726_v30  ;;  %v4760_v58 = vadd.f32 %v4726_v30, %v4668_v14  ;;  %v4877_v56 = vmul.f32 %v12054_v43, %v10938_v23  ;;  %v12163_v30 = vld [vmem:[#allocation2 + $0xf8] sm:$0x7f] }
 0x8a3   :  { %v4730_v40 = vsel %vm523_vm4, %v4728_v48, %v4729_v3  ;;  %v4762_v50 = vadd.f32 %v4729_v3, %v4670_v27  ;;  %v4759_v36 = vadd.f32 %v4727_v16, %v4667_v18  ;;  %v4789_v5 = vrot.slane %v4773_v41, 3 }
 0x8a4   :  { %v4761_v6 = vadd.f32 %v4730_v40, %v4669_v62  ;;  %v4790_v63 = vrot.slane %v4774_v13, 3  ;;  %v4841_v34 = vrot.slane %v4825_v2, 4  ;;  %v4842_v39 = vrot.slane %v4826_v60, 4 }
 0x8a5   :  { %v4878_v44 = vmul.f32 %v12115_v59, %v10938_v23  ;;  %v4811_v17 = vadd.f32 %v4789_v5, %v4759_v36  ;;  %v4812_v12 = vadd.f32 %v4789_v5, %v4760_v58  ;;  %v4893_v25 = vrot.slane %v4877_v56, 5 }
 0x8a6   :  { %v4813_v47 = vadd.f32 %v4790_v63, %v4761_v6  ;;  %v4814_v26 = vadd.f32 %v4790_v63, %v4762_v50  ;;  %v4929_v15 = vmul.f32 %v12054_v43, %v10942_v4  ;;  %v4930_v54 = vmul.f32 %v12115_v59, %v10942_v4  ;;  %v12159_v43 = vld [vmem:[#allocation2 + $0xf0] sm:$0xff] }
 0x8a7   :  { %v4894_v32 = vrot.slane %v4878_v44, 5  ;;  %v4863_v53 = vadd.f32 %v4841_v34, %v4811_v17  ;;  %v4864_v22 = vadd.f32 %v4841_v34, %v4812_v12  ;;  %v4987_v23 = vmul.f32 %v12111_v57, %v10946_v7 }
 0x8a8   :  { %v4865_v11 = vadd.f32 %v4842_v39, %v4813_v47  ;;  %v4866_v14 = vadd.f32 %v4842_v39, %v4814_v26  ;;  %v4945_v49 = vrot.slane %v4929_v15, 6  ;;  %v4946_v52 = vrot.slane %v4930_v54, 6 }
 0x8a9   :  { %v4988_v20 = vmul.f32 %v12115_v59, %v10946_v7  ;;  %v4915_v18 = vadd.f32 %v4893_v25, %v4863_v53  ;;  %v4916_v27 = vadd.f32 %v4893_v25, %v4864_v22  ;;  %v4989_v4 = vmul.f32 %v12159_v43, %v10946_v7 }
 0x8aa   :  { %v4917_v9 = vadd.f32 %v4894_v32, %v4865_v11  ;;  %v4918_v62 = vadd.f32 %v4894_v32, %v4866_v14  ;;  %v4990_v48 = vmul.f32 %v12163_v30, %v10946_v7  ;;  %v5023_v3 = vmul.f32 %v12111_v57, %v10950_v0 }
 0x8ab   :  { %v5024_v41 = vmul.f32 %v12115_v59, %v10950_v0  ;;  %v4967_v13 = vadd.f32 %v4945_v49, %v4915_v18  ;;  %v4968_v2 = vadd.f32 %v4945_v49, %v4916_v27  ;;  %v5025_v40 = vmul.f32 %v12159_v43, %v10950_v0 }
 0x8ac   :  { %v4969_v60 = vadd.f32 %v4946_v52, %v4917_v9  ;;  %v4970_v16 = vadd.f32 %v4946_v52, %v4918_v62  ;;  %v5026_v58 = vmul.f32 %v12163_v30, %v10950_v0  ;;  %v5061_v50 = vrot.slane %v5023_v3, 1 }
 0x8ad   :  { %v5062_v36 = vrot.slane %v5024_v41, 1  ;;  %v5003_v6 = vadd.f32 %v4987_v23, %v4967_v13  ;;  %v5004_v7 = vadd.f32 %v4988_v20, %v4968_v2  ;;  %v5064_v39 = vrot.slane %v5025_v40, 1 }
 0x8ae   :  { %v5005_v5 = vadd.f32 %v4989_v4, %v4969_v60  ;;  %v5006_v63 = vadd.f32 %v4990_v48, %v4970_v16  ;;  %v5065_v56 = vrot.slane %v5026_v58, 1  ;;  %v5115_v44 = vmul.f32 %v12111_v57, %v10989_v46 }
 0x8af   :  { %v5063_v34 = vsel %vm430_vm3, %v5061_v50, %v5062_v36  ;;  %v5096_v12 = vadd.f32 %v5062_v36, %v5004_v7  ;;  %v5116_v47 = vmul.f32 %v12115_v59, %v10989_v46  ;;  %v5117_v0 = vmul.f32 %v12159_v43, %v10989_v46 }
 0x8b0   :  { %v5095_v17 = vadd.f32 %v5063_v34, %v5003_v6  ;;  %v5066_v26 = vsel %vm430_vm3, %v5064_v39, %v5065_v56  ;;  %v5098_v25 = vadd.f32 %v5065_v56, %v5006_v63  ;;  %v5118_v32 = vmul.f32 %v12163_v30, %v10989_v46 }
 0x8b1   :  { %v5153_v15 = vrot.slane %v5115_v44, 2  ;;  %v5097_v54 = vadd.f32 %v5066_v26, %v5005_v5  ;;  %v5154_v53 = vrot.slane %v5116_v47, 2  ;;  %v5156_v22 = vrot.slane %v5117_v0, 2  ;;  %v13291_v5 = vld [vmem:[#allocation46_spill] sm:$0xff] }
 0x8b2   :  { %v5201_v57 = vmul.f32 %v12115_v59, %v10993_v21  ;;  %v5157_v11 = vrot.slane %v5118_v32, 2  ;;  %v5202_v14 = vmul.f32 %v12163_v30, %v10993_v21  ;;  %v5253_v49 = vmul.f32 %v12115_v59, %v11009_v33  ;;  %v12207_v47 = vld [vmem:[#allocation2 + $0x100] sm:$0xff]  ;;  %v12211_v26 = vld [vmem:[#allocation2 + $0x108] sm:$0x7f] }
 0x8b3   :  { %v5254_v52 = vmul.f32 %v12163_v30, %v11009_v33  ;;  %v5155_v23 = vsel %vm523_vm4, %v5153_v15, %v5154_v53  ;;  %v5188_v46 = vadd.f32 %v5154_v53, %v5096_v12  ;;  %v5305_v18 = vmul.f32 %v12115_v59, %v11013_v35  ;;  %v13292_v32 = vld [vmem:[#allocation47_spill] sm:$0xff] }
 0x8b4   :  { %v5217_v20 = vrot.slane %v5201_v57, 3  ;;  %v5158_v27 = vsel %vm523_vm4, %v5156_v22, %v5157_v11  ;;  %v5187_v9 = vadd.f32 %v5155_v23, %v5095_v17  ;;  %v5190_v62 = vadd.f32 %v5157_v11, %v5098_v25 }
 0x8b5   :  { %v5218_v4 = vrot.slane %v5202_v14, 3  ;;  %v5189_v48 = vadd.f32 %v5158_v27, %v5097_v54  ;;  %v5269_v3 = vrot.slane %v5253_v49, 4  ;;  %v5270_v41 = vrot.slane %v5254_v52, 4 }
 0x8b6   :  { %v5240_v21 = vadd.f32 %v5217_v20, %v5188_v46  ;;  %v5239_v13 = vadd.f32 %v5217_v20, %v5187_v9  ;;  %v5306_v33 = vmul.f32 %v12163_v30, %v11013_v35  ;;  %v5321_v60 = vrot.slane %v5305_v18, 5 }
 0x8b7   :  { %v5242_v2 = vadd.f32 %v5218_v4, %v5190_v62  ;;  %v5241_v16 = vadd.f32 %v5218_v4, %v5189_v48  ;;  %v5357_v58 = vmul.f32 %v12115_v59, %v11027_v19  ;;  %v5358_v50 = vmul.f32 %v12163_v30, %v11027_v19  ;;  %v13293_v62 = vld [vmem:[#allocation48_spill] sm:$0xff] }
 0x8b8   :  { %v5292_v40 = vadd.f32 %v5269_v3, %v5240_v21  ;;  %v5291_v36 = vadd.f32 %v5269_v3, %v5239_v13  ;;  %v5322_v7 = vrot.slane %v5306_v33, 5  ;;  %v5415_v63 = vmul.f32 %v12159_v43, %v13291_v5 }
 0x8b9   :  { %v5294_v6 = vadd.f32 %v5270_v41, %v5242_v2  ;;  %v5293_v34 = vadd.f32 %v5270_v41, %v5241_v16  ;;  %v5373_v56 = vrot.slane %v5357_v58, 6  ;;  %v5374_v44 = vrot.slane %v5358_v50, 6 }
 0x8ba   :  { %v5344_v39 = vadd.f32 %v5321_v60, %v5292_v40  ;;  %v5343_v35 = vadd.f32 %v5321_v60, %v5291_v36  ;;  %v5416_v12 = vmul.f32 %v12163_v30, %v13291_v5  ;;  %v5417_v19 = vmul.f32 %v12207_v47, %v13291_v5  ;;  %v13294_v36 = vld [vmem:[#allocation49_spill] sm:$0xff] }
 0x8bb   :  { %v5346_v17 = vadd.f32 %v5322_v7, %v5294_v6  ;;  %v5345_v59 = vadd.f32 %v5322_v7, %v5293_v34  ;;  %v5418_v25 = vmul.f32 %v12211_v26, %v13291_v5  ;;  %v5451_v15 = vmul.f32 %v12159_v43, %v13292_v32  ;;  %v13295_v5 = vld [vmem:[#allocation50_spill] sm:$0xff] }
 0x8bc   :  { %v5396_v0 = vadd.f32 %v5373_v56, %v5344_v39  ;;  %v5395_v54 = vadd.f32 %v5373_v56, %v5343_v35  ;;  %v5452_v22 = vmul.f32 %v12163_v30, %v13292_v32  ;;  %v5453_v57 = vmul.f32 %v12207_v47, %v13292_v32 }
 0x8bd   :  { %v5398_v53 = vadd.f32 %v5374_v44, %v5346_v17  ;;  %v5397_v11 = vadd.f32 %v5374_v44, %v5345_v59  ;;  %v5454_v49 = vmul.f32 %v12211_v26, %v13292_v32  ;;  %v5489_v52 = vrot.slane %v5451_v15, 1  ;;  %v13296_v32 = vld [vmem:[#allocation51_spill] sm:$0xff] }
 0x8be   :  { %v5432_v14 = vadd.f32 %v5416_v12, %v5396_v0  ;;  %v5431_v23 = vadd.f32 %v5415_v63, %v5395_v54  ;;  %v5490_v20 = vrot.slane %v5452_v22, 1  ;;  %v5492_v18 = vrot.slane %v5453_v57, 1 }
 0x8bf   :  { %v5434_v46 = vadd.f32 %v5418_v25, %v5398_v53  ;;  %v5433_v27 = vadd.f32 %v5417_v19, %v5397_v11  ;;  %v5493_v9 = vrot.slane %v5454_v49, 1  ;;  %v5543_v4 = vmul.f32 %v12159_v43, %v13293_v62 }
 0x8c0   :  { %v5544_v48 = vmul.f32 %v12163_v30, %v13293_v62  ;;  %v5491_v21 = vsel %vm430_vm3, %v5489_v52, %v5490_v20  ;;  %v5524_v3 = vadd.f32 %v5490_v20, %v5432_v14  ;;  %v5545_v41 = vmul.f32 %v12207_v47, %v13293_v62  ;;  %v13297_v52 = vld [vmem:[#allocation54_spill] sm:$0xff] }
 0x8c1   :  { %v5546_v13 = vmul.f32 %v12211_v26, %v13293_v62  ;;  %v5494_v2 = vsel %vm430_vm3, %v5492_v18, %v5493_v9  ;;  %v5523_v33 = vadd.f32 %v5491_v21, %v5431_v23  ;;  %v5526_v60 = vadd.f32 %v5493_v9, %v5434_v46 }
 0x8c2   :  { %v5581_v16 = vrot.slane %v5543_v4, 2  ;;  %v5525_v40 = vadd.f32 %v5494_v2, %v5433_v27  ;;  %v5582_v58 = vrot.slane %v5544_v48, 2  ;;  %v5584_v43 = vrot.slane %v5545_v41, 2  ;;  %v13298_v48 = vld [vmem:[#allocation55_spill] sm:$0xff] }
 0x8c3   :  { %v5585_v50 = vrot.slane %v5546_v13, 2  ;;  %v5629_v6 = vmul.f32 %v12163_v30, %v13294_v36  ;;  %v5630_v7 = vmul.f32 %v12211_v26, %v13294_v36  ;;  %v5681_v63 = vmul.f32 %v12163_v30, %v13295_v5 }
 0x8c4   :  { %v5682_v34 = vmul.f32 %v12211_v26, %v13295_v5  ;;  %v5583_v39 = vsel %vm523_vm4, %v5581_v16, %v5582_v58  ;;  %v5616_v44 = vadd.f32 %v5582_v58, %v5524_v3  ;;  %v5733_v15 = vmul.f32 %v12163_v30, %v13296_v32  ;;  %v12259_v16 = vld [vmem:[#allocation2 + $0x118] sm:$0x7f] }
 0x8c5   :  { %v5586_v56 = vsel %vm523_vm4, %v5584_v43, %v5585_v50  ;;  %v5618_v35 = vadd.f32 %v5585_v50, %v5526_v60  ;;  %v5615_v17 = vadd.f32 %v5583_v39, %v5523_v33  ;;  %v5645_v19 = vrot.slane %v5629_v6, 3  ;;  %v13299_v58 = vld [vmem:[#allocation57_spill] sm:$0xff] }
 0x8c6   :  { %v5617_v12 = vadd.f32 %v5586_v56, %v5525_v40  ;;  %v5646_v59 = vrot.slane %v5630_v7, 3  ;;  %v5697_v0 = vrot.slane %v5681_v63, 4  ;;  %v5698_v25 = vrot.slane %v5682_v34, 4 }
 0x8c7   :  { %v5734_v54 = vmul.f32 %v12211_v26, %v13296_v32  ;;  %v5667_v53 = vadd.f32 %v5645_v19, %v5615_v17  ;;  %v5668_v22 = vadd.f32 %v5645_v19, %v5616_v44  ;;  %v5749_v14 = vrot.slane %v5733_v15, 5 }
 0x8c8   :  { %v5669_v57 = vadd.f32 %v5646_v59, %v5617_v12  ;;  %v5670_v11 = vadd.f32 %v5646_v59, %v5618_v35  ;;  %v5785_v23 = vmul.f32 %v12163_v30, %v13297_v52  ;;  %v5786_v46 = vmul.f32 %v12211_v26, %v13297_v52  ;;  %v12255_v30 = vld [vmem:[#allocation2 + $0x110] sm:$0xff] }
 0x8c9   :  { %v5750_v49 = vrot.slane %v5734_v54, 5  ;;  %v5719_v20 = vadd.f32 %v5697_v0, %v5667_v53  ;;  %v5720_v18 = vadd.f32 %v5697_v0, %v5668_v22  ;;  %v5843_v21 = vmul.f32 %v12207_v47, %v13298_v48 }
 0x8ca   :  { %v5721_v27 = vadd.f32 %v5698_v25, %v5669_v57  ;;  %v5722_v9 = vadd.f32 %v5698_v25, %v5670_v11  ;;  %v5801_v62 = vrot.slane %v5785_v23, 6  ;;  %v5802_v4 = vrot.slane %v5786_v46, 6 }
 0x8cb   :  { %v5844_v3 = vmul.f32 %v12211_v26, %v13298_v48  ;;  %v5771_v41 = vadd.f32 %v5749_v14, %v5719_v20  ;;  %v5772_v13 = vadd.f32 %v5749_v14, %v5720_v18  ;;  %v5845_v60 = vmul.f32 %v12255_v30, %v13298_v48 }
 0x8cc   :  { %v5773_v2 = vadd.f32 %v5750_v49, %v5721_v27  ;;  %v5774_v33 = vadd.f32 %v5750_v49, %v5722_v9  ;;  %v5846_v40 = vmul.f32 %v12259_v16, %v13298_v48  ;;  %v5879_v43 = vmul.f32 %v12207_v47, %v13299_v58 }
 0x8cd   :  { %v5880_v50 = vmul.f32 %v12211_v26, %v13299_v58  ;;  %v5823_v36 = vadd.f32 %v5801_v62, %v5771_v41  ;;  %v5824_v6 = vadd.f32 %v5801_v62, %v5772_v13  ;;  %v5881_v63 = vmul.f32 %v12255_v30, %v13299_v58 }
 0x8ce   :  { %v5825_v7 = vadd.f32 %v5802_v4, %v5773_v2  ;;  %v5826_v5 = vadd.f32 %v5802_v4, %v5774_v33  ;;  %v5882_v34 = vmul.f32 %v12259_v16, %v13299_v58  ;;  %v5917_v39 = vrot.slane %v5879_v43, 1  ;;  %v13300_v4 = vld [vmem:[#allocation65_spill] sm:$0xff] }
 0x8cf   :  { %v5918_v56 = vrot.slane %v5880_v50, 1  ;;  %v5859_v44 = vadd.f32 %v5843_v21, %v5823_v36  ;;  %v5860_v35 = vadd.f32 %v5844_v3, %v5824_v6  ;;  %v5920_v59 = vrot.slane %v5881_v63, 1  ;;  %v12295_v50 = vld [vmem:[#allocation2 + $0x120] sm:$0xff] }
 0x8d0   :  { %v5861_v17 = vadd.f32 %v5845_v60, %v5825_v7  ;;  %v5862_v12 = vadd.f32 %v5846_v40, %v5826_v5  ;;  %v5921_v0 = vrot.slane %v5882_v34, 1  ;;  %v5971_v25 = vmul.f32 %v12207_v47, %v13281_v38  ;;  %v13301_v7 = vld [vmem:[#allocation66_spill] sm:$0xff] }
 0x8d1   :  { %v5919_v19 = vsel %vm430_vm3, %v5917_v39, %v5918_v56  ;;  %v5952_v15 = vadd.f32 %v5918_v56, %v5860_v35  ;;  %v5972_v54 = vmul.f32 %v12211_v26, %v13281_v38  ;;  %v5973_v53 = vmul.f32 %v12255_v30, %v13281_v38  ;;  %v12301_v34 = vld [vmem:[#allocation2 + $0x128] sm:$0x7f] }
 0x8d2   :  { %v5951_v32 = vadd.f32 %v5919_v19, %v5859_v44  ;;  %v5922_v22 = vsel %vm430_vm3, %v5920_v59, %v5921_v0  ;;  %v5954_v57 = vadd.f32 %v5921_v0, %v5862_v12  ;;  %v5974_v11 = vmul.f32 %v12259_v16, %v13281_v38  ;;  %v13302_v35 = vld [vmem:[#allocation74_spill] sm:$0xff] }
 0x8d3   :  { %v6009_v14 = vrot.slane %v5971_v25, 2  ;;  %v5953_v49 = vadd.f32 %v5922_v22, %v5861_v17  ;;  %v6010_v52 = vrot.slane %v5972_v54, 2  ;;  %v6012_v23 = vrot.slane %v5973_v53, 2 }
 0x8d4   :  { %v6057_v47 = vmul.f32 %v12211_v26, %v13282_v24  ;;  %v6013_v46 = vrot.slane %v5974_v11, 2  ;;  %v6058_v20 = vmul.f32 %v12259_v16, %v13282_v24  ;;  %v6109_v18 = vmul.f32 %v12211_v26, %v13283_v29 }
 0x8d5   :  { %v6110_v27 = vmul.f32 %v12259_v16, %v13283_v29  ;;  %v6011_v9 = vsel %vm523_vm4, %v6009_v14, %v6010_v52  ;;  %v6044_v38 = vadd.f32 %v6010_v52, %v5952_v15  ;;  %v6161_v48 = vmul.f32 %v12211_v26, %v13300_v4 }
 0x8d6   :  { %v6073_v62 = vrot.slane %v6057_v47, 3  ;;  %v6014_v21 = vsel %vm523_vm4, %v6012_v23, %v6013_v46  ;;  %v6043_v3 = vadd.f32 %v6011_v9, %v5951_v32  ;;  %v6046_v41 = vadd.f32 %v6013_v46, %v5954_v57  ;;  %v13303_v57 = vld [vmem:[#allocation68_spill] sm:$0xff] }
 0x8d7   :  { %v6074_v13 = vrot.slane %v6058_v20, 3  ;;  %v6045_v2 = vadd.f32 %v6014_v21, %v5953_v49  ;;  %v6125_v33 = vrot.slane %v6109_v18, 4  ;;  %v6126_v60 = vrot.slane %v6110_v27, 4 }
 0x8d8   :  { %v6096_v24 = vadd.f32 %v6073_v62, %v6044_v38  ;;  %v6095_v40 = vadd.f32 %v6073_v62, %v6043_v3  ;;  %v6162_v29 = vmul.f32 %v12259_v16, %v13300_v4  ;;  %v6177_v43 = vrot.slane %v6161_v48, 5 }
 0x8d9   :  { %v6098_v58 = vadd.f32 %v6074_v13, %v6046_v41  ;;  %v6097_v36 = vadd.f32 %v6074_v13, %v6045_v2  ;;  %v6213_v5 = vmul.f32 %v12211_v26, %v13301_v7  ;;  %v6214_v63 = vmul.f32 %v12259_v16, %v13301_v7 }
 0x8da   :  { %v6148_v6 = vadd.f32 %v6125_v33, %v6096_v24  ;;  %v6147_v39 = vadd.f32 %v6125_v33, %v6095_v40  ;;  %v6178_v44 = vrot.slane %v6162_v29, 5  ;;  %v6271_v17 = vmul.f32 %v12255_v30, %v13302_v35 }
 0x8db   :  { %v6150_v56 = vadd.f32 %v6126_v60, %v6098_v58  ;;  %v6149_v12 = vadd.f32 %v6126_v60, %v6097_v36  ;;  %v6229_v59 = vrot.slane %v6213_v5, 6  ;;  %v6230_v0 = vrot.slane %v6214_v63, 6 }
 0x8dc   :  { %v6200_v19 = vadd.f32 %v6177_v43, %v6148_v6  ;;  %v6199_v25 = vadd.f32 %v6177_v43, %v6147_v39  ;;  %v6272_v26 = vmul.f32 %v12259_v16, %v13302_v35  ;;  %v6273_v15 = vmul.f32 %v13302_v35, %v12295_v50 }
 0x8dd   :  { %v6202_v32 = vadd.f32 %v6178_v44, %v6150_v56  ;;  %v6201_v54 = vadd.f32 %v6178_v44, %v6149_v12  ;;  %v6274_v22 = vmul.f32 %v13302_v35, %v12301_v34  ;;  %v6307_v11 = vmul.f32 %v12255_v30, %v13303_v57 }
 0x8de   :  { %v6252_v53 = vadd.f32 %v6229_v59, %v6200_v19  ;;  %v6251_v14 = vadd.f32 %v6229_v59, %v6199_v25  ;;  %v6308_v52 = vmul.f32 %v12259_v16, %v13303_v57  ;;  %v6309_v23 = vmul.f32 %v13303_v57, %v12295_v50 }
 0x8df   :  { %v6254_v49 = vadd.f32 %v6230_v0, %v6202_v32  ;;  %v6253_v47 = vadd.f32 %v6230_v0, %v6201_v54  ;;  %v6310_v20 = vmul.f32 %v13303_v57, %v12301_v34  ;;  %v6345_v18 = vrot.slane %v6307_v11, 1  ;;  %v4105_v11 = vld [vmem:[#allocation2 + $0x130] sm:$0xff] }
 0x8e0   :  { %v6288_v46 = vadd.f32 %v6272_v26, %v6252_v53  ;;  %v6287_v27 = vadd.f32 %v6271_v17, %v6251_v14  ;;  %v6346_v38 = vrot.slane %v6308_v52, 1  ;;  %v6348_v62 = vrot.slane %v6309_v23, 1  ;;  %v12347_v14 = vld [vmem:[#allocation2 + $0x138] sm:$0x7f] }
 0x8e1   :  { %v6290_v9 = vadd.f32 %v6274_v22, %v6254_v49  ;;  %v6289_v4 = vadd.f32 %v6273_v15, %v6253_v47  ;;  %v6349_v48 = vrot.slane %v6310_v20, 1  ;;  %v6399_v21 = vmul.f32 %v12255_v30, %v11215_v61  ;;  %v13304_v20 = vld [vmem:[#allocation77_spill] sm:$0xff] }
 0x8e2   :  { %v6400_v3 = vmul.f32 %v12259_v16, %v11215_v61  ;;  %v6347_v41 = vsel %vm430_vm3, %v6345_v18, %v6346_v38  ;;  %v6380_v13 = vadd.f32 %v6346_v38, %v6288_v46  ;;  %v6401_v2 = vmul.f32 %v11215_v61, %v12295_v50 }
 0x8e3   :  { %v6402_v24 = vmul.f32 %v11215_v61, %v12301_v34  ;;  %v6350_v33 = vsel %vm430_vm3, %v6348_v62, %v6349_v48  ;;  %v6379_v60 = vadd.f32 %v6347_v41, %v6287_v27  ;;  %v6382_v40 = vadd.f32 %v6349_v48, %v6290_v9 }
 0x8e4   :  { %v6437_v58 = vrot.slane %v6399_v21, 2  ;;  %v6381_v29 = vadd.f32 %v6350_v33, %v6289_v4  ;;  %v6438_v43 = vrot.slane %v6400_v3, 2  ;;  %v6440_v30 = vrot.slane %v6401_v2, 2 }
 0x8e5   :  { %v6441_v36 = vrot.slane %v6402_v24, 2  ;;  %v6485_v6 = vmul.f32 %v12259_v16, %v11234_v10  ;;  %v6486_v7 = vmul.f32 %v11234_v10, %v12301_v34  ;;  %v6537_v5 = vmul.f32 %v12259_v16, %v13286_v37 }
 0x8e6   :  { %v6538_v61 = vmul.f32 %v13286_v37, %v12301_v34  ;;  %v6439_v63 = vsel %vm523_vm4, %v6437_v58, %v6438_v43  ;;  %v6472_v56 = vadd.f32 %v6438_v43, %v6380_v13  ;;  %v6589_v10 = vmul.f32 %v12259_v16, %v11242_v51 }
 0x8e7   :  { %v6442_v39 = vsel %vm523_vm4, %v6440_v30, %v6441_v36  ;;  %v6474_v44 = vadd.f32 %v6441_v36, %v6382_v40  ;;  %v6471_v35 = vadd.f32 %v6439_v63, %v6379_v60  ;;  %v6501_v12 = vrot.slane %v6485_v6, 3 }
 0x8e8   :  { %v6473_v17 = vadd.f32 %v6442_v39, %v6381_v29  ;;  %v6502_v19 = vrot.slane %v6486_v7, 3  ;;  %v6553_v59 = vrot.slane %v6537_v5, 4  ;;  %v6554_v0 = vrot.slane %v6538_v61, 4 }
 0x8e9   :  { %v6590_v25 = vmul.f32 %v11242_v51, %v12301_v34  ;;  %v6523_v32 = vadd.f32 %v6501_v12, %v6471_v35  ;;  %v6524_v37 = vadd.f32 %v6501_v12, %v6472_v56  ;;  %v6605_v54 = vrot.slane %v6589_v10, 5 }
 0x8ea   :  { %v6525_v26 = vadd.f32 %v6502_v19, %v6473_v17  ;;  %v6526_v15 = vadd.f32 %v6502_v19, %v6474_v44  ;;  %v6641_v22 = vmul.f32 %v12259_v16, %v13266_v42  ;;  %v6642_v57 = vmul.f32 %v13266_v42, %v12301_v34 }
 0x8eb   :  { %v6606_v53 = vrot.slane %v6590_v25, 5  ;;  %v6575_v49 = vadd.f32 %v6553_v59, %v6523_v32  ;;  %v6576_v52 = vadd.f32 %v6553_v59, %v6524_v37  ;;  %v6699_v18 = vmul.f32 %v13304_v20, %v12295_v50  ;;  %v13305_v25 = vld [vmem:[#allocation80_spill] sm:$0xff] }
 0x8ec   :  { %v6577_v23 = vadd.f32 %v6554_v0, %v6525_v26  ;;  %v6578_v47 = vadd.f32 %v6554_v0, %v6526_v15  ;;  %v6657_v51 = vrot.slane %v6641_v22, 6  ;;  %v6658_v46 = vrot.slane %v6642_v57, 6  ;;  %v7213_v26 = vpop.xlane.xlu0 %7212 }
 0x8ed   :  { %v6700_v27 = vmul.f32 %v13304_v20, %v12301_v34  ;;  %v6627_v9 = vadd.f32 %v6605_v54, %v6575_v49  ;;  %v6628_v16 = vadd.f32 %v6605_v54, %v6576_v52  ;;  %v6701_v42 = vmul.f32 %v13304_v20, %v4105_v11 }
 0x8ee   :  { %v6629_v38 = vadd.f32 %v6606_v53, %v6577_v23  ;;  %v6630_v62 = vadd.f32 %v6606_v53, %v6578_v47  ;;  %v6702_v4 = vmul.f32 %v13304_v20, %v12347_v14  ;;  %v6735_v48 = vmul.f32 %v11286_v55, %v12295_v50  ;;  %v13306_v53 = vld [vmem:[#allocation75_spill] sm:$0xff] }
 0x8ef   :  { %v6736_v21 = vmul.f32 %v11286_v55, %v12301_v34  ;;  %v6679_v3 = vadd.f32 %v6657_v51, %v6627_v9  ;;  %v6680_v41 = vadd.f32 %v6657_v51, %v6628_v16  ;;  %v6737_v24 = vmul.f32 %v11286_v55, %v4105_v11 }
 0x8f0   :  { %v6681_v13 = vadd.f32 %v6658_v46, %v6629_v38  ;;  %v6682_v2 = vadd.f32 %v6658_v46, %v6630_v62  ;;  %v6738_v33 = vmul.f32 %v11286_v55, %v12347_v14  ;;  %v6773_v60 = vrot.slane %v6735_v48, 1  ;;  %v8436_v38 = vld [vmem:[%s12632_s5 + $0x68] ss:$0 sm:$0xff] }
 0x8f1   :  { %v6774_v40 = vrot.slane %v6736_v21, 1  ;;  %v6715_v58 = vadd.f32 %v6699_v18, %v6679_v3  ;;  %v6716_v29 = vadd.f32 %v6700_v27, %v6680_v41  ;;  %v6776_v6 = vrot.slane %v6737_v24, 1  ;;  %v7219_v41 = vpop.xlane.xlu0 %7218 }
 0x8f2   :  { %v6717_v43 = vadd.f32 %v6701_v42, %v6681_v13  ;;  %v6718_v30 = vadd.f32 %v6702_v4, %v6682_v2  ;;  %v6777_v7 = vrot.slane %v6738_v33, 1  ;;  %v6827_v5 = vmul.f32 %v11290_v1, %v12295_v50 }
 0x8f3   :  { %v6775_v36 = vsel %vm430_vm3, %v6773_v60, %v6774_v40  ;;  %v6808_v63 = vadd.f32 %v6774_v40, %v6716_v29  ;;  %v6828_v39 = vmul.f32 %v11290_v1, %v12301_v34  ;;  %v6829_v55 = vmul.f32 %v11290_v1, %v4105_v11 }
 0x8f4   :  { %v6807_v61 = vadd.f32 %v6775_v36, %v6715_v58  ;;  %v6778_v56 = vsel %vm430_vm3, %v6776_v6, %v6777_v7  ;;  %v6810_v44 = vadd.f32 %v6777_v7, %v6718_v30  ;;  %v6830_v35 = vmul.f32 %v11290_v1, %v12347_v14  ;;  %v13307_v58 = vld [vmem:[#allocation41_spill] sm:$0xff] }
 0x8f5   :  { %v6865_v17 = vrot.slane %v6827_v5, 2  ;;  %v6809_v12 = vadd.f32 %v6778_v56, %v6717_v43  ;;  %v6866_v19 = vrot.slane %v6828_v39, 2  ;;  %v6868_v59 = vrot.slane %v6829_v55, 2  ;;  %v13308_v43 = vld [vmem:[#allocation42_spill] sm:$0xff]  ;;  %v13309_v5 = vld [vmem:[#allocation87_spill] sm:$0xff] }
 0x8f6   :  { %v6913_v50 = vmul.f32 %v11294_v31, %v12301_v34  ;;  %v6869_v0 = vrot.slane %v6830_v35, 2  ;;  %v6914_v10 = vmul.f32 %v11294_v31, %v12347_v14  ;;  %v6965_v32 = vmul.f32 %v13305_v25, %v12301_v34  ;;  %v8437_v35 = vld [vmem:[%s12633_s6 + $0x1] ss:$0 sm:$0xff] }
 0x8f7   :  { %v6966_v37 = vmul.f32 %v13305_v25, %v12347_v14  ;;  %v6867_v1 = vsel %vm523_vm4, %v6865_v17, %v6866_v19  ;;  %v6900_v15 = vadd.f32 %v6866_v19, %v6808_v63  ;;  %v7017_v22 = vmul.f32 %v13306_v53, %v12301_v34  ;;  %v13310_v63 = vld [vmem:[#allocation70_spill] sm:$0xff] }
 0x8f8   :  { %v6929_v54 = vrot.slane %v6913_v50, 3  ;;  %v6870_v57 = vsel %vm523_vm4, %v6868_v59, %v6869_v0  ;;  %v6899_v11 = vadd.f32 %v6867_v1, %v6807_v61  ;;  %v6902_v49 = vadd.f32 %v6869_v0, %v6810_v44 }
 0x8f9   :  { %v6930_v52 = vrot.slane %v6914_v10, 3  ;;  %v6901_v31 = vadd.f32 %v6870_v57, %v6809_v12  ;;  %v6981_v47 = vrot.slane %v6965_v32, 4  ;;  %v6982_v51 = vrot.slane %v6966_v37, 4  ;;  %v13311_v10 = vld [vmem:[#allocation82_spill] sm:$0xff]  ;;  %v13312_v32 = vld [vmem:[#allocation71_spill] sm:$0xff] }
 0x8fa   :  { %v6952_v23 = vadd.f32 %v6929_v54, %v6900_v15  ;;  %v6951_v46 = vadd.f32 %v6929_v54, %v6899_v11  ;;  %v7018_v18 = vmul.f32 %v13306_v53, %v12347_v14  ;;  %v7033_v27 = vrot.slane %v7017_v22, 5 }
 0x8fb   :  { %v6954_v20 = vadd.f32 %v6930_v52, %v6902_v49  ;;  %v6953_v9 = vadd.f32 %v6930_v52, %v6901_v31  ;;  %v7069_v62 = vmul.f32 %v8436_v38, %v12301_v34  ;;  %v7070_v42 = vmul.f32 %v8436_v38, %v12347_v14 }
 0x8fc   :  { %v7004_v16 = vadd.f32 %v6981_v47, %v6952_v23  ;;  %v7003_v4 = vadd.f32 %v6981_v47, %v6951_v46  ;;  %v7034_v21 = vrot.slane %v7018_v18, 5  ;;  %v7223_v3 = vmul.f32 0.03125, %v7213_v26 }
 0x8fd   :  { %v7006_v48 = vadd.f32 %v6982_v51, %v6954_v20  ;;  %v7005_v13 = vadd.f32 %v6982_v51, %v6953_v9  ;;  %v7085_v24 = vrot.slane %v7069_v62, 6  ;;  %v7086_v33 = vrot.slane %v7070_v42, 6 }
 0x8fe   :  { %v7056_v2 = vadd.f32 %v7033_v27, %v7004_v16  ;;  %v7055_v60 = vadd.f32 %v7033_v27, %v7003_v4  ;;  %v7237_v29 = vrot.slane %v7223_v3, %v13307_v58  ;;  %v7244_v30 = vrot.slane %v7223_v3, %v13308_v43 }
 0x8ff   :  { %v7058_v40 = vadd.f32 %v7034_v21, %v7006_v48  ;;  %v7057_v36 = vadd.f32 %v7034_v21, %v7005_v13  ;;  %v7225_v34 = vmul.f32 0.03125, %v7219_v41  ;;  %vm7879_vm3 = vcmask 254976  }
 0x900   :  { %v7108_v6 = vadd.f32 %v7085_v24, %v7056_v2  ;;  %v7107_v7 = vadd.f32 %v7085_v24, %v7055_v60  ;;  %v12394_v61 = vsub.f32 %v13309_v5, %v7237_v29  ;;  %v12397_v39 = vsub.f32 %v13310_v63, %v7244_v30  ;;  %v12451_v29 = vld [vmem:[%s12634_s7 + $0x1] ss:$0 sm:$0xff]  ;;  %s8473_s7 = smov [#allocation3]  }
 0x901   :  { %v7110_v14 = vadd.f32 %v7086_v33, %v7058_v40  ;;  %v7109_v55 = vadd.f32 %v7086_v33, %v7057_v36  ;;  %v7265_v56 = vrot.slane %v7225_v34, %v13307_v58  ;;  %v7272_v44 = vrot.slane %v7225_v34, %v13308_v43 }
 0x902   :  { %v7131_v17 = vadd.f32 %v8437_v35, %v7107_v7  ;;  %v7132_v12 = vadd.f32 %v8437_v35, %v7108_v6  ;;  %v7303_v19 = vmul.f32 %v12394_v61, %v12394_v61  ;;  %v7304_v59 = vmul.f32 %v12397_v39, %v12397_v39  ;;  %v12456_v6 = vld [vmem:[%s12635_s8 + $0x1] ss:$0 sm:$0xff]  ;;  %s7937_s8 = sshll.u32 %s8473_s7, 4  ;;  %s7938_s8 = int_to_ptr.vmem [resolvable:$true] %s7937_s8 }
 0x903   :  { %v7133_v50 = vadd.f32 %v8437_v35, %v7109_v55  ;;  %v7134_v0 = vadd.f32 %v8437_v35, %v7110_v14  ;;  %v12409_v25 = vsub.f32 %v13311_v10, %v7265_v56  ;;  %v12412_v37 = vsub.f32 %v13312_v32, %v7272_v44  ;;  %s8446_s30 = scalar_lea.vmem %s7938_s8, 32  ;;  %p8451_p1 = scmp.lt.s32.totalorder %s7938_s8, %s7938_s8 }
 0x904   :  { %v7157_v26 = vcombine.high %v7131_v17, %v7131_v17  ;;  %v7319_v1 = vcombine.low %v7303_v19, %v7304_v59  ;;  %v7185_v11 = vrot.slane %v7132_v12, 5  ;;  %v7433_v14 = vcombine.high %v12451_v29, %v12451_v29  ;;  %p8447_p0 = scmp.ne.s32.totalorder %s7938_s8, %s8446_s30  ;;  %p8452_p2 = scmp.lt.s32.totalorder %s8446_s30, %s8446_s30 }
 0x905   :  { %v7158_v15 = vcombine.high %v7133_v50, %v7133_v50  ;;  %v7307_v54 = vmul.f32 %v12409_v25, %v12409_v25  ;;  %v7308_v53 = vmul.f32 %v12412_v37, %v12412_v37  ;;  %v7189_v52 = vrot.slane %v7134_v0, 5 }
 0x906   :  { %v7988_v22 = vrot.slane %v7157_v26, 9  ;;  %v7327_v57 = vsel %vm174_vm1, %v7319_v1, 0.0  ;;  %v7449_v56 = vcombine.high %v12456_v6, %v12456_v6  ;;  %p8453_p3 = por %p8452_p2, %p8451_p1 }
 0x907   :  { %v7989_v49 = vrot.slane %v7158_v15, 9  ;;  %7328 = vadd.xlane.f32.xlu0 %v7327_v57  ;;  %v7321_v31 = vcombine.low %v7307_v54, %v7308_v53  ;;  %v7994_v15 = vld [vmem:[%s12636_s9 + $0x20] sm:$0xff]  ;;  %v7995_v54 = vld [vmem:[%s12636_s9 + $0x28] sm:$0xff]  ;;  %v7996_v53 = vld [vmem:[%s12636_s9 + $0x30] sm:$0xff] }
 0x908   :  { %v7186_v23 = vsel %vm9736_vm8, %v7988_v22, %v7185_v11  ;;  %v8268_v22 = vpack.c.bf16 %v7995_v54, %v7994_v15  ;;  %v7997_v57 = vld [vmem:[%s12636_s9 + $0x38] sm:$0xff]  ;;  %p8454_p4 = pnand %p8453_p3, %p8447_p0 }
 0x909   :  { %v7190_v47 = vsel %vm9736_vm8, %v7989_v49, %v7189_v52  ;;  %v7333_v51 = vsel %vm174_vm1, %v7321_v31, 0.0  ;;  %v8272_v11 = vpack.c.bf16 %v7997_v57, %v7996_v53  ;;  %v8008_v57 = vld [vmem:[%s12640_s13 + $0x80] sm:$0xff] }
 0x90a   :  { %v7206_v46 = vcombine.low %v7186_v23, %v7190_v47  ;;  %8269 = vmatprep.subr.bf16.mxu1 %v8268_v22 }
 0x90b   :  { %7334 = vadd.xlane.f32.xlu0 %v7333_v51  ;;  %8271 = vmatpush3.bf16.msra.mxu1 %v8268_v22 }
 0x90c   :  { %v7220_v20 = vsel %vm174_vm1, %v7206_v46, 0.0  ;;  %8273 = vmatprep.subr.bf16.mxu1 %v8272_v11 }
 0x90d   :  { %7221 = vadd.xlane.f32.xlu1 %v7220_v20 }
 0x90f   :  { %8275 = vmatpush3.bf16.msra.mxu1 %v8272_v11  ;;  %v8009_v11 = vld [vmem:[%s12640_s13 + $0x88] sm:$0xff] }
 0x921   :  { %v7216_v18 = vpop.xlane.xlu1 %7215 }
 0x922   :  { %v7224_v27 = vmul.f32 0.03125, %v7216_v18 }
 0x924   :  { %v7251_v9 = vrot.slane %v7224_v27, %v13307_v58  ;;  %v7258_v16 = vrot.slane %v7224_v27, %v13308_v43 }
 0x926   :  { %v12428_v38 = vsub.f32 %v12080_v45, %v7251_v9  ;;  %v12431_v62 = vsub.f32 %v12090_v8, %v7258_v16 }
 0x928   :  { %v7305_v28 = vmul.f32 %v12428_v38, %v12428_v38  ;;  %v7306_v42 = vmul.f32 %v12431_v62, %v12431_v62 }
 0x92a   :  { %v7320_v4 = vcombine.low %v7305_v28, %v7306_v42 }
 0x92c   :  { %v7330_v48 = vsel %vm174_vm1, %v7320_v4, 0.0 }
 0x92d   :  { %7331 = vadd.xlane.f32.xlu1 %v7330_v48 }
 0x994   :  { %v7329_v21 = vpop.xlane.xlu0 %7328 }
 0x995   :  { %v7339_v3 = vmul.f32 0.03125, %v7329_v21 }
 0x997   :  { %v7343_v41 = vadd.f32 1e-06, %v7339_v3 }
 0x998   :  { %v7335_v19 = vpop.xlane.xlu0 %7334 }
 0x999   :  { %8348 = vrsqrt.f32 %v7343_v41  ;;  %v7341_v50 = vmul.f32 0.03125, %v7335_v19 }
 0x99a   :  { %v7222_v13 = vpop.xlane.xlu1 %7221 }
 0x99b   :  { %v7226_v45 = vmul.f32 0.03125, %v7222_v13  ;;  %v7345_v0 = vadd.f32 1e-06, %v7341_v50 }
 0x99d   :  { %v7279_v2 = vrot.slane %v7226_v45, %v13307_v58  ;;  %v7286_v8 = vrot.slane %v7226_v45, %v13308_v43  ;;  %8350 = vrsqrt.f32 %v7345_v0 }
 0x99f   :  { %v12440_v24 = vsub.f32 %v7186_v23, %v7279_v2  ;;  %v12442_v33 = vsub.f32 %v7190_v47, %v7286_v8 }
 0x9a1   :  { %v7309_v60 = vmul.f32 %v12440_v24, %v12440_v24  ;;  %v7310_v40 = vmul.f32 %v12442_v33, %v12442_v33 }
 0x9a3   :  { %v8349_v30 = vpop.eup %8348  ;;  %v7322_v36 = vcombine.low %v7309_v60, %v7310_v40 }
 0x9a4   :  { %v7361_v34 = vrot.slane %v8349_v30, %v13307_v58  ;;  %v7368_v7 = vrot.slane %v8349_v30, %v13308_v43 }
 0x9a5   :  { %v7336_v5 = vsel %vm174_vm1, %v7322_v36, 0.0  ;;  %v7999_v36 = vld [vmem:[%s12637_s10 + $0x1] ss:$0 sm:$0xff] }
 0x9a6   :  { %7337 = vadd.xlane.f32.xlu1 %v7336_v5  ;;  %v7419_v63 = vmul.f32 %v7361_v34, %v12394_v61  ;;  %v7420_v55 = vmul.f32 %v7368_v7, %v12397_v39 }
 0x9a7   :  { %v8351_v39 = vpop.eup %8350 }
 0x9a8   :  { %v7435_v44 = vmul.f32 %v12451_v29, %v7419_v63  ;;  %v7436_v35 = vmul.f32 %v7433_v14, %v7420_v55  ;;  %v7389_v26 = vrot.slane %v8351_v39, %v13307_v58  ;;  %v7396_v1 = vrot.slane %v8351_v39, %v13308_v43 }
 0x9aa   :  { %v7451_v17 = vadd.f32 %v12456_v6, %v7435_v44  ;;  %v7452_v12 = vadd.f32 %v7449_v56, %v7436_v35  ;;  %v7423_v49 = vmul.f32 %v7389_v26, %v12409_v25  ;;  %v7424_v52 = vmul.f32 %v7396_v1, %v12412_v37 }
 0x9ac   :  { %v7480_v59 = vcombine.low %v7451_v17, %v7452_v12  ;;  %v7439_v51 = vmul.f32 %v12451_v29, %v7423_v49  ;;  %v7440_v46 = vmul.f32 %v7433_v14, %v7424_v52  ;;  %v8010_v49 = vld [vmem:[%s12640_s13 + $0x90] sm:$0xff]  ;;  %v8276_v52 = vpack.c.bf16 %v8009_v11, %v8008_v57  ;;  %v8020_v57 = vld [vmem:[%s12640_s13 + $0xe0] sm:$0xff]  ;;  %v8021_v11 = vld [vmem:[%s12640_s13 + $0xe8] sm:$0xff] }
 0x9ae   :  { %8172 = vmatprep.mubr.msk.f32.mxu1 %vm174_vm1, %v7480_v59  ;;  %v7455_v25 = vadd.f32 %v12456_v6, %v7439_v51  ;;  %v7456_v37 = vadd.f32 %v7449_v56, %v7440_v46  ;;  %8277 = vmatprep.subr.bf16.mxu0 %v8276_v52 }
 0x9af   :  { %8279 = vmatpush3.bf16.msra.mxu0 %v8276_v52  ;;  %v8022_v52 = vld [vmem:[%s12640_s13 + $0xf0] sm:$0xff] }
 0x9b0   :  { %v7482_v4 = vcombine.low %v7455_v25, %v7456_v37 }
 0x9ba   :  { %v7332_v10 = vpop.xlane.xlu1 %7331 }
 0x9bb   :  { %v7340_v61 = vmul.f32 0.03125, %v7332_v10 }
 0x9bd   :  { %v7344_v32 = vadd.f32 1e-06, %v7340_v61 }
 0x9bf   :  { %8352 = vrsqrt.f32 %v7344_v32 }
 0x9c9   :  { %v8353_v31 = vpop.eup %8352 }
 0x9ca   :  { %v7375_v23 = vrot.slane %v8353_v31, %v13307_v58  ;;  %v7382_v47 = vrot.slane %v8353_v31, %v13308_v43  ;;  %v8011_v31 = vld [vmem:[%s12640_s13 + $0x98] sm:$0xff] }
 0x9cc   :  { %v7421_v20 = vmul.f32 %v7375_v23, %v12428_v38  ;;  %v7422_v18 = vmul.f32 %v7382_v47, %v12431_v62  ;;  %v8280_v47 = vpack.c.bf16 %v8011_v31, %v8010_v49  ;;  %v8300_v49 = vpack.c.bf16 %v8021_v11, %v8020_v57  ;;  %v8023_v31 = vld [vmem:[%s12640_s13 + $0xf8] sm:$0xff] }
 0x9ce   :  { %v7437_v27 = vmul.f32 %v12451_v29, %v7421_v20  ;;  %v7438_v9 = vmul.f32 %v7433_v14, %v7422_v18  ;;  %8281 = vmatprep.subr.bf16.mxu0 %v8280_v47 }
 0x9cf   :  { %8283 = vmatpush3.bf16.msra.mxu0 %v8280_v47 }
 0x9d0   :  { %v7453_v16 = vadd.f32 %v12456_v6, %v7437_v27  ;;  %v7454_v28 = vadd.f32 %v7449_v56, %v7438_v9  ;;  %v8012_v27 = vld [vmem:[%s12640_s13 + $0xa0] sm:$0xff]  ;;  %v8013_v9 = vld [vmem:[%s12640_s13 + $0xa8] sm:$0xff] }
 0x9d1   :  { %v8284_v25 = vpack.c.bf16 %v8013_v9, %v8012_v27  ;;  %v8007_v9 = vld [vmem:[%s12639_s12 + $0x1] ss:$0 sm:$0xff] }
 0x9d2   :  { %v7481_v42 = vcombine.low %v7453_v16, %v7454_v28 }
 0x9d3   :  { %8285 = vmatprep.subr.bf16.mxu0 %v8284_v25 }
 0x9d4   :  { %8173 = vmatmul.mubr.msk.f32.vlgmr.msra.gmra.mrb[8].mxu1 %vm174_vm1, %v7481_v42  ;;  %8287 = vmatpush3.bf16.msra.mxu0 %v8284_v25 }
 0x9d5   :  { %8175 = vmatprep.mubr.msk.f32.mxu1 %vm174_vm1, %v7482_v4 }
 0xa33   :  { %v7338_v48 = vpop.xlane.xlu1 %7337 }
 0xa34   :  { %v7342_v21 = vmul.f32 0.03125, %v7338_v48 }
 0xa36   :  { %v7346_v38 = vadd.f32 1e-06, %v7342_v21 }
 0xa38   :  { %8354 = vrsqrt.f32 %v7346_v38 }
 0xa42   :  { %v8355_v62 = vpop.eup %8354 }
 0xa43   :  { %v7403_v3 = vrot.slane %v8355_v62, %v13307_v58  ;;  %v7410_v41 = vrot.slane %v8355_v62, %v13308_v43 }
 0xa45   :  { %v7425_v13 = vmul.f32 %v7403_v3, %v12440_v24  ;;  %v7426_v45 = vmul.f32 %v7410_v41, %v12442_v33 }
 0xa47   :  { %v7441_v2 = vmul.f32 %v12451_v29, %v7425_v13  ;;  %v7442_v8 = vmul.f32 %v7433_v14, %v7426_v45 }
 0xa49   :  { %v7457_v60 = vadd.f32 %v12456_v6, %v7441_v2  ;;  %v7458_v40 = vadd.f32 %v7449_v56, %v7442_v8 }
 0xa4b   :  { %v7483_v30 = vcombine.low %v7457_v60, %v7458_v40 }
 0xa4d   :  { %8176 = vmatmul.mubr.msk.f32.gmra.mrb[10].mxu1 %vm174_vm1, %v7483_v30 }
 0xaa7   :  { %v8174_v58 = vpop.f32.mrb[8].mxu1 }
 0xaa8   :  { %v7564_v34 = vadd.f32 %v8174_v58, %v7999_v36  ;;  %v7558_v43 = vpop.f32.mrb[9].mxu1 }
 0xaa9   :  { %v7559_v7 = vadd.f32 %v7999_v36, %v7558_v43 }
 0xaaa   :  { %v7578_v24 = vmul.f32 %v7564_v34, %v7564_v34 }
 0xaab   :  { %v7577_v5 = vmul.f32 %v7559_v7, %v7559_v7 }
 0xaac   :  { %v7582_v33 = vmul.f32 %v7578_v24, %v7564_v34 }
 0xaad   :  { %v7581_v63 = vmul.f32 %v7577_v5, %v7559_v7 }
 0xaae   :  { %v7586_v29 = vmul.f32 0.044715, %v7582_v33 }
 0xaaf   :  { %v7585_v14 = vmul.f32 0.044715, %v7581_v63 }
 0xab0   :  { %v7590_v55 = vadd.f32 %v7586_v29, %v7564_v34 }
 0xab1   :  { %v7589_v6 = vadd.f32 %v7585_v14, %v7559_v7 }
 0xab2   :  { %v7594_v56 = vmul.f32 0.7978846, %v7590_v55 }
 0xab3   :  { %v7593_v44 = vmul.f32 0.7978846, %v7589_v6 }
 0xab4   :  { %8356 = vtanh.f32 %v7594_v56 }
 0xab5   :  { %8358 = vtanh.f32 %v7593_v44 }
 0xabe   :  { %v8357_v35 = vpop.eup %8356 }
 0xabf   :  { %v8359_v17 = vpop.eup %8358  ;;  %v7602_v12 = vadd.f32 1.0, %v8357_v35 }
 0xac0   :  { %v7601_v19 = vadd.f32 1.0, %v8359_v17 }
 0xac1   :  { %v7606_v59 = vmul.f32 0.5, %v7602_v12 }
 0xac2   :  { %v7605_v50 = vmul.f32 0.5, %v7601_v19  ;;  %v8014_v19 = vld [vmem:[%s12640_s13 + $0xb0] sm:$0xff] }
 0xac3   :  { %v12506_v0 = vmul.f32 %v7606_v59, %v7564_v34  ;;  %v8015_v59 = vld [vmem:[%s12640_s13 + $0xb8] sm:$0xff] }
 0xac4   :  { %v12508_v10 = vmul.f32 %v7605_v50, %v7559_v7  ;;  %v8016_v50 = vld [vmem:[%s12640_s13 + $0xc0] sm:$0xff] }
 0xac5   :  { %v7614_v61 = vmul.f32 %v12506_v0, %v12506_v0 }
 0xac6   :  { %v7613_v32 = vmul.f32 %v12508_v10, %v12508_v10 }
 0xac8   :  { %v7617_v39 = vadd.f32 %v7614_v61, %v7613_v32  ;;  %v8288_v61 = vpack.c.bf16 %v8015_v59, %v8014_v19  ;;  %v8017_v32 = vld [vmem:[%s12640_s13 + $0xc8] sm:$0xff] }
 0xaca   :  { %v7618_v26 = vrot.slane %v7617_v39, 4  ;;  %8289 = vmatprep.subr.bf16.mxu0 %v8288_v61 }
 0xacb   :  { %8291 = vmatpush3.bf16.msra.mxu0 %v8288_v61  ;;  %v8442_v61 = vld [vmem:[#allocation2 + $0xf8] sm:$0x7f] }
 0xacc   :  { %v7619_v1 = vadd.f32 %v7618_v26, %v7617_v39  ;;  %v8292_v26 = vpack.c.bf16 %v8017_v32, %v8016_v50 }
 0xace   :  { %v7620_v15 = vrot.slane %v7619_v1, 2  ;;  %8293 = vmatprep.subr.bf16.mxu0 %v8292_v26 }
 0xacf   :  { %8295 = vmatpush3.bf16.msra.mxu0 %v8292_v26  ;;  %v8443_v26 = vld [vmem:[#allocation2 + $0xd8] sm:$0x7f] }
 0xad0   :  { %v7621_v54 = vadd.f32 %v7620_v15, %v7619_v1  ;;  %v8018_v1 = vld [vmem:[%s12640_s13 + $0xd0] sm:$0xff]  ;;  %v8019_v15 = vld [vmem:[%s12640_s13 + $0xd8] sm:$0xff] }
 0xad2   :  { %v7622_v53 = vrot.slane %v7621_v54, 1 }
 0xad4   :  { %v7623_v22 = vadd.f32 %v7622_v53, %v7621_v54 }
 0xad6   :  { %8360 = vrsqrt.f32 %v7623_v22  ;;  %vm7633_vm13 = vcmp.eq.f32.partialorder %v7623_v22, inf  ;;  %v7636_v46 = vand.u32 2147483648, %v7623_v22  ;;  %vm7635_vm14 = vcmp.eq.f32.partialorder %v7623_v22, 0.0 }
 0xae0   :  { %v8361_v23 = vpop.eup %8360 }
 0xae1   :  { %v7632_v51 = vmul.f32 %v8361_v23, %v7623_v22  ;;  %v8304_v23 = vpack.c.bf16 %v8023_v31, %v8022_v52 }
 0xae3   :  { %v7634_v20 = vsel %vm7633_vm13, %v7623_v22, %v7632_v51  ;;  %v8296_v22 = vpack.c.bf16 %v8019_v15, %v8018_v1 }
 0xae4   :  { %v12526_v18 = vsel %vm7635_vm14, %v7636_v46, %v7634_v20  ;;  %v8005_v46 = vld [vmem:[%s12638_s11 + $0x1] ss:$0 sm:$0xff] }
 0xae5   :  { %7645 = vadd.xlane.f32.xlu0 %v12526_v18  ;;  %8297 = vmatprep.subr.bf16.mxu0 %v8296_v22 }
 0xae6   :  { %8299 = vmatpush3.bf16.msra.mxu0 %v8296_v22  ;;  %v8445_v22 = vld [vmem:[#allocation2 + $0xe8] sm:$0x7f] }
 0xae7   :  { %8301 = vmatprep.subr.bf16.mxu0 %v8300_v49 }
 0xaea   :  { %8303 = vmatpush3.bf16.msra.mxu0 %v8300_v49 }
 0xaeb   :  { %8305 = vmatprep.subr.bf16.mxu0 %v8304_v23 }
 0xaee   :  { %8307 = vmatpush3.bf16.msra.mxu0 %v8304_v23 }
 0xb20   :  { %v8177_v37 = vpop.f32.mrb[10].mxu1 }
 0xb21   :  { %v7574_v16 = vadd.f32 %v8177_v37, %v7999_v36  ;;  %v7568_v28 = vpop.f32.mrb[11].mxu1 }
 0xb22   :  { %v7569_v42 = vadd.f32 %v7999_v36, %v7568_v28 }
 0xb23   :  { %v7580_v4 = vmul.f32 %v7574_v16, %v7574_v16 }
 0xb24   :  { %v7579_v48 = vmul.f32 %v7569_v42, %v7569_v42 }
 0xb25   :  { %v7584_v21 = vmul.f32 %v7580_v4, %v7574_v16 }
 0xb26   :  { %v7583_v38 = vmul.f32 %v7579_v48, %v7569_v42 }
 0xb27   :  { %v7588_v62 = vmul.f32 0.044715, %v7584_v21 }
 0xb28   :  { %v7587_v3 = vmul.f32 0.044715, %v7583_v38 }
 0xb29   :  { %v7592_v41 = vadd.f32 %v7588_v62, %v7574_v16 }
 0xb2a   :  { %v7591_v13 = vadd.f32 %v7587_v3, %v7569_v42 }
 0xb2b   :  { %v7596_v45 = vmul.f32 0.7978846, %v7592_v41 }
 0xb2c   :  { %v7595_v2 = vmul.f32 0.7978846, %v7591_v13 }
 0xb2d   :  { %8362 = vtanh.f32 %v7596_v45 }
 0xb2e   :  { %8364 = vtanh.f32 %v7595_v2 }
 0xb37   :  { %v8363_v8 = vpop.eup %8362 }
 0xb38   :  { %v8365_v60 = vpop.eup %8364  ;;  %v7604_v40 = vadd.f32 1.0, %v8363_v8 }
 0xb39   :  { %v7603_v30 = vadd.f32 1.0, %v8365_v60  ;;  %v8025_v60 = vld [vmem:[%s12641_s14 + $0x1] ss:$0 sm:$0xff] }
 0xb3a   :  { %v7608_v58 = vmul.f32 0.5, %v7604_v40 }
 0xb3b   :  { %v7607_v34 = vmul.f32 0.5, %v7603_v30 }
 0xb3c   :  { %v12535_v43 = vmul.f32 %v7608_v58, %v7574_v16 }
 0xb3d   :  { %v12537_v36 = vmul.f32 %v7607_v34, %v7569_v42 }
 0xb3e   :  { %v7616_v7 = vmul.f32 %v12535_v43, %v12535_v43 }
 0xb3f   :  { %v7615_v24 = vmul.f32 %v12537_v36, %v12537_v36 }
 0xb41   :  { %v7624_v5 = vadd.f32 %v7616_v7, %v7615_v24  ;;  %v8438_v24 = vld [vmem:[#allocation2 + $0x58] sm:$0x7f] }
 0xb43   :  { %v7625_v33 = vrot.slane %v7624_v5, 4 }
 0xb45   :  { %v7626_v63 = vadd.f32 %v7625_v33, %v7624_v5 }
 0xb47   :  { %v7627_v29 = vrot.slane %v7626_v63, 2 }
 0xb49   :  { %v7628_v14 = vadd.f32 %v7627_v29, %v7626_v63  ;;  %v8439_v63 = vld [vmem:[#allocation2 + $0x38] sm:$0x7f] }
 0xb4b   :  { %v7629_v55 = vrot.slane %v7628_v14, 1 }
 0xb4d   :  { %v7630_v6 = vadd.f32 %v7629_v55, %v7628_v14  ;;  %v8440_v14 = vld [vmem:[#allocation2 + $0x68] sm:$0x7f] }
 0xb4f   :  { %8366 = vrsqrt.f32 %v7630_v6  ;;  %vm7640_vm15 = vcmp.eq.f32.partialorder %v7630_v6, inf  ;;  %v7643_v35 = vand.u32 2147483648, %v7630_v6  ;;  %vm7642_vm0 = vcmp.eq.f32.partialorder %v7630_v6, 0.0 }
 0xb59   :  { %v8367_v56 = vpop.eup %8366 }
 0xb5a   :  { %v7639_v44 = vmul.f32 %v8367_v56, %v7630_v6 }
 0xb5c   :  { %v7641_v17 = vsel %vm7640_vm15, %v7630_v6, %v7639_v44 }
 0xb5d   :  { %v7644_v12 = vsel %vm7642_vm0, %v7643_v35, %v7641_v17 }
 0xb5e   :  { %7647 = vadd.xlane.f32.xlu1 %v7644_v12 }
 0xb72   :  { %v7646_v39 = vpop.xlane.xlu0 %7645 }
 0xb73   :  { %v7649_v54 = vmul.f32 0.0078125, %v7646_v39 }
 0xb75   :  { %v7651_v53 = vadd.f32 1e-06, %v7649_v54  ;;  %v8444_v54 = vld [vmem:[#allocation2 + $0x108] sm:$0x7f] }
 0xb77   :  { %8368 = vrcp.f32 %v7651_v53 }
 0xb81   :  { %v8369_v47 = vpop.eup %8368 }
 0xb82   :  { %v7654_v51 = vmul.f32 %v8369_v47, %v12526_v18 }
 0xb84   :  { %v7659_v20 = vmul.f32 %v7654_v51, %v12508_v10  ;;  %v7660_v27 = vmul.f32 %v7654_v51, %v12506_v0 }
 0xb86   :  { %v7669_v25 = vmul.f32 %v8005_v46, %v7659_v20  ;;  %v7670_v37 = vmul.f32 %v8005_v46, %v7660_v27 }
 0xb88   :  { %v7681_v16 = vadd.f32 %v8007_v9, %v7669_v25  ;;  %v7682_v28 = vadd.f32 %v8007_v9, %v7670_v37 }
 0xb8a   :  { %v7685_v42 = vadd.f32 %v7681_v16, %v12508_v10  ;;  %v7686_v18 = vadd.f32 %v7682_v28, %v12506_v0 }
 0xb8c   :  { %8210 = vmatprep.mubr.f32.mxu0 %v7685_v42 }
 0xb8d   :  { %8211 = vmatmul.mubr.f32.vlgmr.msra.gmra.mrb[4].mxu0 %v7686_v18 }
 0xbeb   :  { %v7648_v4 = vpop.xlane.xlu1 %7647 }
 0xbec   :  { %v7650_v48 = vmul.f32 0.0078125, %v7648_v4 }
 0xbee   :  { %v7652_v21 = vadd.f32 1e-06, %v7650_v48 }
 0xbf0   :  { %8370 = vrcp.f32 %v7652_v21 }
 0xbfa   :  { %v8371_v38 = vpop.eup %8370 }
 0xbfb   :  { %v7656_v62 = vmul.f32 %v8371_v38, %v7644_v12 }
 0xbfd   :  { %v7661_v3 = vmul.f32 %v7656_v62, %v12537_v36  ;;  %v7662_v41 = vmul.f32 %v7656_v62, %v12535_v43 }
 0xbff   :  { %v7671_v13 = vmul.f32 %v8005_v46, %v7661_v3  ;;  %v7672_v45 = vmul.f32 %v8005_v46, %v7662_v41 }
 0xc01   :  { %v7683_v2 = vadd.f32 %v8007_v9, %v7671_v13  ;;  %v7684_v8 = vadd.f32 %v8007_v9, %v7672_v45 }
 0xc03   :  { %v7687_v10 = vadd.f32 %v7683_v2, %v12537_v36  ;;  %v7688_v0 = vadd.f32 %v7684_v8, %v12535_v43  ;;  %v8441_v43 = vld [vmem:[#allocation2 + $0x48] sm:$0x7f] }
 0xc05   :  { %8213 = vmatprep.mubr.f32.mxu0 %v7687_v10 }
 0xc06   :  { %8214 = vmatmul.mubr.f32.gmra.mrb[6].mxu0 %v7688_v0 }
 0xc60   :  { %v8212_v40 = vpop.f32.mrb[4].mxu0 }
 0xc61   :  { %v7786_v30 = vadd.f32 %v8212_v40, %v8025_v60  ;;  %v7780_v58 = vpop.f32.mrb[5].mxu0 }
 0xc62   :  { %v7781_v34 = vadd.f32 %v8025_v60, %v7780_v58 }
 0xc63   :  { %v7804_v7 = vcombine.high %v7786_v30, %v7786_v30  ;;  %v7813_v5 = vadd.f32 %v8438_v24, %v7786_v30 }
 0xc64   :  { %v7803_v33 = vcombine.high %v7781_v34, %v7781_v34  ;;  %v7811_v29 = vadd.f32 %v8439_v63, %v7781_v34 }
 0xc65   :  { %v7814_v36 = vadd.f32 %v8440_v14, %v7804_v7  ;;  %7821 = vst.msk [vmem:[#allocation2 + $0x58] sm:$0xf] %vm302_vm5, %v7813_v5  ;;  %v8026_v5 = vld [vmem:[%s12642_s15] ss:$0 sm:$0xff] }
 0xc66   :  { %v7812_v55 = vadd.f32 %v8441_v43, %v7803_v33  ;;  %7819 = vst.msk [vmem:[#allocation2 + $0x38] sm:$0xf] %vm302_vm5, %v7811_v29  ;;  %v8027_v14 = vld [vmem:[%s12643_s16] ss:$0 sm:$0xff] }
 0xc67   :  { %7822 = vst.msk [vmem:[#allocation2 + $0x68] sm:$0xf] %vm302_vm5, %v7814_v36 }
 0xc68   :  { %7820 = vst.msk [vmem:[#allocation2 + $0x48] sm:$0xf] %vm302_vm5, %v7812_v55 }
 0xc6e   :  { %v8313_v56 = vld [vmem:[#allocation2 + $0x58] ss:$16 sps:$4 sm:$0xff]  }
 0xc6f   :  { %v8312_v6 = vld [vmem:[#allocation2 + $0x38] ss:$16 sps:$4 sm:$0xff]   ;;  %v7852_v19 = vsel %vm174_vm1, %v8313_v56, 0.0 }
 0xc70   :  { %v7851_v12 = vsel %vm174_vm1, %v8312_v6, 0.0 }
 0xc71   :  { %v7853_v15 = vadd.f32 %v7852_v19, %v7851_v12 }
 0xc73   :  { %v7854_v11 = vrot.slane %v7853_v15, 4 }
 0xc75   :  { %v7855_v49 = vadd.f32 %v7854_v11, %v7853_v15 }
 0xc77   :  { %v7856_v23 = vrot.slane %v7855_v49, 2 }
 0xc79   :  { %v7857_v20 = vadd.f32 %v7856_v23, %v7855_v49 }
 0xc7b   :  { %v7858_v25 = vrot.slane %v7857_v20, 1 }
 0xc7d   :  { %v7859_v28 = vadd.f32 %v7858_v25, %v7857_v20 }
 0xc7f   :  { %v7870_v4 = vmul.f32 0.0625, %v7859_v28 }
 0xcd9   :  { %v8215_v44 = vpop.f32.mrb[6].mxu0 }
 0xcda   :  { %v7796_v35 = vadd.f32 %v8215_v44, %v8025_v60  ;;  %v7790_v17 = vpop.f32.mrb[7].mxu0 }
 0xcdb   :  { %v7791_v59 = vadd.f32 %v8025_v60, %v7790_v17 }
 0xcdc   :  { %v7806_v50 = vcombine.high %v7796_v35, %v7796_v35  ;;  %v7817_v32 = vadd.f32 %v8442_v61, %v7796_v35 }
 0xcdd   :  { %v7805_v39 = vcombine.high %v7791_v59, %v7791_v59  ;;  %v7815_v1 = vadd.f32 %v8443_v26, %v7791_v59 }
 0xcde   :  { %v7818_v53 = vadd.f32 %v8444_v54, %v7806_v50  ;;  %7825 = vst.msk [vmem:[#allocation2 + $0xf8] sm:$0xf] %vm302_vm5, %v7817_v32 }
 0xcdf   :  { %v7816_v57 = vadd.f32 %v8445_v22, %v7805_v39  ;;  %7823 = vst.msk [vmem:[#allocation2 + $0xd8] sm:$0xf] %vm302_vm5, %v7815_v1 }
 0xce0   :  { %7826 = vst.msk [vmem:[#allocation2 + $0x108] sm:$0xf] %vm302_vm5, %v7818_v53 }
 0xce1   :  { %7824 = vst.msk [vmem:[#allocation2 + $0xe8] sm:$0xf] %vm302_vm5, %v7816_v57 }
 0xce7   :  { %v8315_v52 = vld [vmem:[#allocation2 + $0xf8] ss:$16 sps:$4 sm:$0xff]  }
 0xce8   :  { %v8314_v31 = vld [vmem:[#allocation2 + $0xd8] ss:$16 sps:$4 sm:$0xff]   ;;  %v7861_v47 = vsel %vm174_vm1, %v8315_v52, 0.0 }
 0xce9   :  { %v7860_v51 = vsel %vm174_vm1, %v8314_v31, 0.0 }
 0xcea   :  { %v7862_v46 = vadd.f32 %v7861_v47, %v7860_v51 }
 0xcec   :  { %v7863_v27 = vrot.slane %v7862_v46, 4 }
 0xcee   :  { %v7864_v9 = vadd.f32 %v7863_v27, %v7862_v46 }
 0xcf0   :  { %v7865_v37 = vrot.slane %v7864_v9, 2 }
 0xcf2   :  { %v7866_v16 = vadd.f32 %v7865_v37, %v7864_v9 }
 0xcf4   :  { %v7867_v42 = vrot.slane %v7866_v16, 1 }
 0xcf6   :  { %v7868_v18 = vadd.f32 %v7867_v42, %v7866_v16 }
 0xcf8   :  { %v7871_v48 = vmul.f32 0.0625, %v7868_v18 }
 0xcfa   :  { %v7877_v21 = vsel %vm7876_vm2, %v7871_v48, %v7870_v4 }
 0xcfb   :  { %v7880_v38 = vsel %vm7879_vm3, %v7877_v21, 0.0 }
 0xcfc   :  { %7881 = vadd.xlane.f32.xlu0 %v7880_v38 }
 0xd89   :  { %v7882_v62 = vpop.xlane.xlu0 %7881 }
 0xd8a   :  { %v7883_v3 = vmul.f32 0.03125, %v7882_v62 }
 0xd8c   :  { %v7885_v41 = vrot.slane %v7883_v3, 1  ;;  %v7888_v13 = vsub.f32 %v7870_v4, %v7883_v3 }
 0xd8e   :  { %v7889_v45 = vsub.f32 %v7871_v48, %v7885_v41  ;;  %v7890_v8 = vmul.f32 %v7888_v13, %v7888_v13 }
 0xd90   :  { %v7891_v2 = vmul.f32 %v7889_v45, %v7889_v45 }
 0xd92   :  { %v7894_v10 = vrot.slane %v7891_v2, 7 }
 0xd94   :  { %v7895_v0 = vsel %vm7876_vm2, %v7894_v10, %v7890_v8 }
 0xd95   :  { %v7897_v60 = vsel %vm7879_vm3, %v7895_v0, 0.0 }
 0xd96   :  { %7898 = vadd.xlane.f32.xlu1 %v7897_v60 }
 0xe23   :  { %v7899_v40 = vpop.xlane.xlu1 %7898 }
 0xe24   :  { %v7900_v30 = vmul.f32 0.03125, %v7899_v40 }
 0xe26   :  { %v7901_v58 = vadd.f32 1e-06, %v7900_v30 }
 0xe28   :  { %8372 = vrsqrt.f32 %v7901_v58 }
 0xe32   :  { %v8373_v34 = vpop.eup %8372 }
 0xe33   :  { %v7904_v7 = vrot.slane %v8373_v34, 1  ;;  %v7907_v24 = vmul.f32 %v8373_v34, %v7888_v13 }
 0xe35   :  { %v7908_v33 = vmul.f32 %v7904_v7, %v7889_v45  ;;  %v7915_v63 = vmul.f32 %v8026_v5, %v7907_v24 }
 0xe37   :  { %v7916_v29 = vmul.f32 %v8026_v5, %v7908_v33  ;;  %v7923_v43 = vadd.f32 %v8027_v14, %v7915_v63 }
 0xe39   :  { %v7924_v36 = vadd.f32 %v8027_v14, %v7916_v29 }
 0xe3b   :  { %v7927_v55 = vrot.slane %v7924_v36, 7 }
 0xe3d   :  { %v7928_v6 = vsel %vm7876_vm2, %v7927_v55, %v7923_v43 }
 0xe3e   :  { %7930 = vst.msk [vmem:[#allocation3] sm:$0x3] %vm7879_vm3, %v7928_v6 }
 0xe3f   :  { %8457 = shalt.err (!%p8454_p4)
}
 0xe40   :  { %s8458_s16 = scalar_lea.hbm %s12644_s17, 32 }
 0xe41   :  { %p8459_p5 = scmp.ne.s32.totalorder %s12644_s17, %s8458_s16  ;;  %p8462_p6 = scmp.lt.u32.totalorder %s8458_s16, %s12644_s17 }
 0xe43   :  { %p8464_p7 = pnand %p8462_p6, %p8459_p5 }
 0xe45   :  { %8467 = shalt.err (!%p8464_p7)
}
 0xe46   :  { %7940 = dma.vmem_to_hbm [thread:$0]  %s7938_s8, 32, %s12644_s17, [#allocation4]  }
 0xe47   :  { %8468 = dma.done.wait [#allocation4], 32  }
 0xe48   :  { %8469 = vsyncadd [#allocation4], 4294967264 }
 0xe49   :  { %7944 = vsyncpa [#allocation4], 1 }

</bundles_post_ra>
